<compile_context>
chip_gen: v5e
topology: v5e:2x2
jax: 0.10.0
libtpu: 0.0.40
codegen_flags: <defaults>
</compile_context>

<pallas_src>
import functools

import jax
import jax.numpy as jnp
from jax.experimental import pallas as pl
from jax.experimental.pallas import tpu as pltpu

LATENT = 100
LATENT_PAD = 128            # 100 -> 128 (lane-aligned contraction for fc1)
H1, H2, H3 = 128, 512, 1024
OUT = 28 * 28               # 784
OUT_PAD = 896               # 7 * 128 (lane-dense output stores)
BN_EPS = 1e-5
LEAK = 0.2

_VMEM_LIMIT_TILED = 32 << 20   # tiled stages are tiny; safe on every generation


def _tpu_settings():
    """Generation-specific fused-path VMEM limit and fused/tiled threshold."""
    try:
        kind = jax.devices()[0].device_kind.lower()
    except Exception:  # pragma: no cover
        kind = ""
    if ("v5" in kind) or ("v6" in kind):
        # 128 MiB physical VMEM, 1 TensorCore: fused path wins up to large B.
        return {"fused_vmem": 96 << 20, "auto_threshold": 4096}
    # v7x (64 MiB VMEM per TC, 2 TCs) or unknown: conservative VMEM, switch to
    # the 2-core parallel tiled path earlier.
    return {"fused_vmem": 48 << 20, "auto_threshold": 512}


def _leaky_relu(x, slope=LEAK):
    return jnp.where(x > 0, x, slope * x)


def _mxu_dot(act, w_bf16):
    # bf16 x bf16 MXU matmul, f32 accumulation.
    return jnp.dot(act.astype(jnp.bfloat16), w_bf16,
                   preferred_element_type=jnp.float32)


# ----------------------------------------------------------------------------
# Path 1: fully fused, grid-less kernel (whole batch resident in VMEM).
# BatchNorm stats computed in-kernel over the full batch (one-pass variance).
# ----------------------------------------------------------------------------
def _fused_kernel(x_ref,
                  w1_ref, b1_ref,
                  w2_ref, g2_ref, be2_ref,
                  w3_ref, g3_ref, be3_ref,
                  w4_ref, b4_ref,
                  out_ref):
    inv_b = 1.0 / x_ref.shape[0]

    # fc1 + leaky_relu
    h = _leaky_relu(_mxu_dot(x_ref[...], w1_ref[...]) + b1_ref[...])      # [B, 128]

    # fc2 (bias dropped: cancels in BN) + BN(512) + leaky_relu
    h = _mxu_dot(h, w2_ref[...])                                          # [B, 512]
    mean = jnp.sum(h, axis=0, keepdims=True) * inv_b
    var = jnp.maximum(jnp.sum(h * h, axis=0, keepdims=True) * inv_b - mean * mean, 0.0)
    scale = g2_ref[...] * jax.lax.rsqrt(var + BN_EPS)
    shift = be2_ref[...] - mean * scale
    h = _leaky_relu(h * scale + shift)

    # fc3 (bias dropped) + BN(1024) + leaky_relu
    h = _mxu_dot(h, w3_ref[...])                                          # [B, 1024]
    mean = jnp.sum(h, axis=0, keepdims=True) * inv_b
    var = jnp.maximum(jnp.sum(h * h, axis=0, keepdims=True) * inv_b - mean * mean, 0.0)
    scale = g3_ref[...] * jax.lax.rsqrt(var + BN_EPS)
    shift = be3_ref[...] - mean * scale
    h = _leaky_relu(h * scale + shift)

    # fc4 + tanh (padded output columns are tanh(0) = 0, sliced off in glue)
    out_ref[...] = jnp.tanh(_mxu_dot(h, w4_ref[...]) + b4_ref[...])       # [B, 896]


def _forward_fused(x_pad, params, vmem_limit):
    B = x_pad.shape[0]
    vmem = pl.BlockSpec(memory_space=pltpu.MemorySpace.VMEM)
    args = (
        x_pad,
        params["w1"], params["b1"],
        params["w2"], params["g2"], params["be2"],
        params["w3"], params["g3"], params["be3"],
        params["w4"], params["b4"],
    )
    return pl.pallas_call(
        _fused_kernel,
        out_shape=jax.ShapeDtypeStruct((B, OUT_PAD), jnp.float32),
        in_specs=[vmem] * len(args),
        out_specs=vmem,
        compiler_params=pltpu.CompilerParams(vmem_limit_bytes=vmem_limit),
    )(*args)


# ----------------------------------------------------------------------------
# Path 2: batch-tiled pipeline (large batches).  Three pallas_calls with a
# 1-D "parallel" batch grid; weights stay VMEM-resident (index_map -> (0, 0))
# while bf16 activation tiles stream / double-buffer.  Each stage also emits
# per-tile f32 BN partial sums (sum / sumsq of the pre-activations, masked to
# the real rows) so the full p2/p3 never has to be re-read for statistics.
# ----------------------------------------------------------------------------
def _row_mask(nv_ref, tb):
    rows = pl.program_id(0) * tb + jax.lax.broadcasted_iota(jnp.int32, (tb, 1), 0)
    return rows < nv_ref[0]


def _write_stats(stats_ref, pre, valid):
    s = jnp.sum(jnp.where(valid, pre, 0.0), axis=0, keepdims=True)
    ss = jnp.sum(jnp.where(valid, pre * pre, 0.0), axis=0, keepdims=True)
    zeros = jnp.zeros((6, pre.shape[1]), jnp.float32)
    stats_ref[...] = jnp.concatenate([s, ss, zeros], axis=0)[None]


def _stage1_kernel(nv_ref, x_ref, w1_ref, b1_ref, w2_ref, p2_ref, stats_ref):
    tb = x_ref.shape[0]
    h = _leaky_relu(_mxu_dot(x_ref[...], w1_ref[...]) + b1_ref[...])
    pre = _mxu_dot(h, w2_ref[...])                       # f32, bias dropped (BN)
    p2_ref[...] = pre.astype(p2_ref.dtype)               # bf16 intermediate
    _write_stats(stats_ref, pre, _row_mask(nv_ref, tb))


def _stage2_kernel(nv_ref, p_ref, sc_ref, sh_ref, w_ref, p3_ref, stats_ref):
    tb = p_ref.shape[0]
    h = _leaky_relu(p_ref[...].astype(jnp.float32) * sc_ref[...] + sh_ref[...])
    pre = _mxu_dot(h, w_ref[...])                        # f32, bias dropped (BN)
    p3_ref[...] = pre.astype(p3_ref.dtype)               # bf16 intermediate
    _write_stats(stats_ref, pre, _row_mask(nv_ref, tb))


def _stage3_kernel(nv_ref, p_ref, sc_ref, sh_ref, w_ref, b_ref, o_ref):
    h = _leaky_relu(p_ref[...].astype(jnp.float32) * sc_ref[...] + sh_ref[...])
    o_ref[...] = jnp.tanh(_mxu_dot(h, w_ref[...]) + b_ref[...])


def _stage_call(kernel, n_valid_arr, acts, consts, out_shape, out_specs, tb):
    """Run one stage over a 1-D batch grid; `consts` stay VMEM-resident."""
    b_pad, f_in = acts.shape
    nb = b_pad // tb
    in_specs = [pl.BlockSpec((tb, f_in), lambda i, nv: (i, 0))]
    in_specs += [pl.BlockSpec(c.shape, lambda i, nv: (0, 0)) for c in consts]
    return pl.pallas_call(
        kernel,
        out_shape=out_shape,
        grid_spec=pltpu.PrefetchScalarGridSpec(
            num_scalar_prefetch=1,
            grid=(nb,),
            in_specs=in_specs,
            out_specs=out_specs),
        compiler_params=pltpu.CompilerParams(
            dimension_semantics=("parallel",),   # both TensorCores on v7x
            vmem_limit_bytes=_VMEM_LIMIT_TILED),
    )(n_valid_arr, acts, *consts)


def _bn_from_stats(stats, gamma, beta, n_valid):
    """Combine per-tile [sum; sumsq] partials into fused BN scale/shift."""
    red = jnp.sum(stats, axis=0)                     # (8, H): row0=sum, row1=sumsq
    mean = red[0] / n_valid
    var = jnp.maximum(red[1] / n_valid - mean * mean, 0.0)
    scale = gamma * jax.lax.rsqrt(var + BN_EPS)      # (1, H)
    shift = beta - mean * scale                      # (1, H)
    return scale, shift


def _forward_tiled(x_pad, params, n_valid, tb):
    b_pad = pl.cdiv(x_pad.shape[0], tb) * tb
    if b_pad != x_pad.shape[0]:
        # Padded rows are excluded from BN stats via the in-kernel row mask and
        # sliced off the final output, so padding does not perturb numerics.
        x_pad = jnp.pad(x_pad, ((0, b_pad - x_pad.shape[0]), (0, 0)))
    nb = b_pad // tb
    nv = jnp.array([n_valid], jnp.int32)

    p2, st2 = _stage_call(
        _stage1_kernel, nv, x_pad,
        (params["w1"], params["b1"], params["w2"]),
        (jax.ShapeDtypeStruct((b_pad, H2), jnp.bfloat16),
         jax.ShapeDtypeStruct((nb, 8, H2), jnp.float32)),
        (pl.BlockSpec((tb, H2), lambda i, nv_: (i, 0)),
         pl.BlockSpec((1, 8, H2), lambda i, nv_: (i, 0, 0))),
        tb)
    sc2, sh2 = _bn_from_stats(st2, params["g2"], params["be2"], n_valid)

    p3, st3 = _stage_call(
        _stage2_kernel, nv, p2,
        (sc2, sh2, params["w3"]),
        (jax.ShapeDtypeStruct((b_pad, H3), jnp.bfloat16),
         jax.ShapeDtypeStruct((nb, 8, H3), jnp.float32)),
        (pl.BlockSpec((tb, H3), lambda i, nv_: (i, 0)),
         pl.BlockSpec((1, 8, H3), lambda i, nv_: (i, 0, 0))),
        tb)
    sc3, sh3 = _bn_from_stats(st3, params["g3"], params["be3"], n_valid)

    return _stage_call(
        _stage3_kernel, nv, p3,
        (sc3, sh3, params["w4"], params["b4"]),
        jax.ShapeDtypeStruct((b_pad, OUT_PAD), jnp.float32),
        pl.BlockSpec((tb, OUT_PAD), lambda i, nv_: (i, 0)),
        tb)


# ----------------------------------------------------------------------------
# Public forward
# ----------------------------------------------------------------------------
@functools.partial(jax.jit, static_argnames=("mode", "batch_tile"))
def generator_forward(x, params, *, mode="auto", batch_tile=512):
    assert batch_tile % 8 == 0, "batch_tile must be a multiple of 8 (sublane)"
    B = x.shape[0]
    cfg = _tpu_settings()
    # Pad latent 100 -> 128 with zeros (exact: W1's padded rows are zero).
    x_pad = jnp.pad(x.astype(jnp.float32), ((0, 0), (0, LATENT_PAD - LATENT)))

    use_tiled = (mode == "tiled") or (mode == "auto" and B > cfg["auto_threshold"])
    if use_tiled:
        flat = _forward_tiled(x_pad, params, B, batch_tile)
    else:
        flat = _forward_fused(x_pad, params, cfg["fused_vmem"])

    # Glue: drop padded rows/columns, final view(B, 1, 28, 28).
    return flat[:B, :OUT].reshape(B, 1, 28, 28)


def init_params(key):
    """Deterministic PyTorch-style (uniform +-1/sqrt(fan_in)) init.

    Weights stored transposed as [in, out] and cast to bf16 (HBM-traffic win);
    biases / BN params stay f32.  fc1 is padded along its input dim (100->128)
    and fc4 along its output dim (784->896) with zeros.  b2/b3 are omitted:
    they cancel exactly inside the following BatchNorm.
    """
    def linear(k, fan_in, fan_out, pad_in=0, pad_out=0, want_bias=True):
        kw, kb = jax.random.split(k)
        bound = 1.0 / (fan_in ** 0.5)
        w = jax.random.uniform(kw, (fan_in, fan_out), jnp.float32, -bound, bound)
        b = jax.random.uniform(kb, (1, fan_out), jnp.float32, -bound, bound)
        if pad_in or pad_out:
            w = jnp.pad(w, ((0, pad_in), (0, pad_out)))
            b = jnp.pad(b, ((0, 0), (0, pad_out)))
        return (w.astype(jnp.bfloat16), b) if want_bias else (w.astype(jnp.bfloat16), None)

    k1, k2, k3, k4 = jax.random.split(key, 4)
    w1, b1 = linear(k1, LATENT, H1, pad_in=LATENT_PAD - LATENT)
    w2, _ = linear(k2, H1, H2, want_bias=False)          # bias cancelled by BN2
    w3, _ = linear(k3, H2, H3, want_bias=False)          # bias cancelled by BN3
    w4, b4 = linear(k4, H3, OUT, pad_out=OUT_PAD - OUT)
    return {
        "w1": w1, "b1": b1,
        "w2": w2,
        "g2": jnp.ones((1, H2), jnp.float32), "be2": jnp.zeros((1, H2), jnp.float32),
        "w3": w3,
        "g3": jnp.ones((1, H3), jnp.float32), "be3": jnp.zeros((1, H3), jnp.float32),
        "w4": w4, "b4": b4,
    }


if __name__ == "__main__":
    key = jax.random.PRNGKey(0)
    kx, kp = jax.random.split(key)
    B = 64  # small demo batch (>1 required for batch-norm batch statistics)
    x = jax.random.normal(kx, (B, LATENT), jnp.float32)
    params = init_params(kp)

    out_fused = generator_forward(x, params, mode="fused")
    # batch_tile=48 deliberately does not divide B: exercises the padded-row
    # masking of the in-kernel BN partial sums.
    out_tiled = generator_forward(x, params, mode="tiled", batch_tile=48)
    out_auto = generator_forward(x, params)  # auto -> fused at this batch size
    jax.block_until_ready((out_fused, out_tiled, out_auto))

    assert out_fused.shape == (B, 1, 28, 28), out_fused.shape
    assert out_tiled.shape == (B, 1, 28, 28), out_tiled.shape
    assert out_fused.dtype == jnp.float32
    assert bool(jnp.all(jnp.isfinite(out_fused)))
    assert bool(jnp.all(jnp.isfinite(out_tiled)))
    # bf16 intermediates on the tiled path -> small deviation vs fused f32 path.
    max_diff = float(jnp.max(jnp.abs(out_fused - out_tiled)))
    assert max_diff < 5e-2, f"fused vs tiled mismatch: {max_diff}"
    max_diff_auto = float(jnp.max(jnp.abs(out_fused - out_auto)))
    assert max_diff_auto == 0.0, f"auto path mismatch: {max_diff_auto}"
    print("KERNEL_OK")
</pallas_src>

<mosaic_0001>
module attributes {stable_mosaic.version = 11 : i64} {
  func.func @_fused_kernel(%arg0: memref<64x128xf32, #tpu.memory_space<vmem>>, %arg1: memref<128x128xbf16, #tpu.memory_space<vmem>>, %arg2: memref<1x128xf32, #tpu.memory_space<vmem>>, %arg3: memref<128x512xbf16, #tpu.memory_space<vmem>>, %arg4: memref<1x512xf32, #tpu.memory_space<vmem>>, %arg5: memref<1x512xf32, #tpu.memory_space<vmem>>, %arg6: memref<512x1024xbf16, #tpu.memory_space<vmem>>, %arg7: memref<1x1024xf32, #tpu.memory_space<vmem>>, %arg8: memref<1x1024xf32, #tpu.memory_space<vmem>>, %arg9: memref<1024x896xbf16, #tpu.memory_space<vmem>>, %arg10: memref<1x896xf32, #tpu.memory_space<vmem>>, %arg11: memref<64x896xf32, #tpu.memory_space<vmem>>) attributes {dimension_semantics = [], scalar_prefetch = 0 : i64, scratch_operands = 0 : i64, tpu.core_type = #tpu.core_type<tc>} {
    %c0 = arith.constant 0 : index
    %c0_0 = arith.constant 0 : index
    %0 = vector.load %arg0[%c0, %c0_0] : memref<64x128xf32, #tpu.memory_space<vmem>>, vector<64x128xf32>
    %c0_1 = arith.constant 0 : index
    %c0_2 = arith.constant 0 : index
    %1 = vector.load %arg1[%c0_1, %c0_2] : memref<128x128xbf16, #tpu.memory_space<vmem>>, vector<128x128xbf16>
    %2 = arith.truncf %0 : vector<64x128xf32> to vector<64x128xbf16>
    %cst = arith.constant dense<0.000000e+00> : vector<64x128xf32>
    %3 = tpu.matmul %2, %1, %cst {dimension_numbers = #tpu.dot_dimension_numbers<[1], [0], [0], [1], [0, 0, 1, 1], [], []>} : vector<64x128xbf16>, vector<128x128xbf16>, vector<64x128xf32> -> vector<64x128xf32>
    %c0_3 = arith.constant 0 : index
    %c0_4 = arith.constant 0 : index
    %4 = vector.load %arg2[%c0_3, %c0_4] : memref<1x128xf32, #tpu.memory_space<vmem>>, vector<1x128xf32>
    %5 = vector.broadcast %4 : vector<1x128xf32> to vector<64x128xf32>
    %6 = arith.addf %3, %5 : vector<64x128xf32>
    %cst_5 = arith.constant 0.000000e+00 : f32
    %7 = vector.broadcast %cst_5 : f32 to vector<64x128xf32>
    %8 = arith.cmpf ogt, %6, %7 : vector<64x128xf32>
    %cst_6 = arith.constant 2.000000e-01 : f32
    %9 = vector.broadcast %cst_6 : f32 to vector<64x128xf32>
    %10 = arith.mulf %9, %6 : vector<64x128xf32>
    %11 = arith.select %8, %6, %10 : vector<64x128xi1>, vector<64x128xf32>
    %c0_7 = arith.constant 0 : index
    %c0_8 = arith.constant 0 : index
    %12 = vector.load %arg3[%c0_7, %c0_8] : memref<128x512xbf16, #tpu.memory_space<vmem>>, vector<128x512xbf16>
    %13 = arith.truncf %11 : vector<64x128xf32> to vector<64x128xbf16>
    %cst_9 = arith.constant dense<0.000000e+00> : vector<64x512xf32>
    %14 = tpu.matmul %13, %12, %cst_9 {dimension_numbers = #tpu.dot_dimension_numbers<[1], [0], [0], [1], [0, 0, 1, 1], [], []>} : vector<64x128xbf16>, vector<128x512xbf16>, vector<64x512xf32> -> vector<64x512xf32>
    %cst_10 = arith.constant dense<0.000000e+00> : vector<512xf32>
    %15 = vector.multi_reduction <add>, %14, %cst_10 [0] : vector<64x512xf32> to vector<512xf32>
    %16 = vector.shape_cast %15 : vector<512xf32> to vector<1x512xf32>
    %cst_11 = arith.constant 1.562500e-02 : f32
    %17 = vector.broadcast %cst_11 : f32 to vector<1x512xf32>
    %18 = arith.mulf %16, %17 : vector<1x512xf32>
    %19 = arith.mulf %14, %14 : vector<64x512xf32>
    %cst_12 = arith.constant dense<0.000000e+00> : vector<512xf32>
    %20 = vector.multi_reduction <add>, %19, %cst_12 [0] : vector<64x512xf32> to vector<512xf32>
    %21 = vector.shape_cast %20 : vector<512xf32> to vector<1x512xf32>
    %cst_13 = arith.constant 1.562500e-02 : f32
    %22 = vector.broadcast %cst_13 : f32 to vector<1x512xf32>
    %23 = arith.mulf %21, %22 : vector<1x512xf32>
    %24 = arith.mulf %18, %18 : vector<1x512xf32>
    %25 = arith.subf %23, %24 : vector<1x512xf32>
    %cst_14 = arith.constant 0.000000e+00 : f32
    %26 = vector.broadcast %cst_14 : f32 to vector<1x512xf32>
    %27 = arith.maximumf %25, %26 : vector<1x512xf32>
    %c0_15 = arith.constant 0 : index
    %c0_16 = arith.constant 0 : index
    %28 = vector.load %arg4[%c0_15, %c0_16] : memref<1x512xf32, #tpu.memory_space<vmem>>, vector<1x512xf32>
    %cst_17 = arith.constant 9.99999974E-6 : f32
    %29 = vector.broadcast %cst_17 : f32 to vector<1x512xf32>
    %30 = arith.addf %27, %29 : vector<1x512xf32>
    %31 = math.rsqrt %30 : vector<1x512xf32>
    %32 = arith.mulf %28, %31 : vector<1x512xf32>
    %c0_18 = arith.constant 0 : index
    %c0_19 = arith.constant 0 : index
    %33 = vector.load %arg5[%c0_18, %c0_19] : memref<1x512xf32, #tpu.memory_space<vmem>>, vector<1x512xf32>
    %34 = arith.mulf %18, %32 : vector<1x512xf32>
    %35 = arith.subf %33, %34 : vector<1x512xf32>
    %36 = vector.broadcast %32 : vector<1x512xf32> to vector<64x512xf32>
    %37 = arith.mulf %14, %36 : vector<64x512xf32>
    %38 = vector.broadcast %35 : vector<1x512xf32> to vector<64x512xf32>
    %39 = arith.addf %37, %38 : vector<64x512xf32>
    %cst_20 = arith.constant 0.000000e+00 : f32
    %40 = vector.broadcast %cst_20 : f32 to vector<64x512xf32>
    %41 = arith.cmpf ogt, %39, %40 : vector<64x512xf32>
    %cst_21 = arith.constant 2.000000e-01 : f32
    %42 = vector.broadcast %cst_21 : f32 to vector<64x512xf32>
    %43 = arith.mulf %42, %39 : vector<64x512xf32>
    %44 = arith.select %41, %39, %43 : vector<64x512xi1>, vector<64x512xf32>
    %c0_22 = arith.constant 0 : index
    %c0_23 = arith.constant 0 : index
    %45 = vector.load %arg6[%c0_22, %c0_23] : memref<512x1024xbf16, #tpu.memory_space<vmem>>, vector<512x1024xbf16>
    %46 = arith.truncf %44 : vector<64x512xf32> to vector<64x512xbf16>
    %cst_24 = arith.constant dense<0.000000e+00> : vector<64x1024xf32>
    %47 = tpu.matmul %46, %45, %cst_24 {dimension_numbers = #tpu.dot_dimension_numbers<[1], [0], [0], [1], [0, 0, 1, 1], [], []>} : vector<64x512xbf16>, vector<512x1024xbf16>, vector<64x1024xf32> -> vector<64x1024xf32>
    %cst_25 = arith.constant dense<0.000000e+00> : vector<1024xf32>
    %48 = vector.multi_reduction <add>, %47, %cst_25 [0] : vector<64x1024xf32> to vector<1024xf32>
    %49 = vector.shape_cast %48 : vector<1024xf32> to vector<1x1024xf32>
    %cst_26 = arith.constant 1.562500e-02 : f32
    %50 = vector.broadcast %cst_26 : f32 to vector<1x1024xf32>
    %51 = arith.mulf %49, %50 : vector<1x1024xf32>
    %52 = arith.mulf %47, %47 : vector<64x1024xf32>
    %cst_27 = arith.constant dense<0.000000e+00> : vector<1024xf32>
    %53 = vector.multi_reduction <add>, %52, %cst_27 [0] : vector<64x1024xf32> to vector<1024xf32>
    %54 = vector.shape_cast %53 : vector<1024xf32> to vector<1x1024xf32>
    %cst_28 = arith.constant 1.562500e-02 : f32
    %55 = vector.broadcast %cst_28 : f32 to vector<1x1024xf32>
    %56 = arith.mulf %54, %55 : vector<1x1024xf32>
    %57 = arith.mulf %51, %51 : vector<1x1024xf32>
    %58 = arith.subf %56, %57 : vector<1x1024xf32>
    %cst_29 = arith.constant 0.000000e+00 : f32
    %59 = vector.broadcast %cst_29 : f32 to vector<1x1024xf32>
    %60 = arith.maximumf %58, %59 : vector<1x1024xf32>
    %c0_30 = arith.constant 0 : index
    %c0_31 = arith.constant 0 : index
    %61 = vector.load %arg7[%c0_30, %c0_31] : memref<1x1024xf32, #tpu.memory_space<vmem>>, vector<1x1024xf32>
    %cst_32 = arith.constant 9.99999974E-6 : f32
    %62 = vector.broadcast %cst_32 : f32 to vector<1x1024xf32>
    %63 = arith.addf %60, %62 : vector<1x1024xf32>
    %64 = math.rsqrt %63 : vector<1x1024xf32>
    %65 = arith.mulf %61, %64 : vector<1x1024xf32>
    %c0_33 = arith.constant 0 : index
    %c0_34 = arith.constant 0 : index
    %66 = vector.load %arg8[%c0_33, %c0_34] : memref<1x1024xf32, #tpu.memory_space<vmem>>, vector<1x1024xf32>
    %67 = arith.mulf %51, %65 : vector<1x1024xf32>
    %68 = arith.subf %66, %67 : vector<1x1024xf32>
    %69 = vector.broadcast %65 : vector<1x1024xf32> to vector<64x1024xf32>
    %70 = arith.mulf %47, %69 : vector<64x1024xf32>
    %71 = vector.broadcast %68 : vector<1x1024xf32> to vector<64x1024xf32>
    %72 = arith.addf %70, %71 : vector<64x1024xf32>
    %cst_35 = arith.constant 0.000000e+00 : f32
    %73 = vector.broadcast %cst_35 : f32 to vector<64x1024xf32>
    %74 = arith.cmpf ogt, %72, %73 : vector<64x1024xf32>
    %cst_36 = arith.constant 2.000000e-01 : f32
    %75 = vector.broadcast %cst_36 : f32 to vector<64x1024xf32>
    %76 = arith.mulf %75, %72 : vector<64x1024xf32>
    %77 = arith.select %74, %72, %76 : vector<64x1024xi1>, vector<64x1024xf32>
    %c0_37 = arith.constant 0 : index
    %c0_38 = arith.constant 0 : index
    %78 = vector.load %arg9[%c0_37, %c0_38] : memref<1024x896xbf16, #tpu.memory_space<vmem>>, vector<1024x896xbf16>
    %79 = arith.truncf %77 : vector<64x1024xf32> to vector<64x1024xbf16>
    %cst_39 = arith.constant dense<0.000000e+00> : vector<64x896xf32>
    %80 = tpu.matmul %79, %78, %cst_39 {dimension_numbers = #tpu.dot_dimension_numbers<[1], [0], [0], [1], [0, 0, 1, 1], [], []>} : vector<64x1024xbf16>, vector<1024x896xbf16>, vector<64x896xf32> -> vector<64x896xf32>
    %c0_40 = arith.constant 0 : index
    %c0_41 = arith.constant 0 : index
    %81 = vector.load %arg10[%c0_40, %c0_41] : memref<1x896xf32, #tpu.memory_space<vmem>>, vector<1x896xf32>
    %82 = vector.broadcast %81 : vector<1x896xf32> to vector<64x896xf32>
    %83 = arith.addf %80, %82 : vector<64x896xf32>
    %84 = math.tanh %83 : vector<64x896xf32>
    %c0_42 = arith.constant 0 : index
    %c0_43 = arith.constant 0 : index
    %85 = vector.load %arg11[%c0_42, %c0_43] : memref<64x896xf32, #tpu.memory_space<vmem>>, vector<64x896xf32>
    tpu.vector_store %arg11[%c0_42, %c0_43], %84 {strides = array<i32>} : memref<64x896xf32, #tpu.memory_space<vmem>>, vector<64x896xf32>,
    return
  }
}

</mosaic_0001>

<bundles_post_ra>
// kernel: generator_forward.1
= control target key start
LH: loop header
LB: loop body
LE: loop exit
PB: predicated region body
PF: predicated region fallthrough
CT: control target
= control target key end

     0   :  { %16 = vsyncpa [#allocation3], 0  ;;  %s16030_s0 = inlined_call_operand.vmem [shape: f32[64,128], index: 0, kind: input, shape index: {}]   ;;  %s16031_s1 = inlined_call_operand.hbm [shape: bf16[128,128], index: 1, kind: input, shape index: {}]   ;;  %s16032_s2 = inlined_call_operand.hbm [shape: f32[1,128], index: 2, kind: input, shape index: {}]   ;;  %s16033_s3 = inlined_call_operand.hbm [shape: bf16[128,512], index: 3, kind: input, shape index: {}]   ;;  %s16034_s4 = inlined_call_operand.hbm [shape: f32[1,512], index: 4, kind: input, shape index: {}]   ;;  %s16035_s5 = inlined_call_operand.hbm [shape: f32[1,512], index: 5, kind: input, shape index: {}]   ;;  %s16036_s6 = inlined_call_operand.hbm [shape: bf16[512,1024], index: 6, kind: input, shape index: {}]   ;;  %s16037_s7 = inlined_call_operand.hbm [shape: f32[1,1024], index: 7, kind: input, shape index: {}]   ;;  %s16038_s8 = inlined_call_operand.hbm [shape: f32[1,1024], index: 8, kind: input, shape index: {}]   ;;  %s16039_s9 = inlined_call_operand.hbm [shape: bf16[1024,896], index: 9, kind: input, shape index: {}]   ;;  %s16040_s10 = inlined_call_operand.hbm [shape: f32[1,896], index: 10, kind: input, shape index: {}]   ;;  %s16041_s11 = inlined_call_operand.vmem [shape: f32[64,896], index: 11, kind: output, shape index: {}]  }
   0x1   :  { %17 = vsyncpa [#allocation5], 0 }
   0x2   :  { %18 = vsyncpa [#allocation8], 0 }
   0x3   :  { %19 = vsyncpa [#allocation11], 0 }
   0x4   :  { %20 = vsyncpa [#allocation14], 0  ;;  %s42_s19 = sshll.u32 %s16032_s2, 4  ;;  %s43_s19 = int_to_ptr.hbm [resolvable:$true] %s42_s19 }
   0x5   :  { %21 = vsyncpa [#allocation17], 0  ;;  %s13090_s20 = smov [#allocation4]   ;;  %s66_s24 = sshll.u32 %s16034_s4, 4  ;;  %s67_s24 = int_to_ptr.hbm [resolvable:$true] %s66_s24 }
   0x6   :  { %s44_s21 = sshll.u32 %s13090_s20, 4  ;;  %s13091_s25 = smov [#allocation7]   ;;  %s45_s21 = int_to_ptr.vmem [resolvable:$true] %s44_s21 }
   0x7   :  { %47 = dma.hbm_to_vmem [thread:$0]  %s43_s19, 16, %s45_s21, [#allocation5]  }
   0x8   :  { %s68_s26 = sshll.u32 %s13091_s25, 4  ;;  %s87_s29 = sshll.u32 %s16036_s6, 4  ;;  %s69_s26 = int_to_ptr.vmem [resolvable:$true] %s68_s26  ;;  %s88_s29 = int_to_ptr.hbm [resolvable:$true] %s87_s29 }
   0x9   :  { %71 = dma.hbm_to_vmem [thread:$0]  %s67_s24, 64, %s69_s26, [#allocation8]  }
   0xa   :  { %s13092_s2 = smov [#allocation10]   ;;  %s112_s14 = sshll.u32 %s16038_s8, 4  ;;  %s113_s14 = int_to_ptr.hbm [resolvable:$true] %s112_s14 }
   0xb   :  { %s89_s30 = sshll.u32 %s13092_s2, 4  ;;  %s13093_s15 = smov 512   ;;  %s90_s30 = int_to_ptr.vmem [resolvable:$true] %s89_s30 }
   0xc   :  { %s13094_s4 = smov 32   ;;  %s13095_s16 = smov [#allocation13]  }
   0xd   :  { %95 = dma.hbm_to_vmem [thread:$0]  %s88_s29, 32768, %s90_s30, [#allocation11], %s13093_s15, %s13093_s15, %s13094_s4  }
   0xe   :  { %s114_s17 = sshll.u32 %s13095_s16, 4  ;;  %s28_s6 = sshll.u32 %s16031_s1, 4  ;;  %s115_s17 = int_to_ptr.vmem [resolvable:$true] %s114_s17  ;;  %s29_s6 = int_to_ptr.hbm [resolvable:$true] %s28_s6 }
   0xf   :  { %117 = dma.hbm_to_vmem [thread:$0]  %s113_s14, 128, %s115_s17, [#allocation14]  }
  0x10   :  { %s13096_s20 = smov [#allocation2]   ;;  %s52_s8 = sshll.u32 %s16033_s3, 4  ;;  %s53_s8 = int_to_ptr.hbm [resolvable:$true] %s52_s8 }
  0x11   :  { %s30_s21 = sshll.u32 %s13096_s20, 4  ;;  %s13097_s24 = smov 64   ;;  %s31_s21 = int_to_ptr.vmem [resolvable:$true] %s30_s21 }
  0x12   :  { %s13098_s25 = smov 4   ;;  %s13099_s26 = smov [#allocation6]  }
  0x13   :  { %36 = dma.hbm_to_vmem [thread:$0]  %s29_s6, 1024, %s31_s21, [#allocation3], %s13097_s24, %s13097_s24, %s13098_s25  }
  0x14   :  { %s54_s27 = sshll.u32 %s13099_s26, 4  ;;  %s13100_s28 = smov 256   ;;  %s55_s27 = int_to_ptr.vmem [resolvable:$true] %s54_s27 }
  0x15   :  { %s13101_s29 = smov 16   ;;  %s77_s30 = sshll.u32 %s16035_s5, 4  ;;  %s78_s30 = int_to_ptr.hbm [resolvable:$true] %s77_s30 }
  0x16   :  { %60 = dma.hbm_to_vmem [thread:$0]  %s53_s8, 4096, %s55_s27, [#allocation5], %s13100_s28, %s13100_s28, %s13101_s29  }
  0x17   :  { %s13102_s12 = smov [#allocation9]   ;;  %s101_s15 = sshll.u32 %s16037_s7, 4  ;;  %s102_s15 = int_to_ptr.hbm [resolvable:$true] %s101_s15 }
  0x18   :  { %s79_s13 = sshll.u32 %s13102_s12, 4  ;;  %s13103_s4 = smov [#allocation12]   ;;  %s80_s13 = int_to_ptr.vmem [resolvable:$true] %s79_s13 }
  0x19   :  { %82 = dma.hbm_to_vmem [thread:$0]  %s78_s30, 64, %s80_s13, [#allocation8]  }
  0x1a   :  { %s103_s16 = sshll.u32 %s13103_s4, 4  ;;  %s122_s19 = sshll.u32 %s16039_s9, 4  ;;  %s104_s16 = int_to_ptr.vmem [resolvable:$true] %s103_s16  ;;  %s123_s19 = int_to_ptr.hbm [resolvable:$true] %s122_s19 }
  0x1b   :  { %106 = dma.hbm_to_vmem [thread:$0]  %s102_s15, 128, %s104_s16, [#allocation11]  }
  0x1c   :  { %s13104_s5 = smov [#allocation15]   ;;  %s136_s22 = sshll.u32 %s16040_s10, 4  ;;  %s137_s22 = int_to_ptr.hbm [resolvable:$true] %s136_s22 }
  0x1d   :  { %s124_s6 = sshll.u32 %s13104_s5, 4  ;;  %s13105_s23 = smov 448   ;;  %s125_s6 = int_to_ptr.vmem [resolvable:$true] %s124_s6 }
  0x1e   :  { %s13106_s7 = smov 28   ;;  %s13107_s8 = smov [#allocation16]  }
  0x1f   :  { %130 = dma.hbm_to_vmem [thread:$0]  %s123_s19, 57344, %s125_s6, [#allocation14], %s13105_s23, %s13105_s23, %s13106_s7  }
  0x20   :  { %s138_s24 = sshll.u32 %s13107_s8, 4  ;;  %s139_s24 = int_to_ptr.vmem [resolvable:$true] %s138_s24 }
  0x21   :  { %141 = dma.hbm_to_vmem [thread:$0]  %s137_s22, 112, %s139_s24, [#allocation17]  }
  0x22   :  { %13078 = dma.done.wait [#allocation3], 1024  }
  0x23   :  { %13079 = vsyncadd [#allocation3], 4294966272 }
  0x24   :  { %13080 = dma.done.wait [#allocation5], 4112  }
  0x25   :  { %13081 = vsyncadd [#allocation5], 4294963184 }
  0x26   :  { %13082 = dma.done.wait [#allocation8], 128  }
  0x27   :  { %13083 = vsyncadd [#allocation8], 4294967168 }
  0x28   :  { %13084 = dma.done.wait [#allocation11], 32896  }
  0x29   :  { %13085 = vsyncadd [#allocation11], 4294934400 }
  0x2a   :  { %13086 = dma.done.wait [#allocation14], 57472  }
  0x2b   :  { %13087 = vsyncadd [#allocation14], 4294909824 }
  0x2c   :  { %13088 = dma.done.wait [#allocation17], 112  }
  0x2d   :  { %13089 = vsyncadd [#allocation17], 4294967184  ;;  %v11927_v0 = vld [vmem:[#allocation2 + $0x38] sm:$0xff]  ;;  %v11926_v1 = vld [vmem:[#allocation2 + $0x30] sm:$0xff]  ;;  %vm835_vm10 = vcmask 1040384  }
  0x2e   :  { %262 = vmatpush.bf16.msra.mxu0 %v11927_v0  ;;  %12664 = vmatpush.bf16.msra.mxu1 %v11927_v0  ;;  %v11925_v2 = vld [vmem:[#allocation2 + $0x28] sm:$0xff]  ;;  %v11924_v3 = vld [vmem:[#allocation2 + $0x20] sm:$0xff]  ;;  %v11923_v4 = vld [vmem:[#allocation2 + $0x18] sm:$0xff] }
  0x2f   :  { %v11922_v5 = vld [vmem:[#allocation2 + $0x10] sm:$0xff]  ;;  %v11956_v6 = vld [vmem:[#allocation6 + $0xe4] sm:$0xf]  ;;  %v9098_v8 = vld [vmem:[#allocation6 + $0xe8] sm:$0xf] }
  0x30   :  { %v9092_v7 = vld [vmem:[#allocation6 + $0xf0] sm:$0xf0]  ;;  %v11959_v10 = vld [vmem:[#allocation6 + $0xf4] sm:$0xf0]  ;;  %v11921_v11 = vld [vmem:[#allocation2 + $0x8] sm:$0xff] }
  0x31   :  { %v9095_v9 = vor.u32 %v11956_v6, %v9092_v7  ;;  %v9099_v12 = vor.u32 %v11959_v10, %v9098_v8  ;;  %v11952_v13 = vld [vmem:[#allocation6 + $0xc4] sm:$0xf]  ;;  %v9076_v14 = vld [vmem:[#allocation6 + $0xd0] sm:$0xf0]  ;;  %v9082_v15 = vld [vmem:[#allocation6 + $0xc8] sm:$0xf] }
  0x32   :  { %263 = vmatpush.bf16.msra.mxu0 %v11926_v1  ;;  %12665 = vmatpush.bf16.msra.mxu1 %v11926_v1  ;;  %v11955_v16 = vld [vmem:[#allocation6 + $0xd4] sm:$0xf0]  ;;  %v9090_v17 = vld [vmem:[#allocation6 + $0xe0] sm:$0xf]  ;;  %v11958_v18 = vld [vmem:[#allocation6 + $0xec] sm:$0xf0]  ;;  %v9079_v19 = vor.u32 %v11952_v13, %v9076_v14 }
  0x33   :  { %540 = vmatpush.bf16.msra.mxu2 %v9095_v9  ;;  %569 = vmatpush.bf16.msra.mxu3 %v9099_v12  ;;  %v9083_v20 = vor.u32 %v11955_v16, %v9082_v15  ;;  %v11920_v21 = vld [vmem:[#allocation2] sm:$0xff]  ;;  %v11957_v23 = vld [vmem:[#allocation6 + $0xec] sm:$0xf]  ;;  %v9060_v26 = vld [vmem:[#allocation6 + $0xb0] sm:$0xf0]  ;;  %v9091_v32 = vor.u32 %v11958_v18, %v9090_v17 }
  0x34   :  { %v182_v22 = vld [vmem:[%s16030_s0] sm:$0xff]  ;;  %v9066_v27 = vld [vmem:[#allocation6 + $0xa8] sm:$0xf]  ;;  %v11951_v28 = vld [vmem:[#allocation6 + $0xb4] sm:$0xf0] }
  0x35   :  { %v9100_v24 = vld [vmem:[#allocation6 + $0xf8] sm:$0xf0]  ;;  %v11948_v25 = vld [vmem:[#allocation6 + $0xa4] sm:$0xf]  ;;  %v9074_v34 = vld [vmem:[#allocation6 + $0xc0] sm:$0xf]  ;;  %v9067_v39 = vor.u32 %v11951_v28, %v9066_v27 }
  0x36   :  { %264 = vmatpush.bf16.msra.mxu0 %v11925_v2  ;;  %12666 = vmatpush.bf16.msra.mxu1 %v11925_v2  ;;  %v183_v29 = vld [vmem:[%s16030_s0 + $0x8] sm:$0xff]  ;;  %v186_v30 = vld [vmem:[%s16030_s0 + $0x20] sm:$0xff]  ;;  %v9103_v33 = vor.u32 %v11957_v23, %v9100_v24  ;;  %v11954_v35 = vld [vmem:[#allocation6 + $0xcc] sm:$0xf0]  ;;  %v9063_v38 = vor.u32 %v11948_v25, %v9060_v26 }
  0x37   :  { %v187_v31 = vld [vmem:[%s16030_s0 + $0x28] sm:$0xff]  ;;  %541 = vmatpush.bf16.msra.mxu2 %v9079_v19  ;;  %570 = vmatpush.bf16.msra.mxu3 %v9083_v20  ;;  %v9084_v37 = vld [vmem:[#allocation6 + $0xd8] sm:$0xf0]  ;;  %v206_v41 = vpack.c.bf16 %v183_v29, %v182_v22  ;;  %v9044_v43 = vld [vmem:[#allocation6 + $0x90] sm:$0xf0]  ;;  %v9075_v46 = vor.u32 %v11954_v35, %v9074_v34 }
  0x38   :  { %v11953_v36 = vld [vmem:[#allocation6 + $0xcc] sm:$0xf]  ;;  %v11944_v40 = vld [vmem:[#allocation6 + $0x84] sm:$0xf]  ;;  %v208_v42 = vpack.c.bf16 %v187_v31, %v186_v30  ;;  %v9050_v44 = vld [vmem:[#allocation6 + $0x88] sm:$0xf] }
  0x39   :  { %v11947_v45 = vld [vmem:[#allocation6 + $0x94] sm:$0xf0]  ;;  %v9087_v47 = vor.u32 %v11953_v36, %v9084_v37  ;;  %v9058_v48 = vld [vmem:[#allocation6 + $0xa0] sm:$0xf]  ;;  %v11950_v49 = vld [vmem:[#allocation6 + $0xac] sm:$0xf0]  ;;  %v9047_v52 = vor.u32 %v11944_v40, %v9044_v43 }
  0x3a   :  { %265 = vmatpush.bf16.msra.mxu0 %v11924_v3  ;;  %12667 = vmatpush.bf16.msra.mxu1 %v11924_v3  ;;  %v11949_v50 = vld [vmem:[#allocation6 + $0xac] sm:$0xf]  ;;  %v9068_v51 = vld [vmem:[#allocation6 + $0xb8] sm:$0xf0]  ;;  %v9051_v53 = vor.u32 %v11947_v45, %v9050_v44  ;;  %v9059_v54 = vor.u32 %v11950_v49, %v9058_v48  ;;  %v9042_v56 = vld [vmem:[#allocation6 + $0x80] sm:$0xf] }
  0x3b   :  { %542 = vmatpush.bf16.msra.mxu2 %v9063_v38  ;;  %571 = vmatpush.bf16.msra.mxu3 %v9067_v39  ;;  %v9071_v55 = vor.u32 %v11949_v50, %v9068_v51  ;;  %v11946_v57 = vld [vmem:[#allocation6 + $0x8c] sm:$0xf0]  ;;  %v11945_v58 = vld [vmem:[#allocation6 + $0x8c] sm:$0xf]  ;;  %v9052_v59 = vld [vmem:[#allocation6 + $0x98] sm:$0xf0] }
  0x3c   :  { %v9043_v60 = vor.u32 %v11946_v57, %v9042_v56  ;;  %v9055_v61 = vor.u32 %v11945_v58, %v9052_v59  ;;  %v184_v62 = vld [vmem:[%s16030_s0 + $0x10] sm:$0xff]  ;;  %v185_v63 = vld [vmem:[%s16030_s0 + $0x18] sm:$0xff]  ;;  %v11940_v6 = vld [vmem:[#allocation6 + $0x64] sm:$0xf] }
  0x3d   :  { %v188_v0 = vld [vmem:[%s16030_s0 + $0x30] sm:$0xff]  ;;  %v189_v1 = vld [vmem:[%s16030_s0 + $0x38] sm:$0xff]  ;;  %v207_v2 = vpack.c.bf16 %v185_v63, %v184_v62  ;;  %v9034_v9 = vld [vmem:[#allocation6 + $0x68] sm:$0xf] }
  0x3e   :  { %266 = vmatpush.bf16.msra.mxu0 %v11923_v4  ;;  %12668 = vmatpush.bf16.msra.mxu1 %v11923_v4  ;;  %v209_v3 = vpack.c.bf16 %v189_v1, %v188_v0  ;;  %v9026_v4 = vld [vmem:[#allocation6 + $0x60] sm:$0xf]  ;;  %v9028_v8 = vld [vmem:[#allocation6 + $0x70] sm:$0xf0]  ;;  %v11943_v10 = vld [vmem:[#allocation6 + $0x74] sm:$0xf0] }
  0x3f   :  { %543 = vmatpush.bf16.msra.mxu2 %v9047_v52  ;;  %572 = vmatpush.bf16.msra.mxu3 %v9051_v53  ;;  %v9035_v12 = vor.u32 %v11943_v10, %v9034_v9  ;;  %v11941_v13 = vld [vmem:[#allocation6 + $0x6c] sm:$0xf]  ;;  %v9036_v14 = vld [vmem:[#allocation6 + $0x78] sm:$0xf0]  ;;  %v9010_v16 = vld [vmem:[#allocation6 + $0x40] sm:$0xf] }
  0x40   :  { %v9039_v15 = vor.u32 %v11941_v13, %v9036_v14  ;;  %v11938_v17 = vld [vmem:[#allocation6 + $0x4c] sm:$0xf0]  ;;  %v11936_v18 = vld [vmem:[#allocation6 + $0x44] sm:$0xf]  ;;  %v9012_v20 = vld [vmem:[#allocation6 + $0x50] sm:$0xf0] }
  0x41   :  { %v9011_v19 = vor.u32 %v11938_v17, %v9010_v16  ;;  %v11939_v22 = vld [vmem:[#allocation6 + $0x54] sm:$0xf0]  ;;  %v9015_v23 = vor.u32 %v11936_v18, %v9012_v20  ;;  %v11937_v25 = vld [vmem:[#allocation6 + $0x4c] sm:$0xf]  ;;  %v9020_v26 = vld [vmem:[#allocation6 + $0x58] sm:$0xf0] }
  0x42   :  { %267 = vmatpush.bf16.msra.mxu0 %v11922_v5  ;;  %12669 = vmatpush.bf16.msra.mxu1 %v11922_v5  ;;  %v11942_v5 = vld [vmem:[#allocation6 + $0x6c] sm:$0xf0]  ;;  %v9023_v27 = vor.u32 %v11937_v25, %v9020_v26  ;;  %v8994_v28 = vld [vmem:[#allocation6 + $0x20] sm:$0xf]  ;;  %v11932_v30 = vld [vmem:[#allocation6 + $0x24] sm:$0xf] }
  0x43   :  { %v9027_v7 = vor.u32 %v11942_v5, %v9026_v4  ;;  %573 = vmatpush.bf16.msra.mxu3 %v9035_v12  ;;  %v11934_v29 = vld [vmem:[#allocation6 + $0x2c] sm:$0xf0]  ;;  %v11935_v34 = vld [vmem:[#allocation6 + $0x34] sm:$0xf0]  ;;  %v11933_v37 = vld [vmem:[#allocation6 + $0x2c] sm:$0xf] }
  0x44   :  { %v8995_v31 = vor.u32 %v11934_v29, %v8994_v28  ;;  %v9004_v38 = vld [vmem:[#allocation6 + $0x38] sm:$0xf0]  ;;  %v8978_v40 = vld [vmem:[#allocation6] sm:$0xf]  ;;  %v8980_v44 = vld [vmem:[#allocation6 + $0x10] sm:$0xf0] }
  0x45   :  { %v9007_v39 = vor.u32 %v11933_v37, %v9004_v38  ;;  %v8986_v45 = vld [vmem:[#allocation6 + $0x8] sm:$0xf]  ;;  %v11929_v49 = vld [vmem:[#allocation6 + $0xc] sm:$0xf]  ;;  %v8988_v50 = vld [vmem:[#allocation6 + $0x18] sm:$0xf0] }
  0x46   :  { %268 = vmatpush.bf16.msra.mxu0 %v11921_v11  ;;  %12670 = vmatpush.bf16.msra.mxu1 %v11921_v11  ;;  %v9031_v11 = vor.u32 %v11940_v6, %v9028_v8  ;;  %v8991_v51 = vor.u32 %v11929_v49, %v8988_v50  ;;  %v12698_v53 = vld [vmem:[#allocation4] ss:$0 sm:$0xff] }
  0x48   :  { %544 = vmatpush.bf16.msra.mxu2 %v9031_v11 }
  0x4a   :  { %269 = vmatpush.bf16.msra.mxu0 %v11920_v21  ;;  %12671 = vmatpush.bf16.msra.mxu1 %v11920_v21  ;;  %v9018_v21 = vld [vmem:[#allocation6 + $0x48] sm:$0xf] }
  0x4b   :  { %v9019_v24 = vor.u32 %v11939_v22, %v9018_v21 }
  0x4c   :  { %545 = vmatpush.bf16.msra.mxu2 %v9015_v23 }
  0x4d   :  { %270 = vmatmul.bf16.vlgmr.msra.gmra.mxu0 %v206_v41  ;;  %280 = vmatmul.bf16.vlgmr.msra.gmra.mxu1 %v208_v42  ;;  %v11930_v41 = vld [vmem:[#allocation6 + $0xc] sm:$0xf0]  ;;  %v11928_v42 = vld [vmem:[#allocation6 + $0x4] sm:$0xf] }
  0x4e   :  { %511 = vmatpush.bf16.msrb.mxu1 %v9091_v32  ;;  %598 = vmatpush.bf16.msrb.mxu0 %v9103_v33  ;;  %v8996_v32 = vld [vmem:[#allocation6 + $0x30] sm:$0xf0]  ;;  %v9002_v33 = vld [vmem:[#allocation6 + $0x28] sm:$0xf]  ;;  %v8979_v43 = vor.u32 %v11930_v41, %v8978_v40 }
  0x4f   :  { %574 = vmatpush.bf16.msra.mxu3 %v9019_v24  ;;  %v8999_v35 = vor.u32 %v11932_v30, %v8996_v32  ;;  %v9003_v36 = vor.u32 %v11935_v34, %v9002_v33 }
  0x51   :  { %546 = vmatpush.bf16.msra.mxu2 %v8999_v35 }
  0x52   :  { %512 = vmatpush.bf16.msrb.mxu1 %v9075_v46  ;;  %599 = vmatpush.bf16.msrb.mxu0 %v9087_v47  ;;  %v11931_v46 = vld [vmem:[#allocation6 + $0x14] sm:$0xf0]  ;;  %v8983_v47 = vor.u32 %v11928_v42, %v8980_v44 }
  0x53   :  { %575 = vmatpush.bf16.msra.mxu3 %v9003_v36  ;;  %v8987_v48 = vor.u32 %v11931_v46, %v8986_v45 }
  0x55   :  { %547 = vmatpush.bf16.msra.mxu2 %v8983_v47 }
  0x56   :  { %513 = vmatpush.bf16.msrb.mxu1 %v9059_v54  ;;  %600 = vmatpush.bf16.msrb.mxu0 %v9071_v55 }
  0x57   :  { %576 = vmatpush.bf16.msra.mxu3 %v8987_v48 }
  0x5a   :  { %514 = vmatpush.bf16.msrb.mxu1 %v9043_v60  ;;  %601 = vmatpush.bf16.msrb.mxu0 %v9055_v61 }
  0x5d   :  { %275 = vmatmul.bf16.gmra.mxu0 %v207_v2  ;;  %285 = vmatmul.bf16.gmra.mxu1 %v209_v3 }
  0x5e   :  { %515 = vmatpush.bf16.msrb.mxu1 %v9027_v7  ;;  %602 = vmatpush.bf16.msrb.mxu0 %v9039_v15 }
  0x62   :  { %516 = vmatpush.bf16.msrb.mxu1 %v9011_v19  ;;  %603 = vmatpush.bf16.msrb.mxu0 %v9023_v27 }
  0x66   :  { %517 = vmatpush.bf16.msrb.mxu1 %v8995_v31  ;;  %604 = vmatpush.bf16.msrb.mxu0 %v9007_v39 }
  0x6a   :  { %518 = vmatpush.bf16.msrb.mxu1 %v8979_v43  ;;  %605 = vmatpush.bf16.msrb.mxu0 %v8991_v51 }
  0xca   :  { %v271_v52 = vpop.f32.mrf.mxu0  ;;  %v281_v63 = vpop.f32.mrf.mxu1 }
  0xcb   :  { %v272_v54 = vadd.f32 %v12698_v53, %v271_v52  ;;  %v282_v9 = vadd.f32 %v12698_v53, %v281_v63 }
  0xcd   :  { %v299_v56 = vmul.f32 0.2, %v272_v54  ;;  %vm291_vm0 = vcmp.gt.f32.partialorder %v272_v54, 0.0  ;;  %v303_v12 = vmul.f32 0.2, %v282_v9  ;;  %vm295_vm4 = vcmp.gt.f32.partialorder %v282_v9, 0.0 }
  0xcf   :  { %v307_v59 = vsel %vm291_vm0, %v272_v54, %v299_v56  ;;  %v311_v14 = vsel %vm295_vm4, %v282_v9, %v303_v12 }
  0xd2   :  { %v273_v55 = vpop.f32.mrf.mxu0  ;;  %v283_v5 = vpop.f32.mrf.mxu1 }
  0xd3   :  { %v274_v57 = vadd.f32 %v12698_v53, %v273_v55  ;;  %v284_v10 = vadd.f32 %v12698_v53, %v283_v5 }
  0xd5   :  { %vm292_vm1 = vcmp.gt.f32.partialorder %v274_v57, 0.0  ;;  %v300_v58 = vmul.f32 0.2, %v274_v57  ;;  %v304_v13 = vmul.f32 0.2, %v284_v10  ;;  %vm296_vm5 = vcmp.gt.f32.partialorder %v284_v10, 0.0 }
  0xd7   :  { %v308_v60 = vsel %vm292_vm1, %v274_v57, %v300_v58  ;;  %v312_v15 = vsel %vm296_vm5, %v284_v10, %v304_v13  ;;  %vm839_vm5 = vcmask 1041408  }
  0xd8   :  { %v347_v61 = vpack.c.bf16 %v308_v60, %v307_v59  ;;  %v349_v16 = vpack.c.bf16 %v312_v15, %v311_v14 }
  0xda   :  { %v276_v62 = vpop.f32.mrf.mxu0  ;;  %519 = vmatmul.bf16.vlgmr.msrb.gmra.mxu1 %v347_v61  ;;  %548 = vmatmul.bf16.vlgmr.msra.gmra.mxu2 %v347_v61  ;;  %v286_v11 = vpop.f32.mrf.mxu1 }
  0xdb   :  { %577 = vmatmul.bf16.vlgmr.msra.gmra.mxu3 %v347_v61  ;;  %606 = vmatmul.bf16.vlgmr.msrb.gmra.mxu0 %v347_v61  ;;  %v277_v0 = vadd.f32 %v12698_v53, %v276_v62  ;;  %v287_v18 = vadd.f32 %v12698_v53, %v286_v11 }
  0xdd   :  { %v301_v2 = vmul.f32 0.2, %v277_v0  ;;  %vm293_vm2 = vcmp.gt.f32.partialorder %v277_v0, 0.0  ;;  %v305_v20 = vmul.f32 0.2, %v287_v18  ;;  %vm297_vm6 = vcmp.gt.f32.partialorder %v287_v18, 0.0 }
  0xdf   :  { %v309_v6 = vsel %vm293_vm2, %v277_v0, %v301_v2  ;;  %v313_v22 = vsel %vm297_vm6, %v287_v18, %v305_v20  ;;  %vm837_vm2 = vcmask 1042434  }
  0xe2   :  { %v278_v1 = vpop.f32.mrf.mxu0  ;;  %v288_v17 = vpop.f32.mrf.mxu1 }
  0xe3   :  { %v279_v3 = vadd.f32 %v12698_v53, %v278_v1  ;;  %v289_v19 = vadd.f32 %v12698_v53, %v288_v17 }
  0xe5   :  { %vm294_vm3 = vcmp.gt.f32.partialorder %v279_v3, 0.0  ;;  %v302_v4 = vmul.f32 0.2, %v279_v3  ;;  %v306_v21 = vmul.f32 0.2, %v289_v19  ;;  %vm298_vm7 = vcmp.gt.f32.partialorder %v289_v19, 0.0 }
  0xe7   :  { %v310_v7 = vsel %vm294_vm3, %v279_v3, %v302_v4  ;;  %v314_v23 = vsel %vm298_vm7, %v289_v19, %v306_v21 }
  0xe8   :  { %v348_v8 = vpack.c.bf16 %v310_v7, %v309_v6  ;;  %v350_v24 = vpack.c.bf16 %v314_v23, %v313_v22 }
  0xea   :  { %524 = vmatmul.bf16.gmra.mxu1 %v348_v8  ;;  %553 = vmatmul.bf16.gmra.mxu2 %v348_v8 }
  0xeb   :  { %582 = vmatmul.bf16.gmra.mxu3 %v348_v8  ;;  %611 = vmatmul.bf16.gmra.mxu0 %v348_v8 }
  0xfa   :  { %529 = vmatmul.bf16.gmra.mxu1 %v349_v16  ;;  %558 = vmatmul.bf16.gmra.mxu2 %v349_v16 }
  0xfb   :  { %587 = vmatmul.bf16.gmra.mxu3 %v349_v16  ;;  %616 = vmatmul.bf16.gmra.mxu0 %v349_v16 }
 0x10a   :  { %534 = vmatmul.bf16.gmra.mxu1 %v350_v24  ;;  %563 = vmatmul.bf16.gmra.mxu2 %v350_v24 }
 0x10b   :  { %592 = vmatmul.bf16.gmra.mxu3 %v350_v24  ;;  %621 = vmatmul.bf16.gmra.mxu0 %v350_v24 }
 0x157   :  { %v13222_v25 = vpop.f32.mrf.mxu1 }
 0x158   :  { %v13224_v26 = vpop.f32.mrf.mxu0  ;;  %v683_v48 = vmul.f32 %v13222_v25, %v13222_v25 }
 0x159   :  { %v686_v49 = vmul.f32 %v13224_v26, %v13224_v26 }
 0x15d   :  { %v13226_v27 = vpop.f32.mrf.mxu2 }
 0x15e   :  { %v13228_v28 = vpop.f32.mrf.mxu3  ;;  %v684_v51 = vmul.f32 %v13226_v27, %v13226_v27 }
 0x15f   :  { %v13230_v29 = vpop.f32.mrf.mxu1  ;;  %v685_v52 = vmul.f32 %v13228_v28, %v13228_v28 }
 0x160   :  { %v13232_v30 = vpop.f32.mrf.mxu0  ;;  %v687_v45 = vmul.f32 %v13230_v29, %v13230_v29  ;;  %v627_v55 = vadd.f32 %v13230_v29, %v13222_v25 }
 0x161   :  { %v690_v46 = vmul.f32 %v13232_v30, %v13232_v30  ;;  %v666_v57 = vadd.f32 %v13232_v30, %v13224_v26 }
 0x162   :  { %v715_v59 = vadd.f32 %v687_v45, %v683_v48 }
 0x163   :  { %v754_v60 = vadd.f32 %v690_v46, %v686_v49 }
 0x165   :  { %v13234_v31 = vpop.f32.mrf.mxu2 }
 0x166   :  { %v13236_v32 = vpop.f32.mrf.mxu3  ;;  %v688_v53 = vmul.f32 %v13234_v31, %v13234_v31  ;;  %v640_v61 = vadd.f32 %v13234_v31, %v13226_v27 }
 0x167   :  { %v13238_v33 = vpop.f32.mrf.mxu1  ;;  %v689_v54 = vmul.f32 %v13236_v32, %v13236_v32  ;;  %v653_v0 = vadd.f32 %v13236_v32, %v13228_v28 }
 0x168   :  { %v13240_v34 = vpop.f32.mrf.mxu0  ;;  %v691_v56 = vmul.f32 %v13238_v33, %v13238_v33  ;;  %v628_v63 = vadd.f32 %v627_v55, %v13238_v33  ;;  %v728_v4 = vadd.f32 %v688_v53, %v684_v51 }
 0x169   :  { %v694_v58 = vmul.f32 %v13240_v34, %v13240_v34  ;;  %v667_v3 = vadd.f32 %v666_v57, %v13240_v34  ;;  %v741_v5 = vadd.f32 %v689_v54, %v685_v52 }
 0x16a   :  { %v716_v8 = vadd.f32 %v715_v59, %v691_v56 }
 0x16b   :  { %v755_v9 = vadd.f32 %v754_v60, %v694_v58 }
 0x16d   :  { %v13242_v35 = vpop.f32.mrf.mxu2 }
 0x16e   :  { %v13244_v36 = vpop.f32.mrf.mxu3  ;;  %v692_v62 = vmul.f32 %v13242_v35, %v13242_v35  ;;  %v641_v10 = vadd.f32 %v640_v61, %v13242_v35 }
 0x16f   :  { %v13246_v37 = vpop.f32.mrf.mxu1  ;;  %v693_v1 = vmul.f32 %v13244_v36, %v13244_v36  ;;  %v654_v11 = vadd.f32 %v653_v0, %v13244_v36 }
 0x170   :  { %v13248_v38 = vpop.f32.mrf.mxu0  ;;  %v695_v2 = vmul.f32 %v13246_v37, %v13246_v37  ;;  %v729_v13 = vadd.f32 %v728_v4, %v692_v62  ;;  %v629_v15 = vadd.f32 %v628_v63, %v13246_v37 }
 0x171   :  { %v698_v6 = vmul.f32 %v13248_v38, %v13248_v38  ;;  %v742_v18 = vadd.f32 %v741_v5, %v693_v1  ;;  %v668_v20 = vadd.f32 %v667_v3, %v13248_v38 }
 0x172   :  { %v717_v19 = vadd.f32 %v716_v8, %v695_v2 }
 0x173   :  { %v756_v24 = vadd.f32 %v755_v9, %v698_v6 }
 0x175   :  { %v13250_v39 = vpop.f32.mrf.mxu2 }
 0x176   :  { %v13252_v40 = vpop.f32.mrf.mxu3  ;;  %v696_v14 = vmul.f32 %v13250_v39, %v13250_v39  ;;  %v642_v45 = vadd.f32 %v641_v10, %v13250_v39 }
 0x177   :  { %v13254_v41 = vpop.f32.mrf.mxu1  ;;  %v697_v23 = vmul.f32 %v13252_v40, %v13252_v40  ;;  %v655_v46 = vadd.f32 %v654_v11, %v13252_v40 }
 0x178   :  { %v13256_v42 = vpop.f32.mrf.mxu0  ;;  %v699_v16 = vmul.f32 %v13254_v41, %v13254_v41  ;;  %v630_v48 = vadd.f32 %v629_v15, %v13254_v41  ;;  %v730_v55 = vadd.f32 %v729_v13, %v696_v14 }
 0x179   :  { %v702_v21 = vmul.f32 %v13256_v42, %v13256_v42  ;;  %v669_v54 = vadd.f32 %v668_v20, %v13256_v42  ;;  %v743_v63 = vadd.f32 %v742_v18, %v697_v23 }
 0x17a   :  { %v718_v53 = vadd.f32 %v717_v19, %v699_v16 }
 0x17b   :  { %v757_v57 = vadd.f32 %v756_v24, %v702_v21 }
 0x17d   :  { %v13258_v43 = vpop.f32.mrf.mxu2 }
 0x17e   :  { %v13260_v44 = vpop.f32.mrf.mxu3  ;;  %v700_v49 = vmul.f32 %v13258_v43, %v13258_v43  ;;  %v643_v61 = vadd.f32 %v642_v45, %v13258_v43 }
 0x17f   :  { %v13266_v47 = vpop.f32.mrf.mxu1  ;;  %v701_v56 = vmul.f32 %v13260_v44, %v13260_v44  ;;  %v656_v62 = vadd.f32 %v655_v46, %v13260_v44 }
 0x180   :  { %v13272_v50 = vpop.f32.mrf.mxu0  ;;  %v703_v51 = vmul.f32 %v13266_v47, %v13266_v47  ;;  %v631_v58 = vadd.f32 %v630_v48, %v13266_v47  ;;  %v731_v2 = vadd.f32 %v730_v55, %v700_v49 }
 0x181   :  { %16157 = vst [vmem:[#allocation24_spill] sm:$0xff] %v13272_v50  ;;  %v706_v52 = vmul.f32 %v13272_v50, %v13272_v50  ;;  %v670_v0 = vadd.f32 %v669_v54, %v13272_v50  ;;  %v744_v8 = vadd.f32 %v743_v63, %v701_v56  ;;  %v12100_v50 = vld [vmem:[#allocation10 + $0x45c] sm:$0xf0] }
 0x182   :  { %v719_v4 = vadd.f32 %v718_v53, %v703_v51 }
 0x183   :  { %v758_v5 = vadd.f32 %v757_v57, %v706_v52 }
 0x185   :  { %v13304_v7 = vpop.f32.mrf.mxu2 }
 0x186   :  { %v13308_v12 = vpop.f32.mrf.mxu3  ;;  %v704_v9 = vmul.f32 %v13304_v7, %v13304_v7  ;;  %v644_v45 = vadd.f32 %v643_v61, %v13304_v7 }
 0x187   :  { %v13315_v17 = vpop.f32.mrf.mxu1  ;;  %v705_v10 = vmul.f32 %v13308_v12, %v13308_v12  ;;  %v657_v46 = vadd.f32 %v656_v62, %v13308_v12 }
 0x188   :  { %16158 = vst [vmem:[#allocation25_spill] sm:$0xff] %v13315_v17  ;;  %v13320_v22 = vpop.f32.mrf.mxu0  ;;  %v707_v59 = vmul.f32 %v13315_v17, %v13315_v17  ;;  %v632_v3 = vadd.f32 %v631_v58, %v13315_v17  ;;  %v732_v51 = vadd.f32 %v731_v2, %v704_v9  ;;  %v9650_v17 = vld [vmem:[#allocation10 + $0x440] sm:$0xf] }
 0x189   :  { %16159 = vst [vmem:[#allocation26_spill] sm:$0xff] %v13320_v22  ;;  %v710_v60 = vmul.f32 %v13320_v22, %v13320_v22  ;;  %v671_v11 = vadd.f32 %v670_v0, %v13320_v22  ;;  %v745_v52 = vadd.f32 %v744_v8, %v705_v10 }
 0x18a   :  { %v720_v14 = vadd.f32 %v719_v4, %v707_v59 }
 0x18b   :  { %v759_v15 = vadd.f32 %v758_v5, %v710_v60 }
 0x18d   :  { %v13344_v1 = vpop.f32.mrf.mxu2 }
 0x18e   :  { %16160 = vst [vmem:[#allocation27_spill] sm:$0xff] %v13344_v1  ;;  %v13347_v6 = vpop.f32.mrf.mxu3  ;;  %v708_v20 = vmul.f32 %v13344_v1, %v13344_v1  ;;  %v645_v55 = vadd.f32 %v644_v45, %v13344_v1 }
 0x18f   :  { %16161 = vst [vmem:[#allocation28_spill] sm:$0xff] %v13347_v6  ;;  %v13354_v13 = vpop.f32.mrf.mxu1  ;;  %v709_v21 = vmul.f32 %v13347_v6, %v13347_v6  ;;  %v658_v56 = vadd.f32 %v657_v46, %v13347_v6 }
 0x190   :  { %16162 = vst [vmem:[#allocation29_spill] sm:$0xff] %v13354_v13  ;;  %v633_v16 = vadd.f32 %v632_v3, %v13354_v13  ;;  %v711_v18 = vmul.f32 %v13354_v13, %v13354_v13  ;;  %v13359_v19 = vpop.f32.mrf.mxu0  ;;  %v733_v59 = vadd.f32 %v732_v51, %v708_v20 }
 0x191   :  { %16163 = vst [vmem:[#allocation30_spill] sm:$0xff] %v13359_v19  ;;  %v672_v23 = vadd.f32 %v671_v11, %v13359_v19  ;;  %v714_v24 = vmul.f32 %v13359_v19, %v13359_v19  ;;  %v746_v60 = vadd.f32 %v745_v52, %v709_v21 }
 0x192   :  { %v634_v48 = vrot.slane %v633_v16, 4  ;;  %v721_v49 = vadd.f32 %v720_v14, %v711_v18 }
 0x193   :  { %v673_v53 = vrot.slane %v672_v23, 4  ;;  %v760_v54 = vadd.f32 %v759_v15, %v714_v24 }
 0x194   :  { %v635_v57 = vadd.f32 %v634_v48, %v633_v16  ;;  %v722_v58 = vrot.slane %v721_v49, 4 }
 0x195   :  { %v674_v63 = vadd.f32 %v673_v53, %v672_v23  ;;  %v761_v0 = vrot.slane %v760_v54, 4  ;;  %v13372_v3 = vpop.f32.mrf.mxu2 }
 0x196   :  { %16164 = vst [vmem:[#allocation31_spill] sm:$0xff] %v13372_v3  ;;  %v636_v61 = vrot.slane %v635_v57, 2  ;;  %v723_v62 = vadd.f32 %v722_v58, %v721_v49  ;;  %v646_v4 = vadd.f32 %v645_v55, %v13372_v3  ;;  %v712_v2 = vmul.f32 %v13372_v3, %v13372_v3  ;;  %v13377_v5 = vpop.f32.mrf.mxu3  ;;  %v12004_v3 = vld [vmem:[#allocation10 + $0x15c] sm:$0xf0] }
 0x197   :  { %16165 = vst [vmem:[#allocation32_spill] sm:$0xff] %v13377_v5  ;;  %v675_v8 = vrot.slane %v674_v63, 2  ;;  %v762_v9 = vadd.f32 %v761_v0, %v760_v54  ;;  %v659_v10 = vadd.f32 %v658_v56, %v13377_v5  ;;  %v713_v11 = vmul.f32 %v13377_v5, %v13377_v5 }
 0x198   :  { %v637_v14 = vadd.f32 %v636_v61, %v635_v57  ;;  %v724_v15 = vrot.slane %v723_v62, 2  ;;  %v647_v16 = vrot.slane %v646_v4, 4  ;;  %v734_v18 = vadd.f32 %v733_v59, %v712_v2 }
 0x199   :  { %v676_v20 = vadd.f32 %v675_v8, %v674_v63  ;;  %v763_v21 = vrot.slane %v762_v9, 2  ;;  %v660_v23 = vrot.slane %v659_v10, 4  ;;  %v747_v24 = vadd.f32 %v746_v60, %v713_v11 }
 0x19a   :  { %v638_v45 = vrot.slane %v637_v14, 1  ;;  %v725_v46 = vadd.f32 %v724_v15, %v723_v62  ;;  %v648_v48 = vadd.f32 %v647_v16, %v646_v4  ;;  %v735_v49 = vrot.slane %v734_v18, 4 }
 0x19b   :  { %v677_v51 = vrot.slane %v676_v20, 1  ;;  %v764_v52 = vadd.f32 %v763_v21, %v762_v9  ;;  %v661_v53 = vadd.f32 %v660_v23, %v659_v10  ;;  %v748_v54 = vrot.slane %v747_v24, 4 }
 0x19c   :  { %v639_v55 = vadd.f32 %v638_v45, %v637_v14  ;;  %v726_v56 = vrot.slane %v725_v46, 1  ;;  %v649_v58 = vrot.slane %v648_v48, 2  ;;  %v736_v0 = vadd.f32 %v735_v49, %v734_v18  ;;  %v12084_v45 = vld [vmem:[#allocation10 + $0x3dc] sm:$0xf0] }
 0x19d   :  { %v678_v57 = vadd.f32 %v677_v51, %v676_v20  ;;  %v765_v61 = vrot.slane %v764_v52, 1  ;;  %v662_v19 = vrot.slane %v661_v53, 2  ;;  %v749_v59 = vadd.f32 %v748_v54, %v747_v24  ;;  %v9586_v24 = vld [vmem:[#allocation10 + $0x3c0] sm:$0xf] }
 0x19e   :  { %v13382_v63 = vmul.f32 0.015625, %v639_v55  ;;  %v727_v2 = vadd.f32 %v726_v56, %v725_v46  ;;  %v650_v60 = vadd.f32 %v649_v58, %v648_v48  ;;  %v737_v8 = vrot.slane %v736_v0, 2  ;;  %v9842_v51 = vld [vmem:[#allocation10 + $0x5c0] sm:$0xf] }
 0x19f   :  { %v13384_v62 = vmul.f32 0.015625, %v678_v57  ;;  %v766_v4 = vadd.f32 %v765_v61, %v764_v52  ;;  %v663_v11 = vadd.f32 %v662_v19, %v661_v53  ;;  %v750_v9 = vrot.slane %v749_v59, 2  ;;  %v12148_v19 = vld [vmem:[#allocation10 + $0x5dc] sm:$0xf0] }
 0x1a0   :  { %v767_v10 = vmul.f32 0.015625, %v727_v2  ;;  %v771_v14 = vmul.f32 %v13382_v63, %v13382_v63  ;;  %v651_v15 = vrot.slane %v650_v60, 1  ;;  %v738_v16 = vadd.f32 %v737_v8, %v736_v0  ;;  %v9330_v55 = vld [vmem:[#allocation10 + $0x1c0] sm:$0xf] }
 0x1a1   :  { %v770_v18 = vmul.f32 0.015625, %v766_v4  ;;  %v774_v20 = vmul.f32 %v13384_v62, %v13384_v62  ;;  %v664_v21 = vrot.slane %v663_v11, 1  ;;  %v751_v23 = vadd.f32 %v750_v9, %v749_v59  ;;  %v12020_v56 = vld [vmem:[#allocation10 + $0x1dc] sm:$0xf0] }
 0x1a2   :  { %v775_v46 = vsub.f32 %v767_v10, %v771_v14  ;;  %v652_v48 = vadd.f32 %v651_v15, %v650_v60  ;;  %v739_v49 = vrot.slane %v738_v16, 1  ;;  %v9554_v61 = vld [vmem:[#allocation10 + $0x380] sm:$0xf]  ;;  %v9587_v9 = vor.u32 %v12084_v45, %v9586_v24 }
 0x1a3   :  { %v778_v52 = vsub.f32 %v770_v18, %v774_v20  ;;  %v665_v53 = vadd.f32 %v664_v21, %v663_v11  ;;  %v752_v54 = vrot.slane %v751_v23, 1  ;;  %v12076_v2 = vld [vmem:[#allocation10 + $0x39c] sm:$0xf0]  ;;  %v9843_v21 = vor.u32 %v12148_v19, %v9842_v51 }
 0x1a4   :  { %v779_v58 = vmax.f32 %v775_v46, 0.0  ;;  %v13390_v0 = vmul.f32 0.015625, %v652_v48  ;;  %v740_v57 = vadd.f32 %v739_v49, %v738_v16  ;;  %v9810_v60 = vld [vmem:[#allocation10 + $0x580] sm:$0xf]  ;;  %2619 = vmatpush.bf16.msrb.mxu2 %v9587_v9 }
 0x1a5   :  { %v782_v8 = vmax.f32 %v778_v52, 0.0  ;;  %v13392_v59 = vmul.f32 0.015625, %v665_v53  ;;  %v753_v4 = vadd.f32 %v752_v54, %v751_v23  ;;  %v12140_v10 = vld [vmem:[#allocation10 + $0x59c] sm:$0xf0]  ;;  %v9331_v23 = vor.u32 %v12020_v56, %v9330_v55  ;;  %2648 = vmatpush.bf16.msrb.mxu3 %v9843_v21 }
 0x1a6   :  { %v10098_v14 = vld [vmem:[#allocation10 + $0x7c0] sm:$0xf]  ;;  %v13394_v18 = vadd.f32 1e-05, %v779_v58  ;;  %v768_v11 = vmul.f32 0.015625, %v740_v57  ;;  %v772_v20 = vmul.f32 %v13390_v0, %v13390_v0  ;;  %v9555_v52 = vor.u32 %v12076_v2, %v9554_v61 }
 0x1a7   :  { %v12212_v15 = vld [vmem:[#allocation10 + $0x7dc] sm:$0xf0]  ;;  %v13398_v16 = vadd.f32 1e-05, %v782_v8  ;;  %v769_v48 = vmul.f32 0.015625, %v753_v4  ;;  %v773_v49 = vmul.f32 %v13392_v59, %v13392_v59  ;;  %2590 = vmatpush.bf16.msra.mxu1 %v9331_v23  ;;  %v9811_v19 = vor.u32 %v12140_v10, %v9810_v60 }
 0x1a8   :  { %v9298_v46 = vld [vmem:[#allocation10 + $0x180] sm:$0xf]  ;;  %12699 = vrsqrt.f32 %v13394_v18  ;;  %v776_v45 = vsub.f32 %v768_v11, %v772_v20  ;;  %v10099_v9 = vor.u32 %v12212_v15, %v10098_v14  ;;  %2620 = vmatpush.bf16.msrb.mxu2 %v9555_v52  ;;  %vm794_vm3 = vweird.f32 %v13394_v18 }
 0x1a9   :  { %v12012_v24 = vld [vmem:[#allocation10 + $0x19c] sm:$0xf0]  ;;  %12701 = vrsqrt.f32 %v13398_v16  ;;  %v777_v51 = vsub.f32 %v769_v48, %v773_v49  ;;  %2649 = vmatpush.bf16.msrb.mxu3 %v9811_v19  ;;  %vm824_vm9 = vweird.f32 %v13398_v16 }
 0x1aa   :  { %v9522_v53 = vld [vmem:[#allocation10 + $0x340] sm:$0xf]  ;;  %v780_v22 = vmax.f32 %v776_v45, 0.0  ;;  %v9299_v55 = vor.u32 %v12012_v24, %v9298_v46  ;;  %2677 = vmatpush.bf16.msra.mxu0 %v10099_v9 }
 0x1ab   :  { %v12068_v54 = vld [vmem:[#allocation10 + $0x35c] sm:$0xf0]  ;;  %v781_v1 = vmax.f32 %v777_v51, 0.0 }
 0x1ac   :  { %v10066_v58 = vld [vmem:[#allocation10 + $0x780] sm:$0xf]  ;;  %v9523_v11 = vor.u32 %v12068_v54, %v9522_v53  ;;  %v13404_v20 = vadd.f32 1e-05, %v780_v22  ;;  %2591 = vmatpush.bf16.msra.mxu1 %v9299_v55 }
 0x1ad   :  { %v9778_v57 = vld [vmem:[#allocation10 + $0x540] sm:$0xf]  ;;  %v13406_v49 = vadd.f32 1e-05, %v781_v1 }
 0x1ae   :  { %v12132_v8 = vld [vmem:[#allocation10 + $0x55c] sm:$0xf0]  ;;  %v13408_v23 = vpop.eup %12699  ;;  %12703 = vrsqrt.f32 %v13404_v20  ;;  %2621 = vmatpush.bf16.msrb.mxu2 %v9523_v11  ;;  %vm804_vm11 = vweird.f32 %v13404_v20 }
 0x1af   :  { %v12204_v4 = vld [vmem:[#allocation10 + $0x79c] sm:$0xf0]  ;;  %v9779_v21 = vor.u32 %v12132_v8, %v9778_v57  ;;  %v13411_v22 = vpop.eup %12701  ;;  %v789_v52 = vmul.f32 %v13408_v23, %v13394_v18  ;;  %12705 = vrsqrt.f32 %v13406_v49  ;;  %vm795_vm15 = vweird.f32 %v13408_v23 }
 0x1b0   :  { %v9266_v56 = vld [vmem:[#allocation10 + $0x140] sm:$0xf]  ;;  %v10067_v48 = vor.u32 %v12204_v4, %v10066_v58  ;;  %vm825_vm8 = vweird.f32 %v13411_v22  ;;  %vm814_vm1 = vweird.f32 %v13406_v49  ;;  %vm13464_vm6 = vmor %vm794_vm3, %vm795_vm15 }
 0x1b1   :  { %v9490_v61 = vld [vmem:[#allocation10 + $0x300] sm:$0xf]  ;;  %v9267_v14 = vor.u32 %v12004_v3, %v9266_v56  ;;  %v819_v3 = vmul.f32 %v13411_v22, %v13398_v16  ;;  %2650 = vmatpush.bf16.msrb.mxu3 %v9779_v21  ;;  %v790_v57 = vmul.f32 %v13408_v23, %v789_v52  ;;  %vm13437_vm13 = vmor %vm824_vm9, %vm825_vm8  ;;  %v9651_v16 = vor.u32 %v12100_v50, %v9650_v17 }
 0x1b2   :  { %v12060_v2 = vld [vmem:[#allocation10 + $0x31c] sm:$0xf0]  ;;  %2678 = vmatpush.bf16.msra.mxu0 %v10067_v48 }
 0x1b3   :  { %v9746_v60 = vld [vmem:[#allocation10 + $0x500] sm:$0xf]  ;;  %v9491_v1 = vor.u32 %v12060_v2, %v9490_v61  ;;  %2592 = vmatpush.bf16.msra.mxu1 %v9267_v14  ;;  %v820_v56 = vmul.f32 %v13411_v22, %v819_v3  ;;  %v791_v52 = vmul.f32 0.5, %v790_v57 }
 0x1b4   :  { %v12124_v10 = vld [vmem:[#allocation10 + $0x51c] sm:$0xf0] }
 0x1b5   :  { %v10034_v15 = vld [vmem:[#allocation10 + $0x740] sm:$0xf]  ;;  %v9747_v53 = vor.u32 %v12124_v10, %v9746_v60  ;;  %2622 = vmatpush.bf16.msrb.mxu2 %v9491_v1  ;;  %v13420_v60 = vpop.eup %12703  ;;  %v821_v10 = vmul.f32 0.5, %v820_v56 }
 0x1b6   :  { %v12196_v46 = vld [vmem:[#allocation10 + $0x75c] sm:$0xf0]  ;;  %v799_v3 = vmul.f32 %v13420_v60, %v13404_v20  ;;  %vm805_vm12 = vweird.f32 %v13420_v60 }
 0x1b7   :  { %v9234_v24 = vld [vmem:[#allocation10 + $0x100] sm:$0xf]  ;;  %v10035_v54 = vor.u32 %v12196_v46, %v10034_v15  ;;  %2651 = vmatpush.bf16.msrb.mxu3 %v9747_v53  ;;  %v822_v13 = vsub.f32 1.5, %v821_v10  ;;  %v792_v10 = vsub.f32 1.5, %v791_v52  ;;  %vm806_vm0 = vmor %vm804_vm11, %vm805_vm12 }
 0x1b8   :  { %v11996_v45 = vld [vmem:[#allocation10 + $0x11c] sm:$0xf0] }
 0x1b9   :  { %v9458_v58 = vld [vmem:[#allocation10 + $0x2c0] sm:$0xf]  ;;  %v9235_v8 = vor.u32 %v11996_v45, %v9234_v24  ;;  %2679 = vmatpush.bf16.msra.mxu0 %v10035_v54  ;;  %v13422_v45 = vpop.eup %12705 }
 0x1ba   :  { %v12052_v51 = vld [vmem:[#allocation10 + $0x2dc] sm:$0xf0]  ;;  %v809_v56 = vmul.f32 %v13422_v45, %v13406_v49  ;;  %vm815_vm14 = vweird.f32 %v13422_v45 }
 0x1bb   :  { %v9714_v19 = vld [vmem:[#allocation10 + $0x4c0] sm:$0xf]  ;;  %v9459_v2 = vor.u32 %v12052_v51, %v9458_v58  ;;  %2593 = vmatpush.bf16.msra.mxu1 %v9235_v8  ;;  %vm13458_vm4 = vmor %vm814_vm1, %vm815_vm14 }
 0x1bc   :  { %v12116_v4 = vld [vmem:[#allocation10 + $0x4dc] sm:$0xf0]  ;;  %v810_v57 = vmul.f32 %v13422_v45, %v809_v56 }
 0x1bd   :  { %v10002_v9 = vld [vmem:[#allocation10 + $0x700] sm:$0xf]  ;;  %v9715_v15 = vor.u32 %v12116_v4, %v9714_v19  ;;  %v800_v19 = vmul.f32 %v13420_v60, %v799_v3  ;;  %2623 = vmatpush.bf16.msrb.mxu2 %v9459_v2  ;;  %v823_v2 = vmul.f32 %v13411_v22, %v822_v13 }
 0x1be   :  { %v12188_v55 = vld [vmem:[#allocation10 + $0x71c] sm:$0xf0] }
 0x1bf   :  { %v9202_v11 = vld [vmem:[#allocation10 + $0xc0] sm:$0xf]  ;;  %v10003_v46 = vor.u32 %v12188_v55, %v10002_v9  ;;  %2652 = vmatpush.bf16.msrb.mxu3 %v9715_v15  ;;  %v801_v5 = vmul.f32 0.5, %v800_v19 }
 0x1c0   :  { %v11988_v61 = vld [vmem:[#allocation10 + $0xdc] sm:$0xf0] }
 0x1c1   :  { %v9426_v21 = vld [vmem:[#allocation10 + $0x280] sm:$0xf]  ;;  %v9203_v1 = vor.u32 %v11988_v61, %v9202_v11  ;;  %2680 = vmatpush.bf16.msra.mxu0 %v10003_v46  ;;  %v802_v46 = vsub.f32 1.5, %v801_v5 }
 0x1c2   :  { %v12044_v48 = vld [vmem:[#allocation10 + $0x29c] sm:$0xf0] }
 0x1c3   :  { %v9682_v14 = vld [vmem:[#allocation10 + $0x480] sm:$0xf]  ;;  %v9427_v4 = vor.u32 %v12044_v48, %v9426_v21  ;;  %2594 = vmatpush.bf16.msra.mxu1 %v9203_v1  ;;  %v811_v21 = vmul.f32 0.5, %v810_v57  ;;  %v803_v56 = vmul.f32 %v13420_v60, %v802_v46  ;;  %v827_v57 = vsel %vm13437_vm13, %v13411_v22, %v823_v2  ;;  %v783_v2 = vld [vmem:[#allocation7] sm:$0xf] }
 0x1c4   :  { %v12108_v24 = vld [vmem:[#allocation10 + $0x49c] sm:$0xf0]  ;;  %v12080_v46 = vld [vmem:[#allocation10 + $0x3c4] sm:$0xf] }
 0x1c5   :  { %v9970_v58 = vld [vmem:[#allocation10 + $0x6c0] sm:$0xf]  ;;  %v9683_v55 = vor.u32 %v12108_v24, %v9682_v14  ;;  %2624 = vmatpush.bf16.msrb.mxu2 %v9427_v4  ;;  %v812_v13 = vsub.f32 1.5, %v811_v21  ;;  %v12008_v22 = vld [vmem:[#allocation10 + $0x184] sm:$0xf] }
 0x1c6   :  { %v12180_v51 = vld [vmem:[#allocation10 + $0x6dc] sm:$0xf0] }
 0x1c7   :  { %v9170_v53 = vld [vmem:[#allocation10 + $0x80] sm:$0xf]  ;;  %v9971_v8 = vor.u32 %v12180_v51, %v9970_v58  ;;  %2653 = vmatpush.bf16.msrb.mxu3 %v9683_v55  ;;  %v793_v51 = vmul.f32 %v13408_v23, %v792_v10  ;;  %v813_v50 = vmul.f32 %v13422_v45, %v812_v13 }
 0x1c8   :  { %v11980_v54 = vld [vmem:[#allocation10 + $0x9c] sm:$0xf0] }
 0x1c9   :  { %v9938_v9 = vld [vmem:[#allocation10 + $0x680] sm:$0xf]  ;;  %v9171_v6 = vor.u32 %v11980_v54, %v9170_v53  ;;  %2681 = vmatpush.bf16.msra.mxu0 %v9971_v8  ;;  %v817_v18 = vsel %vm13458_vm4, %v13422_v45, %v813_v50  ;;  %v797_v10 = vsel %vm13464_vm6, %v13408_v23, %v793_v51  ;;  %v12144_v45 = vld [vmem:[#allocation10 + $0x5c4] sm:$0xf] }
 0x1ca   :  { %v9394_v11 = vld [vmem:[#allocation10 + $0x240] sm:$0xf]  ;;  %v833_v21 = vrot.slane %v817_v18, 6  ;;  %v12208_v50 = vld [vmem:[#allocation10 + $0x7c4] sm:$0xf] }
 0x1cb   :  { %v12036_v61 = vld [vmem:[#allocation10 + $0x25c] sm:$0xf0]  ;;  %2595 = vmatpush.bf16.msra.mxu1 %v9171_v6  ;;  %2654 = vmatpush.bf16.msrb.mxu3 %v9651_v16  ;;  %v9844_v16 = vld [vmem:[#allocation10 + $0x5e0] sm:$0xf0] }
 0x1cc   :  { %v12172_v3 = vld [vmem:[#allocation10 + $0x69c] sm:$0xf0]  ;;  %v9395_v14 = vor.u32 %v12036_v61, %v9394_v11 }
 0x1cd   :  { %v9138_v48 = vld [vmem:[#allocation10 + $0x40] sm:$0xf]  ;;  %v9939_v5 = vor.u32 %v12172_v3, %v9938_v9  ;;  %v807_v9 = vsel %vm806_vm0, %v13420_v60, %v803_v56  ;;  %v834_v3 = vrot.slane %v827_v57, 5  ;;  %v12072_v56 = vld [vmem:[#allocation10 + $0x384] sm:$0xf] }
 0x1ce   :  { %v11972_v15 = vld [vmem:[#allocation10 + $0x5c] sm:$0xf0]  ;;  %2625 = vmatpush.bf16.msrb.mxu2 %v9395_v14  ;;  %v832_v55 = vrot.slane %v807_v9, 7  ;;  %v9588_v14 = vld [vmem:[#allocation10 + $0x3e0] sm:$0xf0] }
 0x1cf   :  { %v9906_v24 = vld [vmem:[#allocation10 + $0x640] sm:$0xf]  ;;  %v9139_v53 = vor.u32 %v11972_v15, %v9138_v48  ;;  %2682 = vmatpush.bf16.msra.mxu0 %v9939_v5  ;;  %v838_v52 = vsel %vm837_vm2, %v833_v21, %v834_v3  ;;  %v9591_v13 = vor.u32 %v12080_v46, %v9588_v14  ;;  %v12016_v5 = vld [vmem:[#allocation10 + $0x1c4] sm:$0xf] }
 0x1d0   :  { %v9362_v1 = vld [vmem:[#allocation10 + $0x200] sm:$0xf]  ;;  %v836_v15 = vsel %vm835_vm10, %v797_v10, %v832_v55  ;;  %v9812_v57 = vld [vmem:[#allocation10 + $0x5a0] sm:$0xf0] }
 0x1d1   :  { %v12028_v58 = vld [vmem:[#allocation10 + $0x21c] sm:$0xf0]  ;;  %2596 = vmatpush.bf16.msra.mxu1 %v9139_v53  ;;  %v840_v23 = vsel %vm839_vm5, %v836_v15, %v838_v52  ;;  %v9556_v53 = vld [vmem:[#allocation10 + $0x3a0] sm:$0xf0]  ;;  %v843_v15 = vld [vmem:[#allocation9] sm:$0xf] }
 0x1d2   :  { %v12164_v54 = vld [vmem:[#allocation10 + $0x65c] sm:$0xf0]  ;;  %v9363_v20 = vor.u32 %v12028_v58, %v9362_v1  ;;  %v9332_v1 = vld [vmem:[#allocation10 + $0x1e0] sm:$0xf0]  ;;  %v9847_v58 = vor.u32 %v12144_v45, %v9844_v16 }
 0x1d3   :  { %v9618_v19 = vld [vmem:[#allocation10 + $0x400] sm:$0xf]  ;;  %v9907_v60 = vor.u32 %v12164_v54, %v9906_v24  ;;  %v9335_v51 = vor.u32 %v12016_v5, %v9332_v1  ;;  %v12136_v54 = vld [vmem:[#allocation10 + $0x584] sm:$0xf] }
 0x1d4   :  { %v12092_v4 = vld [vmem:[#allocation10 + $0x41c] sm:$0xf0]  ;;  %2626 = vmatpush.bf16.msrb.mxu2 %v9363_v20  ;;  %v9300_v20 = vld [vmem:[#allocation10 + $0x1a0] sm:$0xf0] }
 0x1d5   :  { %v9106_v17 = vld [vmem:[#allocation10] sm:$0xf]  ;;  %v9619_v8 = vor.u32 %v12092_v4, %v9618_v19  ;;  %2683 = vmatpush.bf16.msra.mxu0 %v9907_v60  ;;  %v842_v19 = vmul.f32 %v840_v23, %v783_v2  ;;  %v9559_v4 = vor.u32 %v12072_v56, %v9556_v53 }
 0x1d6   :  { %v11964_v6 = vld [vmem:[#allocation10 + $0x1c] sm:$0xf0] }
 0x1d7   :  { %v9874_v11 = vld [vmem:[#allocation10 + $0x600] sm:$0xf]  ;;  %v9107_v48 = vor.u32 %v11964_v6, %v9106_v17  ;;  %2655 = vmatpush.bf16.msrb.mxu3 %v9619_v8  ;;  %v10100_v17 = vld [vmem:[#allocation10 + $0x7e0] sm:$0xf0]  ;;  %v9815_v6 = vor.u32 %v12136_v54, %v9812_v57  ;;  %v13477_v49 = vperm.slane %v842_v19, 0  ;;  %v13479_v55 = vperm.slane %v842_v19, 1 }
 0x1d8   :  { %v12156_v61 = vld [vmem:[#allocation10 + $0x61c] sm:$0xf0]  ;;  %2735 = vmatpush.bf16.msra.mxu2 %v9591_v13  ;;  %v10103_v9 = vor.u32 %v12208_v50, %v10100_v17  ;;  %v13481_v18 = vperm.slane %v842_v19, 2  ;;  %v13483_v60 = vperm.slane %v842_v19, 3  ;;  %v9303_v8 = vor.u32 %v12008_v22, %v9300_v20 }
 0x1d9   :  { %v9875_v24 = vor.u32 %v12156_v61, %v9874_v11  ;;  %2597 = vmatpush.bf16.msra.mxu1 %v9107_v48  ;;  %v854_v11 = vmul.f32 %v13479_v55, %v13390_v0  ;;  %v853_v3 = vmul.f32 %v13477_v49, %v13382_v63  ;;  %v870_v13 = vmul.f32 %v13479_v55, %v13226_v27 }
 0x1da   :  { %v855_v61 = vmul.f32 %v13481_v18, %v13392_v59  ;;  %v856_v10 = vmul.f32 %v13483_v60, %v13384_v62  ;;  %v869_v62 = vmul.f32 %v13477_v49, %v13222_v25  ;;  %v874_v16 = vmul.f32 %v13479_v55, %v13234_v31 }
 0x1db   :  { %2764 = vmatpush.bf16.msra.mxu3 %v9847_v58  ;;  %2684 = vmatpush.bf16.msra.mxu0 %v9875_v24  ;;  %v861_v2 = vrot.slane %v854_v11, 7  ;;  %v873_v24 = vmul.f32 %v13477_v49, %v13230_v29  ;;  %v871_v25 = vmul.f32 %v13481_v18, %v13228_v28  ;;  %v875_v23 = vmul.f32 %v13481_v18, %v13236_v32 }
 0x1dc   :  { %2736 = vmatpush.bf16.msra.mxu2 %v9559_v4  ;;  %v862_v21 = vrot.slane %v855_v61, 6  ;;  %v863_v48 = vrot.slane %v856_v10, 5  ;;  %v872_v27 = vmul.f32 %v13483_v60, %v13224_v26  ;;  %v876_v31 = vmul.f32 %v13483_v60, %v13232_v30 }
 0x1dd   :  { %2706 = vmatpush.bf16.msrb.mxu1 %v9335_v51  ;;  %v864_v46 = vsel %vm835_vm10, %v853_v3, %v861_v2  ;;  %v877_v28 = vmul.f32 %v13477_v49, %v13238_v33  ;;  %v881_v26 = vmul.f32 %v13477_v49, %v13246_v37  ;;  %v878_v30 = vmul.f32 %v13479_v55, %v13242_v35 }
 0x1de   :  { %v865_v0 = vsel %vm837_vm2, %v862_v21, %v863_v48  ;;  %v882_v19 = vmul.f32 %v13479_v55, %v13250_v39  ;;  %v879_v48 = vmul.f32 %v13481_v18, %v13244_v36 }
 0x1df   :  { %2765 = vmatpush.bf16.msra.mxu3 %v9815_v6  ;;  %2793 = vmatpush.bf16.msrb.mxu0 %v10103_v9  ;;  %v866_v59 = vsel %vm839_vm5, %v864_v46, %v865_v0 }
 0x1e0   :  { %v868_v14 = vsub.f32 %v843_v15, %v866_v59 }
 0x1e1   :  { %2707 = vmatpush.bf16.msrb.mxu1 %v9303_v8 }
 0x1e2   :  { %v13498_v45 = vperm.slane %v868_v14, 0  ;;  %v13500_v52 = vperm.slane %v868_v14, 1  ;;  %v13502_v63 = vperm.slane %v868_v14, 2  ;;  %v13522_v51 = vperm.slane %v868_v14, 3 }
 0x1e4   :  { %v910_v5 = vadd.f32 %v13498_v45, %v869_v62  ;;  %v914_v1 = vadd.f32 %v13498_v45, %v873_v24  ;;  %v911_v58 = vadd.f32 %v13500_v52, %v870_v13  ;;  %v915_v29 = vadd.f32 %v13500_v52, %v874_v16  ;;  %v12064_v13 = vld [vmem:[#allocation10 + $0x344] sm:$0xf] }
 0x1e5   :  { %v912_v56 = vadd.f32 %v13502_v63, %v871_v25  ;;  %v916_v53 = vadd.f32 %v13502_v63, %v875_v23  ;;  %v913_v37 = vadd.f32 %v13522_v51, %v872_v27  ;;  %v917_v20 = vadd.f32 %v13522_v51, %v876_v31  ;;  %v9524_v16 = vld [vmem:[#allocation10 + $0x360] sm:$0xf0] }
 0x1e6   :  { %vm942_vm7 = vcmp.gt.f32.partialorder %v910_v5, 0.0  ;;  %vm946_vm8 = vcmp.gt.f32.partialorder %v914_v1, 0.0  ;;  %v974_v32 = vmul.f32 0.2, %v910_v5  ;;  %v978_v54 = vmul.f32 0.2, %v914_v1 }
 0x1e7   :  { %vm943_vm9 = vcmp.gt.f32.partialorder %v911_v58, 0.0  ;;  %vm947_vm11 = vcmp.gt.f32.partialorder %v915_v29, 0.0  ;;  %v975_v50 = vmul.f32 0.2, %v911_v58  ;;  %v979_v33 = vmul.f32 0.2, %v915_v29 }
 0x1e8   :  { %v1006_v4 = vsel %vm942_vm7, %v910_v5, %v974_v32  ;;  %v1010_v57 = vsel %vm946_vm8, %v914_v1, %v978_v54  ;;  %vm944_vm12 = vcmp.gt.f32.partialorder %v912_v56, 0.0  ;;  %vm948_vm13 = vcmp.gt.f32.partialorder %v916_v53, 0.0  ;;  %v12128_v23 = vld [vmem:[#allocation10 + $0x544] sm:$0xf] }
 0x1e9   :  { %v13534_v17 = vpack.c.bf16 %v1010_v57, %v1006_v4  ;;  %v1007_v6 = vsel %vm943_vm9, %v911_v58, %v975_v50  ;;  %v976_v9 = vmul.f32 0.2, %v912_v56  ;;  %v980_v22 = vmul.f32 0.2, %v916_v53  ;;  %v9780_v58 = vld [vmem:[#allocation10 + $0x560] sm:$0xf0] }
 0x1ea   :  { %v1011_v35 = vsel %vm947_vm11, %v915_v29, %v979_v33  ;;  %v918_v39 = vadd.f32 %v13498_v45, %v877_v28  ;;  %v922_v8 = vadd.f32 %v13498_v45, %v881_v26  ;;  %vm945_vm14 = vcmp.gt.f32.partialorder %v913_v37, 0.0  ;;  %v12200_v29 = vld [vmem:[#allocation10 + $0x784] sm:$0xf] }
 0x1eb   :  { %2598 = vmatmul.bf16.vlgmr.msra.gmra.mxu1 %v13534_v17  ;;  %v13541_v11 = vpack.c.bf16 %v1011_v35, %v1007_v6  ;;  %v1008_v61 = vsel %vm944_vm12, %v912_v56, %v976_v9  ;;  %v1012_v10 = vsel %vm948_vm13, %v916_v53, %v980_v22  ;;  %vm949_vm15 = vcmp.gt.f32.partialorder %v917_v20, 0.0  ;;  %v10068_v27 = vld [vmem:[#allocation10 + $0x7a0] sm:$0xf0] }
 0x1ec   :  { %v13543_v3 = vpack.c.bf16 %v1012_v10, %v1008_v61  ;;  %v977_v2 = vmul.f32 0.2, %v913_v37  ;;  %v981_v21 = vmul.f32 0.2, %v917_v20  ;;  %v919_v0 = vadd.f32 %v13500_v52, %v878_v30  ;;  %v12000_v31 = vld [vmem:[#allocation10 + $0x144] sm:$0xf] }
 0x1ed   :  { %2627 = vmatmul.bf16.vlgmr.msrb.gmra.mxu2 %v13541_v11  ;;  %v923_v59 = vadd.f32 %v13500_v52, %v882_v19  ;;  %v883_v62 = vmul.f32 %v13481_v18, %v13252_v40  ;;  %v880_v24 = vmul.f32 %v13483_v60, %v13240_v34  ;;  %v982_v5 = vmul.f32 0.2, %v918_v39  ;;  %v9268_v56 = vld [vmem:[#allocation10 + $0x160] sm:$0xf0] }
 0x1ee   :  { %2656 = vmatmul.bf16.vlgmr.msrb.gmra.mxu3 %v13543_v3  ;;  %v1009_v15 = vsel %vm945_vm14, %v913_v37, %v977_v2  ;;  %v1013_v46 = vsel %vm949_vm15, %v917_v20, %v981_v21  ;;  %v986_v36 = vmul.f32 0.2, %v922_v8  ;;  %v920_v1 = vadd.f32 %v13502_v63, %v879_v48  ;;  %v12056_v53 = vld [vmem:[#allocation10 + $0x304] sm:$0xf] }
 0x1ef   :  { %v13551_v14 = vpack.c.bf16 %v1013_v46, %v1009_v15  ;;  %v884_v25 = vmul.f32 %v13483_v60, %v13248_v38  ;;  %vm950_vm0 = vcmp.gt.f32.partialorder %v918_v39, 0.0  ;;  %vm954_vm1 = vcmp.gt.f32.partialorder %v922_v8, 0.0  ;;  %v9492_v28 = vld [vmem:[#allocation10 + $0x320] sm:$0xf0] }
 0x1f0   :  { %v983_v40 = vmul.f32 0.2, %v919_v0  ;;  %v924_v34 = vadd.f32 %v13502_v63, %v883_v62  ;;  %vm951_vm3 = vcmp.gt.f32.partialorder %v919_v0, 0.0  ;;  %v987_v32 = vmul.f32 0.2, %v923_v59 }
 0x1f1   :  { %2685 = vmatmul.bf16.vlgmr.msra.gmra.mxu0 %v13551_v14  ;;  %v9527_v54 = vor.u32 %v12064_v13, %v9524_v16  ;;  %v12120_v26 = vld [vmem:[#allocation10 + $0x504] sm:$0xf]  ;;  %vm955_vm4 = vcmp.gt.f32.partialorder %v923_v59, 0.0  ;;  %v921_v38 = vadd.f32 %v13522_v51, %v880_v24  ;;  %v925_v30 = vadd.f32 %v13522_v51, %v884_v25 }
 0x1f2   :  { %v9748_v19 = vld [vmem:[#allocation10 + $0x520] sm:$0xf0]  ;;  %v885_v57 = vmul.f32 %v13477_v49, %v13254_v41  ;;  %v1014_v50 = vsel %vm950_vm0, %v918_v39, %v982_v5  ;;  %v1018_v33 = vsel %vm954_vm1, %v922_v8, %v986_v36  ;;  %vm952_vm6 = vcmp.gt.f32.partialorder %v920_v1, 0.0 }
 0x1f3   :  { %v12192_v4 = vld [vmem:[#allocation10 + $0x744] sm:$0xf]  ;;  %v984_v6 = vmul.f32 0.2, %v920_v1  ;;  %2737 = vmatpush.bf16.msra.mxu2 %v9527_v54  ;;  %v1015_v22 = vsel %vm951_vm3, %v919_v0, %v983_v40  ;;  %v988_v37 = vmul.f32 0.2, %v924_v34  ;;  %v9783_v35 = vor.u32 %v12128_v23, %v9780_v58 }
 0x1f4   :  { %v10036_v9 = vld [vmem:[#allocation10 + $0x760] sm:$0xf0]  ;;  %v10071_v20 = vor.u32 %v12200_v29, %v10068_v27  ;;  %v1019_v2 = vsel %vm955_vm4, %v923_v59, %v987_v32  ;;  %vm956_vm7 = vcmp.gt.f32.partialorder %v924_v34, 0.0  ;;  %v9271_v21 = vor.u32 %v12000_v31, %v9268_v56 }
 0x1f5   :  { %v11992_v61 = vld [vmem:[#allocation10 + $0x104] sm:$0xf]  ;;  %v9495_v41 = vor.u32 %v12056_v53, %v9492_v28  ;;  %v985_v48 = vmul.f32 0.2, %v921_v38  ;;  %v989_v39 = vmul.f32 0.2, %v925_v30  ;;  %2766 = vmatpush.bf16.msra.mxu3 %v9783_v35  ;;  %v9751_v8 = vor.u32 %v12120_v26, %v9748_v19 }
 0x1f6   :  { %v9236_v10 = vld [vmem:[#allocation10 + $0x120] sm:$0xf0]  ;;  %2794 = vmatpush.bf16.msrb.mxu0 %v10071_v20  ;;  %v10039_v15 = vor.u32 %v12192_v4, %v10036_v9  ;;  %v13570_v46 = vpack.c.bf16 %v1018_v33, %v1014_v50  ;;  %vm953_vm8 = vcmp.gt.f32.partialorder %v921_v38, 0.0  ;;  %vm957_vm9 = vcmp.gt.f32.partialorder %v925_v30, 0.0  ;;  %2708 = vmatpush.bf16.msrb.mxu1 %v9271_v21 }
 0x1f7   :  { %2738 = vmatpush.bf16.msra.mxu2 %v9495_v41  ;;  %v9239_v0 = vor.u32 %v11992_v61, %v9236_v10  ;;  %v1016_v62 = vsel %vm952_vm6, %v920_v1, %v984_v6  ;;  %v1020_v59 = vsel %vm956_vm7, %v924_v34, %v988_v37  ;;  %v889_v24 = vmul.f32 %v13477_v49, %v13266_v47  ;;  %v9460_v58 = vld [vmem:[#allocation10 + $0x2e0] sm:$0xf0]  ;;  %v16172_v6 = vld [vmem:[#allocation24_spill] sm:$0xff] }
 0x1f8   :  { %v886_v13 = vmul.f32 %v13479_v55, %v13258_v43  ;;  %v13579_v16 = vpack.c.bf16 %v1019_v2, %v1015_v22  ;;  %v13582_v5 = vadd.f32 %v13498_v45, %v885_v57  ;;  %v890_v36 = vmul.f32 %v13479_v55, %v13304_v7  ;;  %v12048_v43 = vld [vmem:[#allocation10 + $0x2c4] sm:$0xf] }
 0x1f9   :  { %v887_v1 = vmul.f32 %v13481_v18, %v13260_v44  ;;  %v1017_v25 = vsel %vm953_vm8, %v921_v38, %v985_v48  ;;  %v1021_v23 = vsel %vm957_vm9, %v925_v30, %v989_v39  ;;  %2767 = vmatpush.bf16.msra.mxu3 %v9751_v8  ;;  %v13589_v47 = vadd.f32 %v13498_v45, %v889_v24  ;;  %v12112_v7 = vld [vmem:[#allocation10 + $0x4c4] sm:$0xf] }
 0x1fa   :  { %2795 = vmatpush.bf16.msrb.mxu0 %v10039_v15  ;;  %v13591_v29 = vpack.c.bf16 %v1020_v59, %v1016_v62  ;;  %2709 = vmatpush.bf16.msrb.mxu1 %v9239_v0  ;;  %v927_v27 = vadd.f32 %v13500_v52, %v886_v13  ;;  %v931_v40 = vadd.f32 %v13500_v52, %v890_v36  ;;  %v9716_v34 = vld [vmem:[#allocation10 + $0x4e0] sm:$0xf0]  ;;  %vm958_vm11 = vcmp.gt.f32.partialorder %v13582_v5, 0.0 }
 0x1fb   :  { %2603 = vmatmul.bf16.gmra.mxu1 %v13570_v46  ;;  %v12184_v31 = vld [vmem:[#allocation10 + $0x704] sm:$0xf]  ;;  %v891_v56 = vmul.f32 %v13481_v18, %v13308_v12  ;;  %v928_v53 = vadd.f32 %v13502_v63, %v887_v1  ;;  %v13600_v38 = vpack.c.bf16 %v1021_v23, %v1017_v25  ;;  %v990_v30 = vmul.f32 0.2, %v13582_v5  ;;  %v16173_v25 = vld [vmem:[#allocation28_spill] sm:$0xff] }
 0x1fc   :  { %v10004_v44 = vld [vmem:[#allocation10 + $0x720] sm:$0xf0]  ;;  %v888_v19 = vmul.f32 %v13483_v60, %v13256_v42  ;;  %vm962_vm12 = vcmp.gt.f32.partialorder %v13589_v47, 0.0  ;;  %v994_v50 = vmul.f32 0.2, %v13589_v47  ;;  %v892_v9 = vmul.f32 %v13483_v60, %v16172_v6 }
 0x1fd   :  { %2632 = vmatmul.bf16.gmra.mxu2 %v13579_v16  ;;  %v11984_v28 = vld [vmem:[#allocation10 + $0xc4] sm:$0xf]  ;;  %v932_v33 = vadd.f32 %v13502_v63, %v891_v56  ;;  %vm959_vm13 = vcmp.gt.f32.partialorder %v927_v27, 0.0  ;;  %vm963_vm14 = vcmp.gt.f32.partialorder %v931_v40, 0.0  ;;  %v991_v37 = vmul.f32 0.2, %v927_v27 }
 0x1fe   :  { %v9204_v32 = vld [vmem:[#allocation10 + $0xe0] sm:$0xf0]  ;;  %2661 = vmatmul.bf16.gmra.mxu3 %v13591_v29  ;;  %v9463_v35 = vor.u32 %v12048_v43, %v9460_v58  ;;  %v995_v42 = vmul.f32 0.2, %v931_v40  ;;  %vm960_vm15 = vcmp.gt.f32.partialorder %v928_v53, 0.0  ;;  %v9719_v61 = vor.u32 %v12112_v7, %v9716_v34  ;;  %v16174_v43 = vld [vmem:[#allocation32_spill] sm:$0xff] }
 0x1ff   :  { %v12040_v54 = vld [vmem:[#allocation10 + $0x284] sm:$0xf]  ;;  %v10007_v10 = vor.u32 %v12184_v31, %v10004_v44  ;;  %v992_v21 = vmul.f32 0.2, %v928_v53  ;;  %v929_v41 = vadd.f32 %v13522_v51, %v888_v19  ;;  %v9207_v48 = vor.u32 %v11984_v28, %v9204_v32 }
 0x200   :  { %v9428_v26 = vld [vmem:[#allocation10 + $0x2a0] sm:$0xf0]  ;;  %2739 = vmatpush.bf16.msra.mxu2 %v9463_v35  ;;  %v996_v8 = vmul.f32 0.2, %v932_v33  ;;  %v933_v15 = vadd.f32 %v13522_v51, %v892_v9  ;;  %2768 = vmatpush.bf16.msra.mxu3 %v9719_v61  ;;  %vm964_vm0 = vcmp.gt.f32.partialorder %v932_v33, 0.0  ;;  %v895_v23 = vmul.f32 %v13481_v18, %v16173_v25 }
 0x201   :  { %v12104_v4 = vld [vmem:[#allocation10 + $0x484] sm:$0xf]  ;;  %2690 = vmatmul.bf16.gmra.mxu0 %v13600_v38  ;;  %v9431_v39 = vor.u32 %v12040_v54, %v9428_v26  ;;  %2710 = vmatpush.bf16.msrb.mxu1 %v9207_v48  ;;  %v899_v58 = vmul.f32 %v13481_v18, %v16174_v43  ;;  %v1022_v7 = vsel %vm958_vm11, %v13582_v5, %v990_v30  ;;  %v993_v54 = vmul.f32 0.2, %v929_v41 }
 0x202   :  { %v9684_v57 = vld [vmem:[#allocation10 + $0x4a0] sm:$0xf0]  ;;  %2796 = vmatpush.bf16.msrb.mxu0 %v10007_v10  ;;  %v1026_v34 = vsel %vm962_vm12, %v13589_v47, %v994_v50  ;;  %v1023_v31 = vsel %vm959_vm13, %v927_v27, %v991_v37  ;;  %v1027_v44 = vsel %vm963_vm14, %v931_v40, %v995_v42  ;;  %v1024_v56 = vsel %vm960_vm15, %v928_v53, %v992_v21 }
 0x203   :  { %v12176_v12 = vld [vmem:[#allocation10 + $0x6c4] sm:$0xf]  ;;  %v9687_v0 = vor.u32 %v12104_v4, %v9684_v57  ;;  %v1028_v32 = vsel %vm964_vm0, %v932_v33, %v996_v8  ;;  %v997_v26 = vmul.f32 0.2, %v933_v15  ;;  %v13628_v5 = vadd.f32 %v13502_v63, %v895_v23 }
 0x204   :  { %v9972_v22 = vld [vmem:[#allocation10 + $0x6e0] sm:$0xf0]  ;;  %2740 = vmatpush.bf16.msra.mxu2 %v9431_v39  ;;  %v13630_v30 = vpack.c.bf16 %v1026_v34, %v1022_v7  ;;  %vm961_vm1 = vcmp.gt.f32.partialorder %v929_v41, 0.0  ;;  %vm965_vm3 = vcmp.gt.f32.partialorder %v933_v15, 0.0  ;;  %v13633_v40 = vadd.f32 %v13502_v63, %v899_v58  ;;  %v16178_v63 = vld [vmem:[#allocation31_spill] sm:$0xff] }
 0x205   :  { %v11976_v20 = vld [vmem:[#allocation10 + $0x84] sm:$0xf]  ;;  %v9975_v62 = vor.u32 %v12176_v12, %v9972_v22  ;;  %2769 = vmatpush.bf16.msra.mxu3 %v9687_v0  ;;  %v13635_v53 = vpack.c.bf16 %v1027_v44, %v1023_v31  ;;  %v13642_v9 = vpack.c.bf16 %v1028_v32, %v1024_v56  ;;  %v16177_v22 = vld [vmem:[#allocation27_spill] sm:$0xff]  ;;  %v898_v35 = vmul.f32 %v13479_v55, %v16178_v63  ;;  %v16179_v31 = vld [vmem:[#allocation26_spill] sm:$0xff] }
 0x206   :  { %v9172_v2 = vld [vmem:[#allocation10 + $0xa0] sm:$0xf0]  ;;  %v894_v37 = vmul.f32 %v13479_v55, %v16177_v22  ;;  %v1025_v10 = vsel %vm961_vm1, %v929_v41, %v993_v54  ;;  %v896_v44 = vmul.f32 %v13483_v60, %v16179_v31  ;;  %v9594_v56 = vld [vmem:[#allocation10 + $0x3c8] sm:$0xf]  ;;  %vm968_vm9 = vcmp.gt.f32.partialorder %v13628_v5, 0.0 }
 0x207   :  { %v12032_v59 = vld [vmem:[#allocation10 + $0x244] sm:$0xf]  ;;  %v9175_v13 = vor.u32 %v11976_v20, %v9172_v2  ;;  %2797 = vmatpush.bf16.msrb.mxu0 %v9975_v62  ;;  %v13656_v55 = vadd.f32 %v13500_v52, %v898_v35  ;;  %v9850_v32 = vld [vmem:[#allocation10 + $0x5c8] sm:$0xf]  ;;  %vm972_vm11 = vcmp.gt.f32.partialorder %v13633_v40, 0.0 }
 0x208   :  { %v9396_v24 = vld [vmem:[#allocation10 + $0x260] sm:$0xf0]  ;;  %v13653_v8 = vadd.f32 %v13500_v52, %v894_v37  ;;  %v16180_v54 = vld [vmem:[#allocation30_spill] sm:$0xff] }
 0x209   :  { %v12096_v36 = vld [vmem:[#allocation10 + $0x444] sm:$0xf]  ;;  %v9399_v28 = vor.u32 %v12032_v59, %v9396_v24  ;;  %2711 = vmatpush.bf16.msrb.mxu1 %v9175_v13  ;;  %v13660_v13 = vmul.f32 0.2, %v13628_v5  ;;  %v1003_v34 = vmul.f32 0.2, %v13656_v55 }
 0x20a   :  { %v9652_v1 = vld [vmem:[#allocation10 + $0x460] sm:$0xf0]  ;;  %v999_v7 = vmul.f32 0.2, %v13653_v8  ;;  %v9818_v22 = vld [vmem:[#allocation10 + $0x588] sm:$0xf] }
 0x20b   :  { %v9655_v18 = vor.u32 %v12096_v36, %v9652_v1  ;;  %v12168_v47 = vld [vmem:[#allocation10 + $0x684] sm:$0xf]  ;;  %2608 = vmatmul.bf16.gmra.mxu1 %v13630_v30  ;;  %2741 = vmatpush.bf16.msra.mxu2 %v9399_v28  ;;  %v12085_v28 = vld [vmem:[#allocation10 + $0x3e4] sm:$0xf0]  ;;  %vm967_vm7 = vcmp.gt.f32.partialorder %v13653_v8, 0.0  ;;  %vm971_vm8 = vcmp.gt.f32.partialorder %v13656_v55, 0.0 }
 0x20c   :  { %v9940_v27 = vld [vmem:[#allocation10 + $0x6a0] sm:$0xf0]  ;;  %v12005_v31 = vld [vmem:[#allocation10 + $0x164] sm:$0xf0] }
 0x20d   :  { %v16175_v19 = vld [vmem:[#allocation25_spill] sm:$0xff]  ;;  %2770 = vmatpush.bf16.msra.mxu3 %v9655_v18  ;;  %v9943_v0 = vor.u32 %v12168_v47, %v9940_v27  ;;  %2637 = vmatmul.bf16.gmra.mxu2 %v13635_v53  ;;  %v9595_v47 = vor.u32 %v12085_v28, %v9594_v56  ;;  %v12149_v27 = vld [vmem:[#allocation10 + $0x5e4] sm:$0xf0] }
 0x20e   :  { %v893_v4 = vmul.f32 %v13477_v49, %v16175_v19  ;;  %v16176_v57 = vld [vmem:[#allocation29_spill] sm:$0xff]  ;;  %2666 = vmatmul.bf16.gmra.mxu3 %v13642_v9  ;;  %v9338_v19 = vld [vmem:[#allocation10 + $0x1c8] sm:$0xf] }
 0x20f   :  { %v897_v12 = vmul.f32 %v13477_v49, %v16176_v57  ;;  %v11968_v50 = vld [vmem:[#allocation10 + $0x44] sm:$0xf]  ;;  %v1029_v49 = vsel %vm965_vm3, %v933_v15, %v997_v26  ;;  %2798 = vmatpush.bf16.msrb.mxu0 %v9943_v0  ;;  %v900_v26 = vmul.f32 %v13483_v60, %v16180_v54  ;;  %v937_v57 = vadd.f32 %v13522_v51, %v896_v44  ;;  %v9498_v44 = vld [vmem:[#allocation10 + $0x308] sm:$0xf] }
 0x210   :  { %v9140_v33 = vld [vmem:[#allocation10 + $0x60] sm:$0xf0]  ;;  %v934_v2 = vadd.f32 %v13498_v45, %v893_v4  ;;  %v13666_v36 = vpack.c.bf16 %v1029_v49, %v1025_v10  ;;  %v12021_v4 = vld [vmem:[#allocation10 + $0x1e4] sm:$0xf0]  ;;  %v1035_v0 = vsel %vm971_vm8, %v13656_v55, %v1003_v34 }
 0x211   :  { %v12024_v6 = vld [vmem:[#allocation10 + $0x204] sm:$0xf]  ;;  %v938_v21 = vadd.f32 %v13498_v45, %v897_v12  ;;  %v9143_v62 = vor.u32 %v11968_v50, %v9140_v33  ;;  %v13663_v45 = vmul.f32 0.2, %v13633_v40  ;;  %v9851_v12 = vor.u32 %v12149_v27, %v9850_v32  ;;  %v9562_v33 = vld [vmem:[#allocation10 + $0x388] sm:$0xf] }
 0x212   :  { %v9364_v20 = vld [vmem:[#allocation10 + $0x220] sm:$0xf0]  ;;  %vm966_vm4 = vcmp.gt.f32.partialorder %v934_v2, 0.0  ;;  %v998_v25 = vmul.f32 0.2, %v934_v2  ;;  %2695 = vmatmul.bf16.gmra.mxu0 %v13666_v36  ;;  %v9339_v50 = vor.u32 %v12021_v4, %v9338_v19  ;;  %v941_v60 = vadd.f32 %v13522_v51, %v900_v26 }
 0x213   :  { %v12088_v42 = vld [vmem:[#allocation10 + $0x404] sm:$0xf]  ;;  %v9367_v41 = vor.u32 %v12024_v6, %v9364_v20  ;;  %vm970_vm6 = vcmp.gt.f32.partialorder %v938_v21, 0.0  ;;  %2712 = vmatpush.bf16.msrb.mxu1 %v9143_v62  ;;  %v1002_v58 = vmul.f32 0.2, %v938_v21  ;;  %vm969_vm12 = vcmp.gt.f32.partialorder %v937_v57, 0.0 }
 0x214   :  { %v9620_v61 = vld [vmem:[#allocation10 + $0x420] sm:$0xf0]  ;;  %v12077_v6 = vld [vmem:[#allocation10 + $0x3a4] sm:$0xf0]  ;;  %v1030_v37 = vsel %vm966_vm4, %v934_v2, %v998_v25  ;;  %v1001_v62 = vmul.f32 0.2, %v937_v57 }
 0x215   :  { %v12160_v48 = vld [vmem:[#allocation10 + $0x644] sm:$0xf]  ;;  %v9623_v15 = vor.u32 %v12088_v42, %v9620_v61  ;;  %2742 = vmatpush.bf16.msra.mxu2 %v9367_v41  ;;  %v1034_v63 = vsel %vm970_vm6, %v938_v21, %v1002_v58  ;;  %v9563_v35 = vor.u32 %v12077_v6, %v9562_v33  ;;  %v12141_v20 = vld [vmem:[#allocation10 + $0x5a4] sm:$0xf0]  ;;  %v1031_v21 = vsel %vm967_vm7, %v13653_v8, %v999_v7 }
 0x216   :  { %v9908_v39 = vld [vmem:[#allocation10 + $0x660] sm:$0xf0]  ;;  %v10106_v42 = vld [vmem:[#allocation10 + $0x7c8] sm:$0xf]  ;;  %v9819_v10 = vor.u32 %v12141_v20, %v9818_v22  ;;  %v13683_v2 = vpack.c.bf16 %v1034_v63, %v1030_v37  ;;  %v1036_v41 = vsel %vm972_vm11, %v13633_v40, %v13663_v45  ;;  %vm973_vm13 = vcmp.gt.f32.partialorder %v941_v60, 0.0 }
 0x217   :  { %v11960_v59 = vld [vmem:[#allocation10 + $0x4] sm:$0xf]  ;;  %v9911_v52 = vor.u32 %v12160_v48, %v9908_v39  ;;  %2771 = vmatpush.bf16.msra.mxu3 %v9623_v15  ;;  %v12213_v61 = vld [vmem:[#allocation10 + $0x7e4] sm:$0xf0]  ;;  %v13692_v15 = vpack.c.bf16 %v1035_v0, %v1031_v21  ;;  %v1033_v55 = vsel %vm969_vm12, %v937_v57, %v1001_v62 }
 0x218   :  { %v9108_v24 = vld [vmem:[#allocation10 + $0x20] sm:$0xf0]  ;;  %v10107_v49 = vor.u32 %v12213_v61, %v10106_v42  ;;  %v9306_v48 = vld [vmem:[#allocation10 + $0x188] sm:$0xf] }
 0x219   :  { %v12152_v1 = vld [vmem:[#allocation10 + $0x604] sm:$0xf]  ;;  %v9111_v23 = vor.u32 %v11960_v59, %v9108_v24  ;;  %2799 = vmatpush.bf16.msrb.mxu0 %v9911_v52  ;;  %2851 = vmatpush.bf16.msrb.mxu2 %v9595_v47  ;;  %v12013_v39 = vld [vmem:[#allocation10 + $0x1a4] sm:$0xf0]  ;;  %v1005_v59 = vmul.f32 0.2, %v941_v60  ;;  %v1032_v24 = vsel %vm968_vm9, %v13628_v5, %v13660_v13 }
 0x21a   :  { %v9876_v43 = vld [vmem:[#allocation10 + $0x620] sm:$0xf0]  ;;  %v9307_v51 = vor.u32 %v12013_v39, %v9306_v48  ;;  %v13694_v8 = vpack.c.bf16 %v1036_v41, %v1032_v24  ;;  %v9530_v40 = vld [vmem:[#allocation10 + $0x348] sm:$0xf] }
 0x21b   :  { %v9879_v18 = vor.u32 %v12152_v1, %v9876_v43  ;;  %2713 = vmatpush.bf16.msrb.mxu1 %v9111_v23  ;;  %2880 = vmatpush.bf16.msrb.mxu3 %v9851_v12  ;;  %v1037_v52 = vsel %vm973_vm13, %v941_v60, %v1005_v59  ;;  %v12069_v13 = vld [vmem:[#allocation10 + $0x364] sm:$0xf0] }
 0x21c   :  { %2613 = vmatmul.bf16.gmra.mxu1 %v13683_v2  ;;  %v13698_v5 = vpack.c.bf16 %v1037_v52, %v1033_v55  ;;  %v9786_v45 = vld [vmem:[#allocation10 + $0x548] sm:$0xf]  ;;  %v9531_v1 = vor.u32 %v12069_v13, %v9530_v40 }
 0x21d   :  { %2800 = vmatpush.bf16.msrb.mxu0 %v9879_v18  ;;  %2852 = vmatpush.bf16.msrb.mxu2 %v9563_v35  ;;  %v12133_v25 = vld [vmem:[#allocation10 + $0x564] sm:$0xf0] }
 0x21e   :  { %2642 = vmatmul.bf16.gmra.mxu2 %v13692_v15  ;;  %2671 = vmatmul.bf16.gmra.mxu3 %v13694_v8  ;;  %v10074_v23 = vld [vmem:[#allocation10 + $0x788] sm:$0xf]  ;;  %v9787_v58 = vor.u32 %v12133_v25, %v9786_v45 }
 0x21f   :  { %2822 = vmatpush.bf16.msra.mxu1 %v9339_v50  ;;  %2881 = vmatpush.bf16.msrb.mxu3 %v9819_v10  ;;  %v12205_v43 = vld [vmem:[#allocation10 + $0x7a4] sm:$0xf0] }
 0x220   :  { %v10075_v7 = vor.u32 %v12205_v43, %v10074_v23  ;;  %v9274_v34 = vld [vmem:[#allocation10 + $0x148] sm:$0xf] }
 0x221   :  { %2909 = vmatpush.bf16.msra.mxu0 %v10107_v49  ;;  %2853 = vmatpush.bf16.msrb.mxu2 %v9531_v1  ;;  %v9275_v56 = vor.u32 %v12005_v31, %v9274_v34  ;;  %v12061_v28 = vld [vmem:[#allocation10 + $0x324] sm:$0xf0] }
 0x222   :  { %2700 = vmatmul.bf16.gmra.mxu0 %v13698_v5  ;;  %v9754_v32 = vld [vmem:[#allocation10 + $0x508] sm:$0xf]  ;;  %v9499_v26 = vor.u32 %v12061_v28, %v9498_v44 }
 0x223   :  { %2823 = vmatpush.bf16.msra.mxu1 %v9307_v51  ;;  %v12125_v54 = vld [vmem:[#allocation10 + $0x524] sm:$0xf0]  ;;  %2882 = vmatpush.bf16.msrb.mxu3 %v9787_v58 }
 0x224   :  { %v9755_v18 = vor.u32 %v12125_v54, %v9754_v32  ;;  %v10042_v47 = vld [vmem:[#allocation10 + $0x748] sm:$0xf] }
 0x225   :  { %2910 = vmatpush.bf16.msra.mxu0 %v10075_v7  ;;  %v12197_v27 = vld [vmem:[#allocation10 + $0x764] sm:$0xf0]  ;;  %2854 = vmatpush.bf16.msrb.mxu2 %v9499_v26 }
 0x226   :  { %v9242_v19 = vld [vmem:[#allocation10 + $0x108] sm:$0xf]  ;;  %v10043_v4 = vor.u32 %v12197_v27, %v10042_v47 }
 0x227   :  { %2824 = vmatpush.bf16.msra.mxu1 %v9275_v56  ;;  %v11997_v57 = vld [vmem:[#allocation10 + $0x124] sm:$0xf0]  ;;  %2883 = vmatpush.bf16.msrb.mxu3 %v9755_v18 }
 0x228   :  { %v9243_v12 = vor.u32 %v11997_v57, %v9242_v19  ;;  %v9466_v50 = vld [vmem:[#allocation10 + $0x2c8] sm:$0xf] }
 0x229   :  { %2911 = vmatpush.bf16.msra.mxu0 %v10043_v4  ;;  %v12053_v33 = vld [vmem:[#allocation10 + $0x2e4] sm:$0xf0] }
 0x22a   :  { %v9722_v6 = vld [vmem:[#allocation10 + $0x4c8] sm:$0xf]  ;;  %v9467_v22 = vor.u32 %v12053_v33, %v9466_v50 }
 0x22b   :  { %2825 = vmatpush.bf16.msra.mxu1 %v9243_v12  ;;  %v12117_v37 = vld [vmem:[#allocation10 + $0x4e4] sm:$0xf0] }
 0x22c   :  { %2714 = vmatmul.bf16.vlgmr.msrb.gmra.mxu1 %v13534_v17  ;;  %v10010_v63 = vld [vmem:[#allocation10 + $0x708] sm:$0xf]  ;;  %v9723_v35 = vor.u32 %v12117_v37, %v9722_v6  ;;  %2855 = vmatpush.bf16.msrb.mxu2 %v9467_v22  ;;  %v12081_v22 = vld [vmem:[#allocation10 + $0x3cc] sm:$0xf] }
 0x22d   :  { %v12189_v60 = vld [vmem:[#allocation10 + $0x724] sm:$0xf0]  ;;  %v9596_v37 = vld [vmem:[#allocation10 + $0x3e8] sm:$0xf0] }
 0x22e   :  { %2743 = vmatmul.bf16.vlgmr.msra.gmra.mxu2 %v13541_v11  ;;  %2772 = vmatmul.bf16.vlgmr.msra.gmra.mxu3 %v13543_v3  ;;  %v10011_v20 = vor.u32 %v12189_v60, %v10010_v63  ;;  %v9210_v42 = vld [vmem:[#allocation10 + $0xc8] sm:$0xf]  ;;  %v12145_v63 = vld [vmem:[#allocation10 + $0x5cc] sm:$0xf]  ;;  %v9599_v60 = vor.u32 %v12081_v22, %v9596_v37 }
 0x22f   :  { %v11989_v61 = vld [vmem:[#allocation10 + $0xe4] sm:$0xf0]  ;;  %2884 = vmatpush.bf16.msrb.mxu3 %v9723_v35  ;;  %v9852_v35 = vld [vmem:[#allocation10 + $0x5e8] sm:$0xf0] }
 0x230   :  { %v9434_v10 = vld [vmem:[#allocation10 + $0x288] sm:$0xf]  ;;  %v9211_v49 = vor.u32 %v11989_v61, %v9210_v42  ;;  %2912 = vmatpush.bf16.msra.mxu0 %v10011_v20  ;;  %v9855_v20 = vor.u32 %v12145_v63, %v9852_v35  ;;  %v12017_v42 = vld [vmem:[#allocation10 + $0x1cc] sm:$0xf] }
 0x231   :  { %v12045_v48 = vld [vmem:[#allocation10 + $0x2a4] sm:$0xf0]  ;;  %v9340_v61 = vld [vmem:[#allocation10 + $0x1e8] sm:$0xf0] }
 0x232   :  { %2801 = vmatmul.bf16.vlgmr.msrb.gmra.mxu0 %v13551_v14  ;;  %v9690_v39 = vld [vmem:[#allocation10 + $0x488] sm:$0xf]  ;;  %v9435_v21 = vor.u32 %v12045_v48, %v9434_v10  ;;  %2826 = vmatpush.bf16.msra.mxu1 %v9211_v49  ;;  %v12073_v10 = vld [vmem:[#allocation10 + $0x38c] sm:$0xf]  ;;  %v9343_v49 = vor.u32 %v12017_v42, %v9340_v61 }
 0x233   :  { %v12109_v51 = vld [vmem:[#allocation10 + $0x4a4] sm:$0xf0]  ;;  %v9564_v48 = vld [vmem:[#allocation10 + $0x3a8] sm:$0xf0] }
 0x234   :  { %v9691_v0 = vor.u32 %v12109_v51, %v9690_v39  ;;  %v9978_v62 = vld [vmem:[#allocation10 + $0x6c8] sm:$0xf]  ;;  %2856 = vmatpush.bf16.msrb.mxu2 %v9435_v21  ;;  %v12137_v39 = vld [vmem:[#allocation10 + $0x58c] sm:$0xf]  ;;  %v9567_v21 = vor.u32 %v12073_v10, %v9564_v48 }
 0x235   :  { %v12181_v59 = vld [vmem:[#allocation10 + $0x6e4] sm:$0xf0]  ;;  %v9820_v51 = vld [vmem:[#allocation10 + $0x5a8] sm:$0xf0] }
 0x236   :  { %v9178_v24 = vld [vmem:[#allocation10 + $0x88] sm:$0xf]  ;;  %v9979_v41 = vor.u32 %v12181_v59, %v9978_v62  ;;  %2885 = vmatpush.bf16.msrb.mxu3 %v9691_v0  ;;  %v9823_v0 = vor.u32 %v12137_v39, %v9820_v51  ;;  %v12209_v62 = vld [vmem:[#allocation10 + $0x7cc] sm:$0xf] }
 0x237   :  { %v11981_v55 = vld [vmem:[#allocation10 + $0xa4] sm:$0xf0]  ;;  %v10108_v59 = vld [vmem:[#allocation10 + $0x7e8] sm:$0xf0] }
 0x238   :  { %v9179_v52 = vor.u32 %v11981_v55, %v9178_v24  ;;  %2913 = vmatpush.bf16.msra.mxu0 %v9979_v41  ;;  %v9402_v40 = vld [vmem:[#allocation10 + $0x248] sm:$0xf]  ;;  %v10111_v24 = vor.u32 %v12209_v62, %v10108_v59  ;;  %v12009_v41 = vld [vmem:[#allocation10 + $0x18c] sm:$0xf] }
 0x239   :  { %v12037_v13 = vld [vmem:[#allocation10 + $0x264] sm:$0xf0]  ;;  %v9308_v55 = vld [vmem:[#allocation10 + $0x1a8] sm:$0xf0] }
 0x23a   :  { %2827 = vmatpush.bf16.msra.mxu1 %v9179_v52  ;;  %v9658_v45 = vld [vmem:[#allocation10 + $0x448] sm:$0xf]  ;;  %v9403_v1 = vor.u32 %v12037_v13, %v9402_v40  ;;  %v12065_v52 = vld [vmem:[#allocation10 + $0x34c] sm:$0xf]  ;;  %v9311_v40 = vor.u32 %v12009_v41, %v9308_v55 }
 0x23b   :  { %v12101_v25 = vld [vmem:[#allocation10 + $0x464] sm:$0xf0]  ;;  %v9532_v13 = vld [vmem:[#allocation10 + $0x368] sm:$0xf0] }
 0x23c   :  { %2719 = vmatmul.bf16.gmra.mxu1 %v13570_v46  ;;  %v9946_v23 = vld [vmem:[#allocation10 + $0x688] sm:$0xf]  ;;  %v9659_v58 = vor.u32 %v12101_v25, %v9658_v45  ;;  %2857 = vmatpush.bf16.msrb.mxu2 %v9403_v1  ;;  %v12129_v45 = vld [vmem:[#allocation10 + $0x54c] sm:$0xf]  ;;  %v9535_v25 = vor.u32 %v12065_v52, %v9532_v13 }
 0x23d   :  { %v12173_v43 = vld [vmem:[#allocation10 + $0x6a4] sm:$0xf0]  ;;  %v9788_v1 = vld [vmem:[#allocation10 + $0x568] sm:$0xf0] }
 0x23e   :  { %2748 = vmatmul.bf16.gmra.mxu2 %v13579_v16  ;;  %2777 = vmatmul.bf16.gmra.mxu3 %v13591_v29  ;;  %v9947_v7 = vor.u32 %v12173_v43, %v9946_v23  ;;  %v9146_v34 = vld [vmem:[#allocation10 + $0x48] sm:$0xf]  ;;  %v9791_v23 = vor.u32 %v12129_v45, %v9788_v1  ;;  %v12201_v43 = vld [vmem:[#allocation10 + $0x78c] sm:$0xf] }
 0x23f   :  { %v11973_v31 = vld [vmem:[#allocation10 + $0x64] sm:$0xf0]  ;;  %2886 = vmatpush.bf16.msrb.mxu3 %v9659_v58  ;;  %v10076_v58 = vld [vmem:[#allocation10 + $0x7a8] sm:$0xf0] }
 0x240   :  { %v9370_v44 = vld [vmem:[#allocation10 + $0x208] sm:$0xf]  ;;  %v9147_v56 = vor.u32 %v11973_v31, %v9146_v34  ;;  %2914 = vmatpush.bf16.msra.mxu0 %v9947_v7  ;;  %v10079_v7 = vor.u32 %v12201_v43, %v10076_v58  ;;  %v12001_v31 = vld [vmem:[#allocation10 + $0x14c] sm:$0xf] }
 0x241   :  { %v12029_v28 = vld [vmem:[#allocation10 + $0x224] sm:$0xf0]  ;;  %v11993_v22 = vld [vmem:[#allocation10 + $0x10c] sm:$0xf] }
 0x242   :  { %2806 = vmatmul.bf16.gmra.mxu0 %v13600_v38  ;;  %v9914_v32 = vld [vmem:[#allocation10 + $0x648] sm:$0xf]  ;;  %v9371_v26 = vor.u32 %v12029_v28, %v9370_v44  ;;  %2828 = vmatpush.bf16.msra.mxu1 %v9147_v56  ;;  %v9276_v44 = vld [vmem:[#allocation10 + $0x168] sm:$0xf0] }
 0x243   :  { %v12165_v54 = vld [vmem:[#allocation10 + $0x664] sm:$0xf0]  ;;  %v12057_v56 = vld [vmem:[#allocation10 + $0x30c] sm:$0xf]  ;;  %v9279_v28 = vor.u32 %v12001_v31, %v9276_v44 }
 0x244   :  { %v9915_v18 = vor.u32 %v12165_v54, %v9914_v32  ;;  %v9626_v47 = vld [vmem:[#allocation10 + $0x408] sm:$0xf]  ;;  %2858 = vmatpush.bf16.msrb.mxu2 %v9371_v26  ;;  %v9500_v32 = vld [vmem:[#allocation10 + $0x328] sm:$0xf0] }
 0x245   :  { %v12093_v27 = vld [vmem:[#allocation10 + $0x424] sm:$0xf0]  ;;  %v12121_v54 = vld [vmem:[#allocation10 + $0x50c] sm:$0xf] }
 0x246   :  { %v9627_v19 = vor.u32 %v12093_v27, %v9626_v47  ;;  %2915 = vmatpush.bf16.msra.mxu0 %v9915_v18  ;;  %v9114_v4 = vld [vmem:[#allocation10 + $0x8] sm:$0xf]  ;;  %v9756_v26 = vld [vmem:[#allocation10 + $0x528] sm:$0xf0]  ;;  %v9503_v18 = vor.u32 %v12057_v56, %v9500_v32 }
 0x247   :  { %v11965_v57 = vld [vmem:[#allocation10 + $0x24] sm:$0xf0]  ;;  %v9759_v47 = vor.u32 %v12121_v54, %v9756_v26  ;;  %v12193_v27 = vld [vmem:[#allocation10 + $0x74c] sm:$0xf] }
 0x248   :  { %2887 = vmatpush.bf16.msrb.mxu3 %v9627_v19  ;;  %v9882_v12 = vld [vmem:[#allocation10 + $0x608] sm:$0xf]  ;;  %v9115_v50 = vor.u32 %v11965_v57, %v9114_v4  ;;  %2967 = vmatpush.bf16.msra.mxu2 %v9599_v60  ;;  %v10044_v19 = vld [vmem:[#allocation10 + $0x768] sm:$0xf0] }
 0x249   :  { %v12157_v33 = vld [vmem:[#allocation10 + $0x624] sm:$0xf0]  ;;  %v10047_v4 = vor.u32 %v12193_v27, %v10044_v19  ;;  %v9244_v37 = vld [vmem:[#allocation10 + $0x128] sm:$0xf0] }
 0x24a   :  { %v9883_v6 = vor.u32 %v12157_v33, %v9882_v12  ;;  %2829 = vmatpush.bf16.msra.mxu1 %v9115_v50  ;;  %v12049_v63 = vld [vmem:[#allocation10 + $0x2cc] sm:$0xf]  ;;  %v9247_v60 = vor.u32 %v11993_v22, %v9244_v37 }
 0x24b   :  { %v9468_v35 = vld [vmem:[#allocation10 + $0x2e8] sm:$0xf0] }
 0x24c   :  { %2724 = vmatmul.bf16.gmra.mxu1 %v13630_v30  ;;  %2916 = vmatpush.bf16.msra.mxu0 %v9883_v6  ;;  %v9724_v42 = vld [vmem:[#allocation10 + $0x4e8] sm:$0xf0]  ;;  %v9471_v10 = vor.u32 %v12049_v63, %v9468_v35 }
 0x24d   :  { %2996 = vmatpush.bf16.msra.mxu3 %v9855_v20  ;;  %2968 = vmatpush.bf16.msra.mxu2 %v9567_v21  ;;  %v12113_v20 = vld [vmem:[#allocation10 + $0x4cc] sm:$0xf] }
 0x24e   :  { %2753 = vmatmul.bf16.gmra.mxu2 %v13635_v53  ;;  %2782 = vmatmul.bf16.gmra.mxu3 %v13642_v9  ;;  %v12185_v48 = vld [vmem:[#allocation10 + $0x70c] sm:$0xf] }
 0x24f   :  { %2938 = vmatpush.bf16.msrb.mxu1 %v9343_v49  ;;  %v9727_v49 = vor.u32 %v12113_v20, %v9724_v42  ;;  %v10012_v39 = vld [vmem:[#allocation10 + $0x728] sm:$0xf0] }
 0x250   :  { %3025 = vmatpush.bf16.msrb.mxu0 %v10111_v24  ;;  %v10015_v51 = vor.u32 %v12185_v48, %v10012_v39  ;;  %v11985_v55 = vld [vmem:[#allocation10 + $0xcc] sm:$0xf] }
 0x251   :  { %2997 = vmatpush.bf16.msra.mxu3 %v9823_v0  ;;  %2969 = vmatpush.bf16.msra.mxu2 %v9535_v25  ;;  %v9212_v52 = vld [vmem:[#allocation10 + $0xe8] sm:$0xf0] }
 0x252   :  { %2811 = vmatmul.bf16.gmra.mxu0 %v13666_v36  ;;  %v9215_v13 = vor.u32 %v11985_v55, %v9212_v52  ;;  %v9436_v45 = vld [vmem:[#allocation10 + $0x2a8] sm:$0xf0] }
 0x253   :  { %2939 = vmatpush.bf16.msrb.mxu1 %v9311_v40  ;;  %v12041_v40 = vld [vmem:[#allocation10 + $0x28c] sm:$0xf] }
 0x254   :  { %3026 = vmatpush.bf16.msrb.mxu0 %v10079_v7  ;;  %v12105_v1 = vld [vmem:[#allocation10 + $0x48c] sm:$0xf]  ;;  %v9439_v43 = vor.u32 %v12041_v40, %v9436_v45 }
 0x255   :  { %2998 = vmatpush.bf16.msra.mxu3 %v9791_v23  ;;  %2970 = vmatpush.bf16.msra.mxu2 %v9503_v18  ;;  %v9692_v25 = vld [vmem:[#allocation10 + $0x4a8] sm:$0xf0] }
 0x256   :  { %v9695_v58 = vor.u32 %v12105_v1, %v9692_v25  ;;  %v12177_v7 = vld [vmem:[#allocation10 + $0x6cc] sm:$0xf] }
 0x257   :  { %2940 = vmatpush.bf16.msrb.mxu1 %v9279_v28  ;;  %v11977_v18 = vld [vmem:[#allocation10 + $0x8c] sm:$0xf] }
 0x258   :  { %3027 = vmatpush.bf16.msrb.mxu0 %v10047_v4  ;;  %v12033_v27 = vld [vmem:[#allocation10 + $0x24c] sm:$0xf] }
 0x259   :  { %2999 = vmatpush.bf16.msra.mxu3 %v9759_v47  ;;  %2971 = vmatpush.bf16.msra.mxu2 %v9471_v10  ;;  %v9180_v47 = vld [vmem:[#allocation10 + $0xa8] sm:$0xf0] }
 0x25a   :  { %v9183_v19 = vor.u32 %v11977_v18, %v9180_v47  ;;  %v9404_v4 = vld [vmem:[#allocation10 + $0x268] sm:$0xf0] }
 0x25b   :  { %2941 = vmatpush.bf16.msrb.mxu1 %v9247_v60  ;;  %v12169_v22 = vld [vmem:[#allocation10 + $0x68c] sm:$0xf] }
 0x25c   :  { %2729 = vmatmul.bf16.gmra.mxu1 %v13683_v2  ;;  %3028 = vmatpush.bf16.msrb.mxu0 %v10015_v51  ;;  %v9948_v37 = vld [vmem:[#allocation10 + $0x6a8] sm:$0xf0] }
 0x25d   :  { %3000 = vmatpush.bf16.msra.mxu3 %v9727_v49  ;;  %2972 = vmatpush.bf16.msra.mxu2 %v9439_v43  ;;  %v9951_v63 = vor.u32 %v12169_v22, %v9948_v37  ;;  %v11969_v10 = vld [vmem:[#allocation10 + $0x4c] sm:$0xf] }
 0x25e   :  { %2758 = vmatmul.bf16.gmra.mxu2 %v13692_v15  ;;  %2787 = vmatmul.bf16.gmra.mxu3 %v13694_v8  ;;  %v9148_v49 = vld [vmem:[#allocation10 + $0x68] sm:$0xf0] }
 0x25f   :  { %2942 = vmatpush.bf16.msrb.mxu1 %v9215_v13  ;;  %v12025_v48 = vld [vmem:[#allocation10 + $0x20c] sm:$0xf]  ;;  %v9151_v51 = vor.u32 %v11969_v10, %v9148_v49 }
 0x260   :  { %v12089_v52 = vld [vmem:[#allocation10 + $0x40c] sm:$0xf] }
 0x261   :  { %3001 = vmatpush.bf16.msra.mxu3 %v9695_v58  ;;  %v9628_v40 = vld [vmem:[#allocation10 + $0x428] sm:$0xf0] }
 0x262   :  { %2816 = vmatmul.bf16.gmra.mxu0 %v13698_v5  ;;  %v9631_v13 = vor.u32 %v12089_v52, %v9628_v40  ;;  %v9884_v49 = vld [vmem:[#allocation10 + $0x628] sm:$0xf0]  ;;  %v12150_v52 = vld [vmem:[#allocation10 + $0x5ec] sm:$0xf0] }
 0x263   :  { %2943 = vmatpush.bf16.msrb.mxu1 %v9183_v19 }
 0x267   :  { %2944 = vmatpush.bf16.msrb.mxu1 %v9151_v51 }
 0x268   :  { %v2599_v34 = vpop.f32.mrf.mxu1 }
 0x26c   :  { %2830 = vmatmul.bf16.vlgmr.msra.gmra.mxu1 %v13534_v17 }
 0x26e   :  { %2859 = vmatmul.bf16.vlgmr.msrb.gmra.mxu2 %v13541_v11  ;;  %v2686_v57 = vpop.f32.mrf.mxu0  ;;  %2888 = vmatmul.bf16.vlgmr.msrb.gmra.mxu3 %v13543_v3 }
 0x270   :  { %v2601_v12 = vpop.f32.mrf.mxu1  ;;  %v2628_v50 = vpop.f32.mrf.mxu2 }
 0x271   :  { %v2629_v33 = vadd.f32 %v2628_v50, %v2599_v34  ;;  %v2657_v6 = vpop.f32.mrf.mxu3  ;;  %v9980_v34 = vld [vmem:[#allocation10 + $0x6e8] sm:$0xf0] }
 0x272   :  { %2917 = vmatmul.bf16.vlgmr.msra.gmra.mxu0 %v13551_v14  ;;  %v9983_v31 = vor.u32 %v12177_v7, %v9980_v34 }
 0x273   :  { %v2658_v61 = vadd.f32 %v2657_v6, %v2629_v33  ;;  %v9407_v33 = vor.u32 %v12033_v27, %v9404_v4 }
 0x274   :  { %3029 = vmatpush.bf16.msrb.mxu0 %v9983_v31 }
 0x275   :  { %v13721_v21 = vadd.f32 %v2686_v57, %v2658_v61  ;;  %v12097_v57 = vld [vmem:[#allocation10 + $0x44c] sm:$0xf]  ;;  %2973 = vmatpush.bf16.msra.mxu2 %v9407_v33 }
 0x276   :  { %v2688_v0 = vpop.f32.mrf.mxu0 }
 0x277   :  { %16181 = vst [vmem:[#allocation24_spill] sm:$0xff] %v13721_v21 }
 0x278   :  { %v2604_v62 = vpop.f32.mrf.mxu1  ;;  %v2630_v59 = vpop.f32.mrf.mxu2  ;;  %3030 = vmatpush.bf16.msrb.mxu0 %v9951_v63 }
 0x279   :  { %v2631_v24 = vadd.f32 %v2630_v59, %v2601_v12  ;;  %v2659_v41 = vpop.f32.mrf.mxu3  ;;  %v9660_v12 = vld [vmem:[#allocation10 + $0x468] sm:$0xf0] }
 0x27a   :  { %v9663_v6 = vor.u32 %v12097_v57, %v9660_v12  ;;  %v9916_v59 = vld [vmem:[#allocation10 + $0x668] sm:$0xf0] }
 0x27b   :  { %v2660_v23 = vadd.f32 %v2659_v41, %v2631_v24 }
 0x27c   :  { %2835 = vmatmul.bf16.gmra.mxu1 %v13570_v46  ;;  %3002 = vmatpush.bf16.msra.mxu3 %v9663_v6 }
 0x27d   :  { %v13724_v44 = vadd.f32 %v2688_v0, %v2660_v23  ;;  %v9372_v0 = vld [vmem:[#allocation10 + $0x228] sm:$0xf0] }
 0x27e   :  { %2864 = vmatmul.bf16.gmra.mxu2 %v13579_v16  ;;  %v2691_v56 = vpop.f32.mrf.mxu0  ;;  %2893 = vmatmul.bf16.gmra.mxu3 %v13591_v29  ;;  %v9375_v41 = vor.u32 %v12025_v48, %v9372_v0  ;;  %v9602_v0 = vld [vmem:[#allocation10 + $0x3d0] sm:$0xf] }
 0x27f   :  { %16182 = vst [vmem:[#allocation28_spill] sm:$0xff] %v13724_v44 }
 0x280   :  { %v2633_v28 = vpop.f32.mrf.mxu2  ;;  %v2606_v32 = vpop.f32.mrf.mxu1  ;;  %2974 = vmatpush.bf16.msra.mxu2 %v9375_v41  ;;  %3003 = vmatpush.bf16.msra.mxu3 %v9631_v13  ;;  %v9346_v13 = vld [vmem:[#allocation10 + $0x1d0] sm:$0xf] }
 0x281   :  { %v2634_v54 = vadd.f32 %v2633_v28, %v2604_v62  ;;  %v2662_v26 = vpop.f32.mrf.mxu3  ;;  %v12161_v62 = vld [vmem:[#allocation10 + $0x64c] sm:$0xf] }
 0x282   :  { %2922 = vmatmul.bf16.gmra.mxu0 %v13600_v38  ;;  %v9919_v55 = vor.u32 %v12161_v62, %v9916_v59  ;;  %v12086_v62 = vld [vmem:[#allocation10 + $0x3ec] sm:$0xf0] }
 0x283   :  { %v2663_v50 = vadd.f32 %v2662_v26, %v2634_v54  ;;  %v9858_v59 = vld [vmem:[#allocation10 + $0x5d0] sm:$0xf] }
 0x284   :  { %3031 = vmatpush.bf16.msrb.mxu0 %v9919_v55  ;;  %v9603_v55 = vor.u32 %v12086_v62, %v9602_v0  ;;  %v12006_v0 = vld [vmem:[#allocation10 + $0x16c] sm:$0xf0] }
 0x285   :  { %v13729_v60 = vadd.f32 %v2691_v56, %v2663_v50  ;;  %v9506_v62 = vld [vmem:[#allocation10 + $0x310] sm:$0xf] }
 0x286   :  { %v2693_v35 = vpop.f32.mrf.mxu0  ;;  %3083 = vmatpush.bf16.msrb.mxu2 %v9603_v55  ;;  %v9762_v55 = vld [vmem:[#allocation10 + $0x510] sm:$0xf] }
 0x287   :  { %16183 = vst [vmem:[#allocation32_spill] sm:$0xff] %v13729_v60 }
 0x288   :  { %v2635_v20 = vpop.f32.mrf.mxu2  ;;  %v2609_v39 = vpop.f32.mrf.mxu1 }
 0x289   :  { %v2636_v42 = vadd.f32 %v2635_v20, %v2606_v32  ;;  %v2664_v61 = vpop.f32.mrf.mxu3  ;;  %v11961_v20 = vld [vmem:[#allocation10 + $0xc] sm:$0xf] }
 0x28b   :  { %v2665_v24 = vadd.f32 %v2664_v61, %v2636_v42  ;;  %v9116_v42 = vld [vmem:[#allocation10 + $0x28] sm:$0xf0] }
 0x28c   :  { %2840 = vmatmul.bf16.gmra.mxu1 %v13630_v30  ;;  %v12153_v61 = vld [vmem:[#allocation10 + $0x60c] sm:$0xf]  ;;  %v9119_v10 = vor.u32 %v11961_v20, %v9116_v42  ;;  %v10082_v42 = vld [vmem:[#allocation10 + $0x790] sm:$0xf] }
 0x28d   :  { %v13732_v45 = vadd.f32 %v2693_v35, %v2665_v24  ;;  %v9887_v48 = vor.u32 %v12153_v61, %v9884_v49  ;;  %v12206_v61 = vld [vmem:[#allocation10 + $0x7ac] sm:$0xf0] }
 0x28e   :  { %2869 = vmatmul.bf16.gmra.mxu2 %v13635_v53  ;;  %2898 = vmatmul.bf16.gmra.mxu3 %v13642_v9 }
 0x28f   :  { %16184 = vst [vmem:[#allocation25_spill] sm:$0xff] %v13732_v45  ;;  %v2696_v1 = vpop.f32.mrf.mxu0  ;;  %2945 = vmatpush.bf16.msrb.mxu1 %v9119_v10  ;;  %3032 = vmatpush.bf16.msrb.mxu0 %v9887_v48 }
 0x290   :  { %v2638_v25 = vpop.f32.mrf.mxu2  ;;  %v2611_v7 = vpop.f32.mrf.mxu1 }
 0x291   :  { %v2639_v23 = vadd.f32 %v2638_v25, %v2609_v39  ;;  %v2667_v43 = vpop.f32.mrf.mxu3  ;;  %v12022_v25 = vld [vmem:[#allocation10 + $0x1ec] sm:$0xf0] }
 0x292   :  { %2927 = vmatmul.bf16.gmra.mxu0 %v13666_v36 }
 0x293   :  { %v2668_v58 = vadd.f32 %v2667_v43, %v2639_v23  ;;  %v9570_v23 = vld [vmem:[#allocation10 + $0x390] sm:$0xf] }
 0x294   :  { %v12078_v43 = vld [vmem:[#allocation10 + $0x3ac] sm:$0xf0] }
 0x295   :  { %v13737_v34 = vadd.f32 %v2696_v1, %v2668_v58  ;;  %v9859_v1 = vor.u32 %v12150_v52, %v9858_v59  ;;  %v12126_v52 = vld [vmem:[#allocation10 + $0x52c] sm:$0xf0] }
 0x297   :  { %16185 = vst [vmem:[#allocation29_spill] sm:$0xff] %v13737_v34  ;;  %v2698_v31 = vpop.f32.mrf.mxu0  ;;  %3112 = vmatpush.bf16.msrb.mxu3 %v9859_v1  ;;  %v9250_v1 = vld [vmem:[#allocation10 + $0x110] sm:$0xf] }
 0x298   :  { %v2640_v56 = vpop.f32.mrf.mxu2 }
 0x299   :  { %v2641_v28 = vadd.f32 %v2640_v56, %v2611_v7  ;;  %v2669_v32 = vpop.f32.mrf.mxu3  ;;  %v2614_v18 = vpop.f32.mrf.mxu1  ;;  %v9347_v56 = vor.u32 %v12022_v25, %v9346_v13  ;;  %v12198_v13 = vld [vmem:[#allocation10 + $0x76c] sm:$0xf0] }
 0x29b   :  { %v2670_v54 = vadd.f32 %v2669_v32, %v2641_v28  ;;  %v9826_v28 = vld [vmem:[#allocation10 + $0x590] sm:$0xf]  ;;  %3054 = vmatpush.bf16.msra.mxu1 %v9347_v56 }
 0x29c   :  { %2845 = vmatmul.bf16.gmra.mxu1 %v13683_v2  ;;  %v12142_v32 = vld [vmem:[#allocation10 + $0x5ac] sm:$0xf0] }
 0x29d   :  { %v13740_v26 = vadd.f32 %v2698_v31, %v2670_v54  ;;  %v9571_v54 = vor.u32 %v12078_v43, %v9570_v23  ;;  %v11998_v56 = vld [vmem:[#allocation10 + $0x12c] sm:$0xf0] }
 0x29e   :  { %2874 = vmatmul.bf16.gmra.mxu2 %v13692_v15  ;;  %2903 = vmatmul.bf16.gmra.mxu3 %v13694_v8 }
 0x29f   :  { %16186 = vst [vmem:[#allocation27_spill] sm:$0xff] %v13740_v26  ;;  %v2701_v47 = vpop.f32.mrf.mxu0  ;;  %3084 = vmatpush.bf16.msrb.mxu2 %v9571_v54  ;;  %v9474_v54 = vld [vmem:[#allocation10 + $0x2d0] sm:$0xf] }
 0x2a1   :  { %v2643_v27 = vpop.f32.mrf.mxu2  ;;  %v2672_v4 = vpop.f32.mrf.mxu3 }
 0x2a2   :  { %2932 = vmatmul.bf16.gmra.mxu0 %v13698_v5  ;;  %v2644_v19 = vadd.f32 %v2643_v27, %v2614_v18  ;;  %v2616_v50 = vpop.f32.mrf.mxu1  ;;  %v9827_v18 = vor.u32 %v12142_v32, %v9826_v28  ;;  %v12214_v27 = vld [vmem:[#allocation10 + $0x7ec] sm:$0xf0]  ;;  %v9763_v28 = vor.u32 %v12126_v52, %v9762_v55 }
 0x2a4   :  { %v2673_v57 = vadd.f32 %v2672_v4, %v2644_v19  ;;  %v9314_v19 = vld [vmem:[#allocation10 + $0x190] sm:$0xf]  ;;  %3113 = vmatpush.bf16.msrb.mxu3 %v9827_v18 }
 0x2a5   :  { %v9730_v18 = vld [vmem:[#allocation10 + $0x4d0] sm:$0xf] }
 0x2a6   :  { %v13745_v12 = vadd.f32 %v2701_v47, %v2673_v57  ;;  %v10114_v47 = vld [vmem:[#allocation10 + $0x7d0] sm:$0xf] }
 0x2a7   :  { %v2703_v6 = vpop.f32.mrf.mxu0  ;;  %v10115_v57 = vor.u32 %v12214_v27, %v10114_v47  ;;  %v9251_v27 = vor.u32 %v11998_v56, %v9250_v1  ;;  %v9410_v1 = vld [vmem:[#allocation10 + $0x250] sm:$0xf] }
 0x2a8   :  { %16187 = vst [vmem:[#allocation31_spill] sm:$0xff] %v13745_v12 }
 0x2a9   :  { %v2645_v33 = vpop.f32.mrf.mxu2  ;;  %v2674_v37 = vpop.f32.mrf.mxu3  ;;  %3141 = vmatpush.bf16.msra.mxu0 %v10115_v57  ;;  %v10018_v57 = vld [vmem:[#allocation10 + $0x710] sm:$0xf] }
 0x2aa   :  { %v2646_v22 = vadd.f32 %v2645_v33, %v2616_v50  ;;  %v2715_v39 = vpop.f32.mrf.mxu1  ;;  %v12014_v50 = vld [vmem:[#allocation10 + $0x1ac] sm:$0xf0] }
 0x2ab   :  { %v9538_v33 = vld [vmem:[#allocation10 + $0x350] sm:$0xf] }
 0x2ac   :  { %v2675_v63 = vadd.f32 %v2674_v37, %v2646_v22  ;;  %2946 = vmatmul.bf16.vlgmr.msrb.gmra.mxu1 %v13534_v17  ;;  %v12070_v22 = vld [vmem:[#allocation10 + $0x36c] sm:$0xf0] }
 0x2ad   :  { %v9794_v37 = vld [vmem:[#allocation10 + $0x550] sm:$0xf]  ;;  %v9539_v20 = vor.u32 %v12070_v22, %v9538_v33 }
 0x2ae   :  { %v13747_v35 = vadd.f32 %v2703_v6, %v2675_v63  ;;  %2975 = vmatmul.bf16.vlgmr.msra.gmra.mxu2 %v13541_v11  ;;  %3004 = vmatmul.bf16.vlgmr.msra.gmra.mxu3 %v13543_v3  ;;  %v9315_v6 = vor.u32 %v12014_v50, %v9314_v19  ;;  %v12134_v63 = vld [vmem:[#allocation10 + $0x56c] sm:$0xf0] }
 0x2af   :  { %v2802_v51 = vpop.f32.mrf.mxu0  ;;  %v9795_v48 = vor.u32 %v12134_v63, %v9794_v37  ;;  %3085 = vmatpush.bf16.msrb.mxu2 %v9539_v20  ;;  %v12118_v19 = vld [vmem:[#allocation10 + $0x4ec] sm:$0xf0] }
 0x2b0   :  { %16188 = vst [vmem:[#allocation26_spill] sm:$0xff] %v13747_v35  ;;  %3055 = vmatpush.bf16.msra.mxu1 %v9315_v6  ;;  %v12190_v50 = vld [vmem:[#allocation10 + $0x72c] sm:$0xf0]  ;;  %v9731_v20 = vor.u32 %v12118_v19, %v9730_v18  ;;  %v9188_v35 = vld [vmem:[#allocation10 + $0xb0] sm:$0xf0] }
 0x2b1   :  { %v2744_v24 = vpop.f32.mrf.mxu2  ;;  %v2773_v41 = vpop.f32.mrf.mxu3  ;;  %3114 = vmatpush.bf16.msrb.mxu3 %v9795_v48  ;;  %v9218_v33 = vld [vmem:[#allocation10 + $0xd0] sm:$0xf] }
 0x2b2   :  { %3033 = vmatmul.bf16.vlgmr.msrb.gmra.mxu0 %v13551_v14  ;;  %v2745_v40 = vadd.f32 %v2744_v24, %v2715_v39  ;;  %v2717_v7 = vpop.f32.mrf.mxu1  ;;  %v10083_v39 = vor.u32 %v12206_v61, %v10082_v42  ;;  %v11990_v6 = vld [vmem:[#allocation10 + $0xec] sm:$0xf0] }
 0x2b3   :  { %v9442_v42 = vld [vmem:[#allocation10 + $0x290] sm:$0xf]  ;;  %v9219_v48 = vor.u32 %v11990_v6, %v9218_v33 }
 0x2b4   :  { %v2774_v58 = vadd.f32 %v2773_v41, %v2745_v40  ;;  %v12062_v41 = vld [vmem:[#allocation10 + $0x32c] sm:$0xf0]  ;;  %3142 = vmatpush.bf16.msra.mxu0 %v10083_v39 }
 0x2b5   :  { %v10050_v40 = vld [vmem:[#allocation10 + $0x750] sm:$0xf]  ;;  %3115 = vmatpush.bf16.msrb.mxu3 %v9763_v28 }
 0x2b6   :  { %v13753_v4 = vadd.f32 %v2802_v51, %v2774_v58  ;;  %v9282_v51 = vld [vmem:[#allocation10 + $0x150] sm:$0xf]  ;;  %v9507_v58 = vor.u32 %v12062_v41, %v9506_v62  ;;  %v10051_v32 = vor.u32 %v12198_v13, %v10050_v40 }
 0x2b7   :  { %v2804_v31 = vpop.f32.mrf.mxu0  ;;  %v9283_v24 = vor.u32 %v12006_v0, %v9282_v51  ;;  %v12046_v61 = vld [vmem:[#allocation10 + $0x2ac] sm:$0xf0] }
 0x2b8   :  { %16189 = vst [vmem:[#allocation30_spill] sm:$0xff] %v13753_v4  ;;  %3086 = vmatpush.bf16.msrb.mxu2 %v9507_v58  ;;  %3143 = vmatpush.bf16.msra.mxu0 %v10051_v32  ;;  %v12110_v39 = vld [vmem:[#allocation10 + $0x4ac] sm:$0xf0]  ;;  %v9443_v52 = vor.u32 %v12046_v61, %v9442_v42 }
 0x2b9   :  { %v2746_v10 = vpop.f32.mrf.mxu2  ;;  %v2775_v49 = vpop.f32.mrf.mxu3  ;;  %3056 = vmatpush.bf16.msra.mxu1 %v9283_v24  ;;  %v9986_v51 = vld [vmem:[#allocation10 + $0x6d0] sm:$0xf]  ;;  %3116 = vmatpush.bf16.msrb.mxu3 %v9731_v20 }
 0x2ba   :  { %v2747_v59 = vadd.f32 %v2746_v10, %v2717_v7  ;;  %v2720_v23 = vpop.f32.mrf.mxu1  ;;  %v12054_v7 = vld [vmem:[#allocation10 + $0x2ec] sm:$0xf0] }
 0x2bb   :  { %v9475_v22 = vor.u32 %v12054_v7, %v9474_v54  ;;  %v9698_v10 = vld [vmem:[#allocation10 + $0x490] sm:$0xf] }
 0x2bc   :  { %v2776_v25 = vadd.f32 %v2775_v49, %v2747_v59  ;;  %2951 = vmatmul.bf16.gmra.mxu1 %v13570_v46  ;;  %v12182_v0 = vld [vmem:[#allocation10 + $0x6ec] sm:$0xf0]  ;;  %v9699_v40 = vor.u32 %v12110_v39, %v9698_v10 }
 0x2bd   :  { %3057 = vmatpush.bf16.msra.mxu1 %v9251_v27  ;;  %v9186_v62 = vld [vmem:[#allocation10 + $0x90] sm:$0xf]  ;;  %3087 = vmatpush.bf16.msrb.mxu2 %v9475_v22  ;;  %v9987_v13 = vor.u32 %v12182_v0, %v9986_v51 }
 0x2be   :  { %2980 = vmatmul.bf16.gmra.mxu2 %v13579_v16  ;;  %3009 = vmatmul.bf16.gmra.mxu3 %v13591_v29  ;;  %v13757_v47 = vadd.f32 %v2804_v31, %v2776_v25  ;;  %v10019_v31 = vor.u32 %v12190_v50, %v10018_v57  ;;  %v11982_v59 = vld [vmem:[#allocation10 + $0xac] sm:$0xf0] }
 0x2bf   :  { %v2807_v43 = vpop.f32.mrf.mxu0  ;;  %v12038_v25 = vld [vmem:[#allocation10 + $0x26c] sm:$0xf0]  ;;  %v9187_v56 = vor.u32 %v11982_v59, %v9186_v62  ;;  %3117 = vmatpush.bf16.msrb.mxu3 %v9699_v40 }
 0x2c0   :  { %16190 = vst [vmem:[#allocation33_spill] sm:$0xff] %v13757_v47  ;;  %3144 = vmatpush.bf16.msra.mxu0 %v10019_v31  ;;  %v9666_v58 = vld [vmem:[#allocation10 + $0x450] sm:$0xf]  ;;  %v9411_v7 = vor.u32 %v12038_v25, %v9410_v1 }
 0x2c1   :  { %v2749_v37 = vpop.f32.mrf.mxu2  ;;  %v2778_v63 = vpop.f32.mrf.mxu3  ;;  %3058 = vmatpush.bf16.msra.mxu1 %v9219_v48  ;;  %v12102_v28 = vld [vmem:[#allocation10 + $0x46c] sm:$0xf0]  ;;  %3088 = vmatpush.bf16.msrb.mxu2 %v9443_v52 }
 0x2c2   :  { %3038 = vmatmul.bf16.gmra.mxu0 %v13600_v38  ;;  %v2750_v49 = vadd.f32 %v2749_v37, %v2720_v23  ;;  %v2722_v41 = vpop.f32.mrf.mxu1  ;;  %v9954_v32 = vld [vmem:[#allocation10 + $0x690] sm:$0xf]  ;;  %v9667_v19 = vor.u32 %v12102_v28, %v9666_v58 }
 0x2c3   :  { %v12174_v54 = vld [vmem:[#allocation10 + $0x6ac] sm:$0xf0] }
 0x2c4   :  { %v2779_v24 = vadd.f32 %v2778_v63, %v2750_v49  ;;  %3145 = vmatpush.bf16.msra.mxu0 %v9987_v13  ;;  %v9955_v57 = vor.u32 %v12174_v54, %v9954_v32  ;;  %v11974_v33 = vld [vmem:[#allocation10 + $0x6c] sm:$0xf0]  ;;  %3118 = vmatpush.bf16.msrb.mxu3 %v9667_v19 }
 0x2c5   :  { %3059 = vmatpush.bf16.msra.mxu1 %v9187_v56  ;;  %v9378_v6 = vld [vmem:[#allocation10 + $0x210] sm:$0xf]  ;;  %3089 = vmatpush.bf16.msrb.mxu2 %v9411_v7 }
 0x2c6   :  { %v13761_v23 = vadd.f32 %v2807_v43, %v2779_v24  ;;  %v9154_v43 = vld [vmem:[#allocation10 + $0x50] sm:$0xf] }
 0x2c7   :  { %v2809_v55 = vpop.f32.mrf.mxu0  ;;  %v9155_v22 = vor.u32 %v11974_v33, %v9154_v43  ;;  %v12030_v37 = vld [vmem:[#allocation10 + $0x22c] sm:$0xf0] }
 0x2c8   :  { %16191 = vst [vmem:[#allocation34_spill] sm:$0xff] %v13761_v23  ;;  %v9922_v63 = vld [vmem:[#allocation10 + $0x650] sm:$0xf]  ;;  %v9379_v61 = vor.u32 %v12030_v37, %v9378_v6  ;;  %3146 = vmatpush.bf16.msra.mxu0 %v9955_v57 }
 0x2c9   :  { %v2751_v18 = vpop.f32.mrf.mxu2  ;;  %v2780_v27 = vpop.f32.mrf.mxu3  ;;  %v12166_v10 = vld [vmem:[#allocation10 + $0x66c] sm:$0xf0]  ;;  %3060 = vmatpush.bf16.msra.mxu1 %v9155_v22 }
 0x2ca   :  { %v2752_v50 = vadd.f32 %v2751_v18, %v2722_v41  ;;  %v2725_v31 = vpop.f32.mrf.mxu1  ;;  %v9634_v49 = vld [vmem:[#allocation10 + $0x410] sm:$0xf]  ;;  %v9923_v39 = vor.u32 %v12166_v10, %v9922_v63  ;;  %3090 = vmatpush.bf16.msrb.mxu2 %v9379_v61 }
 0x2cb   :  { %v12094_v48 = vld [vmem:[#allocation10 + $0x42c] sm:$0xf0] }
 0x2cc   :  { %v2781_v20 = vadd.f32 %v2780_v27, %v2752_v50  ;;  %v9635_v51 = vor.u32 %v12094_v48, %v9634_v49  ;;  %2956 = vmatmul.bf16.gmra.mxu1 %v13630_v30  ;;  %3147 = vmatpush.bf16.msra.mxu0 %v9923_v39  ;;  %v9122_v6 = vld [vmem:[#allocation10 + $0x10] sm:$0xf] }
 0x2cd   :  { %v11966_v22 = vld [vmem:[#allocation10 + $0x2c] sm:$0xf0] }
 0x2ce   :  { %2985 = vmatmul.bf16.gmra.mxu2 %v13635_v53  ;;  %3014 = vmatmul.bf16.gmra.mxu3 %v13642_v9  ;;  %v13765_v0 = vadd.f32 %v2809_v55, %v2781_v20  ;;  %v9890_v37 = vld [vmem:[#allocation10 + $0x610] sm:$0xf]  ;;  %v9123_v20 = vor.u32 %v11966_v22, %v9122_v6  ;;  %v9572_v22 = vld [vmem:[#allocation10 + $0x3b0] sm:$0xf0] }
 0x2cf   :  { %v2812_v42 = vpop.f32.mrf.mxu0  ;;  %3119 = vmatpush.bf16.msrb.mxu3 %v9635_v51 }
 0x2d0   :  { %16192 = vst [vmem:[#allocation35_spill] sm:$0xff] %v13765_v0  ;;  %3061 = vmatpush.bf16.msra.mxu1 %v9123_v20 }
 0x2d1   :  { %v2754_v62 = vpop.f32.mrf.mxu2  ;;  %v2783_v59 = vpop.f32.mrf.mxu3 }
 0x2d2   :  { %3043 = vmatmul.bf16.gmra.mxu0 %v13666_v36  ;;  %v2755_v24 = vadd.f32 %v2754_v62, %v2725_v31  ;;  %v2727_v52 = vpop.f32.mrf.mxu1  ;;  %v12158_v31 = vld [vmem:[#allocation10 + $0x62c] sm:$0xf0] }
 0x2d4   :  { %v2784_v41 = vadd.f32 %v2783_v59, %v2755_v24 }
 0x2d6   :  { %v13769_v13 = vadd.f32 %v2812_v42, %v2784_v41  ;;  %v9891_v42 = vor.u32 %v12158_v31, %v9890_v37  ;;  %v12138_v37 = vld [vmem:[#allocation10 + $0x594] sm:$0xf] }
 0x2d7   :  { %v2814_v40 = vpop.f32.mrf.mxu0 }
 0x2d8   :  { %16193 = vst [vmem:[#allocation36_spill] sm:$0xff] %v13769_v13  ;;  %3148 = vmatpush.bf16.msra.mxu0 %v9891_v42 }
 0x2d9   :  { %v2756_v55 = vpop.f32.mrf.mxu2  ;;  %v2785_v1 = vpop.f32.mrf.mxu3 }
 0x2da   :  { %v2757_v25 = vadd.f32 %v2756_v55, %v2727_v52  ;;  %v2730_v56 = vpop.f32.mrf.mxu1 }
 0x2dc   :  { %v2786_v58 = vadd.f32 %v2785_v1, %v2757_v25  ;;  %2961 = vmatmul.bf16.gmra.mxu1 %v13683_v2  ;;  %v12082_v25 = vld [vmem:[#allocation10 + $0x3d4] sm:$0xf] }
 0x2de   :  { %2990 = vmatmul.bf16.gmra.mxu2 %v13692_v15  ;;  %3019 = vmatmul.bf16.gmra.mxu3 %v13694_v8  ;;  %v13773_v32 = vadd.f32 %v2814_v40, %v2786_v58  ;;  %v9604_v58 = vld [vmem:[#allocation10 + $0x3f0] sm:$0xf0] }
 0x2df   :  { %v2817_v28 = vpop.f32.mrf.mxu0 }
 0x2e0   :  { %16194 = vst [vmem:[#allocation37_spill] sm:$0xff] %v13773_v32 }
 0x2e1   :  { %v2759_v54 = vpop.f32.mrf.mxu2  ;;  %v2788_v7 = vpop.f32.mrf.mxu3 }
 0x2e2   :  { %3048 = vmatmul.bf16.gmra.mxu0 %v13698_v5  ;;  %v2760_v18 = vadd.f32 %v2759_v54, %v2730_v56  ;;  %v2732_v19 = vpop.f32.mrf.mxu1  ;;  %v9607_v54 = vor.u32 %v12082_v25, %v9604_v58  ;;  %v12202_v58 = vld [vmem:[#allocation10 + $0x794] sm:$0xf] }
 0x2e4   :  { %v2789_v27 = vadd.f32 %v2788_v7, %v2760_v18  ;;  %v12146_v7 = vld [vmem:[#allocation10 + $0x5d4] sm:$0xf]  ;;  %3199 = vmatpush.bf16.msra.mxu2 %v9607_v54 }
 0x2e5   :  { %v9860_v18 = vld [vmem:[#allocation10 + $0x5f0] sm:$0xf0] }
 0x2e6   :  { %v13777_v50 = vadd.f32 %v2817_v28, %v2789_v27  ;;  %v12018_v27 = vld [vmem:[#allocation10 + $0x1d4] sm:$0xf] }
 0x2e7   :  { %v2819_v57 = vpop.f32.mrf.mxu0  ;;  %v10084_v54 = vld [vmem:[#allocation10 + $0x7b0] sm:$0xf0] }
 0x2e8   :  { %16195 = vst [vmem:[#allocation38_spill] sm:$0xff] %v13777_v50  ;;  %v11978_v50 = vld [vmem:[#allocation10 + $0x94] sm:$0xf] }
 0x2e9   :  { %v2761_v43 = vpop.f32.mrf.mxu2  ;;  %v2790_v33 = vpop.f32.mrf.mxu3 }
 0x2ea   :  { %v2762_v63 = vadd.f32 %v2761_v43, %v2732_v19  ;;  %v2831_v10 = vpop.f32.mrf.mxu1  ;;  %v9348_v43 = vld [vmem:[#allocation10 + $0x1f0] sm:$0xf0] }
 0x2eb   :  { %v9351_v6 = vor.u32 %v12018_v27, %v9348_v43  ;;  %v10087_v27 = vor.u32 %v12202_v58, %v10084_v54  ;;  %v12186_v58 = vld [vmem:[#allocation10 + $0x714] sm:$0xf] }
 0x2ec   :  { %v2791_v61 = vadd.f32 %v2790_v33, %v2762_v63  ;;  %3062 = vmatmul.bf16.vlgmr.msra.gmra.mxu1 %v13534_v17  ;;  %v12074_v33 = vld [vmem:[#allocation10 + $0x394] sm:$0xf] }
 0x2ed   :  { %v9828_v63 = vld [vmem:[#allocation10 + $0x5b0] sm:$0xf0]  ;;  %v9575_v31 = vor.u32 %v12074_v33, %v9572_v22  ;;  %3170 = vmatpush.bf16.msrb.mxu1 %v9351_v6 }
 0x2ee   :  { %3091 = vmatmul.bf16.vlgmr.msrb.gmra.mxu2 %v13541_v11  ;;  %3120 = vmatmul.bf16.vlgmr.msrb.gmra.mxu3 %v13543_v3  ;;  %v13781_v48 = vadd.f32 %v2819_v57, %v2791_v61  ;;  %v9863_v57 = vor.u32 %v12146_v7, %v9860_v18  ;;  %v9831_v42 = vor.u32 %v12138_v37, %v9828_v63  ;;  %v12210_v61 = vld [vmem:[#allocation10 + $0x7d4] sm:$0xf] }
 0x2ef   :  { %v2918_v49 = vpop.f32.mrf.mxu0  ;;  %3200 = vmatpush.bf16.msra.mxu2 %v9575_v31  ;;  %v12002_v7 = vld [vmem:[#allocation10 + $0x154] sm:$0xf] }
 0x2f0   :  { %16196 = vst [vmem:[#allocation39_spill] sm:$0xff] %v13781_v48  ;;  %3228 = vmatpush.bf16.msra.mxu3 %v9863_v57  ;;  %v9284_v33 = vld [vmem:[#allocation10 + $0x170] sm:$0xf0] }
 0x2f1   :  { %v2860_v39 = vpop.f32.mrf.mxu2  ;;  %v2889_v51 = vpop.f32.mrf.mxu3  ;;  %v12058_v6 = vld [vmem:[#allocation10 + $0x314] sm:$0xf]  ;;  %v9287_v22 = vor.u32 %v12002_v7, %v9284_v33 }
 0x2f2   :  { %3149 = vmatmul.bf16.vlgmr.msra.gmra.mxu0 %v13551_v14  ;;  %v2861_v62 = vadd.f32 %v2860_v39, %v2831_v10  ;;  %v2833_v59 = vpop.f32.mrf.mxu1  ;;  %v10116_v10 = vld [vmem:[#allocation10 + $0x7f0] sm:$0xf0] }
 0x2f3   :  { %v12010_v39 = vld [vmem:[#allocation10 + $0x194] sm:$0xf] }
 0x2f4   :  { %v2890_v41 = vadd.f32 %v2889_v51, %v2861_v62  ;;  %v9316_v51 = vld [vmem:[#allocation10 + $0x1b0] sm:$0xf0]  ;;  %3229 = vmatpush.bf16.msra.mxu3 %v9831_v42 }
 0x2f5   :  { %v12066_v62 = vld [vmem:[#allocation10 + $0x354] sm:$0xf] }
 0x2f6   :  { %v13786_v52 = vadd.f32 %v2918_v49, %v2890_v41  ;;  %v10119_v49 = vor.u32 %v12210_v61, %v10116_v10  ;;  %v9540_v41 = vld [vmem:[#allocation10 + $0x370] sm:$0xf0] }
 0x2f7   :  { %v2920_v24 = vpop.f32.mrf.mxu0  ;;  %v9543_v25 = vor.u32 %v12066_v62, %v9540_v41  ;;  %v9508_v37 = vld [vmem:[#allocation10 + $0x330] sm:$0xf0] }
 0x2f8   :  { %16197 = vst [vmem:[#allocation40_spill] sm:$0xff] %v13786_v52  ;;  %3257 = vmatpush.bf16.msrb.mxu0 %v10119_v49  ;;  %v12122_v63 = vld [vmem:[#allocation10 + $0x514] sm:$0xf]  ;;  %v9511_v42 = vor.u32 %v12058_v6, %v9508_v37 }
 0x2f9   :  { %v2862_v40 = vpop.f32.mrf.mxu2  ;;  %v2891_v55 = vpop.f32.mrf.mxu3  ;;  %v9764_v61 = vld [vmem:[#allocation10 + $0x530] sm:$0xf0]  ;;  %3201 = vmatpush.bf16.msra.mxu2 %v9543_v25 }
 0x2fa   :  { %v2863_v1 = vadd.f32 %v2862_v40, %v2833_v59  ;;  %v2836_v56 = vpop.f32.mrf.mxu1  ;;  %v9319_v59 = vor.u32 %v12010_v39, %v9316_v51  ;;  %v12130_v40 = vld [vmem:[#allocation10 + $0x554] sm:$0xf] }
 0x2fb   :  { %v12194_v31 = vld [vmem:[#allocation10 + $0x754] sm:$0xf] }
 0x2fc   :  { %v2892_v19 = vadd.f32 %v2891_v55, %v2863_v1  ;;  %3067 = vmatmul.bf16.gmra.mxu1 %v13570_v46  ;;  %v9796_v55 = vld [vmem:[#allocation10 + $0x570] sm:$0xf0]  ;;  %3258 = vmatpush.bf16.msrb.mxu0 %v10087_v27 }
 0x2fd   :  { %v9799_v18 = vor.u32 %v12130_v40, %v9796_v55  ;;  %3171 = vmatpush.bf16.msrb.mxu1 %v9319_v59  ;;  %v10052_v49 = vld [vmem:[#allocation10 + $0x770] sm:$0xf0]  ;;  %v9767_v59 = vor.u32 %v12122_v63, %v9764_v61  ;;  %3202 = vmatpush.bf16.msra.mxu2 %v9511_v42 }
 0x2fe   :  { %3096 = vmatmul.bf16.gmra.mxu2 %v13579_v16  ;;  %3125 = vmatmul.bf16.gmra.mxu3 %v13591_v29  ;;  %v13791_v20 = vadd.f32 %v2920_v24, %v2892_v19  ;;  %v10055_v39 = vor.u32 %v12194_v31, %v10052_v49  ;;  %v11994_v51 = vld [vmem:[#allocation10 + $0x114] sm:$0xf] }
 0x2ff   :  { %v13789_v28 = vpop.f32.mrf.mxu0  ;;  %3230 = vmatpush.bf16.msra.mxu3 %v9799_v18  ;;  %v12050_v41 = vld [vmem:[#allocation10 + $0x2d4] sm:$0xf] }
 0x300   :  { %16198 = vst [vmem:[#allocation41_spill] sm:$0xff] %v13791_v20  ;;  %v9476_v40 = vld [vmem:[#allocation10 + $0x2f0] sm:$0xf0]  ;;  %3259 = vmatpush.bf16.msrb.mxu0 %v10055_v39 }
 0x301   :  { %v2865_v24 = vpop.f32.mrf.mxu2  ;;  %v2894_v1 = vpop.f32.mrf.mxu3  ;;  %3172 = vmatpush.bf16.msrb.mxu1 %v9287_v22  ;;  %v10020_v7 = vld [vmem:[#allocation10 + $0x730] sm:$0xf0] }
 0x302   :  { %3154 = vmatmul.bf16.gmra.mxu0 %v13600_v38  ;;  %v2866_v19 = vadd.f32 %v2865_v24, %v2836_v56  ;;  %v2838_v57 = vpop.f32.mrf.mxu1  ;;  %v9252_v56 = vld [vmem:[#allocation10 + $0x130] sm:$0xf0] }
 0x303   :  { %v9255_v55 = vor.u32 %v11994_v51, %v9252_v56  ;;  %v12114_v24 = vld [vmem:[#allocation10 + $0x4d4] sm:$0xf]  ;;  %3231 = vmatpush.bf16.msra.mxu3 %v9767_v59 }
 0x304   :  { %v2895_v10 = vadd.f32 %v2894_v1, %v2866_v19  ;;  %v9732_v1 = vld [vmem:[#allocation10 + $0x4f0] sm:$0xf0] }
 0x305   :  { %v11986_v27 = vld [vmem:[#allocation10 + $0xd4] sm:$0xf]  ;;  %v9735_v37 = vor.u32 %v12114_v24, %v9732_v1  ;;  %3173 = vmatpush.bf16.msrb.mxu1 %v9255_v55  ;;  %v9191_v55 = vor.u32 %v11978_v50, %v9188_v35 }
 0x306   :  { %v13797_v62 = vadd.f32 %v13789_v28, %v2895_v10  ;;  %v9220_v19 = vld [vmem:[#allocation10 + $0xf0] sm:$0xf0]  ;;  %v9479_v28 = vor.u32 %v12050_v41, %v9476_v40  ;;  %v10023_v10 = vor.u32 %v12186_v58, %v10020_v7 }
 0x307   :  { %v2925_v43 = vpop.f32.mrf.mxu0  ;;  %v12042_v22 = vld [vmem:[#allocation10 + $0x294] sm:$0xf]  ;;  %v9223_v31 = vor.u32 %v11986_v27, %v9220_v19  ;;  %3232 = vmatpush.bf16.msra.mxu3 %v9735_v37 }
 0x308   :  { %16199 = vst [vmem:[#allocation42_spill] sm:$0xff] %v13797_v62  ;;  %v9444_v63 = vld [vmem:[#allocation10 + $0x2b0] sm:$0xf0]  ;;  %3203 = vmatpush.bf16.msra.mxu2 %v9479_v28  ;;  %3260 = vmatpush.bf16.msrb.mxu0 %v10023_v10 }
 0x309   :  { %v2867_v25 = vpop.f32.mrf.mxu2  ;;  %v2896_v54 = vpop.f32.mrf.mxu3  ;;  %v12106_v49 = vld [vmem:[#allocation10 + $0x494] sm:$0xf]  ;;  %3174 = vmatpush.bf16.msrb.mxu1 %v9223_v31 }
 0x30a   :  { %v2868_v18 = vadd.f32 %v2867_v25, %v2838_v57  ;;  %v2841_v33 = vpop.f32.mrf.mxu1  ;;  %v9700_v51 = vld [vmem:[#allocation10 + $0x4b0] sm:$0xf0]  ;;  %v9447_v57 = vor.u32 %v12042_v22, %v9444_v63 }
 0x30b   :  { %v12178_v56 = vld [vmem:[#allocation10 + $0x6d4] sm:$0xf]  ;;  %v9703_v39 = vor.u32 %v12106_v49, %v9700_v51 }
 0x30c   :  { %v2897_v61 = vadd.f32 %v2896_v54, %v2868_v18  ;;  %v9988_v48 = vld [vmem:[#allocation10 + $0x6f0] sm:$0xf0]  ;;  %3072 = vmatmul.bf16.gmra.mxu1 %v13630_v30  ;;  %3204 = vmatpush.bf16.msra.mxu2 %v9447_v57 }
 0x30d   :  { %v12034_v59 = vld [vmem:[#allocation10 + $0x254] sm:$0xf]  ;;  %v9991_v40 = vor.u32 %v12178_v56, %v9988_v48  ;;  %3233 = vmatpush.bf16.msra.mxu3 %v9703_v39  ;;  %3175 = vmatpush.bf16.msrb.mxu1 %v9191_v55 }
 0x30e   :  { %3101 = vmatmul.bf16.gmra.mxu2 %v13635_v53  ;;  %3130 = vmatmul.bf16.gmra.mxu3 %v13642_v9  ;;  %v13800_v42 = vadd.f32 %v2925_v43, %v2897_v61  ;;  %v9412_v41 = vld [vmem:[#allocation10 + $0x270] sm:$0xf0] }
 0x30f   :  { %v2928_v6 = vpop.f32.mrf.mxu0  ;;  %v12098_v24 = vld [vmem:[#allocation10 + $0x454] sm:$0xf]  ;;  %v9415_v27 = vor.u32 %v12034_v59, %v9412_v41  ;;  %3261 = vmatpush.bf16.msrb.mxu0 %v9991_v40 }
 0x310   :  { %16200 = vst [vmem:[#allocation43_spill] sm:$0xff] %v13800_v42  ;;  %v9668_v1 = vld [vmem:[#allocation10 + $0x470] sm:$0xf0] }
 0x311   :  { %v2870_v58 = vpop.f32.mrf.mxu2  ;;  %v2899_v25 = vpop.f32.mrf.mxu3  ;;  %v12170_v43 = vld [vmem:[#allocation10 + $0x694] sm:$0xf]  ;;  %v9671_v22 = vor.u32 %v12098_v24, %v9668_v1  ;;  %3205 = vmatpush.bf16.msra.mxu2 %v9415_v27 }
 0x312   :  { %3159 = vmatmul.bf16.gmra.mxu0 %v13666_v36  ;;  %v9956_v54 = vld [vmem:[#allocation10 + $0x6b0] sm:$0xf0]  ;;  %v2871_v7 = vadd.f32 %v2870_v58, %v2841_v33  ;;  %v2843_v28 = vpop.f32.mrf.mxu1 }
 0x313   :  { %v11970_v19 = vld [vmem:[#allocation10 + $0x54] sm:$0xf]  ;;  %v9959_v35 = vor.u32 %v12170_v43, %v9956_v54  ;;  %3234 = vmatpush.bf16.msra.mxu3 %v9671_v22 }
 0x314   :  { %v9156_v18 = vld [vmem:[#allocation10 + $0x70] sm:$0xf0]  ;;  %v2900_v10 = vadd.f32 %v2899_v25, %v2871_v7 }
 0x315   :  { %v12026_v63 = vld [vmem:[#allocation10 + $0x214] sm:$0xf]  ;;  %v9159_v31 = vor.u32 %v11970_v19, %v9156_v18  ;;  %3262 = vmatpush.bf16.msrb.mxu0 %v9959_v35 }
 0x316   :  { %v9380_v61 = vld [vmem:[#allocation10 + $0x230] sm:$0xf0]  ;;  %v13805_v51 = vadd.f32 %v2928_v6, %v2900_v10 }
 0x317   :  { %v2930_v37 = vpop.f32.mrf.mxu0  ;;  %v12090_v50 = vld [vmem:[#allocation10 + $0x414] sm:$0xf]  ;;  %v9383_v56 = vor.u32 %v12026_v63, %v9380_v61  ;;  %3176 = vmatpush.bf16.msrb.mxu1 %v9159_v31 }
 0x318   :  { %v9636_v48 = vld [vmem:[#allocation10 + $0x430] sm:$0xf0]  ;;  %16201 = vst [vmem:[#allocation44_spill] sm:$0xff] %v13805_v51 }
 0x319   :  { %v12162_v33 = vld [vmem:[#allocation10 + $0x654] sm:$0xf]  ;;  %v9639_v57 = vor.u32 %v12090_v50, %v9636_v48  ;;  %v2872_v59 = vpop.f32.mrf.mxu2  ;;  %v2901_v41 = vpop.f32.mrf.mxu3  ;;  %3206 = vmatpush.bf16.msra.mxu2 %v9383_v56 }
 0x31a   :  { %v9924_v49 = vld [vmem:[#allocation10 + $0x670] sm:$0xf0]  ;;  %v2873_v40 = vadd.f32 %v2872_v59, %v2843_v28  ;;  %v2846_v55 = vpop.f32.mrf.mxu1 }
 0x31b   :  { %v9927_v39 = vor.u32 %v12162_v33, %v9924_v49  ;;  %3235 = vmatpush.bf16.msra.mxu3 %v9639_v57  ;;  %v11962_v18 = vld [vmem:[#allocation10 + $0x14] sm:$0xf] }
 0x31c   :  { %v2902_v1 = vadd.f32 %v2901_v41, %v2873_v40  ;;  %3077 = vmatmul.bf16.gmra.mxu1 %v13683_v2  ;;  %v9124_v28 = vld [vmem:[#allocation10 + $0x30] sm:$0xf0] }
 0x31d   :  { %3263 = vmatpush.bf16.msrb.mxu0 %v9927_v39  ;;  %v12154_v22 = vld [vmem:[#allocation10 + $0x614] sm:$0xf]  ;;  %v9127_v61 = vor.u32 %v11962_v18, %v9124_v28  ;;  %v9354_v18 = vld [vmem:[#allocation10 + $0x1d8] sm:$0xf] }
 0x31e   :  { %3106 = vmatmul.bf16.gmra.mxu2 %v13692_v15  ;;  %3135 = vmatmul.bf16.gmra.mxu3 %v13694_v8  ;;  %v13808_v6 = vadd.f32 %v2930_v37, %v2902_v1  ;;  %v9892_v10 = vld [vmem:[#allocation10 + $0x630] sm:$0xf0] }
 0x31f   :  { %v2933_v24 = vpop.f32.mrf.mxu0  ;;  %v9895_v50 = vor.u32 %v12154_v22, %v9892_v10  ;;  %3177 = vmatpush.bf16.msrb.mxu1 %v9127_v61 }
 0x320   :  { %16202 = vst [vmem:[#allocation45_spill] sm:$0xff] %v13808_v6 }
 0x321   :  { %v2875_v58 = vpop.f32.mrf.mxu2  ;;  %v2904_v25 = vpop.f32.mrf.mxu3  ;;  %3264 = vmatpush.bf16.msrb.mxu0 %v9895_v50  ;;  %v12079_v50 = vld [vmem:[#allocation10 + $0x3b4] sm:$0xf0] }
 0x322   :  { %3164 = vmatmul.bf16.gmra.mxu0 %v13698_v5  ;;  %v2876_v43 = vadd.f32 %v2875_v58, %v2846_v55  ;;  %v2848_v54 = vpop.f32.mrf.mxu1  ;;  %v9610_v58 = vld [vmem:[#allocation10 + $0x3d8] sm:$0xf] }
 0x324   :  { %v2905_v27 = vadd.f32 %v2904_v25, %v2876_v43  ;;  %v12087_v25 = vld [vmem:[#allocation10 + $0x3f4] sm:$0xf0] }
 0x326   :  { %v13813_v19 = vadd.f32 %v2933_v24, %v2905_v27  ;;  %v12151_v27 = vld [vmem:[#allocation10 + $0x5f4] sm:$0xf0] }
 0x327   :  { %v2935_v7 = vpop.f32.mrf.mxu0 }
 0x328   :  { %16203 = vst [vmem:[#allocation46_spill] sm:$0xff] %v13813_v19  ;;  %v12111_v19 = vld [vmem:[#allocation10 + $0x4b4] sm:$0xf0] }
 0x329   :  { %v2877_v37 = vpop.f32.mrf.mxu2  ;;  %v2906_v63 = vpop.f32.mrf.mxu3 }
 0x32a   :  { %v2878_v35 = vadd.f32 %v2877_v37, %v2848_v54  ;;  %v2947_v48 = vpop.f32.mrf.mxu1  ;;  %v9611_v54 = vor.u32 %v12087_v25, %v9610_v58  ;;  %v12023_v37 = vld [vmem:[#allocation10 + $0x1f4] sm:$0xf0] }
 0x32b   :  { %v12015_v58 = vld [vmem:[#allocation10 + $0x1b4] sm:$0xf0] }
 0x32c   :  { %v2907_v31 = vadd.f32 %v2906_v63, %v2878_v35  ;;  %3178 = vmatmul.bf16.vlgmr.msrb.gmra.mxu1 %v13534_v17  ;;  %v9578_v63 = vld [vmem:[#allocation10 + $0x398] sm:$0xf]  ;;  %3315 = vmatpush.bf16.msrb.mxu2 %v9611_v54  ;;  %v9355_v35 = vor.u32 %v12023_v37, %v9354_v18 }
 0x32d   :  { %v9802_v54 = vld [vmem:[#allocation10 + $0x558] sm:$0xf] }
 0x32e   :  { %3207 = vmatmul.bf16.vlgmr.msra.gmra.mxu2 %v13541_v11  ;;  %3236 = vmatmul.bf16.vlgmr.msra.gmra.mxu3 %v13543_v3  ;;  %v13816_v49 = vadd.f32 %v2935_v7, %v2907_v31  ;;  %v9866_v7 = vld [vmem:[#allocation10 + $0x5d8] sm:$0xf] }
 0x32f   :  { %v3034_v33 = vpop.f32.mrf.mxu0  ;;  %v9867_v22 = vor.u32 %v12151_v27, %v9866_v7  ;;  %v12143_v31 = vld [vmem:[#allocation10 + $0x5b4] sm:$0xf0]  ;;  %3286 = vmatpush.bf16.msra.mxu1 %v9355_v35 }
 0x330   :  { %16204 = vst [vmem:[#allocation47_spill] sm:$0xff] %v13816_v49  ;;  %v12135_v27 = vld [vmem:[#allocation10 + $0x574] sm:$0xf0] }
 0x331   :  { %v2976_v56 = vpop.f32.mrf.mxu2  ;;  %v3005_v57 = vpop.f32.mrf.mxu3  ;;  %3344 = vmatpush.bf16.msrb.mxu3 %v9867_v22  ;;  %v10090_v18 = vld [vmem:[#allocation10 + $0x798] sm:$0xf]  ;;  %v9803_v35 = vor.u32 %v12135_v27, %v9802_v54 }
 0x332   :  { %3265 = vmatmul.bf16.vlgmr.msrb.gmra.mxu0 %v13551_v14  ;;  %v2977_v39 = vadd.f32 %v2976_v56, %v2947_v48  ;;  %v2949_v59 = vpop.f32.mrf.mxu1  ;;  %v9834_v48 = vld [vmem:[#allocation10 + $0x598] sm:$0xf] }
 0x333   :  { %v9835_v56 = vor.u32 %v12143_v31, %v9834_v48  ;;  %v12207_v22 = vld [vmem:[#allocation10 + $0x7b4] sm:$0xf0] }
 0x334   :  { %v3006_v41 = vadd.f32 %v3005_v57, %v2977_v39  ;;  %v10122_v57 = vld [vmem:[#allocation10 + $0x7d8] sm:$0xf] }
 0x335   :  { %v12215_v39 = vld [vmem:[#allocation10 + $0x7f4] sm:$0xf0]  ;;  %3345 = vmatpush.bf16.msrb.mxu3 %v9835_v56 }
 0x336   :  { %v13821_v55 = vadd.f32 %v3034_v33, %v3006_v41  ;;  %v9579_v33 = vor.u32 %v12079_v50, %v9578_v63  ;;  %v9290_v50 = vld [vmem:[#allocation10 + $0x158] sm:$0xf] }
 0x337   :  { %v3036_v40 = vpop.f32.mrf.mxu0  ;;  %v12007_v48 = vld [vmem:[#allocation10 + $0x174] sm:$0xf0] }
 0x338   :  { %16205 = vst [vmem:[#allocation48_spill] sm:$0xff] %v13821_v55  ;;  %3316 = vmatpush.bf16.msrb.mxu2 %v9579_v33  ;;  %v9514_v31 = vld [vmem:[#allocation10 + $0x318] sm:$0xf] }
 0x339   :  { %v2978_v24 = vpop.f32.mrf.mxu2  ;;  %v3007_v1 = vpop.f32.mrf.mxu3  ;;  %v12127_v33 = vld [vmem:[#allocation10 + $0x534] sm:$0xf0]  ;;  %3346 = vmatpush.bf16.msrb.mxu3 %v9803_v35 }
 0x33a   :  { %v2979_v43 = vadd.f32 %v2978_v24, %v2949_v59  ;;  %v2952_v28 = vpop.f32.mrf.mxu1  ;;  %v10123_v59 = vor.u32 %v12215_v39, %v10122_v57  ;;  %v9322_v24 = vld [vmem:[#allocation10 + $0x198] sm:$0xf]  ;;  %v9291_v39 = vor.u32 %v12007_v48, %v9290_v50 }
 0x33b   :  { %v9323_v25 = vor.u32 %v12015_v58, %v9322_v24  ;;  %v12063_v24 = vld [vmem:[#allocation10 + $0x334] sm:$0xf0] }
 0x33c   :  { %v3008_v61 = vadd.f32 %v3007_v1, %v2979_v43  ;;  %3183 = vmatmul.bf16.gmra.mxu1 %v13570_v46  ;;  %v9546_v1 = vld [vmem:[#allocation10 + $0x358] sm:$0xf]  ;;  %3373 = vmatpush.bf16.msra.mxu0 %v10123_v59  ;;  %v9515_v55 = vor.u32 %v12063_v24, %v9514_v31 }
 0x33d   :  { %v12071_v43 = vld [vmem:[#allocation10 + $0x374] sm:$0xf0]  ;;  %3287 = vmatpush.bf16.msra.mxu1 %v9323_v25 }
 0x33e   :  { %3212 = vmatmul.bf16.gmra.mxu2 %v13579_v16  ;;  %3241 = vmatmul.bf16.gmra.mxu3 %v13591_v29  ;;  %v13825_v41 = vadd.f32 %v3036_v40, %v3008_v61  ;;  %v9547_v7 = vor.u32 %v12071_v43, %v9546_v1  ;;  %v10091_v40 = vor.u32 %v12207_v22, %v10090_v18  ;;  %v9770_v58 = vld [vmem:[#allocation10 + $0x518] sm:$0xf] }
 0x33f   :  { %v3039_v10 = vpop.f32.mrf.mxu0  ;;  %v10058_v43 = vld [vmem:[#allocation10 + $0x758] sm:$0xf]  ;;  %v9771_v18 = vor.u32 %v12127_v33, %v9770_v58 }
 0x340   :  { %16206 = vst [vmem:[#allocation49_spill] sm:$0xff] %v13825_v41  ;;  %v12199_v49 = vld [vmem:[#allocation10 + $0x774] sm:$0xf0]  ;;  %3317 = vmatpush.bf16.msrb.mxu2 %v9547_v7  ;;  %3374 = vmatpush.bf16.msra.mxu0 %v10091_v40 }
 0x341   :  { %v2981_v37 = vpop.f32.mrf.mxu2  ;;  %v3010_v63 = vpop.f32.mrf.mxu3  ;;  %v10059_v56 = vor.u32 %v12199_v49, %v10058_v43  ;;  %v9258_v54 = vld [vmem:[#allocation10 + $0x118] sm:$0xf]  ;;  %3288 = vmatpush.bf16.msra.mxu1 %v9291_v39  ;;  %3347 = vmatpush.bf16.msrb.mxu3 %v9771_v18 }
 0x342   :  { %3270 = vmatmul.bf16.gmra.mxu0 %v13600_v38  ;;  %v2982_v61 = vadd.f32 %v2981_v37, %v2952_v28  ;;  %v2954_v57 = vpop.f32.mrf.mxu1  ;;  %v11999_v27 = vld [vmem:[#allocation10 + $0x134] sm:$0xf0] }
 0x343   :  { %v9482_v25 = vld [vmem:[#allocation10 + $0x2d8] sm:$0xf] }
 0x344   :  { %v3011_v59 = vadd.f32 %v3010_v63, %v2982_v61  ;;  %v12055_v22 = vld [vmem:[#allocation10 + $0x2f4] sm:$0xf0]  ;;  %v9259_v63 = vor.u32 %v11999_v27, %v9258_v54  ;;  %3318 = vmatpush.bf16.msrb.mxu2 %v9515_v55  ;;  %3375 = vmatpush.bf16.msra.mxu0 %v10059_v56 }
 0x345   :  { %v9738_v37 = vld [vmem:[#allocation10 + $0x4d8] sm:$0xf]  ;;  %v9483_v40 = vor.u32 %v12055_v22, %v9482_v25 }
 0x346   :  { %v13828_v28 = vadd.f32 %v3039_v10, %v3011_v59  ;;  %v12119_v61 = vld [vmem:[#allocation10 + $0x4f4] sm:$0xf0]  ;;  %3289 = vmatpush.bf16.msra.mxu1 %v9259_v63 }
 0x347   :  { %v3041_v1 = vpop.f32.mrf.mxu0  ;;  %v10026_v50 = vld [vmem:[#allocation10 + $0x718] sm:$0xf]  ;;  %v9739_v33 = vor.u32 %v12119_v61, %v9738_v37 }
 0x348   :  { %16207 = vst [vmem:[#allocation50_spill] sm:$0xff] %v13828_v28  ;;  %v12191_v48 = vld [vmem:[#allocation10 + $0x734] sm:$0xf0]  ;;  %3319 = vmatpush.bf16.msrb.mxu2 %v9483_v40 }
 0x349   :  { %v9226_v7 = vld [vmem:[#allocation10 + $0xd8] sm:$0xf]  ;;  %v2983_v35 = vpop.f32.mrf.mxu2  ;;  %v3012_v10 = vpop.f32.mrf.mxu3  ;;  %v10027_v31 = vor.u32 %v12191_v48, %v10026_v50  ;;  %3348 = vmatpush.bf16.msrb.mxu3 %v9739_v33 }
 0x34a   :  { %v11991_v49 = vld [vmem:[#allocation10 + $0xf4] sm:$0xf0]  ;;  %v2984_v58 = vadd.f32 %v2983_v35, %v2954_v57  ;;  %v2957_v54 = vpop.f32.mrf.mxu1 }
 0x34b   :  { %v9450_v24 = vld [vmem:[#allocation10 + $0x298] sm:$0xf]  ;;  %v9227_v27 = vor.u32 %v11991_v49, %v9226_v7  ;;  %3376 = vmatpush.bf16.msra.mxu0 %v10027_v31 }
 0x34c   :  { %v12047_v59 = vld [vmem:[#allocation10 + $0x2b4] sm:$0xf0]  ;;  %v3013_v41 = vadd.f32 %v3012_v10, %v2984_v58  ;;  %3188 = vmatmul.bf16.gmra.mxu1 %v13630_v30 }
 0x34d   :  { %v9994_v39 = vld [vmem:[#allocation10 + $0x6d8] sm:$0xf]  ;;  %v9451_v25 = vor.u32 %v12047_v59, %v9450_v24  ;;  %3290 = vmatpush.bf16.msra.mxu1 %v9227_v27 }
 0x34e   :  { %3217 = vmatmul.bf16.gmra.mxu2 %v13635_v53  ;;  %3246 = vmatmul.bf16.gmra.mxu3 %v13642_v9  ;;  %v12183_v43 = vld [vmem:[#allocation10 + $0x6f4] sm:$0xf0]  ;;  %v13832_v18 = vadd.f32 %v3041_v1, %v3013_v41 }
 0x34f   :  { %v9706_v28 = vld [vmem:[#allocation10 + $0x498] sm:$0xf]  ;;  %v3044_v6 = vpop.f32.mrf.mxu0  ;;  %v9995_v22 = vor.u32 %v12183_v43, %v9994_v39  ;;  %3320 = vmatpush.bf16.msrb.mxu2 %v9451_v25 }
 0x350   :  { %v9194_v55 = vld [vmem:[#allocation10 + $0x98] sm:$0xf]  ;;  %16208 = vst [vmem:[#allocation51_spill] sm:$0xff] %v13832_v18  ;;  %v9707_v57 = vor.u32 %v12111_v19, %v9706_v28 }
 0x351   :  { %v11983_v56 = vld [vmem:[#allocation10 + $0xb4] sm:$0xf0]  ;;  %v2986_v40 = vpop.f32.mrf.mxu2  ;;  %v3015_v31 = vpop.f32.mrf.mxu3  ;;  %3377 = vmatpush.bf16.msra.mxu0 %v9995_v22 }
 0x352   :  { %v9418_v50 = vld [vmem:[#allocation10 + $0x258] sm:$0xf]  ;;  %3275 = vmatmul.bf16.gmra.mxu0 %v13666_v36  ;;  %v9195_v48 = vor.u32 %v11983_v56, %v9194_v55  ;;  %v2987_v58 = vadd.f32 %v2986_v40, %v2957_v54  ;;  %3349 = vmatpush.bf16.msrb.mxu3 %v9707_v57  ;;  %v2959_v39 = vpop.f32.mrf.mxu1 }
 0x353   :  { %v12039_v37 = vld [vmem:[#allocation10 + $0x274] sm:$0xf0] }
 0x354   :  { %v9962_v63 = vld [vmem:[#allocation10 + $0x698] sm:$0xf]  ;;  %v9419_v41 = vor.u32 %v12039_v37, %v9418_v50  ;;  %3291 = vmatpush.bf16.msra.mxu1 %v9195_v48  ;;  %v3016_v56 = vadd.f32 %v3015_v31, %v2987_v58 }
 0x355   :  { %v12175_v61 = vld [vmem:[#allocation10 + $0x6b4] sm:$0xf0] }
 0x356   :  { %v9674_v7 = vld [vmem:[#allocation10 + $0x458] sm:$0xf]  ;;  %v9963_v1 = vor.u32 %v12175_v61, %v9962_v63  ;;  %3321 = vmatpush.bf16.msrb.mxu2 %v9419_v41  ;;  %v13836_v50 = vadd.f32 %v3044_v6, %v3016_v56 }
 0x357   :  { %v12103_v49 = vld [vmem:[#allocation10 + $0x474] sm:$0xf0]  ;;  %v3046_v18 = vpop.f32.mrf.mxu0 }
 0x358   :  { %v9162_v35 = vld [vmem:[#allocation10 + $0x58] sm:$0xf]  ;;  %v9675_v19 = vor.u32 %v12103_v49, %v9674_v7  ;;  %3378 = vmatpush.bf16.msra.mxu0 %v9963_v1  ;;  %16209 = vst [vmem:[#allocation52_spill] sm:$0xff] %v13836_v50  ;;  %v9996_v50 = vld [vmem:[#allocation10 + $0x6f8] sm:$0xf0] }
 0x359   :  { %v11975_v10 = vld [vmem:[#allocation10 + $0x74] sm:$0xf0]  ;;  %v2988_v57 = vpop.f32.mrf.mxu2  ;;  %v3017_v37 = vpop.f32.mrf.mxu3 }
 0x35a   :  { %v9386_v24 = vld [vmem:[#allocation10 + $0x218] sm:$0xf]  ;;  %v9163_v43 = vor.u32 %v11975_v10, %v9162_v35  ;;  %3350 = vmatpush.bf16.msrb.mxu3 %v9675_v19  ;;  %v2989_v63 = vadd.f32 %v2988_v57, %v2959_v39  ;;  %v2962_v61 = vpop.f32.mrf.mxu1 }
 0x35b   :  { %v12031_v28 = vld [vmem:[#allocation10 + $0x234] sm:$0xf0] }
 0x35c   :  { %v9930_v33 = vld [vmem:[#allocation10 + $0x658] sm:$0xf]  ;;  %v9387_v25 = vor.u32 %v12031_v28, %v9386_v24  ;;  %3292 = vmatpush.bf16.msra.mxu1 %v9163_v43  ;;  %v3018_v48 = vadd.f32 %v3017_v37, %v2989_v63 }
 0x35d   :  { %v12167_v59 = vld [vmem:[#allocation10 + $0x674] sm:$0xf0]  ;;  %3193 = vmatmul.bf16.gmra.mxu1 %v13683_v2 }
 0x35e   :  { %v9642_v27 = vld [vmem:[#allocation10 + $0x418] sm:$0xf]  ;;  %v9931_v22 = vor.u32 %v12167_v59, %v9930_v33  ;;  %3222 = vmatmul.bf16.gmra.mxu2 %v13692_v15  ;;  %3251 = vmatmul.bf16.gmra.mxu3 %v13694_v8  ;;  %v13840_v49 = vadd.f32 %v3046_v18, %v3018_v48 }
 0x35f   :  { %v12095_v55 = vld [vmem:[#allocation10 + $0x434] sm:$0xf0]  ;;  %3322 = vmatpush.bf16.msrb.mxu2 %v9387_v25  ;;  %v3049_v7 = vpop.f32.mrf.mxu0 }
 0x360   :  { %v9643_v54 = vor.u32 %v12095_v55, %v9642_v27  ;;  %3379 = vmatpush.bf16.msra.mxu0 %v9931_v22  ;;  %16210 = vst [vmem:[#allocation53_spill] sm:$0xff] %v13840_v49  ;;  %v9130_v24 = vld [vmem:[#allocation10 + $0x18] sm:$0xf]  ;;  %v12179_v49 = vld [vmem:[#allocation10 + $0x6dc] sm:$0xf] }
 0x361   :  { %v2991_v6 = vpop.f32.mrf.mxu2  ;;  %v3020_v35 = vpop.f32.mrf.mxu3  ;;  %v11967_v58 = vld [vmem:[#allocation10 + $0x34] sm:$0xf0] }
 0x362   :  { %3351 = vmatpush.bf16.msrb.mxu3 %v9643_v54  ;;  %3280 = vmatmul.bf16.gmra.mxu0 %v13698_v5  ;;  %v2992_v10 = vadd.f32 %v2991_v6, %v2962_v61  ;;  %v2964_v40 = vpop.f32.mrf.mxu1  ;;  %v9898_v19 = vld [vmem:[#allocation10 + $0x618] sm:$0xf]  ;;  %v9131_v33 = vor.u32 %v11967_v58, %v9130_v24 }
 0x363   :  { %v12159_v59 = vld [vmem:[#allocation10 + $0x634] sm:$0xf0] }
 0x364   :  { %v3021_v31 = vadd.f32 %v3020_v35, %v2992_v10  ;;  %v9899_v43 = vor.u32 %v12159_v59, %v9898_v19  ;;  %3293 = vmatpush.bf16.msra.mxu1 %v9131_v33  ;;  %v12147_v19 = vld [vmem:[#allocation10 + $0x5dc] sm:$0xf] }
 0x365   :  { %v9356_v59 = vld [vmem:[#allocation10 + $0x1f8] sm:$0xf0] }
 0x366   :  { %v13844_v1 = vadd.f32 %v3049_v7, %v3021_v31  ;;  %3380 = vmatpush.bf16.msra.mxu0 %v9899_v43  ;;  %v9612_v31 = vld [vmem:[#allocation10 + $0x3f8] sm:$0xf0] }
 0x367   :  { %v3051_v41 = vpop.f32.mrf.mxu0 }
 0x368   :  { %16211 = vst [vmem:[#allocation54_spill] sm:$0xff] %v13844_v1  ;;  %v12059_v1 = vld [vmem:[#allocation10 + $0x31c] sm:$0xf] }
 0x369   :  { %v2993_v18 = vpop.f32.mrf.mxu2  ;;  %v3022_v28 = vpop.f32.mrf.mxu3 }
 0x36a   :  { %v2994_v39 = vadd.f32 %v2993_v18, %v2964_v40  ;;  %v3063_v27 = vpop.f32.mrf.mxu1  ;;  %v12083_v40 = vld [vmem:[#allocation10 + $0x3dc] sm:$0xf] }
 0x36b   :  { %v9615_v58 = vor.u32 %v12083_v40, %v9612_v31  ;;  %v9868_v18 = vld [vmem:[#allocation10 + $0x5f8] sm:$0xf0] }
 0x36c   :  { %v3023_v55 = vadd.f32 %v3022_v28, %v2994_v39  ;;  %v12019_v28 = vld [vmem:[#allocation10 + $0x1dc] sm:$0xf]  ;;  %v9871_v33 = vor.u32 %v12147_v19, %v9868_v18 }
 0x36d   :  { %3294 = vmatmul.bf16.vlgmr.msra.gmra.mxu1 %v13534_v17  ;;  %v12075_v39 = vld [vmem:[#allocation10 + $0x39c] sm:$0xf]  ;;  %3431 = vmatpush.bf16.msra.mxu2 %v9615_v58 }
 0x36e   :  { %3323 = vmatmul.bf16.vlgmr.msrb.gmra.mxu2 %v13541_v11  ;;  %3352 = vmatmul.bf16.vlgmr.msrb.gmra.mxu3 %v13543_v3  ;;  %v13848_v25 = vadd.f32 %v3051_v41, %v3023_v55  ;;  %v9580_v55 = vld [vmem:[#allocation10 + $0x3b8] sm:$0xf0] }
 0x36f   :  { %v3150_v56 = vpop.f32.mrf.mxu0  ;;  %3460 = vmatpush.bf16.msra.mxu3 %v9871_v33  ;;  %v9548_v58 = vld [vmem:[#allocation10 + $0x378] sm:$0xf0] }
 0x370   :  { %16212 = vst [vmem:[#allocation55_spill] sm:$0xff] %v13848_v25  ;;  %v12131_v19 = vld [vmem:[#allocation10 + $0x55c] sm:$0xf] }
 0x371   :  { %v3092_v22 = vpop.f32.mrf.mxu2  ;;  %v3121_v54 = vpop.f32.mrf.mxu3  ;;  %v9804_v18 = vld [vmem:[#allocation10 + $0x578] sm:$0xf0] }
 0x372   :  { %3381 = vmatmul.bf16.vlgmr.msra.gmra.mxu0 %v13551_v14  ;;  %v3093_v57 = vadd.f32 %v3092_v22, %v3063_v27  ;;  %v3065_v37 = vpop.f32.mrf.mxu1  ;;  %v9359_v27 = vor.u32 %v12019_v28, %v9356_v59  ;;  %v9836_v22 = vld [vmem:[#allocation10 + $0x5b8] sm:$0xf0] }
 0x373   :  { %v12203_v33 = vld [vmem:[#allocation10 + $0x79c] sm:$0xf] }
 0x374   :  { %v3122_v63 = vadd.f32 %v3121_v54, %v3093_v57  ;;  %v9583_v54 = vor.u32 %v12075_v39, %v9580_v55  ;;  %3402 = vmatpush.bf16.msrb.mxu1 %v9359_v27  ;;  %v10092_v39 = vld [vmem:[#allocation10 + $0x7b8] sm:$0xf0]  ;;  %v9807_v27 = vor.u32 %v12131_v19, %v9804_v18 }
 0x375   :  { %v9292_v25 = vld [vmem:[#allocation10 + $0x178] sm:$0xf0] }
 0x376   :  { %v13852_v48 = vadd.f32 %v3150_v56, %v3122_v63  ;;  %v12139_v56 = vld [vmem:[#allocation10 + $0x59c] sm:$0xf]  ;;  %3432 = vmatpush.bf16.msra.mxu2 %v9583_v54 }
 0x377   :  { %v3152_v61 = vpop.f32.mrf.mxu0  ;;  %v9839_v57 = vor.u32 %v12139_v56, %v9836_v22  ;;  %v10124_v63 = vld [vmem:[#allocation10 + $0x7f8] sm:$0xf0]  ;;  %v10095_v22 = vor.u32 %v12203_v33, %v10092_v39 }
 0x378   :  { %16213 = vst [vmem:[#allocation56_spill] sm:$0xff] %v13852_v48  ;;  %v12003_v56 = vld [vmem:[#allocation10 + $0x15c] sm:$0xf] }
 0x379   :  { %v3094_v7 = vpop.f32.mrf.mxu2  ;;  %v3123_v6 = vpop.f32.mrf.mxu3  ;;  %3461 = vmatpush.bf16.msra.mxu3 %v9839_v57  ;;  %v12123_v48 = vld [vmem:[#allocation10 + $0x51c] sm:$0xf] }
 0x37a   :  { %v3095_v35 = vadd.f32 %v3094_v7, %v3065_v37  ;;  %v3068_v10 = vpop.f32.mrf.mxu1  ;;  %v12211_v37 = vld [vmem:[#allocation10 + $0x7dc] sm:$0xf] }
 0x37b   :  { %v10127_v7 = vor.u32 %v12211_v37, %v10124_v63  ;;  %v12195_v54 = vld [vmem:[#allocation10 + $0x75c] sm:$0xf] }
 0x37c   :  { %v3124_v41 = vadd.f32 %v3123_v6, %v3095_v35  ;;  %v12011_v6 = vld [vmem:[#allocation10 + $0x19c] sm:$0xf] }
 0x37d   :  { %3299 = vmatmul.bf16.gmra.mxu1 %v13570_v46  ;;  %v9324_v35 = vld [vmem:[#allocation10 + $0x1b8] sm:$0xf0]  ;;  %3489 = vmatpush.bf16.msrb.mxu0 %v10127_v7 }
 0x37e   :  { %3328 = vmatmul.bf16.gmra.mxu2 %v13579_v16  ;;  %3357 = vmatmul.bf16.gmra.mxu3 %v13591_v29  ;;  %v13856_v43 = vadd.f32 %v3152_v61, %v3124_v41  ;;  %v12067_v61 = vld [vmem:[#allocation10 + $0x35c] sm:$0xf]  ;;  %v9327_v41 = vor.u32 %v12011_v6, %v9324_v35  ;;  %v9295_v6 = vor.u32 %v12003_v56, %v9292_v25 }
 0x37f   :  { %v3155_v24 = vpop.f32.mrf.mxu0  ;;  %v9551_v59 = vor.u32 %v12067_v61, %v9548_v58  ;;  %v9516_v35 = vld [vmem:[#allocation10 + $0x338] sm:$0xf0]  ;;  %3462 = vmatpush.bf16.msra.mxu3 %v9807_v27 }
 0x380   :  { %16214 = vst [vmem:[#allocation57_spill] sm:$0xff] %v13856_v43  ;;  %3403 = vmatpush.bf16.msrb.mxu1 %v9327_v41  ;;  %v9772_v43 = vld [vmem:[#allocation10 + $0x538] sm:$0xf0]  ;;  %v9519_v57 = vor.u32 %v12059_v1, %v9516_v35 }
 0x381   :  { %v3097_v40 = vpop.f32.mrf.mxu2  ;;  %v3126_v31 = vpop.f32.mrf.mxu3  ;;  %v10060_v7 = vld [vmem:[#allocation10 + $0x778] sm:$0xf0]  ;;  %3433 = vmatpush.bf16.msra.mxu2 %v9551_v59  ;;  %3490 = vmatpush.bf16.msrb.mxu0 %v10095_v22  ;;  %v9775_v58 = vor.u32 %v12123_v48, %v9772_v43 }
 0x382   :  { %3386 = vmatmul.bf16.gmra.mxu0 %v13600_v38  ;;  %v3098_v28 = vadd.f32 %v3097_v40, %v3068_v10  ;;  %v3070_v55 = vpop.f32.mrf.mxu1  ;;  %v10063_v61 = vor.u32 %v12195_v54, %v10060_v7  ;;  %v11995_v40 = vld [vmem:[#allocation10 + $0x11c] sm:$0xf] }
 0x383   :  { %v12051_v19 = vld [vmem:[#allocation10 + $0x2dc] sm:$0xf]  ;;  %3463 = vmatpush.bf16.msra.mxu3 %v9775_v58 }
 0x384   :  { %v3127_v37 = vadd.f32 %v3126_v31, %v3098_v28  ;;  %v9260_v31 = vld [vmem:[#allocation10 + $0x138] sm:$0xf0]  ;;  %3404 = vmatpush.bf16.msrb.mxu1 %v9295_v6 }
 0x385   :  { %v9484_v41 = vld [vmem:[#allocation10 + $0x2f8] sm:$0xf0]  ;;  %3434 = vmatpush.bf16.msra.mxu2 %v9519_v57  ;;  %3491 = vmatpush.bf16.msrb.mxu0 %v10063_v61 }
 0x386   :  { %v13860_v10 = vadd.f32 %v3155_v24, %v3127_v37  ;;  %v12115_v25 = vld [vmem:[#allocation10 + $0x4dc] sm:$0xf]  ;;  %v9263_v24 = vor.u32 %v11995_v40, %v9260_v31  ;;  %v9487_v27 = vor.u32 %v12051_v19, %v9484_v41  ;;  %v9999_v41 = vor.u32 %v12179_v49, %v9996_v50 }
 0x387   :  { %v3157_v63 = vpop.f32.mrf.mxu0  ;;  %v9740_v33 = vld [vmem:[#allocation10 + $0x4f8] sm:$0xf0] }
 0x388   :  { %16215 = vst [vmem:[#allocation58_spill] sm:$0xff] %v13860_v10  ;;  %v12187_v39 = vld [vmem:[#allocation10 + $0x71c] sm:$0xf]  ;;  %v9743_v35 = vor.u32 %v12115_v25, %v9740_v33  ;;  %3405 = vmatpush.bf16.msrb.mxu1 %v9263_v24 }
 0x389   :  { %v3099_v18 = vpop.f32.mrf.mxu2  ;;  %v3128_v28 = vpop.f32.mrf.mxu3  ;;  %v10028_v56 = vld [vmem:[#allocation10 + $0x738] sm:$0xf0]  ;;  %3435 = vmatpush.bf16.msra.mxu2 %v9487_v27 }
 0x38a   :  { %v3100_v59 = vadd.f32 %v3099_v18, %v3070_v55  ;;  %v11987_v22 = vld [vmem:[#allocation10 + $0xdc] sm:$0xf]  ;;  %v3073_v37 = vpop.f32.mrf.mxu1  ;;  %v10031_v6 = vor.u32 %v12187_v39, %v10028_v56  ;;  %3464 = vmatpush.bf16.msra.mxu3 %v9743_v35 }
 0x38b   :  { %v9228_v1 = vld [vmem:[#allocation10 + $0xf8] sm:$0xf0] }
 0x38c   :  { %v3129_v48 = vadd.f32 %v3128_v28, %v3100_v59  ;;  %v12043_v54 = vld [vmem:[#allocation10 + $0x29c] sm:$0xf]  ;;  %v9231_v31 = vor.u32 %v11987_v22, %v9228_v1  ;;  %3492 = vmatpush.bf16.msrb.mxu0 %v10031_v6 }
 0x38d   :  { %v9452_v7 = vld [vmem:[#allocation10 + $0x2b8] sm:$0xf0]  ;;  %3304 = vmatmul.bf16.gmra.mxu1 %v13630_v30 }
 0x38e   :  { %3333 = vmatmul.bf16.gmra.mxu2 %v13635_v53  ;;  %3362 = vmatmul.bf16.gmra.mxu3 %v13642_v9  ;;  %v12107_v40 = vld [vmem:[#allocation10 + $0x49c] sm:$0xf]  ;;  %v13864_v55 = vadd.f32 %v3157_v63, %v3129_v48  ;;  %v9455_v58 = vor.u32 %v12043_v54, %v9452_v7 }
 0x38f   :  { %v3160_v43 = vpop.f32.mrf.mxu0  ;;  %v9708_v10 = vld [vmem:[#allocation10 + $0x4b8] sm:$0xf0]  ;;  %3406 = vmatpush.bf16.msrb.mxu1 %v9231_v31 }
 0x390   :  { %16216 = vst [vmem:[#allocation59_spill] sm:$0xff] %v13864_v55  ;;  %v11979_v57 = vld [vmem:[#allocation10 + $0x9c] sm:$0xf]  ;;  %v9711_v19 = vor.u32 %v12107_v40, %v9708_v10  ;;  %3436 = vmatpush.bf16.msra.mxu2 %v9455_v58  ;;  %3493 = vmatpush.bf16.msrb.mxu0 %v9999_v41 }
 0x391   :  { %v9196_v61 = vld [vmem:[#allocation10 + $0xb8] sm:$0xf0]  ;;  %v3102_v24 = vpop.f32.mrf.mxu2  ;;  %v3131_v33 = vpop.f32.mrf.mxu3 }
 0x392   :  { %3391 = vmatmul.bf16.gmra.mxu0 %v13666_v36  ;;  %v12035_v25 = vld [vmem:[#allocation10 + $0x25c] sm:$0xf]  ;;  %v9199_v63 = vor.u32 %v11979_v57, %v9196_v61  ;;  %v3103_v22 = vadd.f32 %v3102_v24, %v3073_v37  ;;  %v3075_v55 = vpop.f32.mrf.mxu1  ;;  %3465 = vmatpush.bf16.msra.mxu3 %v9711_v19 }
 0x393   :  { %v9420_v18 = vld [vmem:[#allocation10 + $0x278] sm:$0xf0] }
 0x394   :  { %v12099_v28 = vld [vmem:[#allocation10 + $0x45c] sm:$0xf]  ;;  %v9423_v27 = vor.u32 %v12035_v25, %v9420_v18  ;;  %v3132_v35 = vadd.f32 %v3131_v33, %v3103_v22  ;;  %3407 = vmatpush.bf16.msrb.mxu1 %v9199_v63 }
 0x395   :  { %v9676_v39 = vld [vmem:[#allocation10 + $0x478] sm:$0xf0] }
 0x396   :  { %v12171_v56 = vld [vmem:[#allocation10 + $0x69c] sm:$0xf]  ;;  %v9679_v50 = vor.u32 %v12099_v28, %v9676_v39  ;;  %v13868_v37 = vadd.f32 %v3160_v43, %v3132_v35  ;;  %3437 = vmatpush.bf16.msra.mxu2 %v9423_v27 }
 0x397   :  { %v9964_v59 = vld [vmem:[#allocation10 + $0x6b8] sm:$0xf0]  ;;  %v3162_v6 = vpop.f32.mrf.mxu0 }
 0x398   :  { %v11971_v1 = vld [vmem:[#allocation10 + $0x5c] sm:$0xf]  ;;  %v9967_v49 = vor.u32 %v12171_v56, %v9964_v59  ;;  %16217 = vst [vmem:[#allocation60_spill] sm:$0xff] %v13868_v37  ;;  %3466 = vmatpush.bf16.msra.mxu3 %v9679_v50 }
 0x399   :  { %v9164_v48 = vld [vmem:[#allocation10 + $0x78] sm:$0xf0]  ;;  %v3104_v25 = vpop.f32.mrf.mxu2  ;;  %v3133_v18 = vpop.f32.mrf.mxu3 }
 0x39a   :  { %v12027_v10 = vld [vmem:[#allocation10 + $0x21c] sm:$0xf]  ;;  %v9167_v40 = vor.u32 %v11971_v1, %v9164_v48  ;;  %3494 = vmatpush.bf16.msrb.mxu0 %v9967_v49  ;;  %v3105_v28 = vadd.f32 %v3104_v25, %v3075_v55  ;;  %v3078_v24 = vpop.f32.mrf.mxu1 }
 0x39b   :  { %v9388_v54 = vld [vmem:[#allocation10 + $0x238] sm:$0xf0] }
 0x39c   :  { %v12163_v7 = vld [vmem:[#allocation10 + $0x65c] sm:$0xf]  ;;  %v9391_v58 = vor.u32 %v12027_v10, %v9388_v54  ;;  %3408 = vmatpush.bf16.msrb.mxu1 %v9167_v40  ;;  %v3134_v33 = vadd.f32 %v3133_v18, %v3105_v28 }
 0x39d   :  { %v9932_v31 = vld [vmem:[#allocation10 + $0x678] sm:$0xf0]  ;;  %3309 = vmatmul.bf16.gmra.mxu1 %v13683_v2 }
 0x39e   :  { %v12091_v57 = vld [vmem:[#allocation10 + $0x41c] sm:$0xf]  ;;  %3338 = vmatmul.bf16.gmra.mxu2 %v13692_v15  ;;  %v9935_v19 = vor.u32 %v12163_v7, %v9932_v31  ;;  %3367 = vmatmul.bf16.gmra.mxu3 %v13694_v8  ;;  %v13872_v43 = vadd.f32 %v3162_v6, %v3134_v33 }
 0x39f   :  { %v9644_v61 = vld [vmem:[#allocation10 + $0x438] sm:$0xf0]  ;;  %3438 = vmatpush.bf16.msra.mxu2 %v9391_v58  ;;  %v3165_v63 = vpop.f32.mrf.mxu0 }
 0x3a0   :  { %v9647_v41 = vor.u32 %v12091_v57, %v9644_v61  ;;  %3495 = vmatpush.bf16.msrb.mxu0 %v9935_v19  ;;  %16218 = vst [vmem:[#allocation61_spill] sm:$0xff] %v13872_v43  ;;  %v11963_v55 = vld [vmem:[#allocation10 + $0x1c] sm:$0xf] }
 0x3a1   :  { %v3107_v39 = vpop.f32.mrf.mxu2  ;;  %v3136_v56 = vpop.f32.mrf.mxu3  ;;  %v9132_v35 = vld [vmem:[#allocation10 + $0x38] sm:$0xf0] }
 0x3a2   :  { %3467 = vmatpush.bf16.msra.mxu3 %v9647_v41  ;;  %3396 = vmatmul.bf16.gmra.mxu0 %v13698_v5  ;;  %v3108_v59 = vadd.f32 %v3107_v39, %v3078_v24  ;;  %v3080_v22 = vpop.f32.mrf.mxu1  ;;  %v12155_v50 = vld [vmem:[#allocation10 + $0x61c] sm:$0xf]  ;;  %v9135_v10 = vor.u32 %v11963_v55, %v9132_v35 }
 0x3a3   :  { %v9900_v54 = vld [vmem:[#allocation10 + $0x638] sm:$0xf0] }
 0x3a4   :  { %v3137_v1 = vadd.f32 %v3136_v56, %v3108_v59  ;;  %v9903_v40 = vor.u32 %v12155_v50, %v9900_v54  ;;  %3409 = vmatpush.bf16.msrb.mxu1 %v9135_v10 }
 0x3a6   :  { %v13876_v27 = vadd.f32 %v3165_v63, %v3137_v1  ;;  %3496 = vmatpush.bf16.msrb.mxu0 %v9903_v40 }
 0x3a7   :  { %v3167_v48 = vpop.f32.mrf.mxu0 }
 0x3a8   :  { %16219 = vst [vmem:[#allocation62_spill] sm:$0xff] %v13876_v27 }
 0x3a9   :  { %v3109_v49 = vpop.f32.mrf.mxu2  ;;  %v3138_v6 = vpop.f32.mrf.mxu3 }
 0x3aa   :  { %v3110_v7 = vadd.f32 %v3109_v49, %v3080_v22  ;;  %v3179_v31 = vpop.f32.mrf.mxu1 }
 0x3ac   :  { %v3139_v57 = vadd.f32 %v3138_v6, %v3110_v7 }
 0x3ad   :  { %3410 = vmatmul.bf16.vlgmr.msrb.gmra.mxu1 %v13534_v17 }
 0x3ae   :  { %3439 = vmatmul.bf16.vlgmr.msra.gmra.mxu2 %v13541_v11  ;;  %3468 = vmatmul.bf16.vlgmr.msra.gmra.mxu3 %v13543_v3  ;;  %v13880_v58 = vadd.f32 %v3167_v48, %v3139_v57 }
 0x3af   :  { %v3266_v61 = vpop.f32.mrf.mxu0 }
 0x3b0   :  { %16220 = vst [vmem:[#allocation63_spill] sm:$0xff] %v13880_v58 }
 0x3b1   :  { %v3208_v11 = vpop.f32.mrf.mxu2  ;;  %v3237_v19 = vpop.f32.mrf.mxu3 }
 0x3b2   :  { %3497 = vmatmul.bf16.vlgmr.msrb.gmra.mxu0 %v13551_v14  ;;  %v3209_v41 = vadd.f32 %v3208_v11, %v3179_v31  ;;  %v13884_v25 = vpop.f32.mrf.mxu1 }
 0x3b4   :  { %v3238_v18 = vadd.f32 %v3237_v19, %v3209_v41 }
 0x3b6   :  { %v13888_v28 = vadd.f32 %v3266_v61, %v3238_v18 }
 0x3b7   :  { %v13886_v3 = vpop.f32.mrf.mxu0 }
 0x3b8   :  { %16221 = vst [vmem:[#allocation64_spill] sm:$0xff] %v13888_v28 }
 0x3b9   :  { %v13891_v24 = vpop.f32.mrf.mxu2  ;;  %v13893_v33 = vpop.f32.mrf.mxu3 }
 0x3ba   :  { %v3184_v17 = vpop.f32.mrf.mxu1 }
 0x3bd   :  { %3415 = vmatmul.bf16.gmra.mxu1 %v13570_v46 }
 0x3be   :  { %3444 = vmatmul.bf16.gmra.mxu2 %v13579_v16  ;;  %3473 = vmatmul.bf16.gmra.mxu3 %v13591_v29 }
 0x3bf   :  { %v3271_v14 = vpop.f32.mrf.mxu0 }
 0x3c1   :  { %v3213_v63 = vpop.f32.mrf.mxu2  ;;  %v3242_v39 = vpop.f32.mrf.mxu3 }
 0x3c2   :  { %3502 = vmatmul.bf16.gmra.mxu0 %v13600_v38  ;;  %v3214_v56 = vadd.f32 %v3213_v63, %v3184_v17  ;;  %v13898_v59 = vpop.f32.mrf.mxu1 }
 0x3c4   :  { %v3243_v22 = vadd.f32 %v3242_v39, %v3214_v56 }
 0x3c6   :  { %v13902_v16 = vadd.f32 %v3271_v14, %v3243_v22 }
 0x3c7   :  { %v13900_v1 = vpop.f32.mrf.mxu0 }
 0x3c8   :  { %16222 = vst [vmem:[#allocation65_spill] sm:$0xff] %v13902_v16 }
 0x3c9   :  { %v13905_v48 = vpop.f32.mrf.mxu2  ;;  %v13907_v29 = vpop.f32.mrf.mxu3 }
 0x3ca   :  { %v3189_v46 = vpop.f32.mrf.mxu1 }
 0x3cd   :  { %3420 = vmatmul.bf16.gmra.mxu1 %v13630_v30 }
 0x3ce   :  { %3449 = vmatmul.bf16.gmra.mxu2 %v13635_v53  ;;  %3478 = vmatmul.bf16.gmra.mxu3 %v13642_v9 }
 0x3cf   :  { %v3276_v38 = vpop.f32.mrf.mxu0 }
 0x3d1   :  { %v3218_v55 = vpop.f32.mrf.mxu2  ;;  %v3247_v35 = vpop.f32.mrf.mxu3 }
 0x3d2   :  { %3507 = vmatmul.bf16.gmra.mxu0 %v13666_v36  ;;  %v3219_v50 = vadd.f32 %v3218_v55, %v3189_v46  ;;  %v13912_v49 = vpop.f32.mrf.mxu1 }
 0x3d4   :  { %v3248_v6 = vadd.f32 %v3247_v35, %v3219_v50 }
 0x3d6   :  { %v13916_v53 = vadd.f32 %v3276_v38, %v3248_v6 }
 0x3d7   :  { %v13914_v10 = vpop.f32.mrf.mxu0 }
 0x3d8   :  { %16223 = vst [vmem:[#allocation66_spill] sm:$0xff] %v13916_v53 }
 0x3d9   :  { %v13919_v54 = vpop.f32.mrf.mxu2  ;;  %v13921_v9 = vpop.f32.mrf.mxu3 }
 0x3da   :  { %v3194_v30 = vpop.f32.mrf.mxu1 }
 0x3dd   :  { %3425 = vmatmul.bf16.gmra.mxu1 %v13683_v2 }
 0x3de   :  { %3454 = vmatmul.bf16.gmra.mxu2 %v13692_v15  ;;  %3483 = vmatmul.bf16.gmra.mxu3 %v13694_v8 }
 0x3df   :  { %v3281_v36 = vpop.f32.mrf.mxu0 }
 0x3e1   :  { %v3223_v7 = vpop.f32.mrf.mxu2  ;;  %v3252_v40 = vpop.f32.mrf.mxu3 }
 0x3e2   :  { %3512 = vmatmul.bf16.gmra.mxu0 %v13698_v5  ;;  %v3224_v31 = vadd.f32 %v3223_v7, %v3194_v30  ;;  %v13926_v57 = vpop.f32.mrf.mxu1 }
 0x3e4   :  { %v3253_v61 = vadd.f32 %v3252_v40, %v3224_v31 }
 0x3e6   :  { %v13930_v15 = vadd.f32 %v3281_v36, %v3253_v61 }
 0x3e7   :  { %v13928_v11 = vpop.f32.mrf.mxu0 }
 0x3e8   :  { %16224 = vst [vmem:[#allocation67_spill] sm:$0xff] %v13928_v11 }
 0x3e9   :  { %16225 = vst [vmem:[#allocation68_spill] sm:$0xff] %v13930_v15  ;;  %v13932_v19 = vpop.f32.mrf.mxu2  ;;  %v13934_v41 = vpop.f32.mrf.mxu3  ;;  %v3630_v15 = vmul.f32 %v13721_v21, %v13721_v21 }
 0x3ea   :  { %v3295_v8 = vpop.f32.mrf.mxu1 }
 0x3ef   :  { %v3382_v18 = vpop.f32.mrf.mxu0 }
 0x3f1   :  { %v3324_v17 = vpop.f32.mrf.mxu2  ;;  %v3353_v2 = vpop.f32.mrf.mxu3 }
 0x3f2   :  { %v3325_v14 = vadd.f32 %v3324_v17, %v3295_v8  ;;  %v13936_v5 = vpop.f32.mrf.mxu1  ;;  %v3518_v17 = vadd.f32 %v13724_v44, %v13721_v21 }
 0x3f4   :  { %v3354_v63 = vadd.f32 %v3353_v2, %v3325_v14 }
 0x3f6   :  { %v13940_v56 = vadd.f32 %v3382_v18, %v3354_v63 }
 0x3f7   :  { %v13938_v39 = vpop.f32.mrf.mxu0 }
 0x3f8   :  { %16226 = vst [vmem:[#allocation69_spill] sm:$0xff] %v13940_v56 }
 0x3f9   :  { %v13942_v22 = vpop.f32.mrf.mxu2  ;;  %v13944_v46 = vpop.f32.mrf.mxu3 }
 0x3fa   :  { %v3300_v38 = vpop.f32.mrf.mxu1 }
 0x3ff   :  { %v3387_v55 = vpop.f32.mrf.mxu0 }
 0x401   :  { %v3329_v35 = vpop.f32.mrf.mxu2  ;;  %v3358_v50 = vpop.f32.mrf.mxu3 }
 0x402   :  { %v3330_v6 = vadd.f32 %v3329_v35, %v3300_v38  ;;  %v13946_v30 = vpop.f32.mrf.mxu1  ;;  %v3638_v38 = vmul.f32 %v13724_v44, %v13724_v44  ;;  %v3519_v35 = vadd.f32 %v3518_v17, %v13729_v60  ;;  %v3631_v17 = vmul.f32 %v13753_v4, %v13753_v4 }
 0x404   :  { %v3359_v36 = vadd.f32 %v3358_v50, %v3330_v6  ;;  %v3639_v6 = vmul.f32 %v13757_v47, %v13757_v47 }
 0x406   :  { %v13950_v40 = vadd.f32 %v3387_v55, %v3359_v36  ;;  %v3531_v55 = vadd.f32 %v13757_v47, %v13753_v4 }
 0x407   :  { %v13948_v7 = vpop.f32.mrf.mxu0 }
 0x408   :  { %16227 = vst [vmem:[#allocation70_spill] sm:$0xff] %v13950_v40  ;;  %v3532_v44 = vadd.f32 %v3531_v55, %v13761_v23  ;;  %v3647_v40 = vmul.f32 %v13761_v23, %v13761_v23  ;;  %v3662_v55 = vmul.f32 %v13737_v34, %v13737_v34  ;;  %v16232_v23 = vld [vmem:[#allocation38_spill] sm:$0xff] }
 0x409   :  { %v13952_v31 = vpop.f32.mrf.mxu2  ;;  %v13954_v61 = vpop.f32.mrf.mxu3 }
 0x40a   :  { %v3305_v8 = vpop.f32.mrf.mxu1 }
 0x40f   :  { %v3392_v18 = vpop.f32.mrf.mxu0 }
 0x411   :  { %v3334_v2 = vpop.f32.mrf.mxu2  ;;  %v3363_v14 = vpop.f32.mrf.mxu3 }
 0x412   :  { %v3335_v63 = vadd.f32 %v3334_v2, %v3305_v8  ;;  %v13961_v50 = vpop.f32.mrf.mxu1  ;;  %v3646_v8 = vmul.f32 %v13729_v60, %v13729_v60  ;;  %v3520_v2 = vadd.f32 %v3519_v35, %v13732_v45  ;;  %v3533_v60 = vadd.f32 %v3532_v44, %v13765_v0 }
 0x413   :  { %v3655_v35 = vmul.f32 %v13765_v0, %v13765_v0 }
 0x414   :  { %v3364_v36 = vadd.f32 %v3363_v14, %v3335_v63  ;;  %v3694_v14 = vadd.f32 %v3638_v38, %v3630_v15  ;;  %v3654_v63 = vmul.f32 %v13732_v45, %v13732_v45  ;;  %v3521_v21 = vadd.f32 %v3520_v2, %v13737_v34 }
 0x415   :  { %v3670_v2 = vmul.f32 %v13740_v26, %v13740_v26 }
 0x416   :  { %v13979_v47 = vadd.f32 %v3392_v18, %v3364_v36  ;;  %v3695_v4 = vadd.f32 %v3694_v14, %v3646_v8  ;;  %v3522_v15 = vadd.f32 %v3521_v21, %v13740_v26  ;;  %v3534_v36 = vadd.f32 %v3533_v60, %v13769_v13 }
 0x417   :  { %v13967_v58 = vpop.f32.mrf.mxu0  ;;  %v3544_v8 = vadd.f32 %v13791_v20, %v13786_v52  ;;  %v3671_v21 = vmul.f32 %v13773_v32, %v13773_v32 }
 0x418   :  { %16228 = vst [vmem:[#allocation71_spill] sm:$0xff] %v13967_v58  ;;  %v3707_v58 = vadd.f32 %v3639_v6, %v3631_v17  ;;  %v3663_v6 = vmul.f32 %v13769_v13, %v13769_v13  ;;  %v3696_v44 = vadd.f32 %v3695_v4, %v3654_v63  ;;  %v3523_v14 = vadd.f32 %v3522_v15, %v13745_v12  ;;  %v16231_v63 = vld [vmem:[#allocation26_spill] sm:$0xff] }
 0x419   :  { %16229 = vst [vmem:[#allocation72_spill] sm:$0xff] %v13979_v47  ;;  %v13989_v27 = vpop.f32.mrf.mxu2  ;;  %v13991_v18 = vpop.f32.mrf.mxu3  ;;  %v3535_v0 = vadd.f32 %v3534_v36, %v13773_v32  ;;  %v3678_v4 = vmul.f32 %v13745_v12, %v13745_v12  ;;  %v3640_v15 = vmul.f32 %v13791_v20, %v13791_v20 }
 0x41a   :  { %16230 = vst [vmem:[#allocation73_spill] sm:$0xff] %v13991_v18  ;;  %v3708_v38 = vadd.f32 %v3707_v58, %v3647_v40  ;;  %v3310_v17 = vpop.f32.mrf.mxu1  ;;  %v3697_v58 = vadd.f32 %v3696_v44, %v3662_v55  ;;  %v3545_v40 = vadd.f32 %v3544_v8, %v13797_v62  ;;  %v3524_v13 = vadd.f32 %v3523_v14, %v16231_v63  ;;  %v16233_v8 = vld [vmem:[#allocation39_spill] sm:$0xff] }
 0x41b   :  { %v3536_v45 = vadd.f32 %v3535_v0, %v16232_v23  ;;  %v3686_v55 = vmul.f32 %v16231_v63, %v16231_v63  ;;  %v3632_v0 = vmul.f32 %v13786_v52, %v13786_v52 }
 0x41c   :  { %v3709_v34 = vadd.f32 %v3708_v38, %v3655_v35  ;;  %v3679_v35 = vmul.f32 %v16232_v23, %v16232_v23  ;;  %v3546_v38 = vadd.f32 %v3545_v40, %v13800_v42  ;;  %v3698_v36 = vadd.f32 %v3697_v58, %v3670_v2 }
 0x41d   :  { %v3537_v12 = vadd.f32 %v3536_v45, %v16233_v8  ;;  %v3525_v58 = vrot.slane %v3524_v13, 4  ;;  %v3656_v45 = vmul.f32 %v13800_v42, %v13800_v42  ;;  %v16242_v42 = vld [vmem:[#allocation51_spill] sm:$0xff] }
 0x41e   :  { %v3710_v26 = vadd.f32 %v3709_v34, %v3663_v6  ;;  %v3687_v34 = vmul.f32 %v16233_v8, %v16233_v8  ;;  %v3648_v6 = vmul.f32 %v13797_v62, %v13797_v62  ;;  %v3547_v14 = vadd.f32 %v3546_v38, %v13805_v51  ;;  %v16235_v62 = vld [vmem:[#allocation49_spill] sm:$0xff] }
 0x41f   :  { %v3397_v60 = vpop.f32.mrf.mxu0  ;;  %v3699_v2 = vadd.f32 %v3698_v36, %v3678_v4  ;;  %v3538_v47 = vrot.slane %v3537_v12, 4  ;;  %v3641_v38 = vmul.f32 %v16235_v62, %v16235_v62  ;;  %v16238_v36 = vld [vmem:[#allocation48_spill] sm:$0xff] }
 0x420   :  { %v3711_v44 = vadd.f32 %v3710_v26, %v3671_v21  ;;  %v3720_v26 = vadd.f32 %v3640_v15, %v3632_v0  ;;  %v16234_v21 = vld [vmem:[#allocation45_spill] sm:$0xff]  ;;  %v16239_v0 = vld [vmem:[#allocation50_spill] sm:$0xff] }
 0x421   :  { %v3339_v23 = vpop.f32.mrf.mxu2  ;;  %v3368_v40 = vpop.f32.mrf.mxu3  ;;  %v3548_v8 = vadd.f32 %v3547_v14, %v16234_v21  ;;  %v14030_v52 = vadd.f32 %v3699_v2, %v3686_v55  ;;  %v3649_v55 = vmul.f32 %v16239_v0, %v16239_v0  ;;  %v3211_v14 = vadd.f32 %v13891_v24, %v13884_v25 }
 0x422   :  { %v3340_v32 = vadd.f32 %v3339_v23, %v3310_v17  ;;  %v3712_v63 = vadd.f32 %v3711_v44, %v3679_v35  ;;  %v14028_v20 = vpop.f32.mrf.mxu1  ;;  %v3721_v23 = vadd.f32 %v3720_v26, %v3648_v6  ;;  %v3664_v17 = vmul.f32 %v13805_v51, %v13805_v51  ;;  %v16237_v35 = vld [vmem:[#allocation46_spill] sm:$0xff] }
 0x423   :  { %v3549_v15 = vadd.f32 %v3548_v8, %v16237_v35  ;;  %v3633_v44 = vmul.f32 %v16238_v36, %v16238_v36  ;;  %v3557_v8 = vadd.f32 %v16235_v62, %v16238_v36  ;;  %v14053_v6 = vadd.f32 %v3538_v47, %v3537_v12  ;;  %v16243_v12 = vld [vmem:[#allocation52_spill] sm:$0xff] }
 0x424   :  { %v3369_v11 = vadd.f32 %v3368_v40, %v3340_v32  ;;  %v3713_v4 = vadd.f32 %v3712_v63, %v3687_v34  ;;  %v14047_v32 = vadd.f32 %v3525_v58, %v3524_v13  ;;  %v3722_v63 = vadd.f32 %v3721_v23, %v3656_v45  ;;  %v16241_v40 = vld [vmem:[#allocation47_spill] sm:$0xff] }
 0x425   :  { %v3672_v34 = vmul.f32 %v16234_v21, %v16234_v21  ;;  %v3550_v26 = vadd.f32 %v3549_v15, %v16241_v40  ;;  %v3733_v51 = vadd.f32 %v3641_v38, %v3633_v44  ;;  %v3680_v13 = vmul.f32 %v16237_v35, %v16237_v35  ;;  %v16244_v21 = vld [vmem:[#allocation53_spill] sm:$0xff] }
 0x426   :  { %v14045_v2 = vadd.f32 %v3397_v60, %v3369_v11  ;;  %v3714_v25 = vrot.slane %v3713_v4, 4  ;;  %v3723_v24 = vadd.f32 %v3722_v63, %v3664_v17  ;;  %v3558_v11 = vadd.f32 %v3557_v8, %v16239_v0 }
 0x427   :  { %v14034_v18 = vpop.f32.mrf.mxu0  ;;  %v3734_v45 = vadd.f32 %v3733_v51, %v3649_v55  ;;  %v3665_v47 = vmul.f32 %v16243_v12, %v16243_v12  ;;  %v3240_v38 = vadd.f32 %v13893_v33, %v3211_v14  ;;  %v3216_v23 = vadd.f32 %v13905_v48, %v13898_v59 }
 0x428   :  { %16236 = vst [vmem:[#allocation49_spill] sm:$0xff] %v14034_v18  ;;  %v3657_v18 = vmul.f32 %v16242_v42, %v16242_v42  ;;  %v3724_v15 = vadd.f32 %v3723_v24, %v3672_v34  ;;  %v3688_v44 = vmul.f32 %v16241_v40, %v16241_v40  ;;  %v3559_v63 = vadd.f32 %v3558_v11, %v16242_v42  ;;  %v16245_v24 = vld [vmem:[#allocation57_spill] sm:$0xff] }
 0x429   :  { %16240 = vst [vmem:[#allocation48_spill] sm:$0xff] %v14045_v2  ;;  %v14061_v60 = vpop.f32.mrf.mxu2  ;;  %v14063_v58 = vpop.f32.mrf.mxu3  ;;  %v3551_v55 = vrot.slane %v3550_v26, 4  ;;  %v3673_v33 = vmul.f32 %v16244_v21, %v16244_v21  ;;  %v14081_v59 = vadd.f32 %v3714_v25, %v3713_v4  ;;  %v3642_v17 = vmul.f32 %v16245_v24, %v16245_v24  ;;  %v16247_v25 = vld [vmem:[#allocation56_spill] sm:$0xff] }
 0x42a   :  { %v14074_v8 = vpop.f32.mrf.mxu1  ;;  %v3735_v35 = vadd.f32 %v3734_v45, %v3657_v18  ;;  %v3725_v48 = vadd.f32 %v3724_v15, %v3680_v13  ;;  %v3560_v34 = vadd.f32 %v3559_v63, %v16243_v12  ;;  %v14087_v40 = vadd.f32 %v13886_v3, %v3240_v38  ;;  %v16248_v15 = vld [vmem:[#allocation58_spill] sm:$0xff] }
 0x42b   :  { %v3245_v51 = vadd.f32 %v13907_v29, %v3216_v23  ;;  %v3327_v18 = vadd.f32 %v13942_v22, %v13936_v5  ;;  %v3634_v13 = vmul.f32 %v16247_v25, %v16247_v25  ;;  %v3650_v63 = vmul.f32 %v16248_v15, %v16248_v15  ;;  %v16249_v5 = vld [vmem:[#allocation54_spill] sm:$0xff]  ;;  %v16250_v23 = vld [vmem:[#allocation59_spill] sm:$0xff] }
 0x42c   :  { %v3736_v11 = vadd.f32 %v3735_v35, %v3665_v47  ;;  %16246 = vst [vmem:[#allocation50_spill] sm:$0xff] %v14087_v40  ;;  %v14092_v45 = vadd.f32 %v3725_v48, %v3688_v44  ;;  %v3561_v4 = vadd.f32 %v3560_v34, %v16244_v21  ;;  %v14099_v12 = vadd.f32 %v3551_v55, %v3550_v26 }
 0x42d   :  { %v3570_v3 = vadd.f32 %v16245_v24, %v16247_v25  ;;  %v3221_v29 = vadd.f32 %v13919_v54, %v13912_v49  ;;  %v3681_v47 = vmul.f32 %v16249_v5, %v16249_v5  ;;  %v3746_v38 = vadd.f32 %v3642_v17, %v3634_v13 }
 0x42e   :  { %v3737_v35 = vadd.f32 %v3736_v11, %v3673_v33  ;;  %v3562_v22 = vadd.f32 %v3561_v4, %v16249_v5  ;;  %v3658_v44 = vmul.f32 %v16250_v23, %v16250_v23  ;;  %v3643_v33 = vmul.f32 %v14087_v40, %v14087_v40 }
 0x42f   :  { %v14079_v14 = vpop.f32.mrf.mxu0  ;;  %v3571_v55 = vadd.f32 %v3570_v3, %v16248_v15  ;;  %v14118_v49 = vadd.f32 %v13900_v1, %v3245_v51  ;;  %v3356_v54 = vadd.f32 %v13944_v46, %v3327_v18  ;;  %v3747_v34 = vadd.f32 %v3746_v38, %v3650_v63 }
 0x430   :  { %v3666_v17 = vmul.f32 %v13868_v37, %v13868_v37  ;;  %v3635_v11 = vmul.f32 %v13888_v28, %v13888_v28  ;;  %v3332_v4 = vadd.f32 %v13952_v31, %v13946_v30  ;;  %v3583_v3 = vadd.f32 %v14087_v40, %v13888_v28 }
 0x431   :  { %v14110_v48 = vpop.f32.mrf.mxu2  ;;  %v14112_v26 = vpop.f32.mrf.mxu3  ;;  %16251 = vst [vmem:[#allocation51_spill] sm:$0xff] %v14118_v49  ;;  %v3651_v1 = vmul.f32 %v13902_v16, %v13902_v16  ;;  %v3250_v46 = vadd.f32 %v13921_v9, %v3221_v29  ;;  %v3226_v51 = vadd.f32 %v13932_v19, %v13926_v57  ;;  %v3738_v63 = vadd.f32 %v3737_v35, %v3681_v47 }
 0x432   :  { %v14127_v13 = vpop.f32.mrf.mxu1  ;;  %v3572_v38 = vadd.f32 %v3571_v55, %v16250_v23  ;;  %v3748_v15 = vadd.f32 %v3747_v34, %v3658_v44  ;;  %v3674_v30 = vmul.f32 %v13872_v43, %v13872_v43  ;;  %v3759_v31 = vadd.f32 %v3643_v33, %v3635_v11  ;;  %v16254_v34 = vld [vmem:[#allocation55_spill] sm:$0xff] }
 0x433   :  { %v3584_v40 = vadd.f32 %v3583_v3, %v13902_v16  ;;  %v3659_v28 = vmul.f32 %v14118_v49, %v14118_v49  ;;  %v14145_v9 = vadd.f32 %v13938_v39, %v3356_v54  ;;  %v3361_v35 = vadd.f32 %v13954_v61, %v3332_v4  ;;  %v16256_v4 = vld [vmem:[#allocation73_spill] sm:$0xff] }
 0x434   :  { %v3573_v57 = vadd.f32 %v3572_v38, %v13868_v37  ;;  %v3749_v19 = vadd.f32 %v3748_v15, %v3666_v17  ;;  %v3337_v29 = vadd.f32 %v13989_v27, %v13961_v50  ;;  %v3760_v47 = vadd.f32 %v3759_v31, %v3651_v1  ;;  %v16257_v38 = vld [vmem:[#allocation67_spill] sm:$0xff] }
 0x435   :  { %16252 = vst [vmem:[#allocation53_spill] sm:$0xff] %v14145_v9  ;;  %v3585_v44 = vadd.f32 %v3584_v40, %v14118_v49  ;;  %v14153_v55 = vadd.f32 %v13914_v10, %v3250_v46  ;;  %v3255_v33 = vadd.f32 %v13934_v41, %v3226_v51  ;;  %v14157_v11 = vadd.f32 %v3562_v22, %v16254_v34 }
 0x436   :  { %v3689_v39 = vmul.f32 %v16254_v34, %v16254_v34  ;;  %v3574_v15 = vadd.f32 %v3573_v57, %v13872_v43  ;;  %v3750_v61 = vadd.f32 %v3749_v19, %v3674_v30  ;;  %v3761_v50 = vadd.f32 %v3760_v47, %v3659_v28  ;;  %v16259_v57 = vld [vmem:[#allocation62_spill] sm:$0xff] }
 0x437   :  { %v14136_v18 = vpop.f32.mrf.mxu0  ;;  %16253 = vst [vmem:[#allocation54_spill] sm:$0xff] %v14153_v55  ;;  %v3586_v40 = vadd.f32 %v3585_v44, %v13916_v53  ;;  %v3667_v10 = vmul.f32 %v13916_v53, %v13916_v53  ;;  %v3644_v41 = vmul.f32 %v14145_v9, %v14145_v9  ;;  %v3596_v22 = vadd.f32 %v14145_v9, %v13940_v56  ;;  %v16261_v44 = vld [vmem:[#allocation68_spill] sm:$0xff] }
 0x438   :  { %v14174_v17 = vadd.f32 %v13948_v7, %v3361_v35  ;;  %v3366_v3 = vadd.f32 %v16256_v4, %v3337_v29  ;;  %v3342_v1 = vadd.f32 %v14061_v60, %v14028_v20  ;;  %v3675_v51 = vmul.f32 %v14153_v55, %v14153_v55  ;;  %v16260_v60 = vld [vmem:[#allocation70_spill] sm:$0xff] }
 0x439   :  { %v14162_v54 = vpop.f32.mrf.mxu2  ;;  %v14164_v27 = vpop.f32.mrf.mxu3  ;;  %v3587_v46 = vadd.f32 %v3586_v40, %v14153_v55  ;;  %v14185_v30 = vadd.f32 %v16257_v38, %v3255_v33  ;;  %v3636_v31 = vmul.f32 %v13940_v56, %v13940_v56  ;;  %v3575_v19 = vadd.f32 %v3574_v15, %v16259_v57  ;;  %v16262_v55 = vld [vmem:[#allocation71_spill] sm:$0xff] }
 0x43a   :  { %16255 = vst [vmem:[#allocation74_spill] sm:$0xff] %v14174_v17  ;;  %v14179_v28 = vpop.f32.mrf.mxu1  ;;  %v3682_v20 = vmul.f32 %v16259_v57, %v16259_v57  ;;  %v3597_v35 = vadd.f32 %v3596_v22, %v16260_v60  ;;  %v3652_v29 = vmul.f32 %v16260_v60, %v16260_v60  ;;  %v3762_v47 = vadd.f32 %v3761_v50, %v3667_v10  ;;  %v16264_v57 = vld [vmem:[#allocation63_spill] sm:$0xff] }
 0x43b   :  { %16258 = vst [vmem:[#allocation73_spill] sm:$0xff] %v14185_v30  ;;  %v3588_v40 = vadd.f32 %v3587_v46, %v16261_v44  ;;  %v3683_v33 = vmul.f32 %v16261_v44, %v16261_v44  ;;  %v3772_v4 = vadd.f32 %v3644_v41, %v3636_v31  ;;  %v3660_v15 = vmul.f32 %v14174_v17, %v14174_v17 }
 0x43c   :  { %v3598_v38 = vadd.f32 %v3597_v35, %v14174_v17  ;;  %v14204_v53 = vadd.f32 %v16262_v55, %v3366_v3  ;;  %v3371_v22 = vadd.f32 %v14063_v58, %v3342_v1  ;;  %v3576_v43 = vadd.f32 %v3575_v19, %v16264_v57  ;;  %v16265_v35 = vld [vmem:[#allocation72_spill] sm:$0xff] }
 0x43d   :  { %v3690_v50 = vmul.f32 %v16264_v57, %v16264_v57  ;;  %v3763_v10 = vadd.f32 %v3762_v47, %v3675_v51  ;;  %v3589_v46 = vadd.f32 %v3588_v40, %v14185_v30  ;;  %v3691_v41 = vmul.f32 %v14185_v30, %v14185_v30 }
 0x43e   :  { %16263 = vst [vmem:[#allocation67_spill] sm:$0xff] %v14204_v53  ;;  %v3773_v31 = vadd.f32 %v3772_v4, %v3652_v29  ;;  %v3599_v44 = vadd.f32 %v3598_v38, %v16265_v35  ;;  %v3668_v55 = vmul.f32 %v16265_v35, %v16265_v35  ;;  %v3564_v1 = vrot.slane %v14157_v11, 4  ;;  %v16266_v4 = vld [vmem:[#allocation49_spill] sm:$0xff] }
 0x43f   :  { %v14189_v7 = vpop.f32.mrf.mxu0  ;;  %v3739_v19 = vadd.f32 %v3738_v63, %v3689_v39  ;;  %v3751_v57 = vadd.f32 %v3750_v61, %v3682_v20  ;;  %v3764_v51 = vadd.f32 %v3763_v10, %v3683_v33  ;;  %v3676_v29 = vmul.f32 %v14204_v53, %v14204_v53 }
 0x440   :  { %v3774_v47 = vadd.f32 %v3773_v31, %v3660_v15  ;;  %v3600_v40 = vadd.f32 %v3599_v44, %v14204_v53  ;;  %v14225_v38 = vadd.f32 %v16266_v4, %v3371_v22  ;;  %v3727_v35 = vrot.slane %v14092_v45, 4 }
 0x441   :  { %v14216_v3 = vpop.f32.mrf.mxu2  ;;  %v14218_v58 = vpop.f32.mrf.mxu3  ;;  %v3577_v37 = vrot.slane %v3576_v43, 4  ;;  %v3752_v17 = vadd.f32 %v3751_v57, %v3690_v50  ;;  %v3590_v60 = vrot.slane %v3589_v46, 4  ;;  %v3765_v63 = vadd.f32 %v3764_v51, %v3691_v41 }
 0x442   :  { %16267 = vst [vmem:[#allocation71_spill] sm:$0xff] %v14225_v38  ;;  %v14227_v30 = vpop.f32.mrf.mxu1  ;;  %v3775_v39 = vadd.f32 %v3774_v47, %v3668_v55  ;;  %v3601_v61 = vadd.f32 %v3600_v40, %v14045_v2  ;;  %v3684_v20 = vmul.f32 %v14045_v2, %v14045_v2  ;;  %v3527_v44 = vrot.slane %v14047_v32, 2 }
 0x443   :  { %v16268_v33 = vrot.slane %v14053_v6, 2  ;;  %v3716_v22 = vrot.slane %v14081_v59, 2  ;;  %v3740_v10 = vrot.slane %v3739_v19, 4  ;;  %v3565_v57 = vadd.f32 %v3564_v1, %v14157_v11 }
 0x444   :  { %v3776_v50 = vadd.f32 %v3775_v39, %v3676_v29  ;;  %v3602_v41 = vadd.f32 %v3601_v61, %v14225_v38  ;;  %v3692_v31 = vmul.f32 %v14225_v38, %v14225_v38  ;;  %v16269_v55 = vrot.slane %v14030_v52, 4 }
 0x445   :  { %v3541_v15 = vadd.f32 %v16268_v33, %v14053_v6  ;;  %v3553_v47 = vrot.slane %v14099_v12, 2  ;;  %v3728_v40 = vadd.f32 %v3727_v35, %v14092_v45  ;;  %v3578_v6 = vadd.f32 %v3577_v37, %v3576_v43 }
 0x446   :  { %v3702_v51 = vadd.f32 %v16269_v55, %v14030_v52  ;;  %v3753_v4 = vrot.slane %v3752_v17, 4  ;;  %v3591_v33 = vadd.f32 %v3590_v60, %v3589_v46  ;;  %v3766_v2 = vrot.slane %v3765_v63, 4 }
 0x447   :  { %v14230_v49 = vpop.f32.mrf.mxu0  ;;  %v3777_v53 = vadd.f32 %v3776_v50, %v3684_v20  ;;  %v3542_v29 = vrot.slane %v3541_v15, 1  ;;  %v3717_v39 = vadd.f32 %v3716_v22, %v14081_v59  ;;  %v3741_v61 = vadd.f32 %v3740_v10, %v3739_v19 }
 0x448   :  { %v3566_v38 = vrot.slane %v3565_v57, 2  ;;  %v3603_v16 = vrot.slane %v3602_v41, 4  ;;  %v3528_v45 = vadd.f32 %v3527_v44, %v14047_v32  ;;  %v3703_v37 = vrot.slane %v3702_v51, 2 }
 0x449   :  { %v14249_v11 = vpop.f32.mrf.mxu2  ;;  %v14251_v1 = vpop.f32.mrf.mxu3  ;;  %v3778_v52 = vadd.f32 %v3777_v53, %v3692_v31  ;;  %v3554_v43 = vadd.f32 %v3553_v47, %v14099_v12  ;;  %v3729_v60 = vrot.slane %v3728_v40, 2  ;;  %v3579_v46 = vrot.slane %v3578_v6, 2 }
 0x44a   :  { %v14254_v55 = vpop.f32.mrf.mxu1  ;;  %v3754_v35 = vadd.f32 %v3753_v4, %v3752_v17  ;;  %v3592_v20 = vrot.slane %v3591_v33, 2  ;;  %v3767_v50 = vadd.f32 %v3766_v2, %v3765_v63  ;;  %v3543_v23 = vadd.f32 %v3542_v29, %v3541_v15 }
 0x44b   :  { %v3718_v9 = vrot.slane %v3717_v39, 1  ;;  %v3742_v56 = vrot.slane %v3741_v61, 2  ;;  %v3567_v19 = vadd.f32 %v3566_v38, %v3565_v57  ;;  %v3604_v22 = vadd.f32 %v3603_v16, %v3602_v41 }
 0x44c   :  { %v3779_v53 = vrot.slane %v3778_v52, 4  ;;  %v3529_v10 = vrot.slane %v3528_v45, 1  ;;  %v14260_v31 = vadd.f32 %v3703_v37, %v3702_v51  ;;  %v3555_v32 = vrot.slane %v3554_v43, 1 }
 0x44d   :  { %v3730_v44 = vadd.f32 %v3729_v60, %v3728_v40  ;;  %v3580_v24 = vadd.f32 %v3579_v46, %v3578_v6  ;;  %v3755_v12 = vrot.slane %v3754_v35, 2  ;;  %v3593_v47 = vadd.f32 %v3592_v20, %v3591_v33 }
 0x44e   :  { %v3768_v25 = vrot.slane %v3767_v50, 2  ;;  %v14264_v2 = vmul.f32 0.015625, %v3543_v23  ;;  %v3719_v63 = vadd.f32 %v3718_v9, %v3717_v39  ;;  %v3743_v15 = vadd.f32 %v3742_v56, %v3741_v61 }
 0x44f   :  { %v14258_v59 = vpop.f32.mrf.mxu0  ;;  %v3568_v29 = vrot.slane %v3567_v19, 1  ;;  %v3605_v38 = vrot.slane %v3604_v22, 2  ;;  %v3780_v16 = vadd.f32 %v3779_v53, %v3778_v52  ;;  %v3530_v57 = vadd.f32 %v3529_v10, %v3528_v45 }
 0x450   :  { %v3705_v41 = vrot.slane %v14260_v31, 1  ;;  %v3556_v51 = vadd.f32 %v3555_v32, %v3554_v43  ;;  %v3731_v37 = vrot.slane %v3730_v44, 1  ;;  %v3581_v40 = vrot.slane %v3580_v24, 1 }
 0x451   :  { %v3450_v17 = vpop.f32.mrf.mxu2  ;;  %v14262_v4 = vpop.f32.mrf.mxu3  ;;  %v3756_v6 = vadd.f32 %v3755_v12, %v3754_v35  ;;  %v3594_v60 = vrot.slane %v3593_v47, 1  ;;  %v3769_v33 = vadd.f32 %v3768_v25, %v3767_v50  ;;  %v3799_v20 = vmul.f32 0.015625, %v3719_v63 }
 0x452   :  { %v3423_v46 = vpop.f32.mrf.mxu1  ;;  %v3807_v23 = vmul.f32 %v14264_v2, %v14264_v2  ;;  %v3744_v34 = vrot.slane %v3743_v15, 1  ;;  %v3443_v56 = vadd.f32 %v14162_v54, %v14127_v13  ;;  %v3569_v9 = vadd.f32 %v3568_v29, %v3567_v19 }
 0x453   :  { %v3606_v39 = vadd.f32 %v3605_v38, %v3604_v22  ;;  %v3781_v61 = vrot.slane %v3780_v16, 2  ;;  %v3441_v52 = vadd.f32 %v14110_v48, %v14074_v8  ;;  %v14273_v45 = vmul.f32 0.015625, %v3530_v57 }
 0x454   :  { %v14275_v43 = vmul.f32 0.015625, %v3556_v51  ;;  %v3732_v25 = vadd.f32 %v3731_v37, %v3730_v44  ;;  %v3446_v35 = vadd.f32 %v14216_v3, %v14179_v28  ;;  %v3582_v53 = vadd.f32 %v3581_v40, %v3580_v24 }
 0x455   :  { %v3757_v10 = vrot.slane %v3756_v6, 1  ;;  %v3595_v32 = vadd.f32 %v3594_v60, %v3593_v47  ;;  %v3770_v12 = vrot.slane %v3769_v33, 1  ;;  %v3815_v19 = vsub.f32 %v3799_v20, %v3807_v23 }
 0x456   :  { %v3745_v22 = vadd.f32 %v3744_v34, %v3743_v15  ;;  %v3472_v63 = vadd.f32 %v14164_v27, %v3443_v56  ;;  %v3448_v8 = vadd.f32 %v14249_v11, %v14227_v30  ;;  %v14282_v48 = vmul.f32 0.015625, %v3569_v9 }
 0x457   :  { %v3510_v50 = vpop.f32.mrf.mxu0  ;;  %v3607_v44 = vrot.slane %v3606_v39, 1  ;;  %v3782_v29 = vadd.f32 %v3781_v61, %v3780_v16  ;;  %v3470_v28 = vadd.f32 %v14112_v26, %v3441_v52  ;;  %v3800_v3 = vmul.f32 0.015625, %v3732_v25 }
 0x458   :  { %v3808_v24 = vmul.f32 %v14275_v43, %v14275_v43  ;;  %v3475_v47 = vadd.f32 %v14218_v58, %v3446_v35  ;;  %v3451_v38 = vadd.f32 %v3450_v17, %v14254_v55  ;;  %v14289_v34 = vmul.f32 0.015625, %v3582_v53 }
 0x459   :  { %v3452_v13 = vpop.f32.mrf.mxu2  ;;  %v3481_v54 = vpop.f32.mrf.mxu3  ;;  %v3758_v27 = vadd.f32 %v3757_v10, %v3756_v6  ;;  %v14291_v15 = vmul.f32 0.015625, %v3595_v32  ;;  %v3771_v30 = vadd.f32 %v3770_v12, %v3769_v33  ;;  %v3801_v11 = vmul.f32 0.015625, %v3745_v22 }
 0x45a   :  { %v14294_v57 = vadd.f32 %v14136_v18, %v3472_v63  ;;  %v3477_v26 = vadd.f32 %v14251_v1, %v3448_v8  ;;  %v3453_v16 = vadd.f32 %v3452_v13, %v3423_v46  ;;  %v3809_v51 = vmul.f32 %v14282_v48, %v14282_v48  ;;  %v3426_v17 = vpop.f32.mrf.mxu1 }
 0x45b   :  { %v3608_v37 = vadd.f32 %v3607_v44, %v3606_v39  ;;  %v3783_v58 = vrot.slane %v3782_v29, 1  ;;  %v14300_v55 = vadd.f32 %v14079_v14, %v3470_v28  ;;  %v3823_v40 = vmax.f32 %v3815_v19, 0.0 }
 0x45c   :  { %v3816_v6 = vsub.f32 %v3800_v3, %v3808_v24  ;;  %v14303_v60 = vadd.f32 %v14189_v7, %v3475_v47  ;;  %v3480_v18 = vadd.f32 %v14262_v4, %v3451_v38  ;;  %v3802_v33 = vmul.f32 0.015625, %v3758_v27 }
 0x45d   :  { %v3810_v1 = vmul.f32 %v14289_v34, %v14289_v34  ;;  %v3803_v46 = vmul.f32 0.015625, %v3771_v30  ;;  %v3811_v20 = vmul.f32 %v14291_v15, %v14291_v15  ;;  %v3645_v14 = vmul.f32 %v14294_v57, %v14294_v57 }
 0x45e   :  { %v14313_v9 = vadd.f32 %v14230_v49, %v3477_v26  ;;  %v3482_v7 = vadd.f32 %v3481_v54, %v3453_v16  ;;  %v3817_v61 = vsub.f32 %v3801_v11, %v3809_v51  ;;  %v14315_v4 = vmul.f32 0.015625, %v3608_v37 }
 0x45f   :  { %v3784_v52 = vadd.f32 %v3783_v58, %v3782_v29  ;;  %v3637_v25 = vmul.f32 %v14300_v55, %v14300_v55  ;;  %v3513_v35 = vpop.f32.mrf.mxu0  ;;  %v3609_v53 = vadd.f32 %v14294_v57, %v14300_v55  ;;  %v3653_v10 = vmul.f32 %v14303_v60, %v14303_v60 }
 0x460   :  { %v14324_v32 = vadd.f32 %v14258_v59, %v3480_v18  ;;  %v3706_v12 = vadd.f32 %v3705_v41, %v14260_v31  ;;  %v3824_v13 = vmax.f32 %v3816_v6, 0.0  ;;  %v3818_v54 = vsub.f32 %v3802_v33, %v3810_v1 }
 0x461   :  { %v3455_v23 = vpop.f32.mrf.mxu2  ;;  %v3484_v56 = vpop.f32.mrf.mxu3  ;;  %v3819_v19 = vsub.f32 %v3803_v46, %v3811_v20  ;;  %v3785_v22 = vadd.f32 %v3645_v14, %v3637_v25  ;;  %v3610_v63 = vadd.f32 %v3609_v53, %v14303_v60  ;;  %v3661_v8 = vmul.f32 %v14313_v9, %v14313_v9 }
 0x462   :  { %v3456_v39 = vadd.f32 %v3455_v23, %v3426_v17  ;;  %v14332_v44 = vadd.f32 %v3510_v50, %v3482_v7  ;;  %v14334_v29 = vadd.f32 1e-05, %v3823_v40  ;;  %v3825_v59 = vmax.f32 %v3817_v61, 0.0  ;;  %v3428_v11 = vpop.f32.mrf.mxu1 }
 0x463   :  { %v3804_v28 = vmul.f32 0.015625, %v3784_v52  ;;  %v3812_v3 = vmul.f32 %v14315_v4, %v14315_v4  ;;  %v3786_v24 = vadd.f32 %v3785_v22, %v3653_v10  ;;  %v3611_v31 = vadd.f32 %v3610_v63, %v14313_v9 }
 0x464   :  { %v3485_v49 = vadd.f32 %v3484_v56, %v3456_v39  ;;  %v3669_v41 = vmul.f32 %v14324_v32, %v14324_v32  ;;  %v3798_v38 = vmul.f32 0.015625, %v3706_v12  ;;  %v14343_v27 = vadd.f32 1e-05, %v3824_v13 }
 0x465   :  { %v3826_v50 = vmax.f32 %v3818_v54, 0.0  ;;  %v3827_v30 = vmax.f32 %v3819_v19, 0.0  ;;  %v3787_v16 = vadd.f32 %v3786_v24, %v3661_v8  ;;  %v3612_v51 = vadd.f32 %v3611_v31, %v14324_v32 }
 0x466   :  { %v14341_v47 = vadd.f32 %v3513_v35, %v3485_v49  ;;  %v3677_v37 = vmul.f32 %v14332_v44, %v14332_v44  ;;  %v3806_v17 = vmul.f32 %v14273_v45, %v14273_v45  ;;  %12707 = vrsqrt.f32 %v14334_v29 }
 0x467   :  { %v14351_v40 = vadd.f32 1e-05, %v3825_v59  ;;  %v3820_v6 = vsub.f32 %v3804_v28, %v3812_v3  ;;  %v3788_v33 = vadd.f32 %v3787_v16, %v3669_v41  ;;  %v3613_v1 = vadd.f32 %v3612_v51, %v14332_v44  ;;  %v3515_v56 = vpop.f32.mrf.mxu0 }
 0x468   :  { %v3685_v46 = vmul.f32 %v14341_v47, %v14341_v47  ;;  %12709 = vrsqrt.f32 %v14343_v27  ;;  %v14357_v23 = vadd.f32 1e-05, %v3826_v50  ;;  %v14359_v14 = vadd.f32 1e-05, %v3827_v30 }
 0x469   :  { %v3457_v26 = vpop.f32.mrf.mxu2  ;;  %v3486_v18 = vpop.f32.mrf.mxu3  ;;  %v3789_v7 = vadd.f32 %v3788_v33, %v3677_v37  ;;  %v3614_v39 = vadd.f32 %v3613_v1, %v14341_v47  ;;  %v3814_v52 = vsub.f32 %v3798_v38, %v3806_v17  ;;  %12711 = vrsqrt.f32 %v14351_v40 }
 0x46a   :  { %v3458_v58 = vadd.f32 %v3457_v26, %v3428_v11  ;;  %v3828_v25 = vmax.f32 %v3820_v6, 0.0  ;;  %12713 = vrsqrt.f32 %v14357_v23  ;;  %vm3855_vm0 = vweird.f32 %v14334_v29 }
 0x46b   :  { %v3790_v35 = vadd.f32 %v3789_v7, %v3685_v46  ;;  %12715 = vrsqrt.f32 %v14359_v14  ;;  %v3822_v19 = vmax.f32 %v3814_v52, 0.0  ;;  %vm3865_vm4 = vweird.f32 %v14343_v27 }
 0x46c   :  { %v3487_v20 = vadd.f32 %v3486_v18, %v3458_v58  ;;  %v14368_v49 = vpop.eup %12707  ;;  %v14374_v22 = vadd.f32 1e-05, %v3828_v25  ;;  %vm3875_vm6 = vweird.f32 %v14351_v40  ;;  %vm3885_vm12 = vweird.f32 %v14357_v23 }
 0x46d   :  { %v14380_v31 = vadd.f32 1e-05, %v3822_v19  ;;  %v3850_v30 = vmul.f32 %v14368_v49, %v14334_v29  ;;  %vm3856_vm14 = vweird.f32 %v14368_v49 }
 0x46e   :  { %v14362_v61 = vadd.f32 %v3515_v56, %v3487_v20  ;;  %v14372_v54 = vpop.eup %12709  ;;  %12717 = vrsqrt.f32 %v14374_v22  ;;  %vm14423_vm3 = vmor %vm3855_vm0, %vm3856_vm14  ;;  %vm3895_vm14 = vweird.f32 %v14359_v14 }
 0x46f   :  { %v14376_v59 = vpop.eup %12711  ;;  %v3860_v11 = vmul.f32 %v14372_v54, %v14343_v27  ;;  %12719 = vrsqrt.f32 %v14380_v31  ;;  %v3851_v18 = vmul.f32 %v14368_v49, %v3850_v30  ;;  %vm3866_vm15 = vweird.f32 %v14372_v54  ;;  %v10298_v27 = vld [vmem:[#allocation15 + $0x150] sm:$0xf] }
 0x470   :  { %v3615_v53 = vadd.f32 %v3614_v39, %v14362_v61  ;;  %v3693_v10 = vmul.f32 %v14362_v61, %v14362_v61  ;;  %v14378_v24 = vpop.eup %12713  ;;  %v3870_v51 = vmul.f32 %v14376_v59, %v14351_v40  ;;  %vm3876_vm1 = vweird.f32 %v14376_v59  ;;  %vm14431_vm8 = vmor %vm3865_vm4, %vm3866_vm15 }
 0x471   :  { %v14382_v41 = vpop.eup %12715  ;;  %v3880_v37 = vmul.f32 %v14378_v24, %v14357_v23  ;;  %v3861_v1 = vmul.f32 %v14372_v54, %v3860_v11  ;;  %vm3886_vm7 = vweird.f32 %v14378_v24  ;;  %vm14439_vm11 = vmor %vm3875_vm6, %vm3876_vm1  ;;  %vm3905_vm1 = vweird.f32 %v14374_v22 }
 0x472   :  { %v3616_v12 = vrot.slane %v3615_v53, 4  ;;  %v3791_v13 = vadd.f32 %v3790_v35, %v3693_v10  ;;  %v3890_v58 = vmul.f32 %v14382_v41, %v14359_v14  ;;  %v3871_v56 = vmul.f32 %v14376_v59, %v3870_v51  ;;  %vm14444_vm13 = vmor %vm3885_vm12, %vm3886_vm7 }
 0x473   :  { %v3881_v7 = vmul.f32 %v14378_v24, %v3880_v37  ;;  %vm3896_vm9 = vweird.f32 %v14382_v41  ;;  %vm3937_vm4 = vcmask 1044484   ;;  %vm3941_vm12 = vcmask 1045508  }
 0x474   :  { %v3617_v63 = vadd.f32 %v3616_v12, %v3615_v53  ;;  %v3792_v8 = vrot.slane %v3791_v13, 4  ;;  %v14397_v33 = vpop.eup %12717  ;;  %v3891_v39 = vmul.f32 %v14382_v41, %v3890_v58  ;;  %v3852_v53 = vmul.f32 0.5, %v3851_v18  ;;  %vm3897_vm15 = vmor %vm3895_vm14, %vm3896_vm9 }
 0x475   :  { %v14407_v35 = vpop.eup %12719  ;;  %v3900_v10 = vmul.f32 %v14397_v33, %v14374_v22  ;;  %v3862_v12 = vmul.f32 0.5, %v3861_v1  ;;  %v3872_v19 = vmul.f32 0.5, %v3871_v56  ;;  %vm3906_vm0 = vweird.f32 %v14397_v33  ;;  %v10522_v22 = vld [vmem:[#allocation15 + $0x310] sm:$0xf]  ;;  %v10494_v1 = vld [vmem:[#allocation15 + $0x2d8] sm:$0xf] }
 0x476   :  { %v3618_v28 = vrot.slane %v3617_v63, 2  ;;  %v3793_v3 = vadd.f32 %v3792_v8, %v3791_v13  ;;  %v3892_v8 = vmul.f32 0.5, %v3891_v39  ;;  %vm3846_vm7 = vweird.f32 %v14407_v35  ;;  %v12373_v39 = vld [vmem:[#allocation15 + $0x4e8] sm:$0xf0] }
 0x477   :  { %v3863_v30 = vsub.f32 1.5, %v3862_v12 }
 0x478   :  { %v3619_v38 = vadd.f32 %v3618_v28, %v3617_v63  ;;  %v3794_v50 = vrot.slane %v3793_v3, 2  ;;  %v3882_v63 = vmul.f32 0.5, %v3881_v7  ;;  %v3840_v28 = vmul.f32 %v14407_v35, %v14380_v31 }
 0x479   :  { %v3893_v51 = vsub.f32 1.5, %v3892_v8  ;;  %v3864_v18 = vmul.f32 %v14372_v54, %v3863_v30  ;;  %v10774_v30 = vld [vmem:[#allocation15 + $0x508] sm:$0xf] }
 0x47a   :  { %v3620_v26 = vrot.slane %v3619_v38, 1  ;;  %v3795_v16 = vadd.f32 %v3794_v50, %v3793_v3  ;;  %v3901_v50 = vmul.f32 %v14397_v33, %v3900_v10  ;;  %v3841_v37 = vmul.f32 %v14407_v35, %v3840_v28 }
 0x47b   :  { %v3894_v56 = vmul.f32 %v14382_v41, %v3893_v51 }
 0x47c   :  { %v3621_v17 = vadd.f32 %v3620_v26, %v3619_v38  ;;  %v3796_v6 = vrot.slane %v3795_v16, 1  ;;  %v3853_v38 = vsub.f32 1.5, %v3852_v53  ;;  %v3873_v26 = vsub.f32 1.5, %v3872_v19 }
 0x47d   :  { %v3842_v7 = vmul.f32 0.5, %v3841_v37  ;;  %v3868_v53 = vsel %vm14431_vm8, %v14372_v54, %v3864_v18  ;;  %v3898_v10 = vsel %vm3897_vm15, %v14382_v41, %v3894_v56  ;;  %v12268_v18 = vld [vmem:[#allocation15 + $0x1a0] sm:$0xf0]  ;;  %vm3943_vm15 = vcmask 1043456  }
 0x47e   :  { %v14400_v46 = vmul.f32 0.015625, %v3621_v17  ;;  %v3797_v20 = vadd.f32 %v3796_v6, %v3795_v16  ;;  %v3883_v16 = vsub.f32 1.5, %v3882_v63  ;;  %v3854_v58 = vmul.f32 %v14368_v49, %v3853_v38  ;;  %v12324_v38 = vld [vmem:[#allocation15 + $0x360] sm:$0xf0] }
 0x47f   :  { %v3902_v17 = vmul.f32 0.5, %v3901_v50  ;;  %v3874_v29 = vmul.f32 %v14376_v59, %v3873_v26  ;;  %v3928_v54 = vrot.slane %v3868_v53, 6  ;;  %v14473_v28 = vrot.slane %v3898_v10, 3  ;;  %v12380_v26 = vld [vmem:[#allocation15 + $0x520] sm:$0xf0] }
 0x480   :  { %v3805_v52 = vmul.f32 0.015625, %v3797_v20  ;;  %v3813_v25 = vmul.f32 %v14400_v46, %v14400_v46  ;;  %v3884_v20 = vmul.f32 %v14378_v24, %v3883_v16  ;;  %v10326_v16 = vld [vmem:[#allocation15 + $0x188] sm:$0xf]  ;;  %v10466_v10 = vld [vmem:[#allocation15 + $0x2a0] sm:$0xf] }
 0x481   :  { %v3903_v40 = vsub.f32 1.5, %v3902_v17  ;;  %v3878_v23 = vsel %vm14439_vm11, %v14376_v59, %v3874_v29  ;;  %v10775_v17 = vor.u32 %v12380_v26, %v10774_v30  ;;  %v12310_v29 = vld [vmem:[#allocation15 + $0x2f0] sm:$0xf0]  ;;  %vm3939_vm11 = vcmask 1046534   ;;  %v14508_v26 = vld [vmem:[#allocation15 + $0x268] sm:$0xf] }
 0x482   :  { %v3821_v13 = vsub.f32 %v3805_v52, %v3813_v25  ;;  %v3858_v25 = vsel %vm14423_vm3, %v14368_v49, %v3854_v58  ;;  %v3888_v14 = vsel %vm14444_vm13, %v14378_v24, %v3884_v20  ;;  %v3929_v59 = vrot.slane %v3878_v23, 5  ;;  %vm14476_vm3 = vmor %vm3905_vm1, %vm3906_vm0  ;;  %v12317_v58 = vld [vmem:[#allocation15 + $0x328] sm:$0xf0] }
 0x483   :  { %v14467_v49 = vrot.slane %v3858_v25, 7  ;;  %v3904_v19 = vmul.f32 %v14397_v33, %v3903_v40  ;;  %v14471_v8 = vrot.slane %v3888_v14, 4  ;;  %v10523_v6 = vor.u32 %v12317_v58, %v10522_v22  ;;  %7256 = vmatpush.bf16.msrb.mxu3 %v10775_v17  ;;  %v12261_v23 = vld [vmem:[#allocation15 + $0x168] sm:$0xf0]  ;;  %v10970_v17 = vld [vmem:[#allocation15 + $0x690] sm:$0xf] }
 0x484   :  { %v3829_v3 = vmax.f32 %v3821_v13, 0.0  ;;  %v3843_v13 = vsub.f32 1.5, %v3842_v7  ;;  %v10746_v7 = vld [vmem:[#allocation15 + $0x4d0] sm:$0xf]  ;;  %vm3845_vm13 = vweird.f32 %v14380_v31  ;;  %v10299_v14 = vor.u32 %v12261_v23, %v10298_v27  ;;  %v10942_v27 = vld [vmem:[#allocation15 + $0x658] sm:$0xf] }
 0x485   :  { %v3908_v51 = vsel %vm14476_vm3, %v14397_v33, %v3904_v19  ;;  %v10327_v33 = vor.u32 %v12268_v18, %v10326_v16  ;;  %v10747_v53 = vor.u32 %v12373_v39, %v10746_v7  ;;  %v12366_v19 = vld [vmem:[#allocation15 + $0x4b0] sm:$0xf0]  ;;  %vm14500_vm14 = vmor %vm3845_vm13, %vm3846_vm7  ;;  %v3935_v24 = vsel %vm837_vm2, %v3928_v54, %v3929_v59  ;;  %v14510_v16 = vld [vmem:[#allocation15 + $0x280] sm:$0xf0] }
 0x486   :  { %v14414_v11 = vadd.f32 1e-05, %v3829_v3  ;;  %v10550_v3 = vld [vmem:[#allocation15 + $0x348] sm:$0xf]  ;;  %v3844_v20 = vmul.f32 %v14407_v35, %v3843_v13  ;;  %v3932_v40 = vrot.slane %v3908_v51, 2  ;;  %v3938_v59 = vsel %vm3937_vm4, %v14471_v8, %v14473_v28 }
 0x487   :  { %v10551_v50 = vor.u32 %v12324_v38, %v10550_v3  ;;  %7198 = vmatpush.bf16.msra.mxu1 %v10327_v33  ;;  %v10718_v13 = vld [vmem:[#allocation15 + $0x498] sm:$0xf]  ;;  %v10495_v3 = vor.u32 %v12310_v29, %v10494_v1  ;;  %v12254_v38 = vld [vmem:[#allocation15 + $0x130] sm:$0xf0]  ;;  %7257 = vmatpush.bf16.msrb.mxu3 %v10747_v53  ;;  %v10998_v51 = vld [vmem:[#allocation15 + $0x6c8] sm:$0xf]  ;;  %v10439_v23 = vor.u32 %v14510_v16, %v14508_v26 }
 0x488   :  { %12721 = vrsqrt.f32 %v14414_v11  ;;  %vm3915_vm8 = vweird.f32 %v14414_v11  ;;  %v10719_v30 = vor.u32 %v12366_v19, %v10718_v13  ;;  %v12247_v33 = vld [vmem:[#allocation15 + $0xf8] sm:$0xf0]  ;;  %v14521_v28 = vld [vmem:[#allocation15 + $0x230] sm:$0xf]  ;;  %v14523_v39 = vld [vmem:[#allocation15 + $0x248] sm:$0xf0] }
 0x489   :  { %7227 = vmatpush.bf16.msrb.mxu2 %v10551_v50  ;;  %v3848_v50 = vsel %vm14500_vm14, %v14407_v35, %v3844_v20  ;;  %v12429_v35 = vld [vmem:[#allocation15 + $0x6a8] sm:$0xf0]  ;;  %v12359_v20 = vld [vmem:[#allocation15 + $0x478] sm:$0xf0]  ;;  %v12422_v53 = vld [vmem:[#allocation15 + $0x670] sm:$0xf0] }
 0x48a   :  { %v3934_v54 = vsel %vm835_vm10, %v3848_v50, %v14467_v49  ;;  %v10971_v8 = vor.u32 %v12429_v35, %v10970_v17  ;;  %v10943_v13 = vor.u32 %v12422_v53, %v10942_v27  ;;  %v14567_v17 = vld [vmem:[#allocation15 + $0x210] sm:$0xf0]  ;;  %v14573_v27 = vld [vmem:[#allocation15 + $0x5b0] sm:$0xf]  ;;  %v14577_v53 = vld [vmem:[#allocation15 + $0x5c8] sm:$0xf0] }
 0x48b   :  { %v3936_v18 = vsel %vm839_vm5, %v3934_v54, %v3935_v24  ;;  %7199 = vmatpush.bf16.msra.mxu1 %v10299_v14  ;;  %7258 = vmatpush.bf16.msrb.mxu3 %v10719_v30  ;;  %v10411_v14 = vor.u32 %v14523_v39, %v14521_v28  ;;  %v10214_v54 = vld [vmem:[#allocation15 + $0xa8] sm:$0xf]  ;;  %v10859_v28 = vor.u32 %v14577_v53, %v14573_v27  ;;  %v12331_v39 = vld [vmem:[#allocation15 + $0x398] sm:$0xf0] }
 0x48d   :  { %7228 = vmatpush.bf16.msrb.mxu2 %v10523_v6  ;;  %v10690_v6 = vld [vmem:[#allocation15 + $0x460] sm:$0xf] }
 0x48e   :  { %v14449_v52 = vpop.eup %12721  ;;  %v10691_v25 = vor.u32 %v12359_v20, %v10690_v6  ;;  %v3947_v20 = vld [vmem:[#allocation13] sm:$0xff] }
 0x48f   :  { %v3910_v12 = vmul.f32 %v14449_v52, %v14414_v11  ;;  %vm3916_vm6 = vweird.f32 %v14449_v52 }
 0x490   :  { %vm14490_vm9 = vmor %vm3915_vm8, %vm3916_vm6  ;;  %7259 = vmatpush.bf16.msrb.mxu3 %v10691_v25 }
 0x491   :  { %v3911_v63 = vmul.f32 %v14449_v52, %v3910_v12  ;;  %v12303_v12 = vld [vmem:[#allocation15 + $0x2b8] sm:$0xf0]  ;;  %7229 = vmatpush.bf16.msrb.mxu2 %v10495_v3 }
 0x492   :  { %v10467_v7 = vor.u32 %v12303_v12, %v10466_v10  ;;  %v14529_v10 = vld [vmem:[#allocation15 + $0x620] sm:$0xf]  ;;  %v14531_v12 = vld [vmem:[#allocation15 + $0x638] sm:$0xf0] }
 0x493   :  { %v3912_v41 = vmul.f32 0.5, %v3911_v63  ;;  %v10915_v16 = vor.u32 %v14531_v12, %v14529_v10  ;;  %v14581_v10 = vld [vmem:[#allocation15 + $0x1d8] sm:$0xf0] }
 0x495   :  { %v3913_v37 = vsub.f32 1.5, %v3912_v41  ;;  %v3830_v41 = vld [vmem:[#allocation12] sm:$0xff]  ;;  %7230 = vmatpush.bf16.msrb.mxu2 %v10467_v7 }
 0x496   :  { %v10186_v7 = vld [vmem:[#allocation15 + $0x70] sm:$0xf] }
 0x497   :  { %v3914_v56 = vmul.f32 %v14449_v52, %v3913_v37  ;;  %v12436_v37 = vld [vmem:[#allocation15 + $0x6e0] sm:$0xf0] }
 0x498   :  { %v10999_v58 = vor.u32 %v12436_v37, %v10998_v51  ;;  %v10662_v51 = vld [vmem:[#allocation15 + $0x428] sm:$0xf]  ;;  %v12352_v37 = vld [vmem:[#allocation15 + $0x440] sm:$0xf0] }
 0x499   :  { %v3918_v11 = vsel %vm14490_vm9, %v14449_v52, %v3914_v56  ;;  %v10270_v52 = vld [vmem:[#allocation15 + $0x118] sm:$0xf]  ;;  %v10242_v56 = vld [vmem:[#allocation15 + $0xe0] sm:$0xf]  ;;  %7231 = vmatpush.bf16.msrb.mxu2 %v10439_v23  ;;  %v10663_v25 = vor.u32 %v12352_v37, %v10662_v51 }
 0x49a   :  { %v3933_v31 = vrot.slane %v3918_v11, 1  ;;  %v10271_v29 = vor.u32 %v12254_v38, %v10270_v52  ;;  %7285 = vmatpush.bf16.msra.mxu0 %v10999_v58  ;;  %v10243_v11 = vor.u32 %v12247_v33, %v10242_v56  ;;  %v14565_v58 = vld [vmem:[#allocation15 + $0x1f8] sm:$0xf] }
 0x49b   :  { %7260 = vmatpush.bf16.msrb.mxu3 %v10663_v25  ;;  %v10383_v37 = vor.u32 %v14567_v17, %v14565_v58  ;;  %v10578_v58 = vld [vmem:[#allocation15 + $0x380] sm:$0xf]  ;;  %v16285_v25 = vld [vmem:[#allocation28_spill] sm:$0xff] }
 0x49c   :  { %v3940_v22 = vsel %vm3939_vm11, %v3932_v40, %v3933_v31  ;;  %7200 = vmatpush.bf16.msra.mxu1 %v10271_v29  ;;  %v10634_v29 = vld [vmem:[#allocation15 + $0x3f0] sm:$0xf] }
 0x49d   :  { %v3942_v1 = vsel %vm3941_vm12, %v3938_v59, %v3940_v22  ;;  %7232 = vmatpush.bf16.msrb.mxu2 %v10411_v14  ;;  %v14610_v14 = vld [vmem:[#allocation15 + $0x540] sm:$0xf] }
 0x49e   :  { %v3944_v49 = vsel %vm3943_vm15, %v3936_v18, %v3942_v1  ;;  %7286 = vmatpush.bf16.msra.mxu0 %v10971_v8  ;;  %v14571_v1 = vld [vmem:[#allocation15 + $0x5e8] sm:$0xf]  ;;  %v12233_v8 = vld [vmem:[#allocation15 + $0x88] sm:$0xf0] }
 0x49f   :  { %v3946_v40 = vmul.f32 %v3944_v49, %v3830_v41 }
 0x4a0   :  { %7201 = vmatpush.bf16.msra.mxu1 %v10243_v11  ;;  %v14579_v11 = vld [vmem:[#allocation15 + $0x1c0] sm:$0xf] }
 0x4a1   :  { %v14533_v19 = vperm.slane %v3946_v40, 0  ;;  %v14535_v63 = vperm.slane %v3946_v40, 1  ;;  %v14537_v24 = vperm.slane %v3946_v40, 2  ;;  %v14539_v41 = vperm.slane %v3946_v40, 3  ;;  %7233 = vmatpush.bf16.msrb.mxu2 %v10383_v37 }
 0x4a2   :  { %v14541_v31 = vperm.slane %v3946_v40, 4  ;;  %v14543_v3 = vperm.slane %v3946_v40, 5  ;;  %v14545_v52 = vperm.slane %v3946_v40, 6  ;;  %v14547_v38 = vperm.slane %v3946_v40, 7  ;;  %7287 = vmatpush.bf16.msra.mxu0 %v10943_v13 }
 0x4a3   :  { %v3966_v50 = vmul.f32 %v14535_v63, %v14264_v2  ;;  %v3967_v30 = vmul.f32 %v14537_v24, %v14275_v43  ;;  %v3968_v26 = vmul.f32 %v14539_v41, %v14282_v48  ;;  %v12240_v48 = vld [vmem:[#allocation15 + $0xc0] sm:$0xf0]  ;;  %v3965_v35 = vmul.f32 %v14533_v19, %v14273_v45 }
 0x4a4   :  { %v3969_v59 = vmul.f32 %v14541_v31, %v14289_v34  ;;  %v3970_v22 = vmul.f32 %v14543_v3, %v14291_v15  ;;  %v3971_v2 = vmul.f32 %v14545_v52, %v14315_v4  ;;  %v3972_v43 = vmul.f32 %v14547_v38, %v14400_v46  ;;  %v12408_v15 = vld [vmem:[#allocation15 + $0x600] sm:$0xf0]  ;;  %v12345_v4 = vld [vmem:[#allocation15 + $0x408] sm:$0xf0] }
 0x4a5   :  { %v3981_v6 = vrot.slane %v3966_v50, 7  ;;  %v3982_v18 = vrot.slane %v3967_v30, 6  ;;  %v3983_v34 = vrot.slane %v3968_v26, 5  ;;  %v10215_v50 = vor.u32 %v12240_v48, %v10214_v54  ;;  %v10158_v30 = vld [vmem:[#allocation15 + $0x38] sm:$0xf] }
 0x4a6   :  { %v3984_v56 = vrot.slane %v3969_v59, 4  ;;  %v3985_v46 = vrot.slane %v3970_v22, 3  ;;  %v3986_v33 = vrot.slane %v3971_v2, 2  ;;  %v3987_v49 = vrot.slane %v3972_v43, 1  ;;  %v12226_v26 = vld [vmem:[#allocation15 + $0x50] sm:$0xf0]  ;;  %7288 = vmatpush.bf16.msra.mxu0 %v10915_v16 }
 0x4a7   :  { %v3988_v45 = vsel %vm835_vm10, %v3965_v35, %v3981_v6  ;;  %v3989_v40 = vsel %vm837_vm2, %v3982_v18, %v3983_v34  ;;  %v10606_v59 = vld [vmem:[#allocation15 + $0x3b8] sm:$0xf]  ;;  %v4052_v51 = vmul.f32 %v14547_v38, %v14341_v47  ;;  %v12338_v2 = vld [vmem:[#allocation15 + $0x3d0] sm:$0xf0]  ;;  %v10887_v54 = vor.u32 %v12408_v15, %v14571_v1  ;;  %v14600_v47 = vld [vmem:[#allocation15] sm:$0xf]  ;;  %7202 = vmatpush.bf16.msra.mxu1 %v10215_v50 }
 0x4a8   :  { %v3990_v12 = vsel %vm839_vm5, %v3988_v45, %v3989_v40  ;;  %v3991_v23 = vsel %vm3937_vm4, %v3984_v56, %v3985_v46  ;;  %v3992_v13 = vsel %vm3939_vm11, %v3986_v33, %v3987_v49  ;;  %v14591_v43 = vld [vmem:[#allocation15 + $0x578] sm:$0xf]  ;;  %v14593_v35 = vld [vmem:[#allocation15 + $0x590] sm:$0xf0]  ;;  %v10635_v48 = vor.u32 %v12345_v4, %v10634_v29  ;;  %v14602_v18 = vld [vmem:[#allocation15 + $0x18] sm:$0xf0] }
 0x4a9   :  { %v3993_v22 = vsel %vm3941_vm12, %v3991_v23, %v3992_v13  ;;  %v4060_v34 = vmul.f32 %v14547_v38, %v14362_v61  ;;  %v10187_v56 = vor.u32 %v12233_v8, %v10186_v7  ;;  %v14612_v16 = vld [vmem:[#allocation15 + $0x558] sm:$0xf0]  ;;  %v10355_v1 = vor.u32 %v14581_v10, %v14579_v11  ;;  %v16284_v45 = vld [vmem:[#allocation24_spill] sm:$0xff] }
 0x4aa   :  { %v3994_v6 = vsel %vm3943_vm15, %v3990_v12, %v3993_v22  ;;  %v10159_v15 = vor.u32 %v12226_v26, %v10158_v30  ;;  %v10607_v29 = vor.u32 %v12338_v2, %v10606_v59  ;;  %v10831_v4 = vor.u32 %v14593_v35, %v14591_v43  ;;  %7261 = vmatpush.bf16.msrb.mxu3 %v10635_v48  ;;  %v16286_v11 = vld [vmem:[#allocation30_spill] sm:$0xff]  ;;  %v16287_v12 = vld [vmem:[#allocation33_spill] sm:$0xff]  ;;  %v16288_v30 = vld [vmem:[#allocation40_spill] sm:$0xff] }
 0x4ab   :  { %v14604_v17 = vsub.f32 %v3947_v20, %v3994_v6  ;;  %v10131_v46 = vor.u32 %v14602_v18, %v14600_v47  ;;  %v10579_v33 = vor.u32 %v12331_v39, %v10578_v58  ;;  %7289 = vmatpush.bf16.msra.mxu0 %v10887_v54  ;;  %v10803_v27 = vor.u32 %v14612_v16, %v14610_v14  ;;  %v16289_v59 = vld [vmem:[#allocation41_spill] sm:$0xff]  ;;  %v11446_v58 = vld [vmem:[#allocation15 + $0xa48] sm:$0xf] }
 0x4ac   :  { %7203 = vmatpush.bf16.msra.mxu1 %v10187_v56  ;;  %v3997_v40 = vmul.f32 %v14533_v19, %v16284_v45  ;;  %v4005_v53 = vmul.f32 %v14533_v19, %v16285_v25  ;;  %v3998_v10 = vmul.f32 %v14535_v63, %v16286_v11  ;;  %v4006_v23 = vmul.f32 %v14535_v63, %v16287_v12  ;;  %v11418_v45 = vld [vmem:[#allocation15 + $0xa10] sm:$0xf]  ;;  %v12541_v11 = vld [vmem:[#allocation15 + $0xa28] sm:$0xf0] }
 0x4ad   :  { %v14619_v61 = vperm.slane %v14604_v17, 0  ;;  %v14622_v20 = vperm.slane %v14604_v17, 1  ;;  %v14627_v49 = vperm.slane %v14604_v17, 2  ;;  %v14630_v7 = vperm.slane %v14604_v17, 3  ;;  %7234 = vmatpush.bf16.msrb.mxu2 %v10355_v1 }
 0x4ae   :  { %v14633_v8 = vperm.slane %v14604_v17, 7  ;;  %v3999_v26 = vmul.f32 %v14537_v24, %v16288_v30  ;;  %v4007_v22 = vmul.f32 %v14537_v24, %v16289_v59  ;;  %7262 = vmatpush.bf16.msrb.mxu3 %v10607_v29  ;;  %v4000_v25 = vmul.f32 %v14539_v41, %v16238_v36 }
 0x4af   :  { %v4078_v37 = vadd.f32 %v14619_v61, %v3997_v40  ;;  %v4086_v2 = vadd.f32 %v14619_v61, %v4005_v53  ;;  %v4079_v43 = vadd.f32 %v14622_v20, %v3998_v10  ;;  %v4087_v35 = vadd.f32 %v14622_v20, %v4006_v23  ;;  %7290 = vmatpush.bf16.msra.mxu0 %v10859_v28  ;;  %v12604_v10 = vld [vmem:[#allocation15 + $0xc20] sm:$0xf0] }
 0x4b0   :  { %v4133_v13 = vadd.f32 %v14633_v8, %v4052_v51  ;;  %v4141_v50 = vadd.f32 %v14633_v8, %v4060_v34  ;;  %7204 = vmatpush.bf16.msra.mxu1 %v10159_v15  ;;  %v12548_v34 = vld [vmem:[#allocation15 + $0xa60] sm:$0xf0]  ;;  %v4080_v15 = vadd.f32 %v14627_v49, %v3999_v26  ;;  %v4088_v29 = vadd.f32 %v14627_v49, %v4007_v22 }
 0x4b1   :  { %vm4142_vm5 = vcmp.gt.f32.partialorder %v4078_v37, 0.0  ;;  %vm4150_vm0 = vcmp.gt.f32.partialorder %v4086_v2, 0.0  ;;  %v4206_v54 = vmul.f32 0.2, %v4078_v37  ;;  %v4214_v48 = vmul.f32 0.2, %v4086_v2 }
 0x4b2   :  { %vm4197_vm10 = vcmp.gt.f32.partialorder %v4133_v13, 0.0  ;;  %vm4205_vm2 = vcmp.gt.f32.partialorder %v4141_v50, 0.0  ;;  %v4261_v51 = vmul.f32 0.2, %v4133_v13  ;;  %v4269_v6 = vmul.f32 0.2, %v4141_v50  ;;  %7263 = vmatpush.bf16.msrb.mxu3 %v10579_v33 }
 0x4b3   :  { %vm4143_vm1 = vcmp.gt.f32.partialorder %v4079_v43, 0.0  ;;  %vm4151_vm3 = vcmp.gt.f32.partialorder %v4087_v35, 0.0  ;;  %v4270_v39 = vsel %vm4142_vm5, %v4078_v37, %v4206_v54  ;;  %v4278_v14 = vsel %vm4150_vm0, %v4086_v2, %v4214_v48  ;;  %7291 = vmatpush.bf16.msra.mxu0 %v10831_v4  ;;  %v11670_v4 = vld [vmem:[#allocation15 + $0xc08] sm:$0xf]  ;;  %v16292_v54 = vld [vmem:[#allocation34_spill] sm:$0xff] }
 0x4b4   :  { %v4325_v47 = vsel %vm4197_vm10, %v4133_v13, %v4261_v51  ;;  %v4333_v18 = vsel %vm4205_vm2, %v4141_v50, %v4269_v6  ;;  %v4207_v16 = vmul.f32 0.2, %v4079_v43  ;;  %v14657_v28 = vpack.c.bf16 %v4278_v14, %v4270_v39  ;;  %7205 = vmatpush.bf16.msra.mxu1 %v10131_v46  ;;  %v16291_v51 = vld [vmem:[#allocation25_spill] sm:$0xff] }
 0x4b5   :  { %v14655_v56 = vpack.c.bf16 %v4333_v18, %v4325_v47  ;;  %v4215_v1 = vmul.f32 0.2, %v4087_v35  ;;  %v4008_v33 = vmul.f32 %v14539_v41, %v16235_v62  ;;  %v11447_v53 = vor.u32 %v12548_v34, %v11446_v58  ;;  %v16293_v47 = vld [vmem:[#allocation35_spill] sm:$0xff]  ;;  %v16294_v58 = vld [vmem:[#allocation42_spill] sm:$0xff] }
 0x4b6   :  { %v4271_v40 = vsel %vm4143_vm1, %v4079_v43, %v4207_v16  ;;  %vm4144_vm4 = vcmp.gt.f32.partialorder %v4080_v15, 0.0  ;;  %vm4152_vm6 = vcmp.gt.f32.partialorder %v4088_v29, 0.0  ;;  %v4208_v23 = vmul.f32 0.2, %v4080_v15  ;;  %v16290_v43 = vld [vmem:[#allocation32_spill] sm:$0xff] }
 0x4b7   :  { %v4279_v12 = vsel %vm4151_vm3, %v4087_v35, %v4215_v1  ;;  %v4216_v46 = vmul.f32 0.2, %v4088_v29  ;;  %v4081_v50 = vadd.f32 %v14630_v7, %v4000_v25  ;;  %v4089_v30 = vadd.f32 %v14630_v7, %v4008_v33  ;;  %7343 = vmatpush.bf16.msra.mxu2 %v11447_v53  ;;  %7292 = vmatpush.bf16.msra.mxu0 %v10803_v27  ;;  %v16295_v1 = vld [vmem:[#allocation43_spill] sm:$0xff] }
 0x4b8   :  { %v14667_v13 = vpack.c.bf16 %v4279_v12, %v4271_v40  ;;  %7206 = vmatmul.bf16.vlgmr.msra.gmra.mxu1 %v14657_v28  ;;  %v4272_v62 = vsel %vm4144_vm4, %v4080_v15, %v4208_v23  ;;  %v11419_v36 = vor.u32 %v12541_v11, %v11418_v45  ;;  %v11671_v26 = vor.u32 %v12604_v10, %v11670_v4  ;;  %v11222_v11 = vld [vmem:[#allocation15 + $0x888] sm:$0xf]  ;;  %v12492_v4 = vld [vmem:[#allocation15 + $0x8a0] sm:$0xf0]  ;;  %v11390_v10 = vld [vmem:[#allocation15 + $0x9d8] sm:$0xf] }
 0x4b9   :  { %v4280_v59 = vsel %vm4152_vm6, %v4088_v29, %v4216_v46  ;;  %vm4145_vm7 = vcmp.gt.f32.partialorder %v4081_v50, 0.0  ;;  %vm4153_vm8 = vcmp.gt.f32.partialorder %v4089_v30, 0.0  ;;  %v4209_v22 = vmul.f32 0.2, %v4081_v50  ;;  %v12534_v12 = vld [vmem:[#allocation15 + $0x9f0] sm:$0xf0] }
 0x4ba   :  { %7235 = vmatmul.bf16.vlgmr.msrb.gmra.mxu2 %v14667_v13  ;;  %v14673_v37 = vpack.c.bf16 %v4280_v59, %v4272_v62  ;;  %v4217_v2 = vmul.f32 0.2, %v4089_v30  ;;  %7372 = vmatpush.bf16.msra.mxu3 %v11671_v26  ;;  %v4013_v35 = vmul.f32 %v14533_v19, %v16290_v43  ;;  %v4021_v27 = vmul.f32 %v14533_v19, %v16291_v51  ;;  %v12597_v26 = vld [vmem:[#allocation15 + $0xbe8] sm:$0xf0]  ;;  %v11194_v59 = vld [vmem:[#allocation15 + $0x850] sm:$0xf] }
 0x4bb   :  { %v4273_v6 = vsel %vm4145_vm7, %v4081_v50, %v4209_v22  ;;  %7344 = vmatpush.bf16.msra.mxu2 %v11419_v36  ;;  %v4014_v48 = vmul.f32 %v14535_v63, %v16292_v54  ;;  %v4022_v18 = vmul.f32 %v14535_v63, %v16293_v47  ;;  %v4015_v34 = vmul.f32 %v14537_v24, %v16294_v58  ;;  %v11642_v50 = vld [vmem:[#allocation15 + $0xbd0] sm:$0xf]  ;;  %v12485_v22 = vld [vmem:[#allocation15 + $0x868] sm:$0xf0]  ;;  %v11362_v51 = vld [vmem:[#allocation15 + $0x9a0] sm:$0xf] }
 0x4bc   :  { %7264 = vmatmul.bf16.vlgmr.msrb.gmra.mxu3 %v14673_v37  ;;  %v4281_v39 = vsel %vm4153_vm8, %v4089_v30, %v4217_v2  ;;  %v4094_v14 = vadd.f32 %v14619_v61, %v4013_v35  ;;  %v4102_v16 = vadd.f32 %v14619_v61, %v4021_v27  ;;  %v4023_v15 = vmul.f32 %v14537_v24, %v16295_v1 }
 0x4bd   :  { %v14690_v29 = vpack.c.bf16 %v4281_v39, %v4273_v6  ;;  %v4095_v45 = vadd.f32 %v14622_v20, %v4014_v48  ;;  %v4103_v40 = vadd.f32 %v14622_v20, %v4022_v18  ;;  %v4096_v25 = vadd.f32 %v14627_v49, %v4015_v34  ;;  %v12527_v48 = vld [vmem:[#allocation15 + $0x9b8] sm:$0xf0]  ;;  %v11614_v39 = vld [vmem:[#allocation15 + $0xb98] sm:$0xf] }
 0x4be   :  { %vm4158_vm9 = vcmp.gt.f32.partialorder %v4094_v14, 0.0  ;;  %vm4166_vm11 = vcmp.gt.f32.partialorder %v4102_v16, 0.0  ;;  %v4222_v33 = vmul.f32 0.2, %v4094_v14  ;;  %v4230_v53 = vmul.f32 0.2, %v4102_v16 }
 0x4bf   :  { %16296 = vst [vmem:[#allocation49_spill] sm:$0xff] %v14690_v29  ;;  %7293 = vmatmul.bf16.vlgmr.msra.gmra.mxu0 %v14690_v29  ;;  %vm4159_vm12 = vcmp.gt.f32.partialorder %v4095_v45, 0.0  ;;  %vm4167_vm13 = vcmp.gt.f32.partialorder %v4103_v40, 0.0  ;;  %v4223_v23 = vmul.f32 0.2, %v4095_v45  ;;  %v4104_v36 = vadd.f32 %v14627_v49, %v4023_v15 }
 0x4c0   :  { %v4231_v46 = vmul.f32 0.2, %v4103_v40  ;;  %v4286_v30 = vsel %vm4158_vm9, %v4094_v14, %v4222_v33  ;;  %v4294_v62 = vsel %vm4166_vm11, %v4102_v16, %v4230_v53  ;;  %vm4160_vm14 = vcmp.gt.f32.partialorder %v4096_v25, 0.0  ;;  %v12590_v14 = vld [vmem:[#allocation15 + $0xbb0] sm:$0xf0] }
 0x4c1   :  { %v4287_v2 = vsel %vm4159_vm12, %v4095_v45, %v4223_v23  ;;  %v4224_v35 = vmul.f32 0.2, %v4096_v25  ;;  %v14697_v27 = vpack.c.bf16 %v4294_v62, %v4286_v30  ;;  %vm4168_vm15 = vcmp.gt.f32.partialorder %v4104_v36, 0.0  ;;  %v16302_v62 = vld [vmem:[#allocation37_spill] sm:$0xff] }
 0x4c2   :  { %v4295_v43 = vsel %vm4167_vm13, %v4103_v40, %v4231_v46  ;;  %v4232_v6 = vmul.f32 0.2, %v4104_v36  ;;  %v4016_v54 = vmul.f32 %v14539_v41, %v16239_v0  ;;  %v4024_v18 = vmul.f32 %v14539_v41, %v16242_v42  ;;  %v16299_v42 = vld [vmem:[#allocation29_spill] sm:$0xff] }
 0x4c3   :  { %16297 = vst [vmem:[#allocation24_spill] sm:$0xff] %v14697_v27  ;;  %v14701_v47 = vpack.c.bf16 %v4295_v43, %v4287_v2  ;;  %v11223_v58 = vor.u32 %v12492_v4, %v11222_v11  ;;  %v11391_v34 = vor.u32 %v12534_v12, %v11390_v10  ;;  %v4288_v16 = vsel %vm4160_vm14, %v4096_v25, %v4224_v35  ;;  %v16300_v25 = vld [vmem:[#allocation27_spill] sm:$0xff]  ;;  %v16301_v12 = vld [vmem:[#allocation36_spill] sm:$0xff] }
 0x4c4   :  { %v4296_v1 = vsel %vm4168_vm15, %v4104_v36, %v4232_v6  ;;  %v4097_v15 = vadd.f32 %v14630_v7, %v4016_v54  ;;  %v11643_v45 = vor.u32 %v12597_v26, %v11642_v50  ;;  %v4105_v40 = vadd.f32 %v14630_v7, %v4024_v18  ;;  %v11166_v54 = vld [vmem:[#allocation15 + $0x818] sm:$0xf] }
 0x4c5   :  { %16298 = vst [vmem:[#allocation28_spill] sm:$0xff] %v14701_v47  ;;  %7314 = vmatpush.bf16.msrb.mxu1 %v11223_v58  ;;  %7345 = vmatpush.bf16.msra.mxu2 %v11391_v34  ;;  %v11195_v0 = vor.u32 %v12485_v22, %v11194_v59  ;;  %v11363_v33 = vor.u32 %v12527_v48, %v11362_v51  ;;  %v16305_v51 = vld [vmem:[#allocation44_spill] sm:$0xff]  ;;  %v12478_v48 = vld [vmem:[#allocation15 + $0x830] sm:$0xf0] }
 0x4c6   :  { %vm4161_vm10 = vcmp.gt.f32.partialorder %v4097_v15, 0.0  ;;  %v4225_v53 = vmul.f32 0.2, %v4097_v15  ;;  %7373 = vmatpush.bf16.msra.mxu3 %v11643_v45  ;;  %v11615_v23 = vor.u32 %v12590_v14, %v11614_v39  ;;  %v4029_v11 = vmul.f32 %v14533_v19, %v16299_v42  ;;  %v16306_v34 = vld [vmem:[#allocation45_spill] sm:$0xff]  ;;  %v11334_v14 = vld [vmem:[#allocation15 + $0x968] sm:$0xf] }
 0x4c7   :  { %vm4169_vm2 = vcmp.gt.f32.partialorder %v4105_v40, 0.0  ;;  %v4233_v4 = vmul.f32 0.2, %v4105_v40  ;;  %v4037_v10 = vmul.f32 %v14533_v19, %v16300_v25  ;;  %v4030_v46 = vmul.f32 %v14535_v63, %v16301_v12  ;;  %v16307_v45 = vld [vmem:[#allocation52_spill] sm:$0xff]  ;;  %v12660_v42 = vld [vmem:[#allocation15 + $0xde0] sm:$0xf0] }
 0x4c8   :  { %7211 = vmatmul.bf16.gmra.mxu1 %v14697_v27  ;;  %v4289_v50 = vsel %vm4161_vm10, %v4097_v15, %v4225_v53  ;;  %v4110_v30 = vadd.f32 %v14619_v61, %v4029_v11  ;;  %v4038_v36 = vmul.f32 %v14535_v63, %v16302_v62  ;;  %v14720_v2 = vpack.c.bf16 %v4296_v1, %v4288_v16  ;;  %v12653_v25 = vld [vmem:[#allocation15 + $0xda8] sm:$0xf0]  ;;  %v12583_v12 = vld [vmem:[#allocation15 + $0xb78] sm:$0xf0] }
 0x4c9   :  { %v4297_v26 = vsel %vm4169_vm2, %v4105_v40, %v4233_v4  ;;  %7315 = vmatpush.bf16.msrb.mxu1 %v11195_v0  ;;  %v4118_v59 = vadd.f32 %v14619_v61, %v4037_v10  ;;  %v4111_v22 = vadd.f32 %v14622_v20, %v4030_v46  ;;  %7346 = vmatpush.bf16.msra.mxu2 %v11363_v33  ;;  %v12520_v0 = vld [vmem:[#allocation15 + $0x980] sm:$0xf0]  ;;  %v11866_v4 = vld [vmem:[#allocation15 + $0xd90] sm:$0xf]  ;;  %v11586_v10 = vld [vmem:[#allocation15 + $0xb60] sm:$0xf] }
 0x4ca   :  { %7240 = vmatmul.bf16.gmra.mxu2 %v14701_v47  ;;  %16303 = vst [vmem:[#allocation30_spill] sm:$0xff] %v14720_v2  ;;  %7374 = vmatpush.bf16.msra.mxu3 %v11615_v23  ;;  %v4119_v43 = vadd.f32 %v14622_v20, %v4038_v36  ;;  %v14723_v35 = vpack.c.bf16 %v4297_v26, %v4289_v50  ;;  %vm4174_vm5 = vcmp.gt.f32.partialorder %v4110_v30, 0.0  ;;  %v4238_v18 = vmul.f32 0.2, %v4110_v30  ;;  %v11894_v23 = vld [vmem:[#allocation15 + $0xdc8] sm:$0xf] }
 0x4cb   :  { %v4031_v6 = vmul.f32 %v14537_v24, %v16305_v51  ;;  %vm4182_vm0 = vcmp.gt.f32.partialorder %v4118_v59, 0.0  ;;  %v4246_v58 = vmul.f32 0.2, %v4118_v59  ;;  %v4039_v39 = vmul.f32 %v14537_v24, %v16306_v34  ;;  %v11138_v46 = vld [vmem:[#allocation15 + $0x7e0] sm:$0xf] }
 0x4cc   :  { %16304 = vst [vmem:[#allocation33_spill] sm:$0xff] %v14723_v35  ;;  %7269 = vmatmul.bf16.gmra.mxu3 %v14720_v2  ;;  %v4239_v16 = vmul.f32 0.2, %v4111_v22  ;;  %v4247_v1 = vmul.f32 0.2, %v4119_v43  ;;  %v4032_v40 = vmul.f32 %v14539_v41, %v16307_v45  ;;  %vm4175_vm1 = vcmp.gt.f32.partialorder %v4111_v22, 0.0 }
 0x4cd   :  { %v4112_v15 = vadd.f32 %v14627_v49, %v4031_v6  ;;  %vm4183_vm3 = vcmp.gt.f32.partialorder %v4119_v43, 0.0  ;;  %v4120_v33 = vadd.f32 %v14627_v49, %v4039_v39  ;;  %v4040_v53 = vmul.f32 %v14539_v41, %v16244_v21  ;;  %v12471_v51 = vld [vmem:[#allocation15 + $0x7f8] sm:$0xf0]  ;;  %v11306_v21 = vld [vmem:[#allocation15 + $0x930] sm:$0xf] }
 0x4ce   :  { %v4113_v11 = vadd.f32 %v14630_v7, %v4032_v40  ;;  %v4302_v50 = vsel %vm4174_vm5, %v4110_v30, %v4238_v18  ;;  %v4310_v62 = vsel %vm4182_vm0, %v4118_v59, %v4246_v58  ;;  %v11167_v26 = vor.u32 %v12478_v48, %v11166_v54  ;;  %v12513_v6 = vld [vmem:[#allocation15 + $0x948] sm:$0xf0]  ;;  %v11558_v40 = vld [vmem:[#allocation15 + $0xb28] sm:$0xf]  ;;  %v12646_v58 = vld [vmem:[#allocation15 + $0xd70] sm:$0xf0] }
 0x4cf   :  { %7298 = vmatmul.bf16.gmra.mxu0 %v14723_v35  ;;  %v4121_v36 = vadd.f32 %v14630_v7, %v4040_v53  ;;  %v4303_v34 = vsel %vm4175_vm1, %v4111_v22, %v4239_v16  ;;  %v4311_v39 = vsel %vm4183_vm3, %v4119_v43, %v4247_v1  ;;  %vm4176_vm4 = vcmp.gt.f32.partialorder %v4112_v15, 0.0  ;;  %v12576_v35 = vld [vmem:[#allocation15 + $0xb40] sm:$0xf0]  ;;  %v11838_v43 = vld [vmem:[#allocation15 + $0xd58] sm:$0xf] }
 0x4d0   :  { %v11335_v45 = vor.u32 %v12520_v0, %v11334_v14  ;;  %v4240_v2 = vmul.f32 0.2, %v4112_v15  ;;  %v4248_v47 = vmul.f32 0.2, %v4120_v33  ;;  %v4241_v27 = vmul.f32 0.2, %v4113_v11  ;;  %7316 = vmatpush.bf16.msrb.mxu1 %v11167_v26 }
 0x4d1   :  { %v11895_v30 = vor.u32 %v12660_v42, %v11894_v23  ;;  %vm4184_vm6 = vcmp.gt.f32.partialorder %v4120_v33, 0.0  ;;  %vm4177_vm7 = vcmp.gt.f32.partialorder %v4113_v11, 0.0  ;;  %v4249_v59 = vmul.f32 0.2, %v4121_v36  ;;  %v16310_v42 = vld [vmem:[#allocation31_spill] sm:$0xff] }
 0x4d2   :  { %7347 = vmatpush.bf16.msra.mxu2 %v11335_v45  ;;  %v11587_v54 = vor.u32 %v12583_v12, %v11586_v10  ;;  %vm4185_vm8 = vcmp.gt.f32.partialorder %v4121_v36, 0.0  ;;  %v11867_v48 = vor.u32 %v12653_v25, %v11866_v4  ;;  %v11139_v22 = vor.u32 %v12471_v51, %v11138_v46  ;;  %v16311_v12 = vld [vmem:[#allocation26_spill] sm:$0xff]  ;;  %v16315_v26 = vld [vmem:[#allocation47_spill] sm:$0xff] }
 0x4d3   :  { %7401 = vmatpush.bf16.msrb.mxu0 %v11895_v30  ;;  %v11307_v18 = vor.u32 %v12513_v6, %v11306_v21  ;;  %v14743_v14 = vpack.c.bf16 %v4310_v62, %v4302_v50  ;;  %v14745_v16 = vpack.c.bf16 %v4311_v39, %v4303_v34  ;;  %v11559_v1 = vor.u32 %v12576_v35, %v11558_v40  ;;  %v16312_v50 = vld [vmem:[#allocation38_spill] sm:$0xff]  ;;  %v12464_v39 = vld [vmem:[#allocation15 + $0x7c0] sm:$0xf0] }
 0x4d4   :  { %7375 = vmatpush.bf16.msra.mxu3 %v11587_v54  ;;  %v4304_v0 = vsel %vm4176_vm4, %v4112_v15, %v4240_v2  ;;  %v4312_v53 = vsel %vm4184_vm6, %v4120_v33, %v4248_v47  ;;  %v4305_v23 = vsel %vm4177_vm7, %v4113_v11, %v4241_v27  ;;  %7317 = vmatpush.bf16.msrb.mxu1 %v11139_v22  ;;  %v11810_v47 = vld [vmem:[#allocation15 + $0xd20] sm:$0xf]  ;;  %v12639_v2 = vld [vmem:[#allocation15 + $0xd38] sm:$0xf0]  ;;  %v11782_v54 = vld [vmem:[#allocation15 + $0xce8] sm:$0xf] }
 0x4d5   :  { %16308 = vst [vmem:[#allocation40_spill] sm:$0xff] %v14743_v14  ;;  %v4045_v4 = vmul.f32 %v14533_v19, %v16310_v42  ;;  %v4313_v25 = vsel %vm4185_vm8, %v4121_v36, %v4249_v59  ;;  %v11839_v10 = vor.u32 %v12646_v58, %v11838_v43  ;;  %v4053_v46 = vmul.f32 %v14533_v19, %v16311_v12  ;;  %v16313_v15 = vld [vmem:[#allocation39_spill] sm:$0xff]  ;;  %v16314_v11 = vld [vmem:[#allocation46_spill] sm:$0xff]  ;;  %v11082_v43 = vld [vmem:[#allocation15 + $0x770] sm:$0xf] }
 0x4d6   :  { %16309 = vst [vmem:[#allocation41_spill] sm:$0xff] %v14745_v16  ;;  %7348 = vmatpush.bf16.msra.mxu2 %v11307_v18  ;;  %v4046_v35 = vmul.f32 %v14535_v63, %v16312_v50  ;;  %v4054_v33 = vmul.f32 %v14535_v63, %v16313_v15  ;;  %v4047_v62 = vmul.f32 %v14537_v24, %v16314_v11  ;;  %v11110_v63 = vld [vmem:[#allocation15 + $0x7a8] sm:$0xf]  ;;  %v11278_v59 = vld [vmem:[#allocation15 + $0x8f8] sm:$0xf]  ;;  %v16318_v22 = vld [vmem:[#allocation55_spill] sm:$0xff] }
 0x4d7   :  { %7402 = vmatpush.bf16.msrb.mxu0 %v11867_v48  ;;  %v4126_v27 = vadd.f32 %v14619_v61, %v4045_v4  ;;  %v4134_v19 = vadd.f32 %v14619_v61, %v4053_v46  ;;  %v4055_v51 = vmul.f32 %v14537_v24, %v16315_v26  ;;  %v14768_v21 = vpack.c.bf16 %v4312_v53, %v4304_v0  ;;  %v12506_v61 = vld [vmem:[#allocation15 + $0x910] sm:$0xf0]  ;;  %v12632_v48 = vld [vmem:[#allocation15 + $0xd00] sm:$0xf0]  ;;  %v12457_v58 = vld [vmem:[#allocation15 + $0x788] sm:$0xf0] }
 0x4d8   :  { %7216 = vmatmul.bf16.gmra.mxu1 %v14743_v14  ;;  %7376 = vmatpush.bf16.msra.mxu3 %v11559_v1  ;;  %v4127_v36 = vadd.f32 %v14622_v20, %v4046_v35  ;;  %v4135_v6 = vadd.f32 %v14622_v20, %v4054_v33  ;;  %v4128_v34 = vadd.f32 %v14627_v49, %v4047_v62  ;;  %v11530_v1 = vld [vmem:[#allocation15 + $0xaf0] sm:$0xf]  ;;  %v12569_v0 = vld [vmem:[#allocation15 + $0xb08] sm:$0xf0]  ;;  %v12499_v12 = vld [vmem:[#allocation15 + $0x8d8] sm:$0xf0] }
 0x4d9   :  { %16316 = vst [vmem:[#allocation32_spill] sm:$0xff] %v14768_v21  ;;  %v14772_v45 = vpack.c.bf16 %v4313_v25, %v4305_v23  ;;  %v11811_v40 = vor.u32 %v12639_v2, %v11810_v47  ;;  %v4136_v30 = vadd.f32 %v14627_v49, %v4055_v51  ;;  %vm4190_vm9 = vcmp.gt.f32.partialorder %v4126_v27, 0.0  ;;  %v11502_v47 = vld [vmem:[#allocation15 + $0xab8] sm:$0xf]  ;;  %v12562_v2 = vld [vmem:[#allocation15 + $0xad0] sm:$0xf0] }
 0x4da   :  { %7245 = vmatmul.bf16.gmra.mxu2 %v14745_v16  ;;  %v4254_v24 = vmul.f32 0.2, %v4126_v27  ;;  %v4048_v20 = vmul.f32 %v14539_v41, %v16249_v5  ;;  %v4056_v18 = vmul.f32 %v14539_v41, %v16318_v22  ;;  %vm4198_vm11 = vcmp.gt.f32.partialorder %v4134_v19, 0.0  ;;  %v12625_v26 = vld [vmem:[#allocation15 + $0xcc8] sm:$0xf0] }
 0x4db   :  { %16317 = vst [vmem:[#allocation25_spill] sm:$0xff] %v14772_v45  ;;  %7403 = vmatpush.bf16.msrb.mxu0 %v11839_v10  ;;  %v4262_v49 = vmul.f32 0.2, %v4134_v19  ;;  %vm4191_vm12 = vcmp.gt.f32.partialorder %v4127_v36, 0.0  ;;  %v4255_v53 = vmul.f32 0.2, %v4127_v36  ;;  %v11111_v41 = vor.u32 %v12464_v39, %v11110_v63 }
 0x4dc   :  { %7274 = vmatmul.bf16.gmra.mxu3 %v14768_v21  ;;  %vm4199_vm13 = vcmp.gt.f32.partialorder %v4135_v6, 0.0  ;;  %v4263_v23 = vmul.f32 0.2, %v4135_v6  ;;  %vm4192_vm14 = vcmp.gt.f32.partialorder %v4128_v34, 0.0  ;;  %v4256_v42 = vmul.f32 0.2, %v4128_v34 }
 0x4dd   :  { %v4264_v4 = vmul.f32 0.2, %v4136_v30  ;;  %v4129_v5 = vadd.f32 %v14630_v7, %v4048_v20  ;;  %v4137_v25 = vadd.f32 %v14630_v7, %v4056_v18  ;;  %v11250_v10 = vld [vmem:[#allocation15 + $0x8c0] sm:$0xf]  ;;  %v14784_v46 = vperm.slane %v14604_v17, 4  ;;  %7318 = vmatpush.bf16.msrb.mxu1 %v11111_v41 }
 0x4de   :  { %vm4200_vm15 = vcmp.gt.f32.partialorder %v4136_v30, 0.0  ;;  %v11279_v50 = vor.u32 %v12506_v61, %v11278_v59  ;;  %v11783_v35 = vor.u32 %v12632_v48, %v11782_v54  ;;  %v4318_v15 = vsel %vm4190_vm9, %v4126_v27, %v4254_v24  ;;  %v11754_v7 = vld [vmem:[#allocation15 + $0xcb0] sm:$0xf]  ;;  %v11054_v59 = vld [vmem:[#allocation15 + $0x738] sm:$0xf] }
 0x4df   :  { %7303 = vmatmul.bf16.gmra.mxu0 %v14772_v45  ;;  %v4326_v33 = vsel %vm4198_vm11, %v4134_v19, %v4262_v49  ;;  %v11083_v11 = vor.u32 %v12457_v58, %v11082_v43  ;;  %v11531_v62 = vor.u32 %v12569_v0, %v11530_v1  ;;  %v4319_v51 = vsel %vm4191_vm12, %v4127_v36, %v4255_v53  ;;  %v12450_v61 = vld [vmem:[#allocation15 + $0x750] sm:$0xf0]  ;;  %v11726_v24 = vld [vmem:[#allocation15 + $0xc78] sm:$0xf]  ;;  %v11474_v36 = vld [vmem:[#allocation15 + $0xa80] sm:$0xf] }
 0x4e0   :  { %7404 = vmatpush.bf16.msrb.mxu0 %v11811_v40  ;;  %v4327_v63 = vsel %vm4199_vm13, %v4135_v6, %v4263_v23  ;;  %v4320_v39 = vsel %vm4192_vm14, %v4128_v34, %v4256_v42  ;;  %7349 = vmatpush.bf16.msra.mxu2 %v11279_v50  ;;  %v11251_v40 = vor.u32 %v12499_v12, %v11250_v10  ;;  %v4257_v27 = vmul.f32 0.2, %v4129_v5  ;;  %v12555_v22 = vld [vmem:[#allocation15 + $0xa98] sm:$0xf0]  ;;  %v12618_v34 = vld [vmem:[#allocation15 + $0xc90] sm:$0xf0] }
 0x4e1   :  { %v4328_v54 = vsel %vm4200_vm15, %v4136_v30, %v4264_v4  ;;  %v4265_v48 = vmul.f32 0.2, %v4137_v25  ;;  %7377 = vmatpush.bf16.msra.mxu3 %v11531_v62  ;;  %v11503_v19 = vor.u32 %v12562_v2, %v11502_v47  ;;  %vm4193_vm10 = vcmp.gt.f32.partialorder %v4129_v5, 0.0  ;;  %7319 = vmatpush.bf16.msrb.mxu1 %v11083_v11  ;;  %v11026_v18 = vld [vmem:[#allocation15 + $0x700] sm:$0xf]  ;;  %v16322_v42 = vld [vmem:[#allocation56_spill] sm:$0xff] }
 0x4e2   :  { %vm4201_vm2 = vcmp.gt.f32.partialorder %v4137_v25, 0.0  ;;  %v11755_v20 = vor.u32 %v12625_v26, %v11754_v7  ;;  %v11055_v6 = vor.u32 %v12450_v61, %v11054_v59  ;;  %v12443_v43 = vld [vmem:[#allocation15 + $0x718] sm:$0xf0]  ;;  %v14793_v58 = vperm.slane %v14604_v17, 5  ;;  %v16323_v50 = vld [vmem:[#allocation57_spill] sm:$0xff]  ;;  %v16324_v2 = vld [vmem:[#allocation64_spill] sm:$0xff] }
 0x4e3   :  { %v14795_v30 = vpack.c.bf16 %v4326_v33, %v4318_v15  ;;  %v14797_v1 = vpack.c.bf16 %v4327_v63, %v4319_v51  ;;  %v14799_v0 = vpack.c.bf16 %v4328_v54, %v4320_v39  ;;  %v4321_v49 = vsel %vm4193_vm10, %v4129_v5, %v4257_v27  ;;  %v11698_v5 = vld [vmem:[#allocation15 + $0xc40] sm:$0xf]  ;;  %v16327_v7 = vld [vmem:[#allocation69_spill] sm:$0xff]  ;;  %v12321_v39 = vld [vmem:[#allocation15 + $0x34c] sm:$0xf] }
 0x4e4   :  { %7405 = vmatpush.bf16.msrb.mxu0 %v11783_v35  ;;  %7350 = vmatpush.bf16.msra.mxu2 %v11251_v40  ;;  %v4329_v53 = vsel %vm4201_vm2, %v4137_v25, %v4265_v48  ;;  %v11475_v23 = vor.u32 %v12555_v22, %v11474_v36  ;;  %v4001_v4 = vmul.f32 %v14541_v31, %v16322_v42  ;;  %v14806_v41 = vperm.slane %v14604_v17, 6  ;;  %v12611_v25 = vld [vmem:[#allocation15 + $0xc58] sm:$0xf0]  ;;  %v16328_v51 = vld [vmem:[#allocation53_spill] sm:$0xff]  ;;  %v10552_v40 = vld [vmem:[#allocation15 + $0x364] sm:$0xf0] }
 0x4e5   :  { %16319 = vst [vmem:[#allocation34_spill] sm:$0xff] %v14795_v30  ;;  %7378 = vmatpush.bf16.msra.mxu3 %v11503_v19  ;;  %v11727_v10 = vor.u32 %v12618_v34, %v11726_v24  ;;  %v11027_v12 = vor.u32 %v12443_v43, %v11026_v18  ;;  %v4009_v35 = vmul.f32 %v14541_v31, %v16323_v50  ;;  %v16325_v17 = vld [vmem:[#allocation50_spill] sm:$0xff]  ;;  %v12377_v48 = vld [vmem:[#allocation15 + $0x50c] sm:$0xf]  ;;  %v10776_v19 = vld [vmem:[#allocation15 + $0x524] sm:$0xf0] }
 0x4e6   :  { %16320 = vst [vmem:[#allocation35_spill] sm:$0xff] %v14797_v1  ;;  %7320 = vmatpush.bf16.msrb.mxu1 %v11055_v6  ;;  %v4082_v47 = vadd.f32 %v14784_v46, %v4001_v4  ;;  %v4002_v15 = vmul.f32 %v14543_v3, %v16324_v2  ;;  %v4010_v33 = vmul.f32 %v14543_v3, %v16325_v17  ;;  %v12314_v22 = vld [vmem:[#allocation15 + $0x314] sm:$0xf]  ;;  %v10524_v6 = vld [vmem:[#allocation15 + $0x32c] sm:$0xf0] }
 0x4e7   :  { %16321 = vst [vmem:[#allocation42_spill] sm:$0xff] %v14799_v0  ;;  %v14817_v11 = vpack.c.bf16 %v4329_v53, %v4321_v49  ;;  %v4090_v62 = vadd.f32 %v14784_v46, %v4009_v35  ;;  %v4003_v26 = vmul.f32 %v14545_v52, %v16327_v7  ;;  %v4011_v63 = vmul.f32 %v14545_v52, %v16328_v51 }
 0x4e8   :  { %7221 = vmatmul.bf16.gmra.mxu1 %v14795_v30  ;;  %7406 = vmatpush.bf16.msrb.mxu0 %v11755_v20  ;;  %v4083_v59 = vadd.f32 %v14793_v58, %v4002_v15  ;;  %v4091_v61 = vadd.f32 %v14793_v58, %v4010_v33  ;;  %v4004_v54 = vmul.f32 %v14547_v38, %v14300_v55  ;;  %vm4146_vm5 = vcmp.gt.f32.partialorder %v4082_v47, 0.0  ;;  %v16329_v33 = vld [vmem:[#allocation58_spill] sm:$0xff] }
 0x4e9   :  { %16326 = vst [vmem:[#allocation43_spill] sm:$0xff] %v14817_v11  ;;  %7379 = vmatpush.bf16.msra.mxu3 %v11475_v23  ;;  %v4012_v27 = vmul.f32 %v14547_v38, %v14294_v57  ;;  %v11699_v24 = vor.u32 %v12611_v25, %v11698_v5  ;;  %v4084_v20 = vadd.f32 %v14806_v41, %v4003_v26  ;;  %vm4154_vm0 = vcmp.gt.f32.partialorder %v4090_v62, 0.0 }
 0x4ea   :  { %7250 = vmatmul.bf16.gmra.mxu2 %v14797_v1  ;;  %v4092_v36 = vadd.f32 %v14806_v41, %v4011_v63  ;;  %7321 = vmatpush.bf16.msrb.mxu1 %v11027_v12  ;;  %v4085_v34 = vadd.f32 %v14633_v8, %v4004_v54  ;;  %v10555_v18 = vor.u32 %v12321_v39, %v10552_v40  ;;  %v4210_v57 = vmul.f32 0.2, %v4082_v47  ;;  %v16330_v63 = vld [vmem:[#allocation59_spill] sm:$0xff]  ;;  %v12265_v40 = vld [vmem:[#allocation15 + $0x18c] sm:$0xf] }
 0x4eb   :  { %v4093_v55 = vadd.f32 %v14633_v8, %v4012_v27  ;;  %v4218_v43 = vmul.f32 0.2, %v4090_v62  ;;  %v10779_v49 = vor.u32 %v12377_v48, %v10776_v19  ;;  %vm4147_vm1 = vcmp.gt.f32.partialorder %v4083_v59, 0.0  ;;  %v10328_v54 = vld [vmem:[#allocation15 + $0x1a4] sm:$0xf0] }
 0x4ec   :  { %7279 = vmatmul.bf16.gmra.mxu3 %v14799_v0  ;;  %7407 = vmatpush.bf16.msrb.mxu0 %v11727_v10  ;;  %vm4155_vm3 = vcmp.gt.f32.partialorder %v4091_v61, 0.0  ;;  %v4211_v53 = vmul.f32 0.2, %v4083_v59  ;;  %v10527_v23 = vor.u32 %v12314_v22, %v10524_v6  ;;  %v4219_v42 = vmul.f32 0.2, %v4091_v61  ;;  %v16334_v6 = vld [vmem:[#allocation51_spill] sm:$0xff] }
 0x4ed   :  { %7459 = vmatpush.bf16.msrb.mxu2 %v10555_v18  ;;  %v4212_v4 = vmul.f32 0.2, %v4084_v20  ;;  %v4220_v10 = vmul.f32 0.2, %v4092_v36  ;;  %7488 = vmatpush.bf16.msrb.mxu3 %v10779_v49  ;;  %vm4148_vm4 = vcmp.gt.f32.partialorder %v4084_v20, 0.0  ;;  %vm4156_vm6 = vcmp.gt.f32.partialorder %v4092_v36, 0.0 }
 0x4ee   :  { %v4213_v12 = vmul.f32 0.2, %v4085_v34  ;;  %v4221_v50 = vmul.f32 0.2, %v4093_v55  ;;  %vm4149_vm7 = vcmp.gt.f32.partialorder %v4085_v34, 0.0  ;;  %vm4157_vm8 = vcmp.gt.f32.partialorder %v4093_v55, 0.0 }
 0x4ef   :  { %7308 = vmatmul.bf16.gmra.mxu0 %v14817_v11  ;;  %v4274_v35 = vsel %vm4146_vm5, %v4082_v47, %v4210_v57  ;;  %v4282_v5 = vsel %vm4154_vm0, %v4090_v62, %v4218_v43  ;;  %v4275_v25 = vsel %vm4147_vm1, %v4083_v59, %v4211_v53  ;;  %v4283_v2 = vsel %vm4155_vm3, %v4091_v61, %v4219_v42  ;;  %v12307_v47 = vld [vmem:[#allocation15 + $0x2dc] sm:$0xf]  ;;  %v16332_v59 = vld [vmem:[#allocation65_spill] sm:$0xff]  ;;  %v10496_v48 = vld [vmem:[#allocation15 + $0x2f4] sm:$0xf0] }
 0x4f0   :  { %7408 = vmatpush.bf16.msrb.mxu0 %v11699_v24  ;;  %v4276_v15 = vsel %vm4148_vm4, %v4084_v20, %v4212_v4  ;;  %v4284_v17 = vsel %vm4156_vm6, %v4092_v36, %v4220_v10  ;;  %v4017_v7 = vmul.f32 %v14541_v31, %v16329_v33  ;;  %v4277_v26 = vsel %vm4149_vm7, %v4085_v34, %v4213_v12  ;;  %v12370_v19 = vld [vmem:[#allocation15 + $0x4d4] sm:$0xf]  ;;  %v10748_v24 = vld [vmem:[#allocation15 + $0x4ec] sm:$0xf0]  ;;  %v16335_v57 = vld [vmem:[#allocation70_spill] sm:$0xff] }
 0x4f1   :  { %7460 = vmatpush.bf16.msrb.mxu2 %v10527_v23  ;;  %v4285_v51 = vsel %vm4157_vm8, %v4093_v55, %v4221_v50  ;;  %v4025_v39 = vmul.f32 %v14541_v31, %v16330_v63  ;;  %v14844_v27 = vpack.c.bf16 %v4282_v5, %v4274_v35  ;;  %v4018_v61 = vmul.f32 %v14543_v3, %v16332_v59  ;;  %v16336_v49 = vld [vmem:[#allocation74_spill] sm:$0xff]  ;;  %v12258_v23 = vld [vmem:[#allocation15 + $0x154] sm:$0xf]  ;;  %v10300_v42 = vld [vmem:[#allocation15 + $0x16c] sm:$0xf0] }
 0x4f2   :  { %v4098_v62 = vadd.f32 %v14784_v46, %v4017_v7  ;;  %v14849_v20 = vpack.c.bf16 %v4283_v2, %v4275_v25  ;;  %v14851_v36 = vpack.c.bf16 %v4284_v17, %v4276_v15  ;;  %v4026_v34 = vmul.f32 %v14543_v3, %v16334_v6  ;;  %v12300_v35 = vld [vmem:[#allocation15 + $0x2a4] sm:$0xf]  ;;  %v10468_v5 = vld [vmem:[#allocation15 + $0x2bc] sm:$0xf0]  ;;  %v12363_v17 = vld [vmem:[#allocation15 + $0x49c] sm:$0xf] }
 0x4f3   :  { %16331 = vst [vmem:[#allocation29_spill] sm:$0xff] %v14844_v27  ;;  %v4106_v22 = vadd.f32 %v14784_v46, %v4025_v39  ;;  %v14857_v55 = vpack.c.bf16 %v4285_v51, %v4277_v26  ;;  %v4099_v18 = vadd.f32 %v14793_v58, %v4018_v61  ;;  %v4019_v43 = vmul.f32 %v14545_v52, %v16335_v57  ;;  %v10720_v33 = vld [vmem:[#allocation15 + $0x4b4] sm:$0xf0] }
 0x4f4   :  { %16333 = vst [vmem:[#allocation27_spill] sm:$0xff] %v14851_v36  ;;  %v4027_v53 = vmul.f32 %v14545_v52, %v16336_v49  ;;  %v4107_v4 = vadd.f32 %v14793_v58, %v4026_v34  ;;  %v10331_v10 = vor.u32 %v12265_v40, %v10328_v54  ;;  %v10499_v12 = vor.u32 %v12307_v47, %v10496_v48 }
 0x4f5   :  { %v10751_v50 = vor.u32 %v12370_v19, %v10748_v24  ;;  %vm4162_vm9 = vcmp.gt.f32.partialorder %v4098_v62, 0.0  ;;  %v4100_v25 = vadd.f32 %v14806_v41, %v4019_v43  ;;  %v4020_v15 = vmul.f32 %v14547_v38, %v14303_v60 }
 0x4f6   :  { %v4108_v2 = vadd.f32 %v14806_v41, %v4027_v53  ;;  %vm4170_vm11 = vcmp.gt.f32.partialorder %v4106_v22, 0.0  ;;  %v4226_v7 = vmul.f32 0.2, %v4098_v62  ;;  %v4028_v26 = vmul.f32 %v14547_v38, %v14313_v9  ;;  %7430 = vmatpush.bf16.msra.mxu1 %v10331_v10  ;;  %7461 = vmatpush.bf16.msrb.mxu2 %v10499_v12  ;;  %v12251_v53 = vld [vmem:[#allocation15 + $0x11c] sm:$0xf] }
 0x4f7   :  { %v10303_v51 = vor.u32 %v12258_v23, %v10300_v42  ;;  %v4234_v63 = vmul.f32 0.2, %v4106_v22  ;;  %vm4163_vm12 = vcmp.gt.f32.partialorder %v4099_v18, 0.0  ;;  %v4227_v39 = vmul.f32 0.2, %v4099_v18  ;;  %7489 = vmatpush.bf16.msrb.mxu3 %v10751_v50 }
 0x4f8   :  { %7322 = vmatmul.bf16.vlgmr.msrb.gmra.mxu1 %v14844_v27  ;;  %v10471_v40 = vor.u32 %v12300_v35, %v10468_v5  ;;  %v4235_v54 = vmul.f32 0.2, %v4107_v4  ;;  %v4101_v47 = vadd.f32 %v14633_v8, %v4020_v15  ;;  %v4109_v60 = vadd.f32 %v14633_v8, %v4028_v26  ;;  %v10272_v23 = vld [vmem:[#allocation15 + $0x134] sm:$0xf0]  ;;  %v12293_v42 = vld [vmem:[#allocation15 + $0x26c] sm:$0xf] }
 0x4f9   :  { %v10723_v59 = vor.u32 %v12363_v17, %v10720_v33  ;;  %vm4171_vm13 = vcmp.gt.f32.partialorder %v4107_v4, 0.0  ;;  %v4228_v61 = vmul.f32 0.2, %v4100_v25  ;;  %v4236_v48 = vmul.f32 0.2, %v4108_v2  ;;  %v16339_v33 = vld [vmem:[#allocation66_spill] sm:$0xff] }
 0x4fa   :  { %7351 = vmatmul.bf16.vlgmr.msra.gmra.mxu2 %v14849_v20  ;;  %vm4164_vm14 = vcmp.gt.f32.partialorder %v4100_v25, 0.0  ;;  %vm4172_vm15 = vcmp.gt.f32.partialorder %v4108_v2, 0.0  ;;  %7431 = vmatpush.bf16.msra.mxu1 %v10303_v51  ;;  %v4290_v9 = vsel %vm4162_vm9, %v4098_v62, %v4226_v7  ;;  %v4298_v19 = vsel %vm4170_vm11, %v4106_v22, %v4234_v63  ;;  %v10440_v10 = vld [vmem:[#allocation15 + $0x284] sm:$0xf0]  ;;  %v12433_v12 = vld [vmem:[#allocation15 + $0x6cc] sm:$0xf] }
 0x4fb   :  { %v4291_v24 = vsel %vm4163_vm12, %v4099_v18, %v4227_v39  ;;  %7462 = vmatpush.bf16.msrb.mxu2 %v10471_v40  ;;  %v4299_v6 = vsel %vm4171_vm13, %v4107_v4, %v4235_v54  ;;  %vm4165_vm10 = vcmp.gt.f32.partialorder %v4101_v47, 0.0  ;;  %v4229_v34 = vmul.f32 0.2, %v4101_v47  ;;  %7490 = vmatpush.bf16.msrb.mxu3 %v10723_v59  ;;  %v11000_v50 = vld [vmem:[#allocation15 + $0x6e4] sm:$0xf0] }
 0x4fc   :  { %7380 = vmatmul.bf16.vlgmr.msra.gmra.mxu3 %v14851_v36  ;;  %v4237_v57 = vmul.f32 0.2, %v4109_v60  ;;  %v4292_v43 = vsel %vm4164_vm14, %v4100_v25, %v4228_v61  ;;  %v4300_v49 = vsel %vm4172_vm15, %v4108_v2, %v4236_v48  ;;  %v14879_v35 = vpack.c.bf16 %v4298_v19, %v4290_v9  ;;  %v16337_v4 = vld [vmem:[#allocation60_spill] sm:$0xff]  ;;  %v16338_v25 = vld [vmem:[#allocation61_spill] sm:$0xff]  ;;  %v12356_v15 = vld [vmem:[#allocation15 + $0x464] sm:$0xf] }
 0x4fd   :  { %v14881_v62 = vpack.c.bf16 %v4299_v6, %v4291_v24  ;;  %vm4173_vm2 = vcmp.gt.f32.partialorder %v4109_v60, 0.0  ;;  %v14883_v22 = vpack.c.bf16 %v4300_v49, %v4292_v43  ;;  %v4293_v18 = vsel %vm4165_vm10, %v4101_v47, %v4229_v34  ;;  %v10692_v17 = vld [vmem:[#allocation15 + $0x47c] sm:$0xf0]  ;;  %v12244_v39 = vld [vmem:[#allocation15 + $0xe4] sm:$0xf]  ;;  %v16340_v61 = vld [vmem:[#allocation54_spill] sm:$0xff] }
 0x4fe   :  { %v4033_v5 = vmul.f32 %v14541_v31, %v16337_v4  ;;  %v4041_v2 = vmul.f32 %v14541_v31, %v16338_v25  ;;  %v4034_v7 = vmul.f32 %v14543_v3, %v16339_v33  ;;  %v10275_v26 = vor.u32 %v12251_v53, %v10272_v23  ;;  %v10244_v40 = vld [vmem:[#allocation15 + $0xfc] sm:$0xf0]  ;;  %v12286_v54 = vld [vmem:[#allocation15 + $0x234] sm:$0xf]  ;;  %v16341_v9 = vld [vmem:[#allocation72_spill] sm:$0xff] }
 0x4ff   :  { %7409 = vmatmul.bf16.vlgmr.msrb.gmra.mxu0 %v14857_v55  ;;  %v10443_v51 = vor.u32 %v12293_v42, %v10440_v10  ;;  %v11003_v63 = vor.u32 %v12433_v12, %v11000_v50  ;;  %v4301_v59 = vsel %vm4173_vm2, %v4109_v60, %v4237_v57  ;;  %v4042_v48 = vmul.f32 %v14543_v3, %v16340_v61  ;;  %v12426_v24 = vld [vmem:[#allocation15 + $0x694] sm:$0xf]  ;;  %v10972_v6 = vld [vmem:[#allocation15 + $0x6ac] sm:$0xf0]  ;;  %v16342_v42 = vld [vmem:[#allocation67_spill] sm:$0xff] }
 0x500   :  { %v4114_v47 = vadd.f32 %v14784_v46, %v4033_v5  ;;  %v4035_v19 = vmul.f32 %v14545_v52, %v16341_v9  ;;  %v10412_v34 = vld [vmem:[#allocation15 + $0x24c] sm:$0xf0]  ;;  %v4122_v43 = vadd.f32 %v14784_v46, %v4041_v2  ;;  %v4115_v49 = vadd.f32 %v14793_v58, %v4034_v7  ;;  %7432 = vmatpush.bf16.msra.mxu1 %v10275_v26  ;;  %v12349_v4 = vld [vmem:[#allocation15 + $0x42c] sm:$0xf]  ;;  %v10664_v5 = vld [vmem:[#allocation15 + $0x444] sm:$0xf0] }
 0x501   :  { %7463 = vmatpush.bf16.msrb.mxu2 %v10443_v51  ;;  %v10695_v53 = vor.u32 %v12356_v15, %v10692_v17  ;;  %v4123_v60 = vadd.f32 %v14793_v58, %v4042_v48  ;;  %v10247_v57 = vor.u32 %v12244_v39, %v10244_v40  ;;  %v10415_v23 = vor.u32 %v12286_v54, %v10412_v34  ;;  %v12419_v15 = vld [vmem:[#allocation15 + $0x65c] sm:$0xf]  ;;  %v10944_v17 = vld [vmem:[#allocation15 + $0x674] sm:$0xf0]  ;;  %v12412_v61 = vld [vmem:[#allocation15 + $0x624] sm:$0xf] }
 0x502   :  { %v4043_v10 = vmul.f32 %v14545_v52, %v16342_v42  ;;  %v4036_v12 = vmul.f32 %v14547_v38, %v14324_v32  ;;  %7517 = vmatpush.bf16.msra.mxu0 %v11003_v63  ;;  %v10975_v50 = vor.u32 %v12426_v24, %v10972_v6  ;;  %v14906_v25 = vpack.c.bf16 %v4301_v59, %v4293_v18  ;;  %v10916_v48 = vld [vmem:[#allocation15 + $0x63c] sm:$0xf0]  ;;  %v10216_v24 = vld [vmem:[#allocation15 + $0xc4] sm:$0xf0]  ;;  %v12279_v6 = vld [vmem:[#allocation15 + $0x1fc] sm:$0xf] }
 0x503   :  { %7491 = vmatpush.bf16.msrb.mxu3 %v10695_v53  ;;  %vm4178_vm5 = vcmp.gt.f32.partialorder %v4114_v47, 0.0  ;;  %v4116_v2 = vadd.f32 %v14806_v41, %v4035_v19  ;;  %v10667_v33 = vor.u32 %v12349_v4, %v10664_v5  ;;  %vm4186_vm0 = vcmp.gt.f32.partialorder %v4122_v43, 0.0  ;;  %v10384_v34 = vld [vmem:[#allocation15 + $0x214] sm:$0xf0]  ;;  %v12230_v5 = vld [vmem:[#allocation15 + $0x74] sm:$0xf] }
 0x504   :  { %v4242_v7 = vmul.f32 0.2, %v4114_v47  ;;  %v4124_v26 = vadd.f32 %v14806_v41, %v4043_v10  ;;  %v4044_v32 = vmul.f32 %v14547_v38, %v14332_v44  ;;  %v4250_v51 = vmul.f32 0.2, %v4122_v43  ;;  %7433 = vmatpush.bf16.msra.mxu1 %v10247_v57  ;;  %v12237_v38 = vld [vmem:[#allocation15 + $0xac] sm:$0xf] }
 0x505   :  { %7464 = vmatpush.bf16.msrb.mxu2 %v10415_v23  ;;  %vm4179_vm1 = vcmp.gt.f32.partialorder %v4115_v49, 0.0  ;;  %vm4187_vm3 = vcmp.gt.f32.partialorder %v4123_v60, 0.0  ;;  %v4243_v18 = vmul.f32 0.2, %v4115_v49  ;;  %v4251_v63 = vmul.f32 0.2, %v4123_v60 }
 0x506   :  { %v4117_v39 = vadd.f32 %v14633_v8, %v4036_v12  ;;  %v4125_v40 = vadd.f32 %v14633_v8, %v4044_v32  ;;  %7518 = vmatpush.bf16.msra.mxu0 %v10975_v50  ;;  %v10947_v54 = vor.u32 %v12419_v15, %v10944_v17  ;;  %v4244_v59 = vmul.f32 0.2, %v4116_v2  ;;  %v12405_v12 = vld [vmem:[#allocation15 + $0x5ec] sm:$0xf]  ;;  %v10888_v50 = vld [vmem:[#allocation15 + $0x604] sm:$0xf0] }
 0x507   :  { %7492 = vmatpush.bf16.msrb.mxu3 %v10667_v33  ;;  %vm4180_vm4 = vcmp.gt.f32.partialorder %v4116_v2, 0.0  ;;  %vm4188_vm6 = vcmp.gt.f32.partialorder %v4124_v26, 0.0  ;;  %v4252_v44 = vmul.f32 0.2, %v4124_v26  ;;  %v4306_v9 = vsel %vm4178_vm5, %v4114_v47, %v4242_v7  ;;  %v10188_v15 = vld [vmem:[#allocation15 + $0x8c] sm:$0xf0] }
 0x508   :  { %7327 = vmatmul.bf16.gmra.mxu1 %v14879_v35  ;;  %v4314_v19 = vsel %vm4186_vm0, %v4122_v43, %v4250_v51  ;;  %vm4181_vm7 = vcmp.gt.f32.partialorder %v4117_v39, 0.0  ;;  %vm4189_vm8 = vcmp.gt.f32.partialorder %v4125_v40, 0.0  ;;  %v4245_v8 = vmul.f32 0.2, %v4117_v39  ;;  %v12342_v17 = vld [vmem:[#allocation15 + $0x3f4] sm:$0xf] }
 0x509   :  { %v10919_v53 = vor.u32 %v12412_v61, %v10916_v48  ;;  %v4307_v57 = vsel %vm4179_vm1, %v4115_v49, %v4243_v18  ;;  %v4315_v23 = vsel %vm4187_vm3, %v4123_v60, %v4251_v63  ;;  %v4253_v42 = vmul.f32 0.2, %v4125_v40  ;;  %v10636_v32 = vld [vmem:[#allocation15 + $0x40c] sm:$0xf0]  ;;  %v12398_v49 = vld [vmem:[#allocation15 + $0x5b4] sm:$0xf] }
 0x50a   :  { %7356 = vmatmul.bf16.gmra.mxu2 %v14881_v62  ;;  %7519 = vmatpush.bf16.msra.mxu0 %v10947_v54  ;;  %v10219_v10 = vor.u32 %v12237_v38, %v10216_v24  ;;  %v4308_v47 = vsel %vm4180_vm4, %v4116_v2, %v4244_v59  ;;  %v4316_v43 = vsel %vm4188_vm6, %v4124_v26, %v4252_v44  ;;  %v10860_v51 = vld [vmem:[#allocation15 + $0x5cc] sm:$0xf0]  ;;  %v12272_v2 = vld [vmem:[#allocation15 + $0x1c4] sm:$0xf]  ;;  %v10356_v54 = vld [vmem:[#allocation15 + $0x1dc] sm:$0xf0] }
 0x50b   :  { %v10387_v4 = vor.u32 %v12279_v6, %v10384_v34  ;;  %v14922_v33 = vpack.c.bf16 %v4314_v19, %v4306_v9  ;;  %v10191_v7 = vor.u32 %v12230_v5, %v10188_v15  ;;  %v14924_v60 = vpack.c.bf16 %v4315_v23, %v4307_v57  ;;  %v12223_v26 = vld [vmem:[#allocation15 + $0x3c] sm:$0xf]  ;;  %v10160_v9 = vld [vmem:[#allocation15 + $0x54] sm:$0xf0]  ;;  %v16344_v34 = vld [vmem:[#allocation63_spill] sm:$0xff] }
 0x50c   :  { %7385 = vmatmul.bf16.gmra.mxu3 %v14883_v22  ;;  %7434 = vmatpush.bf16.msra.mxu1 %v10219_v10  ;;  %v10891_v18 = vor.u32 %v12405_v12, %v10888_v50  ;;  %v10639_v63 = vor.u32 %v12342_v17, %v10636_v32  ;;  %v14926_v59 = vpack.c.bf16 %v4316_v43, %v4308_v47  ;;  %v16343_v48 = vld [vmem:[#allocation62_spill] sm:$0xff]  ;;  %v16345_v57 = vld [vmem:[#allocation68_spill] sm:$0xff]  ;;  %v16346_v50 = vld [vmem:[#allocation73_spill] sm:$0xff] }
 0x50d   :  { %7465 = vmatpush.bf16.msrb.mxu2 %v10387_v4  ;;  %v4309_v61 = vsel %vm4181_vm7, %v4117_v39, %v4245_v8  ;;  %v4049_v44 = vmul.f32 %v14541_v31, %v16343_v48  ;;  %v10359_v38 = vor.u32 %v12272_v2, %v10356_v54  ;;  %v12335_v19 = vld [vmem:[#allocation15 + $0x3bc] sm:$0xf]  ;;  %v10608_v24 = vld [vmem:[#allocation15 + $0x3d4] sm:$0xf0]  ;;  %v4317_v6 = vsel %vm4189_vm8, %v4125_v40, %v4253_v42  ;;  %v12216_v15 = vld [vmem:[#allocation15 + $0x4] sm:$0xf] }
 0x50e   :  { %7520 = vmatpush.bf16.msra.mxu0 %v10919_v53  ;;  %v4057_v53 = vmul.f32 %v14541_v31, %v16344_v34  ;;  %v4050_v23 = vmul.f32 %v14543_v3, %v16345_v57  ;;  %7493 = vmatpush.bf16.msrb.mxu3 %v10639_v63  ;;  %v10163_v8 = vor.u32 %v12223_v26, %v10160_v9  ;;  %v12391_v31 = vld [vmem:[#allocation15 + $0x57c] sm:$0xf]  ;;  %v10832_v42 = vld [vmem:[#allocation15 + $0x594] sm:$0xf0]  ;;  %v10132_v17 = vld [vmem:[#allocation15 + $0x1c] sm:$0xf0] }
 0x50f   :  { %7414 = vmatmul.bf16.gmra.mxu0 %v14906_v25  ;;  %v4130_v39 = vadd.f32 %v14784_v46, %v4049_v44  ;;  %v10611_v10 = vor.u32 %v12335_v19, %v10608_v24  ;;  %v4058_v47 = vmul.f32 %v14543_v3, %v16346_v50  ;;  %v10863_v40 = vor.u32 %v12398_v49, %v10860_v51  ;;  %v16348_v32 = vld [vmem:[#allocation71_spill] sm:$0xff]  ;;  %v11448_v9 = vld [vmem:[#allocation15 + $0xa64] sm:$0xf0]  ;;  %v11420_v50 = vld [vmem:[#allocation15 + $0xa2c] sm:$0xf0] }
 0x510   :  { %7435 = vmatpush.bf16.msra.mxu1 %v10191_v7  ;;  %v4138_v12 = vadd.f32 %v14784_v46, %v4057_v53  ;;  %v14943_v43 = vpack.c.bf16 %v4317_v6, %v4309_v61  ;;  %v4131_v4 = vadd.f32 %v14793_v58, %v4050_v23  ;;  %v12328_v7 = vld [vmem:[#allocation15 + $0x384] sm:$0xf]  ;;  %v16347_v46 = vld [vmem:[#allocation48_spill] sm:$0xff]  ;;  %v4059_v49 = vmul.f32 %v14545_v52, %v16348_v32  ;;  %v10804_v44 = vld [vmem:[#allocation15 + $0x55c] sm:$0xf0] }
 0x511   :  { %7466 = vmatpush.bf16.msrb.mxu2 %v10359_v38  ;;  %v4139_v5 = vadd.f32 %v14793_v58, %v4058_v47  ;;  %vm4194_vm9 = vcmp.gt.f32.partialorder %v4130_v39, 0.0  ;;  %v4051_v3 = vmul.f32 %v14545_v52, %v16347_v46  ;;  %v10135_v51 = vor.u32 %v12216_v15, %v10132_v17  ;;  %v12384_v58 = vld [vmem:[#allocation15 + $0x544] sm:$0xf]  ;;  %v12545_v38 = vld [vmem:[#allocation15 + $0xa4c] sm:$0xf] }
 0x512   :  { %7521 = vmatpush.bf16.msra.mxu0 %v10891_v18  ;;  %7494 = vmatpush.bf16.msrb.mxu3 %v10611_v10  ;;  %v10580_v18 = vld [vmem:[#allocation15 + $0x39c] sm:$0xf0]  ;;  %v4258_v63 = vmul.f32 0.2, %v4130_v39  ;;  %v4266_v2 = vmul.f32 0.2, %v4138_v12  ;;  %v10835_v54 = vor.u32 %v12391_v31, %v10832_v42  ;;  %v4140_v48 = vadd.f32 %v14806_v41, %v4059_v49 }
 0x513   :  { %v10583_v26 = vor.u32 %v12328_v7, %v10580_v18  ;;  %v4132_v61 = vadd.f32 %v14806_v41, %v4051_v3  ;;  %vm4202_vm11 = vcmp.gt.f32.partialorder %v4138_v12, 0.0  ;;  %v4259_v52 = vmul.f32 0.2, %v4131_v4  ;;  %v12538_v10 = vld [vmem:[#allocation15 + $0xa14] sm:$0xf] }
 0x514   :  { %7436 = vmatpush.bf16.msra.mxu1 %v10163_v8  ;;  %v4267_v19 = vmul.f32 0.2, %v4139_v5  ;;  %v11451_v24 = vor.u32 %v12545_v38, %v11448_v9  ;;  %vm4195_vm12 = vcmp.gt.f32.partialorder %v4131_v4, 0.0  ;;  %vm4203_vm13 = vcmp.gt.f32.partialorder %v4139_v5, 0.0  ;;  %v12489_v17 = vld [vmem:[#allocation15 + $0x88c] sm:$0xf] }
 0x515   :  { %v10807_v6 = vor.u32 %v12384_v58, %v10804_v44  ;;  %v4322_v34 = vsel %vm4194_vm9, %v4130_v39, %v4258_v63  ;;  %v4330_v53 = vsel %vm4202_vm11, %v4138_v12, %v4266_v2  ;;  %v4260_v57 = vmul.f32 0.2, %v4132_v61  ;;  %v12601_v12 = vld [vmem:[#allocation15 + $0xc0c] sm:$0xf]  ;;  %v11224_v7 = vld [vmem:[#allocation15 + $0x8a4] sm:$0xf0] }
 0x516   :  { %7522 = vmatpush.bf16.msra.mxu0 %v10863_v40  ;;  %7495 = vmatpush.bf16.msrb.mxu3 %v10583_v26  ;;  %v4268_v23 = vmul.f32 0.2, %v4140_v48  ;;  %v4323_v41 = vsel %vm4195_vm12, %v4131_v4, %v4259_v52  ;;  %v4331_v8 = vsel %vm4203_vm13, %v4139_v5, %v4267_v19  ;;  %vm4196_vm14 = vcmp.gt.f32.partialorder %v4132_v61, 0.0  ;;  %v11672_v4 = vld [vmem:[#allocation15 + $0xc24] sm:$0xf0] }
 0x517   :  { %7575 = vmatpush.bf16.msra.mxu2 %v11451_v24  ;;  %vm4204_vm15 = vcmp.gt.f32.partialorder %v4140_v48, 0.0  ;;  %v11423_v47 = vor.u32 %v12538_v10, %v11420_v50  ;;  %v14955_v40 = vpack.c.bf16 %v4330_v53, %v4322_v34  ;;  %v14957_v31 = vpack.c.bf16 %v4331_v8, %v4323_v41  ;;  %v12531_v46 = vld [vmem:[#allocation15 + $0x9dc] sm:$0xf]  ;;  %v11392_v32 = vld [vmem:[#allocation15 + $0x9f4] sm:$0xf0] }
 0x518   :  { %7332 = vmatmul.bf16.gmra.mxu1 %v14922_v33  ;;  %v4324_v42 = vsel %vm4196_vm14, %v4132_v61, %v4260_v57  ;;  %v4332_v15 = vsel %vm4204_vm15, %v4140_v48, %v4268_v23  ;;  %v11675_v5 = vor.u32 %v12601_v12, %v11672_v4  ;;  %v11227_v3 = vor.u32 %v12489_v17, %v11224_v7  ;;  %v11644_v18 = vld [vmem:[#allocation15 + $0xbec] sm:$0xf0]  ;;  %v12482_v63 = vld [vmem:[#allocation15 + $0x854] sm:$0xf]  ;;  %v12524_v58 = vld [vmem:[#allocation15 + $0x9a4] sm:$0xf] }
 0x519   :  { %7437 = vmatpush.bf16.msra.mxu1 %v10135_v51  ;;  %v14961_v39 = vpack.c.bf16 %v4332_v15, %v4324_v42  ;;  %v11395_v49 = vor.u32 %v12531_v46, %v11392_v32  ;;  %v12594_v51 = vld [vmem:[#allocation15 + $0xbd4] sm:$0xf]  ;;  %v11196_v26 = vld [vmem:[#allocation15 + $0x86c] sm:$0xf0]  ;;  %v11364_v61 = vld [vmem:[#allocation15 + $0x9bc] sm:$0xf0] }
 0x51a   :  { %7361 = vmatmul.bf16.gmra.mxu2 %v14924_v60  ;;  %7523 = vmatpush.bf16.msra.mxu0 %v10835_v54  ;;  %v11647_v54 = vor.u32 %v12594_v51, %v11644_v18  ;;  %v11199_v48 = vor.u32 %v12482_v63, %v11196_v26  ;;  %v11367_v44 = vor.u32 %v12524_v58, %v11364_v61  ;;  %v12587_v52 = vld [vmem:[#allocation15 + $0xb9c] sm:$0xf]  ;;  %v11616_v19 = vld [vmem:[#allocation15 + $0xbb4] sm:$0xf0]  ;;  %v12517_v23 = vld [vmem:[#allocation15 + $0x96c] sm:$0xf] }
 0x51b   :  { %7576 = vmatpush.bf16.msra.mxu2 %v11423_v47  ;;  %7604 = vmatpush.bf16.msra.mxu3 %v11675_v5  ;;  %v12475_v53 = vld [vmem:[#allocation15 + $0x81c] sm:$0xf]  ;;  %v11168_v57 = vld [vmem:[#allocation15 + $0x834] sm:$0xf0]  ;;  %v11336_v8 = vld [vmem:[#allocation15 + $0x984] sm:$0xf0] }
 0x51c   :  { %7390 = vmatmul.bf16.gmra.mxu3 %v14926_v59  ;;  %v11171_v41 = vor.u32 %v12475_v53, %v11168_v57  ;;  %v12657_v10 = vld [vmem:[#allocation15 + $0xdcc] sm:$0xf]  ;;  %v11896_v50 = vld [vmem:[#allocation15 + $0xde4] sm:$0xf0]  ;;  %v11339_v47 = vor.u32 %v12517_v23, %v11336_v8  ;;  %v12650_v4 = vld [vmem:[#allocation15 + $0xd94] sm:$0xf] }
 0x51d   :  { %7546 = vmatpush.bf16.msrb.mxu1 %v11227_v3  ;;  %v11899_v42 = vor.u32 %v12657_v10, %v11896_v50  ;;  %v11868_v5 = vld [vmem:[#allocation15 + $0xdac] sm:$0xf0]  ;;  %v12580_v17 = vld [vmem:[#allocation15 + $0xb64] sm:$0xf]  ;;  %v11588_v3 = vld [vmem:[#allocation15 + $0xb7c] sm:$0xf0] }
 0x51e   :  { %7524 = vmatpush.bf16.msra.mxu0 %v10807_v6  ;;  %v11619_v6 = vor.u32 %v12587_v52, %v11616_v19  ;;  %v11871_v46 = vor.u32 %v12650_v4, %v11868_v5  ;;  %v12468_v32 = vld [vmem:[#allocation15 + $0x7e4] sm:$0xf]  ;;  %v11591_v51 = vor.u32 %v12580_v17, %v11588_v3  ;;  %v12510_v63 = vld [vmem:[#allocation15 + $0x934] sm:$0xf]  ;;  %v12643_v26 = vld [vmem:[#allocation15 + $0xd5c] sm:$0xf] }
 0x51f   :  { %7419 = vmatmul.bf16.gmra.mxu0 %v14943_v43  ;;  %7577 = vmatpush.bf16.msra.mxu2 %v11395_v49  ;;  %v11140_v49 = vld [vmem:[#allocation15 + $0x7fc] sm:$0xf0]  ;;  %v16350_v19 = vld [vmem:[#allocation28_spill] sm:$0xff]  ;;  %v16351_v53 = vld [vmem:[#allocation30_spill] sm:$0xff] }
 0x520   :  { %7605 = vmatpush.bf16.msra.mxu3 %v11647_v54  ;;  %v11143_v18 = vor.u32 %v12468_v32, %v11140_v49  ;;  %v11308_v54 = vld [vmem:[#allocation15 + $0x94c] sm:$0xf0]  ;;  %v12636_v23 = vld [vmem:[#allocation15 + $0xd24] sm:$0xf]  ;;  %v12573_v8 = vld [vmem:[#allocation15 + $0xb2c] sm:$0xf] }
 0x521   :  { %7547 = vmatpush.bf16.msrb.mxu1 %v11199_v48  ;;  %v11311_v61 = vor.u32 %v12510_v63, %v11308_v54  ;;  %v11840_v48 = vld [vmem:[#allocation15 + $0xd74] sm:$0xf0]  ;;  %v16352_v4 = vld [vmem:[#allocation33_spill] sm:$0xff]  ;;  %v12461_v17 = vld [vmem:[#allocation15 + $0x7ac] sm:$0xf] }
 0x522   :  { %7633 = vmatpush.bf16.msrb.mxu0 %v11899_v42  ;;  %v11843_v52 = vor.u32 %v12643_v26, %v11840_v48  ;;  %v12503_v3 = vld [vmem:[#allocation15 + $0x8fc] sm:$0xf]  ;;  %v11280_v49 = vld [vmem:[#allocation15 + $0x914] sm:$0xf0]  ;;  %v12454_v48 = vld [vmem:[#allocation15 + $0x774] sm:$0xf] }
 0x523   :  { %7578 = vmatpush.bf16.msra.mxu2 %v11367_v44  ;;  %v16349_v44 = vld [vmem:[#allocation24_spill] sm:$0xff]  ;;  %v11283_v63 = vor.u32 %v12503_v3, %v11280_v49  ;;  %v12496_v3 = vld [vmem:[#allocation15 + $0x8c4] sm:$0xf]  ;;  %v11252_v49 = vld [vmem:[#allocation15 + $0x8dc] sm:$0xf0] }
 0x524   :  { %7606 = vmatpush.bf16.msra.mxu3 %v11619_v6 }
 0x525   :  { %7548 = vmatpush.bf16.msrb.mxu1 %v11171_v41  ;;  %v11812_v41 = vld [vmem:[#allocation15 + $0xd3c] sm:$0xf0] }
 0x526   :  { %7634 = vmatpush.bf16.msrb.mxu0 %v11871_v46  ;;  %v11815_v50 = vor.u32 %v12636_v23, %v11812_v41  ;;  %v11112_v46 = vld [vmem:[#allocation15 + $0x7c4] sm:$0xf0]  ;;  %v12566_v23 = vld [vmem:[#allocation15 + $0xaf4] sm:$0xf] }
 0x527   :  { %7579 = vmatpush.bf16.msra.mxu2 %v11339_v47  ;;  %v11560_v47 = vld [vmem:[#allocation15 + $0xb44] sm:$0xf0]  ;;  %v11115_v32 = vor.u32 %v12461_v17, %v11112_v46 }
 0x528   :  { %7337 = vmatmul.bf16.gmra.mxu1 %v14955_v40  ;;  %7607 = vmatpush.bf16.msra.mxu3 %v11591_v51  ;;  %v11563_v42 = vor.u32 %v12573_v8, %v11560_v47  ;;  %v12629_v51 = vld [vmem:[#allocation15 + $0xcec] sm:$0xf]  ;;  %v12622_v47 = vld [vmem:[#allocation15 + $0xcb4] sm:$0xf] }
 0x529   :  { %7549 = vmatpush.bf16.msrb.mxu1 %v11143_v18  ;;  %v11784_v18 = vld [vmem:[#allocation15 + $0xd04] sm:$0xf0] }
 0x52a   :  { %7366 = vmatmul.bf16.gmra.mxu2 %v14957_v31  ;;  %7635 = vmatpush.bf16.msrb.mxu0 %v11843_v52  ;;  %v11787_v54 = vor.u32 %v12629_v51, %v11784_v18  ;;  %v11084_v52 = vld [vmem:[#allocation15 + $0x78c] sm:$0xf0]  ;;  %v11255_v18 = vor.u32 %v12496_v3, %v11252_v49  ;;  %v11028_v3 = vld [vmem:[#allocation15 + $0x71c] sm:$0xf0]  ;;  %v12552_v49 = vld [vmem:[#allocation15 + $0xa84] sm:$0xf] }
 0x52b   :  { %7580 = vmatpush.bf16.msra.mxu2 %v11311_v61  ;;  %v11087_v8 = vor.u32 %v12454_v48, %v11084_v52  ;;  %v12615_v48 = vld [vmem:[#allocation15 + $0xc7c] sm:$0xf]  ;;  %v11728_v52 = vld [vmem:[#allocation15 + $0xc94] sm:$0xf0] }
 0x52c   :  { %7395 = vmatmul.bf16.gmra.mxu3 %v14961_v39 }
 0x52d   :  { %7608 = vmatpush.bf16.msra.mxu3 %v11563_v42  ;;  %7550 = vmatpush.bf16.msrb.mxu1 %v11115_v32  ;;  %v11756_v42 = vld [vmem:[#allocation15 + $0xccc] sm:$0xf0]  ;;  %v12447_v32 = vld [vmem:[#allocation15 + $0x73c] sm:$0xf] }
 0x52e   :  { %7636 = vmatpush.bf16.msrb.mxu0 %v11815_v50  ;;  %v11532_v50 = vld [vmem:[#allocation15 + $0xb0c] sm:$0xf0]  ;;  %v11759_v46 = vor.u32 %v12622_v47, %v11756_v42  ;;  %v12440_v42 = vld [vmem:[#allocation15 + $0x704] sm:$0xf] }
 0x52f   :  { %7424 = vmatmul.bf16.gmra.mxu0 %v14655_v56  ;;  %7581 = vmatpush.bf16.msra.mxu2 %v11283_v63  ;;  %v11535_v17 = vor.u32 %v12566_v23, %v11532_v50  ;;  %v11056_v63 = vld [vmem:[#allocation15 + $0x754] sm:$0xf0]  ;;  %v11731_v50 = vor.u32 %v12615_v48, %v11728_v52  ;;  %v10558_v48 = vld [vmem:[#allocation15 + $0x350] sm:$0xf]  ;;  %v12325_v52 = vld [vmem:[#allocation15 + $0x368] sm:$0xf0] }
 0x531   :  { %7551 = vmatpush.bf16.msrb.mxu1 %v11087_v8  ;;  %7609 = vmatpush.bf16.msra.mxu3 %v11535_v17 }
 0x532   :  { %7637 = vmatpush.bf16.msrb.mxu0 %v11787_v54  ;;  %v12559_v54 = vld [vmem:[#allocation15 + $0xabc] sm:$0xf] }
 0x533   :  { %7582 = vmatpush.bf16.msra.mxu2 %v11255_v18 }
 0x535   :  { %v14965_v2 = vpop.f32.mrf.mxu1 }
 0x536   :  { %7638 = vmatpush.bf16.msrb.mxu0 %v11759_v46  ;;  %v12608_v46 = vld [vmem:[#allocation15 + $0xc44] sm:$0xf] }
 0x538   :  { %7438 = vmatmul.bf16.vlgmr.msra.gmra.mxu1 %v14657_v28 }
 0x53a   :  { %7467 = vmatmul.bf16.vlgmr.msrb.gmra.mxu2 %v14667_v13  ;;  %7639 = vmatpush.bf16.msrb.mxu0 %v11731_v50 }
 0x53c   :  { %v14969_v38 = vpop.f32.mrf.mxu0  ;;  %7496 = vmatmul.bf16.vlgmr.msrb.gmra.mxu3 %v14673_v37 }
 0x53d   :  { %v14972_v9 = vpop.f32.mrf.mxu2  ;;  %v14974_v24 = vpop.f32.mrf.mxu1 }
 0x53f   :  { %7525 = vmatmul.bf16.vlgmr.msra.gmra.mxu0 %v14690_v29  ;;  %v14977_v34 = vpop.f32.mrf.mxu3 }
 0x544   :  { %v14979_v15 = vpop.f32.mrf.mxu0 }
 0x545   :  { %v14981_v12 = vpop.f32.mrf.mxu2  ;;  %v14983_v7 = vpop.f32.mrf.mxu1 }
 0x547   :  { %v14985_v58 = vpop.f32.mrf.mxu3 }
 0x548   :  { %7443 = vmatmul.bf16.gmra.mxu1 %v16349_v44 }
 0x54a   :  { %7472 = vmatmul.bf16.gmra.mxu2 %v16350_v19 }
 0x54c   :  { %v14989_v6 = vpop.f32.mrf.mxu0  ;;  %7501 = vmatmul.bf16.gmra.mxu3 %v16351_v53  ;;  %v11059_v53 = vor.u32 %v12447_v32, %v11056_v63  ;;  %v11031_v32 = vor.u32 %v12440_v42, %v11028_v3  ;;  %v11476_v63 = vld [vmem:[#allocation15 + $0xa9c] sm:$0xf0] }
 0x54d   :  { %v14992_v57 = vpop.f32.mrf.mxu2  ;;  %v14994_v10 = vpop.f32.mrf.mxu1  ;;  %v15027_v3 = vld [vmem:[#allocation16] sm:$0xff] }
 0x54e   :  { %7552 = vmatpush.bf16.msrb.mxu1 %v11059_v53  ;;  %16353 = vst [vmem:[#allocation36_spill] sm:$0xff] %v15027_v3 }
 0x54f   :  { %7530 = vmatmul.bf16.gmra.mxu0 %v16352_v4  ;;  %v14997_v5 = vpop.f32.mrf.mxu3  ;;  %v11504_v4 = vld [vmem:[#allocation15 + $0xad4] sm:$0xf0] }
 0x550   :  { %v11507_v23 = vor.u32 %v12559_v54, %v11504_v4  ;;  %v11700_v4 = vld [vmem:[#allocation15 + $0xc5c] sm:$0xf0]  ;;  %v11479_v54 = vor.u32 %v12552_v49, %v11476_v63  ;;  %v15032_v49 = vperm.slane %v15027_v3, 0  ;;  %v12318_v63 = vld [vmem:[#allocation15 + $0x330] sm:$0xf0] }
 0x551   :  { %v11703_v18 = vor.u32 %v12608_v46, %v11700_v4  ;;  %v10782_v3 = vld [vmem:[#allocation15 + $0x510] sm:$0xf] }
 0x552   :  { %7610 = vmatpush.bf16.msra.mxu3 %v11507_v23  ;;  %7553 = vmatpush.bf16.msrb.mxu1 %v11031_v32  ;;  %v10530_v32 = vld [vmem:[#allocation15 + $0x318] sm:$0xf] }
 0x553   :  { %7640 = vmatpush.bf16.msrb.mxu0 %v11703_v18  ;;  %v10531_v4 = vor.u32 %v12318_v63, %v10530_v32  ;;  %v7208_v18 = vadd.f32 %v14965_v2, %v15032_v49  ;;  %v12269_v63 = vld [vmem:[#allocation15 + $0x1a8] sm:$0xf0] }
 0x554   :  { %v14999_v26 = vpop.f32.mrf.mxu0 }
 0x555   :  { %v15001_v61 = vpop.f32.mrf.mxu2  ;;  %v15003_v41 = vpop.f32.mrf.mxu1 }
 0x556   :  { %7611 = vmatpush.bf16.msra.mxu3 %v11479_v54 }
 0x557   :  { %v15005_v51 = vpop.f32.mrf.mxu3 }
 0x558   :  { %7448 = vmatmul.bf16.gmra.mxu1 %v14743_v14  ;;  %v10502_v14 = vld [vmem:[#allocation15 + $0x2e0] sm:$0xf] }
 0x55a   :  { %7477 = vmatmul.bf16.gmra.mxu2 %v14745_v16 }
 0x55c   :  { %v15009_v47 = vpop.f32.mrf.mxu0  ;;  %7506 = vmatmul.bf16.gmra.mxu3 %v14768_v21  ;;  %v10559_v21 = vor.u32 %v12325_v52, %v10558_v48  ;;  %v7237_v52 = vadd.f32 %v14972_v9, %v7208_v18  ;;  %v7210_v9 = vadd.f32 %v14974_v24, %v15032_v49 }
 0x55d   :  { %v15012_v8 = vpop.f32.mrf.mxu2  ;;  %v15014_v17 = vpop.f32.mrf.mxu1 }
 0x55e   :  { %7691 = vmatpush.bf16.msrb.mxu2 %v10559_v21  ;;  %v7266_v19 = vadd.f32 %v14977_v34, %v7237_v52  ;;  %v10754_v52 = vld [vmem:[#allocation15 + $0x4d8] sm:$0xf] }
 0x55f   :  { %7535 = vmatmul.bf16.gmra.mxu0 %v14772_v45  ;;  %v15017_v53 = vpop.f32.mrf.mxu3 }
 0x562   :  { %7692 = vmatpush.bf16.msrb.mxu2 %v10531_v4  ;;  %v12311_v4 = vld [vmem:[#allocation15 + $0x2f8] sm:$0xf0] }
 0x564   :  { %v15019_v16 = vpop.f32.mrf.mxu0 }
 0x565   :  { %v15021_v23 = vpop.f32.mrf.mxu2  ;;  %v15023_v50 = vpop.f32.mrf.mxu1 }
 0x567   :  { %v15025_v42 = vpop.f32.mrf.mxu3 }
 0x568   :  { %7453 = vmatmul.bf16.gmra.mxu1 %v14795_v30  ;;  %v10334_v30 = vld [vmem:[#allocation15 + $0x190] sm:$0xf] }
 0x569   :  { %v10335_v44 = vor.u32 %v12269_v63, %v10334_v30  ;;  %v12374_v30 = vld [vmem:[#allocation15 + $0x4f0] sm:$0xf0] }
 0x56a   :  { %7482 = vmatmul.bf16.gmra.mxu2 %v14797_v1  ;;  %v12381_v1 = vld [vmem:[#allocation15 + $0x528] sm:$0xf0]  ;;  %v10755_v63 = vor.u32 %v12374_v30, %v10754_v52 }
 0x56b   :  { %v10783_v32 = vor.u32 %v12381_v1, %v10782_v3  ;;  %7662 = vmatpush.bf16.msra.mxu1 %v10335_v44  ;;  %v7239_v1 = vadd.f32 %v14981_v12, %v7210_v9  ;;  %v7295_v3 = vadd.f32 %v14969_v38, %v7266_v19  ;;  %v10474_v44 = vld [vmem:[#allocation15 + $0x2a8] sm:$0xf]  ;;  %v7213_v19 = vadd.f32 %v14983_v7, %v15032_v49  ;;  %v12255_v7 = vld [vmem:[#allocation15 + $0x138] sm:$0xf0] }
 0x56c   :  { %v15034_v21 = vpop.f32.mrf.mxu0  ;;  %7511 = vmatmul.bf16.gmra.mxu3 %v14799_v0 }
 0x56d   :  { %v15037_v46 = vpop.f32.mrf.mxu2  ;;  %v15039_v54 = vpop.f32.mrf.mxu1  ;;  %7720 = vmatpush.bf16.msrb.mxu3 %v10783_v32  ;;  %v7242_v52 = vadd.f32 %v14992_v57, %v7213_v19  ;;  %v11006_v19 = vld [vmem:[#allocation15 + $0x6d0] sm:$0xf] }
 0x56f   :  { %7540 = vmatmul.bf16.gmra.mxu0 %v14817_v11  ;;  %v15044_v48 = vpop.f32.mrf.mxu3  ;;  %v10503_v11 = vor.u32 %v12311_v4, %v10502_v14  ;;  %v10306_v14 = vld [vmem:[#allocation15 + $0x158] sm:$0xf]  ;;  %v12262_v4 = vld [vmem:[#allocation15 + $0x170] sm:$0xf0] }
 0x570   :  { %v10307_v9 = vor.u32 %v12262_v4, %v10306_v14  ;;  %v10278_v14 = vld [vmem:[#allocation15 + $0x120] sm:$0xf] }
 0x571   :  { %7693 = vmatpush.bf16.msrb.mxu2 %v10503_v11  ;;  %v12304_v11 = vld [vmem:[#allocation15 + $0x2c0] sm:$0xf0]  ;;  %7721 = vmatpush.bf16.msrb.mxu3 %v10755_v63 }
 0x572   :  { %v10475_v38 = vor.u32 %v12304_v11, %v10474_v44  ;;  %7663 = vmatpush.bf16.msra.mxu1 %v10307_v9  ;;  %v10446_v44 = vld [vmem:[#allocation15 + $0x270] sm:$0xf]  ;;  %v12297_v11 = vld [vmem:[#allocation15 + $0x288] sm:$0xf0]  ;;  %v7271_v9 = vadd.f32 %v14997_v5, %v7242_v52 }
 0x573   :  { %v10447_v57 = vor.u32 %v12297_v11, %v10446_v44 }
 0x574   :  { %v15047_v45 = vpop.f32.mrf.mxu0 }
 0x575   :  { %v15049_v0 = vpop.f32.mrf.mxu2  ;;  %v7323_v2 = vpop.f32.mrf.mxu1  ;;  %7694 = vmatpush.bf16.msrb.mxu2 %v10475_v38 }
 0x576   :  { %v7324_v34 = vadd.f32 %v7323_v2, %v7295_v3 }
 0x577   :  { %v15054_v18 = vpop.f32.mrf.mxu3 }
 0x578   :  { %7554 = vmatmul.bf16.vlgmr.msrb.gmra.mxu1 %v14844_v27  ;;  %v7268_v27 = vadd.f32 %v14985_v58, %v7239_v1  ;;  %v10726_v1 = vld [vmem:[#allocation15 + $0x4a0] sm:$0xf] }
 0x579   :  { %7695 = vmatpush.bf16.msrb.mxu2 %v10447_v57  ;;  %v10950_v57 = vld [vmem:[#allocation15 + $0x660] sm:$0xf] }
 0x57a   :  { %7583 = vmatmul.bf16.vlgmr.msra.gmra.mxu2 %v14849_v20  ;;  %v7297_v30 = vadd.f32 %v14979_v15, %v7268_v27  ;;  %v12437_v27 = vld [vmem:[#allocation15 + $0x6e8] sm:$0xf0] }
 0x57b   :  { %v11007_v15 = vor.u32 %v12437_v27, %v11006_v19  ;;  %v12423_v27 = vld [vmem:[#allocation15 + $0x678] sm:$0xf0] }
 0x57c   :  { %v7410_v32 = vpop.f32.mrf.mxu0  ;;  %7612 = vmatmul.bf16.vlgmr.msra.gmra.mxu3 %v14851_v36 }
 0x57d   :  { %v7352_v24 = vpop.f32.mrf.mxu2  ;;  %v7325_v12 = vpop.f32.mrf.mxu1  ;;  %7749 = vmatpush.bf16.msra.mxu0 %v11007_v15  ;;  %v7218_v15 = vadd.f32 %v15003_v41, %v15032_v49 }
 0x57e   :  { %v7353_v29 = vadd.f32 %v7352_v24, %v7324_v34  ;;  %v7326_v58 = vadd.f32 %v7325_v12, %v7297_v30  ;;  %v12367_v34 = vld [vmem:[#allocation15 + $0x4b8] sm:$0xf0] }
 0x57f   :  { %7641 = vmatmul.bf16.vlgmr.msrb.gmra.mxu0 %v14857_v55  ;;  %v7381_v2 = vpop.f32.mrf.mxu3  ;;  %v10727_v4 = vor.u32 %v12367_v34, %v10726_v1  ;;  %v12430_v1 = vld [vmem:[#allocation15 + $0x6b0] sm:$0xf0]  ;;  %v10698_v34 = vld [vmem:[#allocation15 + $0x468] sm:$0xf] }
 0x580   :  { %v7382_v3 = vadd.f32 %v7381_v2, %v7353_v29  ;;  %v10279_v2 = vor.u32 %v12255_v7, %v10278_v14  ;;  %v12248_v7 = vld [vmem:[#allocation15 + $0x100] sm:$0xf0] }
 0x581   :  { %7722 = vmatpush.bf16.msrb.mxu3 %v10727_v4  ;;  %v12360_v4 = vld [vmem:[#allocation15 + $0x480] sm:$0xf0] }
 0x582   :  { %v7411_v36 = vadd.f32 %v7410_v32, %v7382_v3  ;;  %v7215_v32 = vadd.f32 %v14994_v10, %v15032_v49  ;;  %7664 = vmatpush.bf16.msra.mxu1 %v10279_v2  ;;  %v7300_v3 = vadd.f32 %v14989_v6, %v7271_v9  ;;  %v10250_v6 = vld [vmem:[#allocation15 + $0xe8] sm:$0xf]  ;;  %v10699_v9 = vor.u32 %v12360_v4, %v10698_v34  ;;  %v10418_v2 = vld [vmem:[#allocation15 + $0x238] sm:$0xf]  ;;  %v10222_v4 = vld [vmem:[#allocation15 + $0xb0] sm:$0xf] }
 0x584   :  { %12723 = vtanh.f32 %v7411_v36  ;;  %v7412_v24 = vpop.f32.mrf.mxu0  ;;  %v7244_v5 = vadd.f32 %v15001_v61, %v7215_v32 }
 0x585   :  { %v7354_v63 = vpop.f32.mrf.mxu2  ;;  %v7328_v38 = vpop.f32.mrf.mxu1  ;;  %7723 = vmatpush.bf16.msrb.mxu3 %v10699_v9 }
 0x586   :  { %v7355_v29 = vadd.f32 %v7354_v63, %v7326_v58  ;;  %v7329_v10 = vadd.f32 %v7328_v38, %v7300_v3  ;;  %v10978_v58 = vld [vmem:[#allocation15 + $0x698] sm:$0xf]  ;;  %v7273_v44 = vadd.f32 %v15005_v51, %v7244_v5  ;;  %v12290_v38 = vld [vmem:[#allocation15 + $0x250] sm:$0xf0]  ;;  %v7247_v51 = vadd.f32 %v15012_v8, %v7218_v15 }
 0x587   :  { %v7383_v36 = vpop.f32.mrf.mxu3  ;;  %v10979_v61 = vor.u32 %v12430_v1, %v10978_v58  ;;  %v10419_v19 = vor.u32 %v12290_v38, %v10418_v2  ;;  %v12409_v2 = vld [vmem:[#allocation15 + $0x608] sm:$0xf0]  ;;  %v7220_v38 = vadd.f32 %v15014_v17, %v15032_v49 }
 0x588   :  { %v7384_v12 = vadd.f32 %v7383_v36, %v7355_v29  ;;  %7559 = vmatmul.bf16.gmra.mxu1 %v14879_v35  ;;  %v10251_v29 = vor.u32 %v12248_v7, %v10250_v6  ;;  %v10951_v36 = vor.u32 %v12423_v27, %v10950_v57  ;;  %v7302_v5 = vadd.f32 %v14999_v26, %v7273_v44  ;;  %v12241_v7 = vld [vmem:[#allocation15 + $0xc8] sm:$0xf0]  ;;  %v10390_v44 = vld [vmem:[#allocation15 + $0x200] sm:$0xf] }
 0x589   :  { %7750 = vmatpush.bf16.msra.mxu0 %v10979_v61  ;;  %7696 = vmatpush.bf16.msrb.mxu2 %v10419_v19  ;;  %v12353_v61 = vld [vmem:[#allocation15 + $0x448] sm:$0xf0]  ;;  %v7276_v8 = vadd.f32 %v15017_v53, %v7247_v51  ;;  %v10223_v9 = vor.u32 %v12241_v7, %v10222_v4  ;;  %v7249_v53 = vadd.f32 %v15021_v23, %v7220_v38  ;;  %v12234_v51 = vld [vmem:[#allocation15 + $0x90] sm:$0xf0] }
 0x58a   :  { %7588 = vmatmul.bf16.gmra.mxu2 %v14881_v62  ;;  %v12724_v52 = vpop.eup %12723  ;;  %v7413_v30 = vadd.f32 %v7412_v24, %v7384_v12  ;;  %7665 = vmatpush.bf16.msra.mxu1 %v10251_v29  ;;  %v10894_v29 = vld [vmem:[#allocation15 + $0x5f0] sm:$0xf]  ;;  %v7223_v7 = vadd.f32 %v15023_v50, %v15032_v49 }
 0x58b   :  { %8878 = vst [vmem:[%s16041_s11] sm:$0xff] %v12724_v52  ;;  %v10895_v19 = vor.u32 %v12409_v2, %v10894_v29  ;;  %v7305_v15 = vadd.f32 %v15009_v47, %v7276_v8  ;;  %v10642_v47 = vld [vmem:[#allocation15 + $0x3f8] sm:$0xf] }
 0x58c   :  { %12725 = vtanh.f32 %v7413_v30  ;;  %v7415_v14 = vpop.f32.mrf.mxu0  ;;  %7617 = vmatmul.bf16.gmra.mxu3 %v14883_v22  ;;  %v10922_v30 = vld [vmem:[#allocation15 + $0x628] sm:$0xf] }
 0x58d   :  { %v7357_v63 = vpop.f32.mrf.mxu2  ;;  %v7330_v11 = vpop.f32.mrf.mxu1  ;;  %7751 = vmatpush.bf16.msra.mxu0 %v10951_v36 }
 0x58e   :  { %v7358_v24 = vadd.f32 %v7357_v63, %v7329_v10  ;;  %v7331_v41 = vadd.f32 %v7330_v11, %v7302_v5  ;;  %v12416_v10 = vld [vmem:[#allocation15 + $0x640] sm:$0xf0]  ;;  %v10670_v63 = vld [vmem:[#allocation15 + $0x430] sm:$0xf]  ;;  %7666 = vmatpush.bf16.msra.mxu1 %v10223_v9  ;;  %v10838_v9 = vld [vmem:[#allocation15 + $0x580] sm:$0xf] }
 0x58f   :  { %7646 = vmatmul.bf16.gmra.mxu0 %v14906_v25  ;;  %v7386_v32 = vpop.f32.mrf.mxu3  ;;  %v10923_v34 = vor.u32 %v12416_v10, %v10922_v30  ;;  %v7278_v30 = vadd.f32 %v15025_v42, %v7249_v53 }
 0x590   :  { %v7387_v12 = vadd.f32 %v7386_v32, %v7358_v24  ;;  %v12283_v24 = vld [vmem:[#allocation15 + $0x218] sm:$0xf0] }
 0x591   :  { %7752 = vmatpush.bf16.msra.mxu0 %v10923_v34  ;;  %v10391_v11 = vor.u32 %v12283_v24, %v10390_v44  ;;  %v12402_v34 = vld [vmem:[#allocation15 + $0x5d0] sm:$0xf0]  ;;  %v12339_v24 = vld [vmem:[#allocation15 + $0x3d8] sm:$0xf0] }
 0x592   :  { %v12726_v3 = vpop.eup %12725  ;;  %v7416_v52 = vadd.f32 %v7415_v14, %v7387_v12  ;;  %v10671_v14 = vor.u32 %v12353_v61, %v10670_v63  ;;  %v10194_v12 = vld [vmem:[#allocation15 + $0x78] sm:$0xf]  ;;  %v10362_v63 = vld [vmem:[#allocation15 + $0x1c8] sm:$0xf]  ;;  %v12276_v61 = vld [vmem:[#allocation15 + $0x1e0] sm:$0xf0] }
 0x593   :  { %8885 = vst [vmem:[%s16041_s11 + $0x38] sm:$0xff] %v12726_v3  ;;  %7697 = vmatpush.bf16.msrb.mxu2 %v10391_v11  ;;  %v10195_v3 = vor.u32 %v12234_v51, %v10194_v12  ;;  %v10363_v8 = vor.u32 %v12276_v61, %v10362_v63  ;;  %v12395_v11 = vld [vmem:[#allocation15 + $0x598] sm:$0xf0]  ;;  %v10586_v51 = vld [vmem:[#allocation15 + $0x388] sm:$0xf] }
 0x594   :  { %12727 = vtanh.f32 %v7416_v52  ;;  %v7417_v58 = vpop.f32.mrf.mxu0  ;;  %7724 = vmatpush.bf16.msrb.mxu3 %v10671_v14  ;;  %v12346_v52 = vld [vmem:[#allocation15 + $0x410] sm:$0xf0]  ;;  %v10614_v14 = vld [vmem:[#allocation15 + $0x3c0] sm:$0xf]  ;;  %v10839_v38 = vor.u32 %v12395_v11, %v10838_v9  ;;  %v11426_v63 = vld [vmem:[#allocation15 + $0xa18] sm:$0xf] }
 0x595   :  { %v7359_v1 = vpop.f32.mrf.mxu2  ;;  %v7333_v6 = vpop.f32.mrf.mxu1  ;;  %7753 = vmatpush.bf16.msra.mxu0 %v10895_v19  ;;  %7667 = vmatpush.bf16.msra.mxu1 %v10195_v3  ;;  %v10615_v2 = vor.u32 %v12339_v24, %v10614_v14  ;;  %v7307_v19 = vadd.f32 %v15019_v16, %v7278_v30  ;;  %v12549_v30 = vld [vmem:[#allocation15 + $0xa68] sm:$0xf0]  ;;  %v12542_v61 = vld [vmem:[#allocation15 + $0xa30] sm:$0xf0] }
 0x596   :  { %v7360_v26 = vadd.f32 %v7359_v1, %v7331_v41  ;;  %v7334_v17 = vadd.f32 %v7333_v6, %v7305_v15  ;;  %v10866_v41 = vld [vmem:[#allocation15 + $0x5b8] sm:$0xf]  ;;  %v10643_v1 = vor.u32 %v12346_v52, %v10642_v47  ;;  %v12227_v6 = vld [vmem:[#allocation15 + $0x58] sm:$0xf0]  ;;  %v10138_v15 = vld [vmem:[#allocation15 + $0x8] sm:$0xf]  ;;  %v11427_v14 = vor.u32 %v12542_v61, %v11426_v63 }
 0x597   :  { %v7388_v57 = vpop.f32.mrf.mxu3  ;;  %v10867_v4 = vor.u32 %v12402_v34, %v10866_v41  ;;  %7698 = vmatpush.bf16.msrb.mxu2 %v10363_v8  ;;  %v12388_v52 = vld [vmem:[#allocation15 + $0x560] sm:$0xf0]  ;;  %v11454_v41 = vld [vmem:[#allocation15 + $0xa50] sm:$0xf]  ;;  %v11622_v61 = vld [vmem:[#allocation15 + $0xba0] sm:$0xf] }
 0x598   :  { %v7389_v27 = vadd.f32 %v7388_v57, %v7360_v26  ;;  %7564 = vmatmul.bf16.gmra.mxu1 %v14922_v33  ;;  %v10166_v26 = vld [vmem:[#allocation15 + $0x40] sm:$0xf]  ;;  %7725 = vmatpush.bf16.msrb.mxu3 %v10643_v1  ;;  %v7252_v57 = vadd.f32 %v15037_v46, %v7223_v7  ;;  %v12332_v46 = vld [vmem:[#allocation15 + $0x3a0] sm:$0xf0]  ;;  %v7225_v1 = vadd.f32 %v15039_v54, %v15032_v49 }
 0x599   :  { %v10167_v42 = vor.u32 %v12227_v6, %v10166_v26  ;;  %7754 = vmatpush.bf16.msra.mxu0 %v10867_v4  ;;  %v10587_v47 = vor.u32 %v12332_v46, %v10586_v51  ;;  %v12598_v51 = vld [vmem:[#allocation15 + $0xbf0] sm:$0xf0]  ;;  %v11202_v46 = vld [vmem:[#allocation15 + $0x858] sm:$0xf] }
 0x59a   :  { %7593 = vmatmul.bf16.gmra.mxu2 %v14924_v60  ;;  %v12728_v32 = vpop.eup %12727  ;;  %v7418_v36 = vadd.f32 %v7417_v58, %v7389_v27  ;;  %v7281_v16 = vadd.f32 %v15044_v48, %v7252_v57  ;;  %v7254_v48 = vadd.f32 %v15049_v0, %v7225_v1  ;;  %v12605_v0 = vld [vmem:[#allocation15 + $0xc28] sm:$0xf0] }
 0x59b   :  { %8892 = vst [vmem:[%s16041_s11 + $0x70] sm:$0xff] %v12728_v32  ;;  %7668 = vmatpush.bf16.msra.mxu1 %v10167_v42  ;;  %v12220_v32 = vld [vmem:[#allocation15 + $0x20] sm:$0xf0] }
 0x59c   :  { %12729 = vtanh.f32 %v7418_v36  ;;  %v7420_v5 = vpop.f32.mrf.mxu0  ;;  %7622 = vmatmul.bf16.gmra.mxu3 %v14926_v59  ;;  %v10139_v12 = vor.u32 %v12220_v32, %v10138_v15  ;;  %v7310_v8 = vadd.f32 %v15034_v21, %v7281_v16  ;;  %v7283_v21 = vadd.f32 %v15054_v18, %v7254_v48 }
 0x59d   :  { %v7362_v23 = vpop.f32.mrf.mxu2  ;;  %v7335_v58 = vpop.f32.mrf.mxu1  ;;  %7726 = vmatpush.bf16.msrb.mxu3 %v10615_v2  ;;  %7755 = vmatpush.bf16.msra.mxu0 %v10839_v38  ;;  %v12493_v2 = vld [vmem:[#allocation15 + $0x8a8] sm:$0xf0]  ;;  %v11398_v38 = vld [vmem:[#allocation15 + $0x9e0] sm:$0xf] }
 0x59e   :  { %v7363_v10 = vadd.f32 %v7362_v23, %v7334_v17  ;;  %v7336_v50 = vadd.f32 %v7335_v58, %v7307_v19  ;;  %v10810_v23 = vld [vmem:[#allocation15 + $0x548] sm:$0xf]  ;;  %v11455_v58 = vor.u32 %v12549_v30, %v11454_v41 }
 0x59f   :  { %7651 = vmatmul.bf16.gmra.mxu0 %v14943_v43  ;;  %v7391_v44 = vpop.f32.mrf.mxu3  ;;  %7669 = vmatpush.bf16.msra.mxu1 %v10139_v12  ;;  %v11650_v12 = vld [vmem:[#allocation15 + $0xbd8] sm:$0xf] }
 0x5a0   :  { %v7392_v29 = vadd.f32 %v7391_v44, %v7363_v10  ;;  %v10811_v10 = vor.u32 %v12388_v52, %v10810_v23  ;;  %7807 = vmatpush.bf16.msra.mxu2 %v11455_v58  ;;  %v11678_v44 = vld [vmem:[#allocation15 + $0xc10] sm:$0xf] }
 0x5a1   :  { %7727 = vmatpush.bf16.msrb.mxu3 %v10587_v47  ;;  %v11679_v9 = vor.u32 %v12605_v0, %v11678_v44  ;;  %v12528_v47 = vld [vmem:[#allocation15 + $0x9c0] sm:$0xf0]  ;;  %v12521_v44 = vld [vmem:[#allocation15 + $0x988] sm:$0xf0]  ;;  %v11902_v0 = vld [vmem:[#allocation15 + $0xdd0] sm:$0xf] }
 0x5a2   :  { %v12730_v27 = vpop.eup %12729  ;;  %v7421_v53 = vadd.f32 %v7420_v5, %v7392_v29  ;;  %7756 = vmatpush.bf16.msra.mxu0 %v10811_v10  ;;  %v11230_v29 = vld [vmem:[#allocation15 + $0x890] sm:$0xf] }
 0x5a3   :  { %8899 = vst [vmem:[%s16041_s11 + $0xa8] sm:$0xff] %v12730_v27  ;;  %v11231_v19 = vor.u32 %v12493_v2, %v11230_v29  ;;  %v12535_v27 = vld [vmem:[#allocation15 + $0x9f8] sm:$0xf0]  ;;  %v11874_v2 = vld [vmem:[#allocation15 + $0xd98] sm:$0xf] }
 0x5a4   :  { %12731 = vtanh.f32 %v7421_v53  ;;  %v7422_v36 = vpop.f32.mrf.mxu0  ;;  %7808 = vmatpush.bf16.msra.mxu2 %v11427_v14  ;;  %v7312_v53 = vadd.f32 %v15047_v45, %v7283_v21  ;;  %v11651_v45 = vor.u32 %v12598_v51, %v11650_v12  ;;  %v11174_v14 = vld [vmem:[#allocation15 + $0x820] sm:$0xf]  ;;  %v12661_v21 = vld [vmem:[#allocation15 + $0xde8] sm:$0xf0] }
 0x5a5   :  { %v7364_v17 = vpop.f32.mrf.mxu2  ;;  %v7338_v3 = vpop.f32.mrf.mxu1  ;;  %7836 = vmatpush.bf16.msra.mxu3 %v11679_v9  ;;  %7778 = vmatpush.bf16.msrb.mxu1 %v11231_v19  ;;  %v11846_v12 = vld [vmem:[#allocation15 + $0xd60] sm:$0xf] }
 0x5a6   :  { %v7365_v5 = vadd.f32 %v7364_v17, %v7336_v50  ;;  %v7339_v49 = vadd.f32 %v7338_v3, %v7310_v8  ;;  %v11399_v50 = vor.u32 %v12535_v27, %v11398_v38  ;;  %v11370_v3 = vld [vmem:[#allocation15 + $0x9a8] sm:$0xf]  ;;  %v12654_v38 = vld [vmem:[#allocation15 + $0xdb0] sm:$0xf0] }
 0x5a7   :  { %v7393_v34 = vpop.f32.mrf.mxu3  ;;  %v11371_v41 = vor.u32 %v12528_v47, %v11370_v3  ;;  %v11875_v27 = vor.u32 %v12654_v38, %v11874_v2  ;;  %v16356_v3 = vld [vmem:[#allocation28_spill] sm:$0xff] }
 0x5a8   :  { %v7394_v4 = vadd.f32 %v7393_v34, %v7365_v5  ;;  %7569 = vmatmul.bf16.gmra.mxu1 %v14955_v40  ;;  %7809 = vmatpush.bf16.msra.mxu2 %v11399_v50  ;;  %v12486_v5 = vld [vmem:[#allocation15 + $0x870] sm:$0xf0]  ;;  %v11146_v50 = vld [vmem:[#allocation15 + $0x7e8] sm:$0xf] }
 0x5a9   :  { %v11203_v52 = vor.u32 %v12486_v5, %v11202_v46  ;;  %7837 = vmatpush.bf16.msra.mxu3 %v11651_v45  ;;  %v16355_v45 = vld [vmem:[#allocation24_spill] sm:$0xff] }
 0x5aa   :  { %7598 = vmatmul.bf16.gmra.mxu2 %v14957_v31  ;;  %v12732_v26 = vpop.eup %12731  ;;  %v7423_v6 = vadd.f32 %v7422_v36, %v7394_v4  ;;  %v12591_v4 = vld [vmem:[#allocation15 + $0xbb8] sm:$0xf0] }
 0x5ab   :  { %8906 = vst [vmem:[%s16041_s11 + $0xe0] sm:$0xff] %v12732_v26  ;;  %7779 = vmatpush.bf16.msrb.mxu1 %v11203_v52  ;;  %v11623_v8 = vor.u32 %v12591_v4, %v11622_v61  ;;  %v16354_v26 = vld [vmem:[#allocation49_spill] sm:$0xff]  ;;  %v16357_v52 = vld [vmem:[#allocation30_spill] sm:$0xff]  ;;  %v12577_v4 = vld [vmem:[#allocation15 + $0xb48] sm:$0xf0] }
 0x5ac   :  { %12733 = vtanh.f32 %v7423_v6  ;;  %v7425_v54 = vpop.f32.mrf.mxu0  ;;  %7627 = vmatmul.bf16.gmra.mxu3 %v14961_v39  ;;  %7810 = vmatpush.bf16.msra.mxu2 %v11371_v41 }
 0x5ad   :  { %v7367_v7 = vpop.f32.mrf.mxu2  ;;  %v7340_v24 = vpop.f32.mrf.mxu1  ;;  %7838 = vmatpush.bf16.msra.mxu3 %v11623_v8 }
 0x5ae   :  { %v7368_v42 = vadd.f32 %v7367_v7, %v7339_v49  ;;  %v7341_v18 = vadd.f32 %v7340_v24, %v7312_v53  ;;  %v12479_v49 = vld [vmem:[#allocation15 + $0x838] sm:$0xf0]  ;;  %v11903_v24 = vor.u32 %v12661_v21, %v11902_v0  ;;  %v12584_v53 = vld [vmem:[#allocation15 + $0xb80] sm:$0xf0] }
 0x5af   :  { %7656 = vmatmul.bf16.gmra.mxu0 %v14655_v56  ;;  %v7396_v11 = vpop.f32.mrf.mxu3  ;;  %v11175_v7 = vor.u32 %v12479_v49, %v11174_v14  ;;  %v16358_v14 = vld [vmem:[#allocation33_spill] sm:$0xff]  ;;  %v12507_v21 = vld [vmem:[#allocation15 + $0x918] sm:$0xf0] }
 0x5b0   :  { %v7397_v57 = vadd.f32 %v7396_v11, %v7368_v42  ;;  %7865 = vmatpush.bf16.msrb.mxu0 %v11903_v24  ;;  %v12633_v24 = vld [vmem:[#allocation15 + $0xd08] sm:$0xf0] }
 0x5b1   :  { %7780 = vmatpush.bf16.msrb.mxu1 %v11175_v7  ;;  %v12465_v7 = vld [vmem:[#allocation15 + $0x7c8] sm:$0xf0] }
 0x5b2   :  { %v12734_v15 = vpop.eup %12733  ;;  %v7426_v32 = vadd.f32 %v7425_v54, %v7397_v57  ;;  %v11342_v54 = vld [vmem:[#allocation15 + $0x970] sm:$0xf]  ;;  %v11594_v57 = vld [vmem:[#allocation15 + $0xb68] sm:$0xf] }
 0x5b3   :  { %8913 = vst [vmem:[%s16041_s11 + $0x118] sm:$0xff] %v12734_v15  ;;  %v11343_v42 = vor.u32 %v12521_v44, %v11342_v54  ;;  %v12472_v15 = vld [vmem:[#allocation15 + $0x800] sm:$0xf0]  ;;  %v11118_v54 = vld [vmem:[#allocation15 + $0x7b0] sm:$0xf] }
 0x5b4   :  { %12735 = vtanh.f32 %v7426_v32  ;;  %v7427_v36 = vpop.f32.mrf.mxu0  ;;  %v11595_v32 = vor.u32 %v12584_v53, %v11594_v57  ;;  %7866 = vmatpush.bf16.msrb.mxu0 %v11875_v27  ;;  %v11286_v44 = vld [vmem:[#allocation15 + $0x900] sm:$0xf]  ;;  %v11119_v0 = vor.u32 %v12465_v7, %v11118_v54  ;;  %v11090_v27 = vld [vmem:[#allocation15 + $0x778] sm:$0xf]  ;;  %v12458_v53 = vld [vmem:[#allocation15 + $0x790] sm:$0xf0] }
 0x5b5   :  { %v7369_v17 = vpop.f32.mrf.mxu2  ;;  %v15124_v16 = vpop.f32.mrf.mxu1  ;;  %7811 = vmatpush.bf16.msra.mxu2 %v11343_v42  ;;  %v11790_v42 = vld [vmem:[#allocation15 + $0xcf0] sm:$0xf]  ;;  %v16359_v54 = vld [vmem:[#allocation40_spill] sm:$0xff] }
 0x5b6   :  { %v7370_v23 = vadd.f32 %v7369_v17, %v7341_v18  ;;  %v11147_v18 = vor.u32 %v12472_v15, %v11146_v50  ;;  %v12514_v17 = vld [vmem:[#allocation15 + $0x950] sm:$0xf0]  ;;  %7839 = vmatpush.bf16.msra.mxu3 %v11595_v32  ;;  %v11791_v2 = vor.u32 %v12633_v24, %v11790_v42  ;;  %v11538_v50 = vld [vmem:[#allocation15 + $0xaf8] sm:$0xf]  ;;  %v11091_v32 = vor.u32 %v12458_v53, %v11090_v27  ;;  %v11034_v53 = vld [vmem:[#allocation15 + $0x708] sm:$0xf] }
 0x5b7   :  { %v7398_v30 = vpop.f32.mrf.mxu3 }
 0x5b8   :  { %v7399_v10 = vadd.f32 %v7398_v30, %v7370_v23  ;;  %7670 = vmatmul.bf16.vlgmr.msra.gmra.mxu1 %v14657_v28  ;;  %v12647_v23 = vld [vmem:[#allocation15 + $0xd78] sm:$0xf0]  ;;  %v11818_v30 = vld [vmem:[#allocation15 + $0xd28] sm:$0xf] }
 0x5b9   :  { %v11847_v5 = vor.u32 %v12647_v23, %v11846_v12  ;;  %7781 = vmatpush.bf16.msrb.mxu1 %v11147_v18  ;;  %v12570_v18 = vld [vmem:[#allocation15 + $0xb10] sm:$0xf0]  ;;  %v11258_v23 = vld [vmem:[#allocation15 + $0x8c8] sm:$0xf] }
 0x5ba   :  { %7699 = vmatmul.bf16.vlgmr.msrb.gmra.mxu2 %v14667_v13  ;;  %v12736_v58 = vpop.eup %12735  ;;  %v7428_v1 = vadd.f32 %v7427_v36, %v7399_v10  ;;  %v11314_v36 = vld [vmem:[#allocation15 + $0x938] sm:$0xf]  ;;  %v12640_v10 = vld [vmem:[#allocation15 + $0xd40] sm:$0xf0]  ;;  %v11539_v12 = vor.u32 %v12570_v18, %v11538_v50 }
 0x5bb   :  { %8920 = vst [vmem:[%s16041_s11 + $0x150] sm:$0xff] %v12736_v58  ;;  %v11315_v46 = vor.u32 %v12514_v17, %v11314_v36  ;;  %7867 = vmatpush.bf16.msrb.mxu0 %v11847_v5  ;;  %v11566_v58 = vld [vmem:[#allocation15 + $0xb30] sm:$0xf]  ;;  %v11819_v61 = vor.u32 %v12640_v10, %v11818_v30  ;;  %v11762_v36 = vld [vmem:[#allocation15 + $0xcb8] sm:$0xf] }
 0x5bc   :  { %12737 = vtanh.f32 %v7428_v1  ;;  %v15131_v34 = vpop.f32.mrf.mxu0  ;;  %7728 = vmatmul.bf16.vlgmr.msrb.gmra.mxu3 %v14673_v37  ;;  %v11567_v8 = vor.u32 %v12577_v4, %v11566_v58  ;;  %v12626_v17 = vld [vmem:[#allocation15 + $0xcd0] sm:$0xf0]  ;;  %v12500_v5 = vld [vmem:[#allocation15 + $0x8e0] sm:$0xf0]  ;;  %v11062_v30 = vld [vmem:[#allocation15 + $0x740] sm:$0xf] }
 0x5bd   :  { %v15134_v63 = vpop.f32.mrf.mxu2  ;;  %v15136_v48 = vpop.f32.mrf.mxu1  ;;  %7812 = vmatpush.bf16.msra.mxu2 %v11315_v46  ;;  %7782 = vmatpush.bf16.msrb.mxu1 %v11119_v0  ;;  %v11763_v46 = vor.u32 %v12626_v17, %v11762_v36  ;;  %v11259_v58 = vor.u32 %v12500_v5, %v11258_v23  ;;  %v11510_v4 = vld [vmem:[#allocation15 + $0xac0] sm:$0xf]  ;;  %v12619_v0 = vld [vmem:[#allocation15 + $0xc98] sm:$0xf0]  ;;  %v12444_v50 = vld [vmem:[#allocation15 + $0x720] sm:$0xf0] }
 0x5be   :  { %7840 = vmatpush.bf16.msra.mxu3 %v11567_v8  ;;  %v12563_v8 = vld [vmem:[#allocation15 + $0xad8] sm:$0xf0]  ;;  %v11035_v36 = vor.u32 %v12444_v50, %v11034_v53  ;;  %v12556_v17 = vld [vmem:[#allocation15 + $0xaa0] sm:$0xf0]  ;;  %v16365_v50 = vld [vmem:[#allocation36_spill] sm:$0xff] }
 0x5bf   :  { %7757 = vmatmul.bf16.vlgmr.msra.gmra.mxu0 %v16354_v26  ;;  %v15139_v6 = vpop.f32.mrf.mxu3  ;;  %v11511_v42 = vor.u32 %v12563_v8, %v11510_v4  ;;  %v10560_v4 = vld [vmem:[#allocation15 + $0x36c] sm:$0xf0]  ;;  %v16364_v53 = vld [vmem:[#allocation35_spill] sm:$0xff] }
 0x5c0   :  { %7868 = vmatpush.bf16.msrb.mxu0 %v11819_v61  ;;  %v12451_v61 = vld [vmem:[#allocation15 + $0x758] sm:$0xf0] }
 0x5c1   :  { %7783 = vmatpush.bf16.msrb.mxu1 %v11091_v32  ;;  %v11063_v7 = vor.u32 %v12451_v61, %v11062_v30  ;;  %v11482_v32 = vld [vmem:[#allocation15 + $0xa88] sm:$0xf]  ;;  %v16362_v30 = vld [vmem:[#allocation25_spill] sm:$0xff] }
 0x5c2   :  { %v12738_v9 = vpop.eup %12737  ;;  %7841 = vmatpush.bf16.msra.mxu3 %v11539_v12  ;;  %v11706_v12 = vld [vmem:[#allocation15 + $0xc48] sm:$0xf]  ;;  %v11483_v23 = vor.u32 %v12556_v17, %v11482_v32  ;;  %v12322_v61 = vld [vmem:[#allocation15 + $0x354] sm:$0xf]  ;;  %v15195_v32 = vperm.slane %v16365_v50, 1 }
 0x5c3   :  { %8927 = vst [vmem:[%s16041_s11 + $0x188] sm:$0xff] %v12738_v9  ;;  %v11287_v9 = vor.u32 %v12507_v21, %v11286_v44  ;;  %v11734_v44 = vld [vmem:[#allocation15 + $0xc80] sm:$0xf]  ;;  %v16360_v21 = vld [vmem:[#allocation41_spill] sm:$0xff]  ;;  %v10563_v8 = vor.u32 %v12322_v61, %v10560_v4  ;;  %v10532_v17 = vld [vmem:[#allocation15 + $0x334] sm:$0xf0] }
 0x5c4   :  { %v15144_v11 = vpop.f32.mrf.mxu0  ;;  %7869 = vmatpush.bf16.msrb.mxu0 %v11791_v2  ;;  %v11735_v24 = vor.u32 %v12619_v0, %v11734_v44  ;;  %v16361_v2 = vld [vmem:[#allocation32_spill] sm:$0xff]  ;;  %v7440_v4 = vadd.f32 %v15124_v16, %v15195_v32 }
 0x5c5   :  { %v15146_v29 = vpop.f32.mrf.mxu2  ;;  %v15148_v19 = vpop.f32.mrf.mxu1  ;;  %7813 = vmatpush.bf16.msra.mxu2 %v11287_v9  ;;  %7784 = vmatpush.bf16.msrb.mxu1 %v11063_v7 }
 0x5c6   :  { %7842 = vmatpush.bf16.msra.mxu3 %v11511_v42  ;;  %v7469_v50 = vadd.f32 %v15134_v63, %v7440_v4  ;;  %v7442_v63 = vadd.f32 %v15136_v48, %v15195_v32 }
 0x5c7   :  { %v15150_v51 = vpop.f32.mrf.mxu3 }
 0x5c8   :  { %7675 = vmatmul.bf16.gmra.mxu1 %v16355_v45  ;;  %7870 = vmatpush.bf16.msrb.mxu0 %v11763_v46  ;;  %v12612_v46 = vld [vmem:[#allocation15 + $0xc60] sm:$0xf0]  ;;  %v10308_v45 = vld [vmem:[#allocation15 + $0x174] sm:$0xf0] }
 0x5c9   :  { %7814 = vmatpush.bf16.msra.mxu2 %v11259_v58  ;;  %v11707_v5 = vor.u32 %v12612_v46, %v11706_v12  ;;  %7785 = vmatpush.bf16.msrb.mxu1 %v11035_v36  ;;  %v12315_v36 = vld [vmem:[#allocation15 + $0x31c] sm:$0xf] }
 0x5ca   :  { %7704 = vmatmul.bf16.gmra.mxu2 %v16356_v3  ;;  %7843 = vmatpush.bf16.msra.mxu3 %v11483_v23  ;;  %v16366_v46 = vld [vmem:[#allocation42_spill] sm:$0xff]  ;;  %v16368_v3 = vld [vmem:[#allocation29_spill] sm:$0xff] }
 0x5cc   :  { %v15154_v47 = vpop.f32.mrf.mxu0  ;;  %7733 = vmatmul.bf16.gmra.mxu3 %v16357_v52  ;;  %7871 = vmatpush.bf16.msrb.mxu0 %v11735_v24  ;;  %v16363_v24 = vld [vmem:[#allocation34_spill] sm:$0xff] }
 0x5cd   :  { %v15157_v41 = vpop.f32.mrf.mxu2  ;;  %v15159_v1 = vpop.f32.mrf.mxu1  ;;  %7923 = vmatpush.bf16.msrb.mxu2 %v10563_v8  ;;  %v16367_v8 = vld [vmem:[#allocation43_spill] sm:$0xff] }
 0x5cf   :  { %7762 = vmatmul.bf16.gmra.mxu0 %v16358_v14  ;;  %v15162_v49 = vpop.f32.mrf.mxu3  ;;  %v7498_v14 = vadd.f32 %v15139_v6, %v7469_v50  ;;  %v12371_v50 = vld [vmem:[#allocation15 + $0x4dc] sm:$0xf] }
 0x5d0   :  { %7872 = vmatpush.bf16.msrb.mxu0 %v11707_v5  ;;  %v10535_v5 = vor.u32 %v12315_v36, %v10532_v17  ;;  %v10336_v17 = vld [vmem:[#allocation15 + $0x1ac] sm:$0xf0] }
 0x5d2   :  { %7924 = vmatpush.bf16.msrb.mxu2 %v10535_v5  ;;  %v10504_v5 = vld [vmem:[#allocation15 + $0x2fc] sm:$0xf0] }
 0x5d4   :  { %v15164_v38 = vpop.f32.mrf.mxu0 }
 0x5d5   :  { %v15166_v57 = vpop.f32.mrf.mxu2  ;;  %v15168_v15 = vpop.f32.mrf.mxu1 }
 0x5d7   :  { %v15170_v10 = vpop.f32.mrf.mxu3 }
 0x5d8   :  { %7680 = vmatmul.bf16.gmra.mxu1 %v16359_v54  ;;  %v12308_v54 = vld [vmem:[#allocation15 + $0x2e4] sm:$0xf] }
 0x5da   :  { %7709 = vmatmul.bf16.gmra.mxu2 %v16360_v21 }
 0x5dc   :  { %v15174_v9 = vpop.f32.mrf.mxu0  ;;  %7738 = vmatmul.bf16.gmra.mxu3 %v16361_v2  ;;  %v12266_v2 = vld [vmem:[#allocation15 + $0x194] sm:$0xf] }
 0x5dd   :  { %v15177_v27 = vpop.f32.mrf.mxu2  ;;  %v15179_v18 = vpop.f32.mrf.mxu1  ;;  %v10339_v52 = vor.u32 %v12266_v2, %v10336_v17  ;;  %v10756_v2 = vld [vmem:[#allocation15 + $0x4f4] sm:$0xf0]  ;;  %v16369_v17 = vld [vmem:[#allocation27_spill] sm:$0xff] }
 0x5df   :  { %7767 = vmatmul.bf16.gmra.mxu0 %v16362_v30  ;;  %v15182_v58 = vpop.f32.mrf.mxu3  ;;  %v10784_v30 = vld [vmem:[#allocation15 + $0x52c] sm:$0xf0]  ;;  %7894 = vmatpush.bf16.msra.mxu1 %v10339_v52  ;;  %v12301_v52 = vld [vmem:[#allocation15 + $0x2ac] sm:$0xf] }
 0x5e4   :  { %v15184_v7 = vpop.f32.mrf.mxu0 }
 0x5e5   :  { %v15186_v44 = vpop.f32.mrf.mxu2  ;;  %v15188_v0 = vpop.f32.mrf.mxu1 }
 0x5e7   :  { %v15190_v42 = vpop.f32.mrf.mxu3 }
 0x5e8   :  { %7685 = vmatmul.bf16.gmra.mxu1 %v16363_v24  ;;  %v12378_v24 = vld [vmem:[#allocation15 + $0x514] sm:$0xf] }
 0x5e9   :  { %v10787_v36 = vor.u32 %v12378_v24, %v10784_v30  ;;  %v7471_v30 = vadd.f32 %v15146_v29, %v7442_v63  ;;  %v7527_v24 = vadd.f32 %v15131_v34, %v7498_v14  ;;  %v7445_v14 = vadd.f32 %v15148_v19, %v15195_v32  ;;  %v10280_v19 = vld [vmem:[#allocation15 + $0x13c] sm:$0xf0] }
 0x5ea   :  { %7714 = vmatmul.bf16.gmra.mxu2 %v16364_v53 }
 0x5eb   :  { %7952 = vmatpush.bf16.msrb.mxu3 %v10787_v36 }
 0x5ec   :  { %v15197_v12 = vpop.f32.mrf.mxu0  ;;  %7743 = vmatmul.bf16.gmra.mxu3 %v16366_v46 }
 0x5ed   :  { %v15200_v23 = vpop.f32.mrf.mxu2  ;;  %v15202_v61 = vpop.f32.mrf.mxu1 }
 0x5ef   :  { %7772 = vmatmul.bf16.gmra.mxu0 %v16367_v8  ;;  %v15207_v53 = vpop.f32.mrf.mxu3  ;;  %v10507_v8 = vor.u32 %v12308_v54, %v10504_v5  ;;  %v12259_v54 = vld [vmem:[#allocation15 + $0x15c] sm:$0xf]  ;;  %v10759_v5 = vor.u32 %v12371_v50, %v10756_v2  ;;  %v7474_v50 = vadd.f32 %v15157_v41, %v7445_v14  ;;  %v12434_v14 = vld [vmem:[#allocation15 + $0x6d4] sm:$0xf] }
 0x5f0   :  { %v10311_v63 = vor.u32 %v12259_v54, %v10308_v45  ;;  %v12252_v45 = vld [vmem:[#allocation15 + $0x124] sm:$0xf] }
 0x5f1   :  { %7925 = vmatpush.bf16.msrb.mxu2 %v10507_v8  ;;  %v10476_v8 = vld [vmem:[#allocation15 + $0x2c4] sm:$0xf0]  ;;  %7953 = vmatpush.bf16.msrb.mxu3 %v10759_v5 }
 0x5f2   :  { %v10479_v34 = vor.u32 %v12301_v52, %v10476_v8  ;;  %7895 = vmatpush.bf16.msra.mxu1 %v10311_v63  ;;  %v12294_v52 = vld [vmem:[#allocation15 + $0x274] sm:$0xf]  ;;  %v10448_v8 = vld [vmem:[#allocation15 + $0x28c] sm:$0xf0]  ;;  %v7503_v63 = vadd.f32 %v15162_v49, %v7474_v50 }
 0x5f3   :  { %v10451_v41 = vor.u32 %v12294_v52, %v10448_v8 }
 0x5f4   :  { %v15210_v21 = vpop.f32.mrf.mxu0 }
 0x5f5   :  { %v15212_v46 = vpop.f32.mrf.mxu2  ;;  %v7555_v16 = vpop.f32.mrf.mxu1  ;;  %7926 = vmatpush.bf16.msrb.mxu2 %v10479_v34 }
 0x5f6   :  { %v7556_v6 = vadd.f32 %v7555_v16, %v7527_v24 }
 0x5f7   :  { %v15217_v4 = vpop.f32.mrf.mxu3 }
 0x5f8   :  { %7786 = vmatmul.bf16.vlgmr.msrb.gmra.mxu1 %v16368_v3  ;;  %v7500_v3 = vadd.f32 %v15150_v51, %v7471_v30  ;;  %v12364_v30 = vld [vmem:[#allocation15 + $0x4a4] sm:$0xf] }
 0x5f9   :  { %7927 = vmatpush.bf16.msrb.mxu2 %v10451_v41 }
 0x5fa   :  { %7815 = vmatmul.bf16.vlgmr.msra.gmra.mxu2 %v14849_v20  ;;  %v7529_v2 = vadd.f32 %v15144_v11, %v7500_v3  ;;  %v11008_v11 = vld [vmem:[#allocation15 + $0x6ec] sm:$0xf0] }
 0x5fb   :  { %v11011_v3 = vor.u32 %v12434_v14, %v11008_v11  ;;  %v12420_v14 = vld [vmem:[#allocation15 + $0x664] sm:$0xf]  ;;  %v10952_v11 = vld [vmem:[#allocation15 + $0x67c] sm:$0xf0] }
 0x5fc   :  { %v7642_v36 = vpop.f32.mrf.mxu0  ;;  %7844 = vmatmul.bf16.vlgmr.msra.gmra.mxu3 %v16369_v17 }
 0x5fd   :  { %v7584_v48 = vpop.f32.mrf.mxu2  ;;  %v7557_v29 = vpop.f32.mrf.mxu1  ;;  %7981 = vmatpush.bf16.msra.mxu0 %v11011_v3  ;;  %v7450_v3 = vadd.f32 %v15168_v15, %v15195_v32 }
 0x5fe   :  { %v7585_v26 = vadd.f32 %v7584_v48, %v7556_v6  ;;  %v7558_v51 = vadd.f32 %v7557_v29, %v7529_v2  ;;  %v10728_v6 = vld [vmem:[#allocation15 + $0x4bc] sm:$0xf0] }
 0x5ff   :  { %7873 = vmatmul.bf16.vlgmr.msrb.gmra.mxu0 %v14857_v55  ;;  %v7613_v16 = vpop.f32.mrf.mxu3  ;;  %v10731_v5 = vor.u32 %v12364_v30, %v10728_v6  ;;  %v10980_v30 = vld [vmem:[#allocation15 + $0x6b4] sm:$0xf0] }
 0x600   :  { %v7614_v24 = vadd.f32 %v7613_v16, %v7585_v26  ;;  %v10283_v16 = vor.u32 %v12252_v45, %v10280_v19 }
 0x601   :  { %7954 = vmatpush.bf16.msrb.mxu3 %v10731_v5  ;;  %v10700_v5 = vld [vmem:[#allocation15 + $0x484] sm:$0xf0] }
 0x602   :  { %v7643_v17 = vadd.f32 %v7642_v36, %v7614_v24  ;;  %v7447_v36 = vadd.f32 %v15159_v1, %v15195_v32  ;;  %7896 = vmatpush.bf16.msra.mxu1 %v10283_v16  ;;  %v7532_v24 = vadd.f32 %v15154_v47, %v7503_v63  ;;  %v12245_v47 = vld [vmem:[#allocation15 + $0xec] sm:$0xf]  ;;  %v10252_v63 = vld [vmem:[#allocation15 + $0x104] sm:$0xf0]  ;;  %v10420_v16 = vld [vmem:[#allocation15 + $0x254] sm:$0xf0] }
 0x604   :  { %12739 = vtanh.f32 %v7643_v17  ;;  %v7644_v54 = vpop.f32.mrf.mxu0  ;;  %v7476_v49 = vadd.f32 %v15166_v57, %v7447_v36  ;;  %v12357_v57 = vld [vmem:[#allocation15 + $0x46c] sm:$0xf] }
 0x605   :  { %v7586_v48 = vpop.f32.mrf.mxu2  ;;  %v7560_v34 = vpop.f32.mrf.mxu1  ;;  %v10703_v8 = vor.u32 %v12357_v57, %v10700_v5  ;;  %v10672_v57 = vld [vmem:[#allocation15 + $0x44c] sm:$0xf0]  ;;  %v12238_v5 = vld [vmem:[#allocation15 + $0xb4] sm:$0xf] }
 0x606   :  { %v7587_v26 = vadd.f32 %v7586_v48, %v7558_v51  ;;  %v7561_v1 = vadd.f32 %v7560_v34, %v7532_v24  ;;  %v12427_v51 = vld [vmem:[#allocation15 + $0x69c] sm:$0xf]  ;;  %v7505_v19 = vadd.f32 %v15170_v10, %v7476_v49  ;;  %v10255_v34 = vor.u32 %v12245_v47, %v10252_v63 }
 0x607   :  { %v7615_v17 = vpop.f32.mrf.mxu3  ;;  %v10983_v48 = vor.u32 %v12427_v51, %v10980_v30  ;;  %7955 = vmatpush.bf16.msrb.mxu3 %v10703_v8  ;;  %v10392_v8 = vld [vmem:[#allocation15 + $0x21c] sm:$0xf0] }
 0x608   :  { %v7616_v29 = vadd.f32 %v7615_v17, %v7587_v26  ;;  %7791 = vmatmul.bf16.gmra.mxu1 %v14879_v35  ;;  %v12287_v26 = vld [vmem:[#allocation15 + $0x23c] sm:$0xf]  ;;  %v10955_v17 = vor.u32 %v12420_v14, %v10952_v11  ;;  %v7534_v49 = vadd.f32 %v15164_v38, %v7505_v19  ;;  %v10224_v19 = vld [vmem:[#allocation15 + $0xcc] sm:$0xf0] }
 0x609   :  { %7982 = vmatpush.bf16.msra.mxu0 %v10983_v48  ;;  %v10423_v41 = vor.u32 %v12287_v26, %v10420_v16  ;;  %7897 = vmatpush.bf16.msra.mxu1 %v10255_v34  ;;  %v12350_v48 = vld [vmem:[#allocation15 + $0x434] sm:$0xf]  ;;  %v10227_v63 = vor.u32 %v12238_v5, %v10224_v19  ;;  %v10896_v16 = vld [vmem:[#allocation15 + $0x60c] sm:$0xf0]  ;;  %v7452_v34 = vadd.f32 %v15179_v18, %v15195_v32 }
 0x60a   :  { %7820 = vmatmul.bf16.gmra.mxu2 %v14881_v62  ;;  %v12740_v50 = vpop.eup %12739  ;;  %v7645_v2 = vadd.f32 %v7644_v54, %v7616_v29  ;;  %v7479_v29 = vadd.f32 %v15177_v27, %v7450_v3  ;;  %v12406_v26 = vld [vmem:[#allocation15 + $0x5f4] sm:$0xf]  ;;  %v7455_v19 = vadd.f32 %v15188_v0, %v15195_v32 }
 0x60b   :  { %8879 = vst [vmem:[%s16041_s11 + $0x8] sm:$0xff] %v12740_v50  ;;  %7928 = vmatpush.bf16.msrb.mxu2 %v10423_v41  ;;  %v10899_v14 = vor.u32 %v12406_v26, %v10896_v16 }
 0x60c   :  { %12741 = vtanh.f32 %v7645_v2  ;;  %v7647_v6 = vpop.f32.mrf.mxu0  ;;  %7849 = vmatmul.bf16.gmra.mxu3 %v14883_v22  ;;  %v12413_v2 = vld [vmem:[#allocation15 + $0x62c] sm:$0xf]  ;;  %v7508_v27 = vadd.f32 %v15182_v58, %v7479_v29  ;;  %v7481_v58 = vadd.f32 %v15186_v44, %v7452_v34  ;;  %v10196_v29 = vld [vmem:[#allocation15 + $0x94] sm:$0xf0] }
 0x60d   :  { %v7589_v45 = vpop.f32.mrf.mxu2  ;;  %v7562_v54 = vpop.f32.mrf.mxu1  ;;  %7983 = vmatpush.bf16.msra.mxu0 %v10955_v17  ;;  %7898 = vmatpush.bf16.msra.mxu1 %v10227_v63  ;;  %v12392_v63 = vld [vmem:[#allocation15 + $0x584] sm:$0xf] }
 0x60e   :  { %v7590_v52 = vadd.f32 %v7589_v45, %v7561_v1  ;;  %v7563_v15 = vadd.f32 %v7562_v54, %v7534_v49  ;;  %v10924_v1 = vld [vmem:[#allocation15 + $0x644] sm:$0xf0]  ;;  %v7537_v3 = vadd.f32 %v15174_v9, %v7508_v27  ;;  %v12343_v9 = vld [vmem:[#allocation15 + $0x3fc] sm:$0xf] }
 0x60f   :  { %7878 = vmatmul.bf16.gmra.mxu0 %v14906_v25  ;;  %v7618_v36 = vpop.f32.mrf.mxu3  ;;  %v10927_v45 = vor.u32 %v12413_v2, %v10924_v1  ;;  %v7510_v2 = vadd.f32 %v15190_v42, %v7481_v58 }
 0x610   :  { %v7619_v10 = vadd.f32 %v7618_v36, %v7590_v52  ;;  %v12280_v52 = vld [vmem:[#allocation15 + $0x204] sm:$0xf] }
 0x611   :  { %7984 = vmatpush.bf16.msra.mxu0 %v10927_v45  ;;  %v10395_v54 = vor.u32 %v12280_v52, %v10392_v8  ;;  %v10868_v45 = vld [vmem:[#allocation15 + $0x5d4] sm:$0xf0]  ;;  %v10616_v8 = vld [vmem:[#allocation15 + $0x3dc] sm:$0xf0] }
 0x612   :  { %v12742_v24 = vpop.eup %12741  ;;  %v7648_v50 = vadd.f32 %v7647_v6, %v7619_v10  ;;  %v10675_v6 = vor.u32 %v12350_v48, %v10672_v57  ;;  %v12231_v10 = vld [vmem:[#allocation15 + $0x7c] sm:$0xf]  ;;  %v12273_v48 = vld [vmem:[#allocation15 + $0x1cc] sm:$0xf]  ;;  %v10364_v57 = vld [vmem:[#allocation15 + $0x1e4] sm:$0xf0] }
 0x613   :  { %8886 = vst [vmem:[%s16041_s11 + $0x40] sm:$0xff] %v12742_v24  ;;  %7929 = vmatpush.bf16.msrb.mxu2 %v10395_v54  ;;  %v10199_v24 = vor.u32 %v12231_v10, %v10196_v29  ;;  %v10367_v27 = vor.u32 %v12273_v48, %v10364_v57  ;;  %v10840_v54 = vld [vmem:[#allocation15 + $0x59c] sm:$0xf0]  ;;  %v12329_v29 = vld [vmem:[#allocation15 + $0x38c] sm:$0xf] }
 0x614   :  { %12743 = vtanh.f32 %v7648_v50  ;;  %v7649_v51 = vpop.f32.mrf.mxu0  ;;  %7956 = vmatpush.bf16.msrb.mxu3 %v10675_v6  ;;  %v10644_v50 = vld [vmem:[#allocation15 + $0x414] sm:$0xf0]  ;;  %v12336_v6 = vld [vmem:[#allocation15 + $0x3c4] sm:$0xf]  ;;  %v10843_v34 = vor.u32 %v12392_v63, %v10840_v54  ;;  %v12539_v48 = vld [vmem:[#allocation15 + $0xa1c] sm:$0xf] }
 0x615   :  { %v7591_v30 = vpop.f32.mrf.mxu2  ;;  %v7565_v47 = vpop.f32.mrf.mxu1  ;;  %7985 = vmatpush.bf16.msra.mxu0 %v10899_v14  ;;  %7899 = vmatpush.bf16.msra.mxu1 %v10199_v24  ;;  %v10619_v16 = vor.u32 %v12336_v6, %v10616_v8  ;;  %v7539_v14 = vadd.f32 %v15184_v7, %v7510_v2  ;;  %v11456_v2 = vld [vmem:[#allocation15 + $0xa6c] sm:$0xf0]  ;;  %v11428_v57 = vld [vmem:[#allocation15 + $0xa34] sm:$0xf0] }
 0x616   :  { %v7592_v38 = vadd.f32 %v7591_v30, %v7563_v15  ;;  %v7566_v18 = vadd.f32 %v7565_v47, %v7537_v3  ;;  %v12399_v15 = vld [vmem:[#allocation15 + $0x5bc] sm:$0xf]  ;;  %v10647_v30 = vor.u32 %v12343_v9, %v10644_v50  ;;  %v10168_v47 = vld [vmem:[#allocation15 + $0x5c] sm:$0xf0]  ;;  %v12217_v3 = vld [vmem:[#allocation15 + $0xc] sm:$0xf]  ;;  %v11431_v6 = vor.u32 %v12539_v48, %v11428_v57 }
 0x617   :  { %v7620_v41 = vpop.f32.mrf.mxu3  ;;  %v10871_v5 = vor.u32 %v12399_v15, %v10868_v45  ;;  %7930 = vmatpush.bf16.msrb.mxu2 %v10367_v27  ;;  %v10812_v50 = vld [vmem:[#allocation15 + $0x564] sm:$0xf0]  ;;  %v12546_v15 = vld [vmem:[#allocation15 + $0xa54] sm:$0xf]  ;;  %v12588_v57 = vld [vmem:[#allocation15 + $0xba4] sm:$0xf] }
 0x618   :  { %v7621_v11 = vadd.f32 %v7620_v41, %v7592_v38  ;;  %7796 = vmatmul.bf16.gmra.mxu1 %v14922_v33  ;;  %v12224_v38 = vld [vmem:[#allocation15 + $0x44] sm:$0xf]  ;;  %7957 = vmatpush.bf16.msrb.mxu3 %v10647_v30  ;;  %v7484_v41 = vadd.f32 %v15200_v23, %v7455_v19  ;;  %v10588_v23 = vld [vmem:[#allocation15 + $0x3a4] sm:$0xf0]  ;;  %v7457_v30 = vadd.f32 %v15202_v61, %v15195_v32 }
 0x619   :  { %v10171_v42 = vor.u32 %v12224_v38, %v10168_v47  ;;  %7986 = vmatpush.bf16.msra.mxu0 %v10871_v5  ;;  %v10591_v9 = vor.u32 %v12329_v29, %v10588_v23  ;;  %v11652_v29 = vld [vmem:[#allocation15 + $0xbf4] sm:$0xf0]  ;;  %v12483_v23 = vld [vmem:[#allocation15 + $0x85c] sm:$0xf] }
 0x61a   :  { %7825 = vmatmul.bf16.gmra.mxu2 %v14924_v60  ;;  %v12744_v36 = vpop.eup %12743  ;;  %v7650_v17 = vadd.f32 %v7649_v51, %v7621_v11  ;;  %v7513_v7 = vadd.f32 %v15207_v53, %v7484_v41  ;;  %v7486_v53 = vadd.f32 %v15212_v46, %v7457_v30  ;;  %v11680_v46 = vld [vmem:[#allocation15 + $0xc2c] sm:$0xf0] }
 0x61b   :  { %8893 = vst [vmem:[%s16041_s11 + $0x78] sm:$0xff] %v12744_v36  ;;  %7900 = vmatpush.bf16.msra.mxu1 %v10171_v42  ;;  %v10140_v36 = vld [vmem:[#allocation15 + $0x24] sm:$0xf0] }
 0x61c   :  { %12745 = vtanh.f32 %v7650_v17  ;;  %v7652_v49 = vpop.f32.mrf.mxu0  ;;  %7854 = vmatmul.bf16.gmra.mxu3 %v14926_v59  ;;  %v10143_v10 = vor.u32 %v12217_v3, %v10140_v36  ;;  %v7542_v27 = vadd.f32 %v15197_v12, %v7513_v7  ;;  %v7515_v12 = vadd.f32 %v15217_v4, %v7486_v53 }
 0x61d   :  { %v7594_v44 = vpop.f32.mrf.mxu2  ;;  %v7567_v51 = vpop.f32.mrf.mxu1  ;;  %7958 = vmatpush.bf16.msrb.mxu3 %v10619_v16  ;;  %7987 = vmatpush.bf16.msra.mxu0 %v10843_v34  ;;  %v11232_v16 = vld [vmem:[#allocation15 + $0x8ac] sm:$0xf0]  ;;  %v12532_v34 = vld [vmem:[#allocation15 + $0x9e4] sm:$0xf] }
 0x61e   :  { %v7595_v1 = vadd.f32 %v7594_v44, %v7566_v18  ;;  %v7568_v0 = vadd.f32 %v7567_v51, %v7539_v14  ;;  %v12385_v44 = vld [vmem:[#allocation15 + $0x54c] sm:$0xf]  ;;  %v11459_v51 = vor.u32 %v12546_v15, %v11456_v2 }
 0x61f   :  { %7883 = vmatmul.bf16.gmra.mxu0 %v14943_v43  ;;  %v7623_v52 = vpop.f32.mrf.mxu3  ;;  %7901 = vmatpush.bf16.msra.mxu1 %v10143_v10  ;;  %v12595_v10 = vld [vmem:[#allocation15 + $0xbdc] sm:$0xf] }
 0x620   :  { %v7624_v26 = vadd.f32 %v7623_v52, %v7595_v1  ;;  %v10815_v1 = vor.u32 %v12385_v44, %v10812_v50  ;;  %8039 = vmatpush.bf16.msra.mxu2 %v11459_v51  ;;  %v12602_v52 = vld [vmem:[#allocation15 + $0xc14] sm:$0xf] }
 0x621   :  { %7959 = vmatpush.bf16.msrb.mxu3 %v10591_v9  ;;  %v11683_v63 = vor.u32 %v12602_v52, %v11680_v46  ;;  %v11372_v9 = vld [vmem:[#allocation15 + $0x9c4] sm:$0xf0]  ;;  %v11344_v52 = vld [vmem:[#allocation15 + $0x98c] sm:$0xf0]  ;;  %v12658_v46 = vld [vmem:[#allocation15 + $0xdd4] sm:$0xf] }
 0x622   :  { %v12746_v11 = vpop.eup %12745  ;;  %v7653_v58 = vadd.f32 %v7652_v49, %v7624_v26  ;;  %7988 = vmatpush.bf16.msra.mxu0 %v10815_v1  ;;  %v12490_v26 = vld [vmem:[#allocation15 + $0x894] sm:$0xf] }
 0x623   :  { %8900 = vst [vmem:[%s16041_s11 + $0xb0] sm:$0xff] %v12746_v11  ;;  %v11235_v14 = vor.u32 %v12490_v26, %v11232_v16  ;;  %v11400_v11 = vld [vmem:[#allocation15 + $0x9fc] sm:$0xf0]  ;;  %v12651_v16 = vld [vmem:[#allocation15 + $0xd9c] sm:$0xf] }
 0x624   :  { %12747 = vtanh.f32 %v7653_v58  ;;  %v7654_v17 = vpop.f32.mrf.mxu0  ;;  %8040 = vmatpush.bf16.msra.mxu2 %v11431_v6  ;;  %v7544_v58 = vadd.f32 %v15210_v21, %v7515_v12  ;;  %v11655_v21 = vor.u32 %v12595_v10, %v11652_v29  ;;  %v12476_v6 = vld [vmem:[#allocation15 + $0x824] sm:$0xf]  ;;  %v11904_v12 = vld [vmem:[#allocation15 + $0xdec] sm:$0xf0] }
 0x625   :  { %v7596_v18 = vpop.f32.mrf.mxu2  ;;  %v7570_v24 = vpop.f32.mrf.mxu1  ;;  %8068 = vmatpush.bf16.msra.mxu3 %v11683_v63  ;;  %8010 = vmatpush.bf16.msrb.mxu1 %v11235_v14  ;;  %v12644_v10 = vld [vmem:[#allocation15 + $0xd64] sm:$0xf] }
 0x626   :  { %v7597_v49 = vadd.f32 %v7596_v18, %v7568_v0  ;;  %v7571_v32 = vadd.f32 %v7570_v24, %v7542_v27  ;;  %v11403_v0 = vor.u32 %v12532_v34, %v11400_v11  ;;  %v12525_v24 = vld [vmem:[#allocation15 + $0x9ac] sm:$0xf]  ;;  %v11876_v34 = vld [vmem:[#allocation15 + $0xdb4] sm:$0xf0] }
 0x627   :  { %v7625_v45 = vpop.f32.mrf.mxu3  ;;  %v11375_v15 = vor.u32 %v12525_v24, %v11372_v9  ;;  %v11879_v11 = vor.u32 %v12651_v16, %v11876_v34  ;;  %v16372_v24 = vld [vmem:[#allocation28_spill] sm:$0xff] }
 0x628   :  { %v7626_v5 = vadd.f32 %v7625_v45, %v7597_v49  ;;  %7801 = vmatmul.bf16.gmra.mxu1 %v14955_v40  ;;  %8041 = vmatpush.bf16.msra.mxu2 %v11403_v0  ;;  %v11204_v49 = vld [vmem:[#allocation15 + $0x874] sm:$0xf0]  ;;  %v12469_v0 = vld [vmem:[#allocation15 + $0x7ec] sm:$0xf] }
 0x629   :  { %v11207_v50 = vor.u32 %v12483_v23, %v11204_v49  ;;  %8069 = vmatpush.bf16.msra.mxu3 %v11655_v21  ;;  %v16371_v21 = vld [vmem:[#allocation24_spill] sm:$0xff] }
 0x62a   :  { %7830 = vmatmul.bf16.gmra.mxu2 %v14957_v31  ;;  %v12748_v38 = vpop.eup %12747  ;;  %v7655_v47 = vadd.f32 %v7654_v17, %v7626_v5  ;;  %v11624_v5 = vld [vmem:[#allocation15 + $0xbbc] sm:$0xf0] }
 0x62b   :  { %8907 = vst [vmem:[%s16041_s11 + $0xe8] sm:$0xff] %v12748_v38  ;;  %8011 = vmatpush.bf16.msrb.mxu1 %v11207_v50  ;;  %v11627_v27 = vor.u32 %v12588_v57, %v11624_v5  ;;  %v16370_v38 = vld [vmem:[#allocation49_spill] sm:$0xff]  ;;  %v16373_v50 = vld [vmem:[#allocation30_spill] sm:$0xff] }
 0x62c   :  { %12749 = vtanh.f32 %v7655_v47  ;;  %v7657_v61 = vpop.f32.mrf.mxu0  ;;  %7859 = vmatmul.bf16.gmra.mxu3 %v14961_v39  ;;  %8042 = vmatpush.bf16.msra.mxu2 %v11375_v15  ;;  %v11568_v5 = vld [vmem:[#allocation15 + $0xb4c] sm:$0xf0] }
 0x62d   :  { %v7599_v19 = vpop.f32.mrf.mxu2  ;;  %v7572_v8 = vpop.f32.mrf.mxu1  ;;  %8070 = vmatpush.bf16.msra.mxu3 %v11627_v27 }
 0x62e   :  { %v7600_v42 = vadd.f32 %v7599_v19, %v7571_v32  ;;  %v7573_v4 = vadd.f32 %v7572_v8, %v7544_v58  ;;  %v11176_v32 = vld [vmem:[#allocation15 + $0x83c] sm:$0xf0]  ;;  %v11907_v8 = vor.u32 %v12658_v46, %v11904_v12  ;;  %v11596_v58 = vld [vmem:[#allocation15 + $0xb84] sm:$0xf0] }
 0x62f   :  { %7888 = vmatmul.bf16.gmra.mxu0 %v14655_v56  ;;  %v7628_v54 = vpop.f32.mrf.mxu3  ;;  %v11179_v19 = vor.u32 %v12476_v6, %v11176_v32  ;;  %v16374_v6 = vld [vmem:[#allocation33_spill] sm:$0xff]  ;;  %v11288_v12 = vld [vmem:[#allocation15 + $0x91c] sm:$0xf0] }
 0x630   :  { %v7629_v41 = vadd.f32 %v7628_v54, %v7600_v42  ;;  %8097 = vmatpush.bf16.msrb.mxu0 %v11907_v8  ;;  %v11792_v8 = vld [vmem:[#allocation15 + $0xd0c] sm:$0xf0] }
 0x631   :  { %8012 = vmatpush.bf16.msrb.mxu1 %v11179_v19  ;;  %v11120_v19 = vld [vmem:[#allocation15 + $0x7cc] sm:$0xf0] }
 0x632   :  { %v12750_v3 = vpop.eup %12749  ;;  %v7658_v36 = vadd.f32 %v7657_v61, %v7629_v41  ;;  %v12518_v61 = vld [vmem:[#allocation15 + $0x974] sm:$0xf]  ;;  %v12581_v41 = vld [vmem:[#allocation15 + $0xb6c] sm:$0xf] }
 0x633   :  { %8914 = vst [vmem:[%s16041_s11 + $0x120] sm:$0xff] %v12750_v3  ;;  %v11347_v42 = vor.u32 %v12518_v61, %v11344_v52  ;;  %v11148_v3 = vld [vmem:[#allocation15 + $0x804] sm:$0xf0]  ;;  %v12462_v61 = vld [vmem:[#allocation15 + $0x7b4] sm:$0xf] }
 0x634   :  { %12751 = vtanh.f32 %v7658_v36  ;;  %v7659_v17 = vpop.f32.mrf.mxu0  ;;  %v11599_v36 = vor.u32 %v12581_v41, %v11596_v58  ;;  %8098 = vmatpush.bf16.msrb.mxu0 %v11879_v11  ;;  %v12504_v52 = vld [vmem:[#allocation15 + $0x904] sm:$0xf]  ;;  %v11123_v46 = vor.u32 %v12462_v61, %v11120_v19  ;;  %v12455_v11 = vld [vmem:[#allocation15 + $0x77c] sm:$0xf]  ;;  %v11092_v58 = vld [vmem:[#allocation15 + $0x794] sm:$0xf0] }
 0x635   :  { %v7601_v18 = vpop.f32.mrf.mxu2  ;;  %v15287_v7 = vpop.f32.mrf.mxu1  ;;  %8043 = vmatpush.bf16.msra.mxu2 %v11347_v42  ;;  %v12630_v42 = vld [vmem:[#allocation15 + $0xcf4] sm:$0xf]  ;;  %v16375_v61 = vld [vmem:[#allocation40_spill] sm:$0xff] }
 0x636   :  { %v7602_v44 = vadd.f32 %v7601_v18, %v7573_v4  ;;  %v11151_v4 = vor.u32 %v12469_v0, %v11148_v3  ;;  %v11316_v18 = vld [vmem:[#allocation15 + $0x954] sm:$0xf0]  ;;  %8071 = vmatpush.bf16.msra.mxu3 %v11599_v36  ;;  %v11795_v16 = vor.u32 %v12630_v42, %v11792_v8  ;;  %v12567_v0 = vld [vmem:[#allocation15 + $0xafc] sm:$0xf]  ;;  %v11095_v36 = vor.u32 %v12455_v11, %v11092_v58  ;;  %v12441_v58 = vld [vmem:[#allocation15 + $0x70c] sm:$0xf] }
 0x637   :  { %v7630_v2 = vpop.f32.mrf.mxu3 }
 0x638   :  { %v7631_v1 = vadd.f32 %v7630_v2, %v7602_v44  ;;  %7902 = vmatmul.bf16.vlgmr.msra.gmra.mxu1 %v14657_v28  ;;  %v11848_v44 = vld [vmem:[#allocation15 + $0xd7c] sm:$0xf0]  ;;  %v12637_v2 = vld [vmem:[#allocation15 + $0xd2c] sm:$0xf] }
 0x639   :  { %v11851_v49 = vor.u32 %v12644_v10, %v11848_v44  ;;  %8013 = vmatpush.bf16.msrb.mxu1 %v11151_v4  ;;  %v11540_v4 = vld [vmem:[#allocation15 + $0xb14] sm:$0xf0]  ;;  %v12497_v44 = vld [vmem:[#allocation15 + $0x8cc] sm:$0xf] }
 0x63a   :  { %7931 = vmatmul.bf16.vlgmr.msrb.gmra.mxu2 %v14667_v13  ;;  %v12752_v51 = vpop.eup %12751  ;;  %v7660_v30 = vadd.f32 %v7659_v17, %v7631_v1  ;;  %v12511_v17 = vld [vmem:[#allocation15 + $0x93c] sm:$0xf]  ;;  %v11820_v1 = vld [vmem:[#allocation15 + $0xd44] sm:$0xf0]  ;;  %v11543_v10 = vor.u32 %v12567_v0, %v11540_v4 }
 0x63b   :  { %8921 = vst [vmem:[%s16041_s11 + $0x158] sm:$0xff] %v12752_v51  ;;  %v11319_v23 = vor.u32 %v12511_v17, %v11316_v18  ;;  %8099 = vmatpush.bf16.msrb.mxu0 %v11851_v49  ;;  %v12574_v51 = vld [vmem:[#allocation15 + $0xb34] sm:$0xf]  ;;  %v11823_v57 = vor.u32 %v12637_v2, %v11820_v1  ;;  %v12623_v17 = vld [vmem:[#allocation15 + $0xcbc] sm:$0xf] }
 0x63c   :  { %12753 = vtanh.f32 %v7660_v30  ;;  %v15294_v45 = vpop.f32.mrf.mxu0  ;;  %7960 = vmatmul.bf16.vlgmr.msrb.gmra.mxu3 %v14673_v37  ;;  %v11571_v27 = vor.u32 %v12574_v51, %v11568_v5  ;;  %v11764_v18 = vld [vmem:[#allocation15 + $0xcd4] sm:$0xf0]  ;;  %v11260_v49 = vld [vmem:[#allocation15 + $0x8e4] sm:$0xf0]  ;;  %v12448_v2 = vld [vmem:[#allocation15 + $0x744] sm:$0xf] }
 0x63d   :  { %v15297_v48 = vpop.f32.mrf.mxu2  ;;  %v15299_v53 = vpop.f32.mrf.mxu1  ;;  %8044 = vmatpush.bf16.msra.mxu2 %v11319_v23  ;;  %8014 = vmatpush.bf16.msrb.mxu1 %v11123_v46  ;;  %v11767_v23 = vor.u32 %v12623_v17, %v11764_v18  ;;  %v11263_v51 = vor.u32 %v12497_v44, %v11260_v49  ;;  %v12560_v5 = vld [vmem:[#allocation15 + $0xac4] sm:$0xf]  ;;  %v11736_v46 = vld [vmem:[#allocation15 + $0xc9c] sm:$0xf0]  ;;  %v11036_v0 = vld [vmem:[#allocation15 + $0x724] sm:$0xf0] }
 0x63e   :  { %8072 = vmatpush.bf16.msra.mxu3 %v11571_v27  ;;  %v11512_v27 = vld [vmem:[#allocation15 + $0xadc] sm:$0xf0]  ;;  %v11039_v17 = vor.u32 %v12441_v58, %v11036_v0  ;;  %v11484_v18 = vld [vmem:[#allocation15 + $0xaa4] sm:$0xf0] }
 0x63f   :  { %7989 = vmatmul.bf16.vlgmr.msra.gmra.mxu0 %v16370_v38  ;;  %v15302_v47 = vpop.f32.mrf.mxu3  ;;  %v11515_v42 = vor.u32 %v12560_v5, %v11512_v27  ;;  %v12326_v5 = vld [vmem:[#allocation15 + $0x370] sm:$0xf0]  ;;  %v16380_v58 = vld [vmem:[#allocation35_spill] sm:$0xff] }
 0x640   :  { %8100 = vmatpush.bf16.msrb.mxu0 %v11823_v57  ;;  %v11064_v57 = vld [vmem:[#allocation15 + $0x75c] sm:$0xf0] }
 0x641   :  { %8015 = vmatpush.bf16.msrb.mxu1 %v11095_v36  ;;  %v11067_v19 = vor.u32 %v12448_v2, %v11064_v57  ;;  %v12553_v36 = vld [vmem:[#allocation15 + $0xa8c] sm:$0xf]  ;;  %v16378_v2 = vld [vmem:[#allocation25_spill] sm:$0xff]  ;;  %v10566_v57 = vld [vmem:[#allocation15 + $0x358] sm:$0xf] }
 0x642   :  { %v12754_v63 = vpop.eup %12753  ;;  %8073 = vmatpush.bf16.msra.mxu3 %v11543_v10  ;;  %v12609_v10 = vld [vmem:[#allocation15 + $0xc4c] sm:$0xf]  ;;  %v11487_v44 = vor.u32 %v12553_v36, %v11484_v18  ;;  %v10567_v27 = vor.u32 %v12326_v5, %v10566_v57  ;;  %v15357_v0 = vld [vmem:[#allocation16] sm:$0xff]  ;;  %v12319_v18 = vld [vmem:[#allocation15 + $0x338] sm:$0xf0] }
 0x643   :  { %8928 = vst [vmem:[%s16041_s11 + $0x190] sm:$0xff] %v12754_v63  ;;  %v11291_v63 = vor.u32 %v12504_v52, %v11288_v12  ;;  %v12616_v52 = vld [vmem:[#allocation15 + $0xc84] sm:$0xf]  ;;  %v16376_v12 = vld [vmem:[#allocation41_spill] sm:$0xff]  ;;  %v15360_v36 = vperm.slane %v15357_v0, 2 }
 0x644   :  { %v15307_v54 = vpop.f32.mrf.mxu0  ;;  %8101 = vmatpush.bf16.msrb.mxu0 %v11795_v16  ;;  %v11739_v8 = vor.u32 %v12616_v52, %v11736_v46  ;;  %v16377_v16 = vld [vmem:[#allocation32_spill] sm:$0xff]  ;;  %16381 = vst [vmem:[#allocation37_spill] sm:$0xff] %v15357_v0 }
 0x645   :  { %v15309_v26 = vpop.f32.mrf.mxu2  ;;  %v15311_v14 = vpop.f32.mrf.mxu1  ;;  %8045 = vmatpush.bf16.msra.mxu2 %v11291_v63  ;;  %8016 = vmatpush.bf16.msrb.mxu1 %v11067_v19  ;;  %v7672_v5 = vadd.f32 %v15287_v7, %v15360_v36 }
 0x646   :  { %8074 = vmatpush.bf16.msra.mxu3 %v11515_v42 }
 0x647   :  { %v15313_v29 = vpop.f32.mrf.mxu3  ;;  %v7701_v0 = vadd.f32 %v15297_v48, %v7672_v5  ;;  %v7674_v48 = vadd.f32 %v15299_v53, %v15360_v36 }
 0x648   :  { %7907 = vmatmul.bf16.gmra.mxu1 %v16371_v21  ;;  %8102 = vmatpush.bf16.msrb.mxu0 %v11767_v23  ;;  %v11708_v23 = vld [vmem:[#allocation15 + $0xc64] sm:$0xf0]  ;;  %v12263_v21 = vld [vmem:[#allocation15 + $0x178] sm:$0xf0] }
 0x649   :  { %8046 = vmatpush.bf16.msra.mxu2 %v11263_v51  ;;  %v11711_v49 = vor.u32 %v12609_v10, %v11708_v23  ;;  %8017 = vmatpush.bf16.msrb.mxu1 %v11039_v17  ;;  %v10538_v17 = vld [vmem:[#allocation15 + $0x320] sm:$0xf]  ;;  %v16382_v23 = vld [vmem:[#allocation42_spill] sm:$0xff] }
 0x64a   :  { %7936 = vmatmul.bf16.gmra.mxu2 %v16372_v24  ;;  %8075 = vmatpush.bf16.msra.mxu3 %v11487_v44  ;;  %v16384_v24 = vld [vmem:[#allocation29_spill] sm:$0xff] }
 0x64c   :  { %v15317_v9 = vpop.f32.mrf.mxu0  ;;  %7965 = vmatmul.bf16.gmra.mxu3 %v16373_v50  ;;  %8103 = vmatpush.bf16.msrb.mxu0 %v11739_v8  ;;  %v16379_v8 = vld [vmem:[#allocation34_spill] sm:$0xff] }
 0x64d   :  { %v15320_v15 = vpop.f32.mrf.mxu2  ;;  %v15322_v30 = vpop.f32.mrf.mxu1  ;;  %8155 = vmatpush.bf16.msrb.mxu2 %v10567_v27  ;;  %v16383_v27 = vld [vmem:[#allocation43_spill] sm:$0xff] }
 0x64f   :  { %7994 = vmatmul.bf16.gmra.mxu0 %v16374_v6  ;;  %v15325_v32 = vpop.f32.mrf.mxu3  ;;  %v7730_v6 = vadd.f32 %v15302_v47, %v7701_v0  ;;  %v10762_v0 = vld [vmem:[#allocation15 + $0x4e0] sm:$0xf] }
 0x650   :  { %8104 = vmatpush.bf16.msrb.mxu0 %v11711_v49  ;;  %v10539_v49 = vor.u32 %v12319_v18, %v10538_v17  ;;  %v12270_v18 = vld [vmem:[#allocation15 + $0x1b0] sm:$0xf0] }
 0x652   :  { %8156 = vmatpush.bf16.msrb.mxu2 %v10539_v49  ;;  %v12312_v49 = vld [vmem:[#allocation15 + $0x300] sm:$0xf0] }
 0x654   :  { %v15327_v34 = vpop.f32.mrf.mxu0 }
 0x655   :  { %v15329_v41 = vpop.f32.mrf.mxu2  ;;  %v15331_v3 = vpop.f32.mrf.mxu1 }
 0x657   :  { %v15333_v1 = vpop.f32.mrf.mxu3 }
 0x658   :  { %7912 = vmatmul.bf16.gmra.mxu1 %v16375_v61  ;;  %v10510_v61 = vld [vmem:[#allocation15 + $0x2e8] sm:$0xf] }
 0x65a   :  { %7941 = vmatmul.bf16.gmra.mxu2 %v16376_v12 }
 0x65c   :  { %v15337_v63 = vpop.f32.mrf.mxu0  ;;  %7970 = vmatmul.bf16.gmra.mxu3 %v16377_v16  ;;  %v10342_v16 = vld [vmem:[#allocation15 + $0x198] sm:$0xf] }
 0x65d   :  { %v15340_v11 = vpop.f32.mrf.mxu2  ;;  %v15342_v4 = vpop.f32.mrf.mxu1  ;;  %v10343_v50 = vor.u32 %v12270_v18, %v10342_v16  ;;  %v12375_v16 = vld [vmem:[#allocation15 + $0x4f8] sm:$0xf0]  ;;  %v16385_v18 = vld [vmem:[#allocation27_spill] sm:$0xff] }
 0x65f   :  { %7999 = vmatmul.bf16.gmra.mxu0 %v16378_v2  ;;  %v15345_v51 = vpop.f32.mrf.mxu3  ;;  %v12382_v2 = vld [vmem:[#allocation15 + $0x530] sm:$0xf0]  ;;  %8126 = vmatpush.bf16.msra.mxu1 %v10343_v50  ;;  %v10482_v50 = vld [vmem:[#allocation15 + $0x2b0] sm:$0xf] }
 0x664   :  { %v15347_v19 = vpop.f32.mrf.mxu0 }
 0x665   :  { %v15349_v52 = vpop.f32.mrf.mxu2  ;;  %v15351_v46 = vpop.f32.mrf.mxu1 }
 0x667   :  { %v15353_v42 = vpop.f32.mrf.mxu3 }
 0x668   :  { %7917 = vmatmul.bf16.gmra.mxu1 %v16379_v8  ;;  %v10790_v8 = vld [vmem:[#allocation15 + $0x518] sm:$0xf] }
 0x669   :  { %v10791_v17 = vor.u32 %v12382_v2, %v10790_v8  ;;  %v7703_v2 = vadd.f32 %v15309_v26, %v7674_v48  ;;  %v7759_v8 = vadd.f32 %v15294_v45, %v7730_v6  ;;  %v7677_v6 = vadd.f32 %v15311_v14, %v15360_v36  ;;  %v12256_v14 = vld [vmem:[#allocation15 + $0x140] sm:$0xf0] }
 0x66a   :  { %7946 = vmatmul.bf16.gmra.mxu2 %v16380_v58 }
 0x66b   :  { %8184 = vmatpush.bf16.msrb.mxu3 %v10791_v17 }
 0x66c   :  { %v15362_v10 = vpop.f32.mrf.mxu0  ;;  %7975 = vmatmul.bf16.gmra.mxu3 %v16382_v23 }
 0x66d   :  { %v15365_v44 = vpop.f32.mrf.mxu2  ;;  %v15367_v57 = vpop.f32.mrf.mxu1 }
 0x66f   :  { %8004 = vmatmul.bf16.gmra.mxu0 %v16383_v27  ;;  %v15372_v58 = vpop.f32.mrf.mxu3  ;;  %v10511_v27 = vor.u32 %v12312_v49, %v10510_v61  ;;  %v10314_v61 = vld [vmem:[#allocation15 + $0x160] sm:$0xf]  ;;  %v10763_v49 = vor.u32 %v12375_v16, %v10762_v0  ;;  %v7706_v0 = vadd.f32 %v15320_v15, %v7677_v6  ;;  %v11014_v6 = vld [vmem:[#allocation15 + $0x6d8] sm:$0xf] }
 0x670   :  { %v10315_v48 = vor.u32 %v12263_v21, %v10314_v61  ;;  %v10286_v21 = vld [vmem:[#allocation15 + $0x128] sm:$0xf] }
 0x671   :  { %8157 = vmatpush.bf16.msrb.mxu2 %v10511_v27  ;;  %v12305_v27 = vld [vmem:[#allocation15 + $0x2c8] sm:$0xf0]  ;;  %8185 = vmatpush.bf16.msrb.mxu3 %v10763_v49 }
 0x672   :  { %v10483_v45 = vor.u32 %v12305_v27, %v10482_v50  ;;  %8127 = vmatpush.bf16.msra.mxu1 %v10315_v48  ;;  %v10454_v50 = vld [vmem:[#allocation15 + $0x278] sm:$0xf]  ;;  %v12298_v27 = vld [vmem:[#allocation15 + $0x290] sm:$0xf0]  ;;  %v7735_v48 = vadd.f32 %v15325_v32, %v7706_v0 }
 0x673   :  { %v10455_v15 = vor.u32 %v12298_v27, %v10454_v50 }
 0x674   :  { %v15375_v12 = vpop.f32.mrf.mxu0 }
 0x675   :  { %v15377_v23 = vpop.f32.mrf.mxu2  ;;  %v7787_v7 = vpop.f32.mrf.mxu1  ;;  %8158 = vmatpush.bf16.msrb.mxu2 %v10483_v45 }
 0x676   :  { %v7788_v47 = vadd.f32 %v7787_v7, %v7759_v8 }
 0x677   :  { %v15382_v5 = vpop.f32.mrf.mxu3 }
 0x678   :  { %8018 = vmatmul.bf16.vlgmr.msrb.gmra.mxu1 %v16384_v24  ;;  %v7732_v24 = vadd.f32 %v15313_v29, %v7703_v2  ;;  %v10734_v2 = vld [vmem:[#allocation15 + $0x4a8] sm:$0xf] }
 0x679   :  { %8159 = vmatpush.bf16.msrb.mxu2 %v10455_v15 }
 0x67a   :  { %8047 = vmatmul.bf16.vlgmr.msra.gmra.mxu2 %v14849_v20  ;;  %v7761_v16 = vadd.f32 %v15307_v54, %v7732_v24  ;;  %v12438_v54 = vld [vmem:[#allocation15 + $0x6f0] sm:$0xf0] }
 0x67b   :  { %v11015_v24 = vor.u32 %v12438_v54, %v11014_v6  ;;  %v10958_v6 = vld [vmem:[#allocation15 + $0x668] sm:$0xf]  ;;  %v12424_v54 = vld [vmem:[#allocation15 + $0x680] sm:$0xf0] }
 0x67c   :  { %v7874_v17 = vpop.f32.mrf.mxu0  ;;  %8076 = vmatmul.bf16.vlgmr.msra.gmra.mxu3 %v16385_v18 }
 0x67d   :  { %v7816_v53 = vpop.f32.mrf.mxu2  ;;  %v7789_v26 = vpop.f32.mrf.mxu1  ;;  %8213 = vmatpush.bf16.msra.mxu0 %v11015_v24  ;;  %v7682_v24 = vadd.f32 %v15331_v3, %v15360_v36 }
 0x67e   :  { %v7817_v38 = vadd.f32 %v7816_v53, %v7788_v47  ;;  %v7790_v29 = vadd.f32 %v7789_v26, %v7761_v16  ;;  %v12368_v47 = vld [vmem:[#allocation15 + $0x4c0] sm:$0xf0] }
 0x67f   :  { %8105 = vmatmul.bf16.vlgmr.msrb.gmra.mxu0 %v14857_v55  ;;  %v7845_v7 = vpop.f32.mrf.mxu3  ;;  %v10735_v49 = vor.u32 %v12368_v47, %v10734_v2  ;;  %v12431_v2 = vld [vmem:[#allocation15 + $0x6b8] sm:$0xf0] }
 0x680   :  { %v7846_v8 = vadd.f32 %v7845_v7, %v7817_v38  ;;  %v10287_v7 = vor.u32 %v12256_v14, %v10286_v21 }
 0x681   :  { %8186 = vmatpush.bf16.msrb.mxu3 %v10735_v49  ;;  %v12361_v49 = vld [vmem:[#allocation15 + $0x488] sm:$0xf0] }
 0x682   :  { %v7875_v18 = vadd.f32 %v7874_v17, %v7846_v8  ;;  %v7679_v17 = vadd.f32 %v15322_v30, %v15360_v36  ;;  %8128 = vmatpush.bf16.msra.mxu1 %v10287_v7  ;;  %v7764_v8 = vadd.f32 %v15317_v9, %v7735_v48  ;;  %v10258_v9 = vld [vmem:[#allocation15 + $0xf0] sm:$0xf]  ;;  %v12249_v48 = vld [vmem:[#allocation15 + $0x108] sm:$0xf0]  ;;  %v12291_v7 = vld [vmem:[#allocation15 + $0x258] sm:$0xf0] }
 0x684   :  { %12755 = vtanh.f32 %v7875_v18  ;;  %v7876_v61 = vpop.f32.mrf.mxu0  ;;  %v7708_v32 = vadd.f32 %v15329_v41, %v7679_v17  ;;  %v10706_v41 = vld [vmem:[#allocation15 + $0x470] sm:$0xf] }
 0x685   :  { %v7818_v53 = vpop.f32.mrf.mxu2  ;;  %v7792_v45 = vpop.f32.mrf.mxu1  ;;  %v10707_v27 = vor.u32 %v12361_v49, %v10706_v41  ;;  %v12354_v41 = vld [vmem:[#allocation15 + $0x450] sm:$0xf0]  ;;  %v10230_v49 = vld [vmem:[#allocation15 + $0xb8] sm:$0xf] }
 0x686   :  { %v7819_v38 = vadd.f32 %v7818_v53, %v7790_v29  ;;  %v7793_v30 = vadd.f32 %v7792_v45, %v7764_v8  ;;  %v10986_v29 = vld [vmem:[#allocation15 + $0x6a0] sm:$0xf]  ;;  %v7737_v14 = vadd.f32 %v15333_v1, %v7708_v32  ;;  %v10259_v45 = vor.u32 %v12249_v48, %v10258_v9 }
 0x687   :  { %v7847_v18 = vpop.f32.mrf.mxu3  ;;  %v10987_v53 = vor.u32 %v12431_v2, %v10986_v29  ;;  %8187 = vmatpush.bf16.msrb.mxu3 %v10707_v27  ;;  %v12284_v27 = vld [vmem:[#allocation15 + $0x220] sm:$0xf0] }
 0x688   :  { %v7848_v26 = vadd.f32 %v7847_v18, %v7819_v38  ;;  %8023 = vmatmul.bf16.gmra.mxu1 %v14879_v35  ;;  %v10426_v38 = vld [vmem:[#allocation15 + $0x240] sm:$0xf]  ;;  %v10959_v18 = vor.u32 %v12424_v54, %v10958_v6  ;;  %v7766_v32 = vadd.f32 %v15327_v34, %v7737_v14  ;;  %v12242_v14 = vld [vmem:[#allocation15 + $0xd0] sm:$0xf0] }
 0x689   :  { %8214 = vmatpush.bf16.msra.mxu0 %v10987_v53  ;;  %v10427_v15 = vor.u32 %v12291_v7, %v10426_v38  ;;  %8129 = vmatpush.bf16.msra.mxu1 %v10259_v45  ;;  %v10678_v53 = vld [vmem:[#allocation15 + $0x438] sm:$0xf]  ;;  %v10231_v48 = vor.u32 %v12242_v14, %v10230_v49  ;;  %v12410_v7 = vld [vmem:[#allocation15 + $0x610] sm:$0xf0]  ;;  %v7684_v45 = vadd.f32 %v15342_v4, %v15360_v36 }
 0x68a   :  { %8052 = vmatmul.bf16.gmra.mxu2 %v14881_v62  ;;  %v12756_v0 = vpop.eup %12755  ;;  %v7877_v16 = vadd.f32 %v7876_v61, %v7848_v26  ;;  %v7711_v26 = vadd.f32 %v15340_v11, %v7682_v24  ;;  %v10902_v38 = vld [vmem:[#allocation15 + $0x5f8] sm:$0xf]  ;;  %v7687_v14 = vadd.f32 %v15351_v46, %v15360_v36 }
 0x68b   :  { %8880 = vst [vmem:[%s16041_s11 + $0x10] sm:$0xff] %v12756_v0  ;;  %8160 = vmatpush.bf16.msrb.mxu2 %v10427_v15  ;;  %v10903_v6 = vor.u32 %v12410_v7, %v10902_v38 }
 0x68c   :  { %12757 = vtanh.f32 %v7877_v16  ;;  %v7879_v47 = vpop.f32.mrf.mxu0  ;;  %8081 = vmatmul.bf16.gmra.mxu3 %v14883_v22  ;;  %v10930_v16 = vld [vmem:[#allocation15 + $0x630] sm:$0xf]  ;;  %v7740_v11 = vadd.f32 %v15345_v51, %v7711_v26  ;;  %v7713_v51 = vadd.f32 %v15349_v52, %v7684_v45  ;;  %v12235_v26 = vld [vmem:[#allocation15 + $0x98] sm:$0xf0] }
 0x68d   :  { %v7821_v21 = vpop.f32.mrf.mxu2  ;;  %v7794_v61 = vpop.f32.mrf.mxu1  ;;  %8215 = vmatpush.bf16.msra.mxu0 %v10959_v18  ;;  %8130 = vmatpush.bf16.msra.mxu1 %v10231_v48  ;;  %v10846_v48 = vld [vmem:[#allocation15 + $0x588] sm:$0xf] }
 0x68e   :  { %v7822_v50 = vadd.f32 %v7821_v21, %v7793_v30  ;;  %v7795_v3 = vadd.f32 %v7794_v61, %v7766_v32  ;;  %v12417_v30 = vld [vmem:[#allocation15 + $0x648] sm:$0xf0]  ;;  %v7769_v24 = vadd.f32 %v15337_v63, %v7740_v11  ;;  %v10650_v63 = vld [vmem:[#allocation15 + $0x400] sm:$0xf] }
 0x68f   :  { %8110 = vmatmul.bf16.gmra.mxu0 %v14906_v25  ;;  %v7850_v17 = vpop.f32.mrf.mxu3  ;;  %v10931_v21 = vor.u32 %v12417_v30, %v10930_v16  ;;  %v7742_v16 = vadd.f32 %v15353_v42, %v7713_v51 }
 0x690   :  { %v7851_v1 = vadd.f32 %v7850_v17, %v7822_v50  ;;  %v10398_v50 = vld [vmem:[#allocation15 + $0x208] sm:$0xf] }
 0x691   :  { %8216 = vmatpush.bf16.msra.mxu0 %v10931_v21  ;;  %v10399_v61 = vor.u32 %v12284_v27, %v10398_v50  ;;  %v12403_v21 = vld [vmem:[#allocation15 + $0x5d8] sm:$0xf0]  ;;  %v12340_v27 = vld [vmem:[#allocation15 + $0x3e0] sm:$0xf0] }
 0x692   :  { %v12758_v8 = vpop.eup %12757  ;;  %v7880_v0 = vadd.f32 %v7879_v47, %v7851_v1  ;;  %v10679_v47 = vor.u32 %v12354_v41, %v10678_v53  ;;  %v10202_v1 = vld [vmem:[#allocation15 + $0x80] sm:$0xf]  ;;  %v10370_v53 = vld [vmem:[#allocation15 + $0x1d0] sm:$0xf]  ;;  %v12277_v41 = vld [vmem:[#allocation15 + $0x1e8] sm:$0xf0] }
 0x693   :  { %8887 = vst [vmem:[%s16041_s11 + $0x48] sm:$0xff] %v12758_v8  ;;  %8161 = vmatpush.bf16.msrb.mxu2 %v10399_v61  ;;  %v10203_v8 = vor.u32 %v12235_v26, %v10202_v1  ;;  %v10371_v11 = vor.u32 %v12277_v41, %v10370_v53  ;;  %v12396_v61 = vld [vmem:[#allocation15 + $0x5a0] sm:$0xf0]  ;;  %v10594_v26 = vld [vmem:[#allocation15 + $0x390] sm:$0xf] }
 0x694   :  { %12759 = vtanh.f32 %v7880_v0  ;;  %v7881_v29 = vpop.f32.mrf.mxu0  ;;  %8188 = vmatpush.bf16.msrb.mxu3 %v10679_v47  ;;  %v12347_v0 = vld [vmem:[#allocation15 + $0x418] sm:$0xf0]  ;;  %v10622_v47 = vld [vmem:[#allocation15 + $0x3c8] sm:$0xf]  ;;  %v10847_v45 = vor.u32 %v12396_v61, %v10846_v48  ;;  %v11434_v53 = vld [vmem:[#allocation15 + $0xa20] sm:$0xf] }
 0x695   :  { %v7823_v2 = vpop.f32.mrf.mxu2  ;;  %v7797_v9 = vpop.f32.mrf.mxu1  ;;  %8217 = vmatpush.bf16.msra.mxu0 %v10903_v6  ;;  %8131 = vmatpush.bf16.msra.mxu1 %v10203_v8  ;;  %v10623_v7 = vor.u32 %v12340_v27, %v10622_v47  ;;  %v7771_v6 = vadd.f32 %v15347_v19, %v7742_v16  ;;  %v12550_v16 = vld [vmem:[#allocation15 + $0xa70] sm:$0xf0]  ;;  %v12543_v41 = vld [vmem:[#allocation15 + $0xa38] sm:$0xf0] }
 0x696   :  { %v7824_v34 = vadd.f32 %v7823_v2, %v7795_v3  ;;  %v7798_v4 = vadd.f32 %v7797_v9, %v7769_v24  ;;  %v10874_v3 = vld [vmem:[#allocation15 + $0x5c0] sm:$0xf]  ;;  %v10651_v2 = vor.u32 %v12347_v0, %v10650_v63  ;;  %v12228_v9 = vld [vmem:[#allocation15 + $0x60] sm:$0xf0]  ;;  %v10146_v24 = vld [vmem:[#allocation15 + $0x10] sm:$0xf]  ;;  %v11435_v47 = vor.u32 %v12543_v41, %v11434_v53 }
 0x697   :  { %v7852_v15 = vpop.f32.mrf.mxu3  ;;  %v10875_v49 = vor.u32 %v12403_v21, %v10874_v3  ;;  %8162 = vmatpush.bf16.msrb.mxu2 %v10371_v11  ;;  %v12389_v0 = vld [vmem:[#allocation15 + $0x568] sm:$0xf0]  ;;  %v11462_v3 = vld [vmem:[#allocation15 + $0xa58] sm:$0xf]  ;;  %v11630_v41 = vld [vmem:[#allocation15 + $0xba8] sm:$0xf] }
 0x698   :  { %v7853_v54 = vadd.f32 %v7852_v15, %v7824_v34  ;;  %8028 = vmatmul.bf16.gmra.mxu1 %v14922_v33  ;;  %v10174_v34 = vld [vmem:[#allocation15 + $0x48] sm:$0xf]  ;;  %8189 = vmatpush.bf16.msrb.mxu3 %v10651_v2  ;;  %v7716_v15 = vadd.f32 %v15365_v44, %v7687_v14  ;;  %v12333_v44 = vld [vmem:[#allocation15 + $0x3a8] sm:$0xf0]  ;;  %v7689_v2 = vadd.f32 %v15367_v57, %v15360_v36 }
 0x699   :  { %v10175_v42 = vor.u32 %v12228_v9, %v10174_v34  ;;  %8218 = vmatpush.bf16.msra.mxu0 %v10875_v49  ;;  %v10595_v63 = vor.u32 %v12333_v44, %v10594_v26  ;;  %v12599_v26 = vld [vmem:[#allocation15 + $0xbf8] sm:$0xf0]  ;;  %v11210_v44 = vld [vmem:[#allocation15 + $0x860] sm:$0xf] }
 0x69a   :  { %8057 = vmatmul.bf16.gmra.mxu2 %v14924_v60  ;;  %v12760_v17 = vpop.eup %12759  ;;  %v7882_v18 = vadd.f32 %v7881_v29, %v7853_v54  ;;  %v7745_v19 = vadd.f32 %v15372_v58, %v7716_v15  ;;  %v7718_v58 = vadd.f32 %v15377_v23, %v7689_v2  ;;  %v12606_v23 = vld [vmem:[#allocation15 + $0xc30] sm:$0xf0] }
 0x69b   :  { %8894 = vst [vmem:[%s16041_s11 + $0x80] sm:$0xff] %v12760_v17  ;;  %8132 = vmatpush.bf16.msra.mxu1 %v10175_v42  ;;  %v12221_v17 = vld [vmem:[#allocation15 + $0x28] sm:$0xf0] }
 0x69c   :  { %12761 = vtanh.f32 %v7882_v18  ;;  %v7884_v32 = vpop.f32.mrf.mxu0  ;;  %8086 = vmatmul.bf16.gmra.mxu3 %v14926_v59  ;;  %v10147_v1 = vor.u32 %v12221_v17, %v10146_v24  ;;  %v7774_v11 = vadd.f32 %v15362_v10, %v7745_v19  ;;  %v7747_v10 = vadd.f32 %v15382_v5, %v7718_v58 }
 0x69d   :  { %v7826_v52 = vpop.f32.mrf.mxu2  ;;  %v7799_v29 = vpop.f32.mrf.mxu1  ;;  %8190 = vmatpush.bf16.msrb.mxu3 %v10623_v7  ;;  %8219 = vmatpush.bf16.msra.mxu0 %v10847_v45  ;;  %v12494_v7 = vld [vmem:[#allocation15 + $0x8b0] sm:$0xf0]  ;;  %v11406_v45 = vld [vmem:[#allocation15 + $0x9e8] sm:$0xf] }
 0x69e   :  { %v7827_v30 = vadd.f32 %v7826_v52, %v7798_v4  ;;  %v7800_v46 = vadd.f32 %v7799_v29, %v7771_v6  ;;  %v10818_v52 = vld [vmem:[#allocation15 + $0x550] sm:$0xf]  ;;  %v11463_v29 = vor.u32 %v12550_v16, %v11462_v3 }
 0x69f   :  { %8115 = vmatmul.bf16.gmra.mxu0 %v14943_v43  ;;  %v7855_v50 = vpop.f32.mrf.mxu3  ;;  %8133 = vmatpush.bf16.msra.mxu1 %v10147_v1  ;;  %v11658_v1 = vld [vmem:[#allocation15 + $0xbe0] sm:$0xf] }
 0x6a0   :  { %v7856_v38 = vadd.f32 %v7855_v50, %v7827_v30  ;;  %v10819_v30 = vor.u32 %v12389_v0, %v10818_v52  ;;  %8271 = vmatpush.bf16.msra.mxu2 %v11463_v29  ;;  %v11686_v50 = vld [vmem:[#allocation15 + $0xc18] sm:$0xf] }
 0x6a1   :  { %8191 = vmatpush.bf16.msrb.mxu3 %v10595_v63  ;;  %v11687_v48 = vor.u32 %v12606_v23, %v11686_v50  ;;  %v12529_v63 = vld [vmem:[#allocation15 + $0x9c8] sm:$0xf0]  ;;  %v12522_v50 = vld [vmem:[#allocation15 + $0x990] sm:$0xf0]  ;;  %v11910_v23 = vld [vmem:[#allocation15 + $0xdd8] sm:$0xf] }
 0x6a2   :  { %v12762_v54 = vpop.eup %12761  ;;  %v7885_v51 = vadd.f32 %v7884_v32, %v7856_v38  ;;  %8220 = vmatpush.bf16.msra.mxu0 %v10819_v30  ;;  %v11238_v38 = vld [vmem:[#allocation15 + $0x898] sm:$0xf] }
 0x6a3   :  { %8901 = vst [vmem:[%s16041_s11 + $0xb8] sm:$0xff] %v12762_v54  ;;  %v11239_v6 = vor.u32 %v12494_v7, %v11238_v38  ;;  %v12536_v54 = vld [vmem:[#allocation15 + $0xa00] sm:$0xf0]  ;;  %v11882_v7 = vld [vmem:[#allocation15 + $0xda0] sm:$0xf] }
 0x6a4   :  { %12763 = vtanh.f32 %v7885_v51  ;;  %v7886_v18 = vpop.f32.mrf.mxu0  ;;  %8272 = vmatpush.bf16.msra.mxu2 %v11435_v47  ;;  %v7776_v51 = vadd.f32 %v15375_v12, %v7747_v10  ;;  %v11659_v12 = vor.u32 %v12599_v26, %v11658_v1  ;;  %v11182_v47 = vld [vmem:[#allocation15 + $0x828] sm:$0xf]  ;;  %v12662_v10 = vld [vmem:[#allocation15 + $0xdf0] sm:$0xf0] }
 0x6a5   :  { %v7828_v4 = vpop.f32.mrf.mxu2  ;;  %v7802_v8 = vpop.f32.mrf.mxu1  ;;  %8300 = vmatpush.bf16.msra.mxu3 %v11687_v48  ;;  %8242 = vmatpush.bf16.msrb.mxu1 %v11239_v6  ;;  %v11854_v1 = vld [vmem:[#allocation15 + $0xd68] sm:$0xf] }
 0x6a6   :  { %v7829_v32 = vadd.f32 %v7828_v4, %v7800_v46  ;;  %v7803_v36 = vadd.f32 %v7802_v8, %v7774_v11  ;;  %v11407_v46 = vor.u32 %v12536_v54, %v11406_v45  ;;  %v11378_v8 = vld [vmem:[#allocation15 + $0x9b0] sm:$0xf]  ;;  %v12655_v45 = vld [vmem:[#allocation15 + $0xdb8] sm:$0xf0] }
 0x6a7   :  { %v7857_v21 = vpop.f32.mrf.mxu3  ;;  %v11379_v3 = vor.u32 %v12529_v63, %v11378_v8  ;;  %v11883_v54 = vor.u32 %v12655_v45, %v11882_v7  ;;  %v16388_v8 = vld [vmem:[#allocation28_spill] sm:$0xff] }
 0x6a8   :  { %v7858_v49 = vadd.f32 %v7857_v21, %v7829_v32  ;;  %8033 = vmatmul.bf16.gmra.mxu1 %v14955_v40  ;;  %8273 = vmatpush.bf16.msra.mxu2 %v11407_v46  ;;  %v12487_v32 = vld [vmem:[#allocation15 + $0x878] sm:$0xf0]  ;;  %v11154_v46 = vld [vmem:[#allocation15 + $0x7f0] sm:$0xf] }
 0x6a9   :  { %v11211_v0 = vor.u32 %v12487_v32, %v11210_v44  ;;  %8301 = vmatpush.bf16.msra.mxu3 %v11659_v12  ;;  %v16387_v12 = vld [vmem:[#allocation24_spill] sm:$0xff] }
 0x6aa   :  { %8062 = vmatmul.bf16.gmra.mxu2 %v14957_v31  ;;  %v12764_v34 = vpop.eup %12763  ;;  %v7887_v9 = vadd.f32 %v7886_v18, %v7858_v49  ;;  %v12592_v49 = vld [vmem:[#allocation15 + $0xbc0] sm:$0xf0] }
 0x6ab   :  { %8908 = vst [vmem:[%s16041_s11 + $0xf0] sm:$0xff] %v12764_v34  ;;  %8243 = vmatpush.bf16.msrb.mxu1 %v11211_v0  ;;  %v11631_v11 = vor.u32 %v12592_v49, %v11630_v41  ;;  %v16386_v34 = vld [vmem:[#allocation49_spill] sm:$0xff]  ;;  %v16389_v0 = vld [vmem:[#allocation30_spill] sm:$0xff] }
 0x6ac   :  { %12765 = vtanh.f32 %v7887_v9  ;;  %v7889_v57 = vpop.f32.mrf.mxu0  ;;  %8091 = vmatmul.bf16.gmra.mxu3 %v14961_v39  ;;  %8274 = vmatpush.bf16.msra.mxu2 %v11379_v3  ;;  %v12578_v49 = vld [vmem:[#allocation15 + $0xb50] sm:$0xf0] }
 0x6ad   :  { %v7831_v14 = vpop.f32.mrf.mxu2  ;;  %v7804_v27 = vpop.f32.mrf.mxu1  ;;  %8302 = vmatpush.bf16.msra.mxu3 %v11631_v11 }
 0x6ae   :  { %v7832_v42 = vadd.f32 %v7831_v14, %v7803_v36  ;;  %v7805_v5 = vadd.f32 %v7804_v27, %v7776_v51  ;;  %v12480_v36 = vld [vmem:[#allocation15 + $0x840] sm:$0xf0]  ;;  %v11911_v27 = vor.u32 %v12662_v10, %v11910_v23  ;;  %v12585_v51 = vld [vmem:[#allocation15 + $0xb88] sm:$0xf0] }
 0x6af   :  { %8120 = vmatmul.bf16.gmra.mxu0 %v14655_v56  ;;  %v7860_v61 = vpop.f32.mrf.mxu3  ;;  %v11183_v14 = vor.u32 %v12480_v36, %v11182_v47  ;;  %v16390_v47 = vld [vmem:[#allocation33_spill] sm:$0xff]  ;;  %v12508_v10 = vld [vmem:[#allocation15 + $0x920] sm:$0xf0] }
 0x6b0   :  { %v7861_v15 = vadd.f32 %v7860_v61, %v7832_v42  ;;  %8329 = vmatpush.bf16.msrb.mxu0 %v11911_v27  ;;  %v12634_v27 = vld [vmem:[#allocation15 + $0xd10] sm:$0xf0] }
 0x6b1   :  { %8244 = vmatpush.bf16.msrb.mxu1 %v11183_v14  ;;  %v12466_v14 = vld [vmem:[#allocation15 + $0x7d0] sm:$0xf0] }
 0x6b2   :  { %v12766_v24 = vpop.eup %12765  ;;  %v7890_v17 = vadd.f32 %v7889_v57, %v7861_v15  ;;  %v11350_v57 = vld [vmem:[#allocation15 + $0x978] sm:$0xf]  ;;  %v11602_v15 = vld [vmem:[#allocation15 + $0xb70] sm:$0xf] }
 0x6b3   :  { %8915 = vst [vmem:[%s16041_s11 + $0x128] sm:$0xff] %v12766_v24  ;;  %v11351_v42 = vor.u32 %v12522_v50, %v11350_v57  ;;  %v12473_v24 = vld [vmem:[#allocation15 + $0x808] sm:$0xf0]  ;;  %v11126_v57 = vld [vmem:[#allocation15 + $0x7b8] sm:$0xf] }
 0x6b4   :  { %12767 = vtanh.f32 %v7890_v17  ;;  %v7891_v18 = vpop.f32.mrf.mxu0  ;;  %v11603_v17 = vor.u32 %v12585_v51, %v11602_v15  ;;  %8330 = vmatpush.bf16.msrb.mxu0 %v11883_v54  ;;  %v11294_v50 = vld [vmem:[#allocation15 + $0x908] sm:$0xf]  ;;  %v11127_v23 = vor.u32 %v12466_v14, %v11126_v57  ;;  %v11098_v54 = vld [vmem:[#allocation15 + $0x780] sm:$0xf]  ;;  %v12459_v51 = vld [vmem:[#allocation15 + $0x798] sm:$0xf0] }
 0x6b5   :  { %v7833_v4 = vpop.f32.mrf.mxu2  ;;  %v15452_v19 = vpop.f32.mrf.mxu1  ;;  %8275 = vmatpush.bf16.msra.mxu2 %v11351_v42  ;;  %v11798_v42 = vld [vmem:[#allocation15 + $0xcf8] sm:$0xf]  ;;  %v16391_v57 = vld [vmem:[#allocation40_spill] sm:$0xff] }
 0x6b6   :  { %v7834_v52 = vadd.f32 %v7833_v4, %v7805_v5  ;;  %v11155_v5 = vor.u32 %v12473_v24, %v11154_v46  ;;  %v12515_v4 = vld [vmem:[#allocation15 + $0x958] sm:$0xf0]  ;;  %8303 = vmatpush.bf16.msra.mxu3 %v11603_v17  ;;  %v11799_v7 = vor.u32 %v12634_v27, %v11798_v42  ;;  %v11546_v46 = vld [vmem:[#allocation15 + $0xb00] sm:$0xf]  ;;  %v11099_v17 = vor.u32 %v12459_v51, %v11098_v54  ;;  %v11042_v51 = vld [vmem:[#allocation15 + $0x710] sm:$0xf] }
 0x6b7   :  { %v7862_v16 = vpop.f32.mrf.mxu3 }
 0x6b8   :  { %v7863_v30 = vadd.f32 %v7862_v16, %v7834_v52  ;;  %8134 = vmatmul.bf16.vlgmr.msra.gmra.mxu1 %v14657_v28  ;;  %v12648_v52 = vld [vmem:[#allocation15 + $0xd80] sm:$0xf0]  ;;  %v11826_v16 = vld [vmem:[#allocation15 + $0xd30] sm:$0xf] }
 0x6b9   :  { %v11855_v32 = vor.u32 %v12648_v52, %v11854_v1  ;;  %8245 = vmatpush.bf16.msrb.mxu1 %v11155_v5  ;;  %v12571_v5 = vld [vmem:[#allocation15 + $0xb18] sm:$0xf0]  ;;  %v11266_v52 = vld [vmem:[#allocation15 + $0x8d0] sm:$0xf] }
 0x6ba   :  { %8163 = vmatmul.bf16.vlgmr.msrb.gmra.mxu2 %v14667_v13  ;;  %v12768_v29 = vpop.eup %12767  ;;  %v7892_v2 = vadd.f32 %v7891_v18, %v7863_v30  ;;  %v11322_v18 = vld [vmem:[#allocation15 + $0x940] sm:$0xf]  ;;  %v12641_v30 = vld [vmem:[#allocation15 + $0xd48] sm:$0xf0]  ;;  %v11547_v1 = vor.u32 %v12571_v5, %v11546_v46 }
 0x6bb   :  { %8922 = vst [vmem:[%s16041_s11 + $0x160] sm:$0xff] %v12768_v29  ;;  %v11323_v44 = vor.u32 %v12515_v4, %v11322_v18  ;;  %8331 = vmatpush.bf16.msrb.mxu0 %v11855_v32  ;;  %v11574_v29 = vld [vmem:[#allocation15 + $0xb38] sm:$0xf]  ;;  %v11827_v41 = vor.u32 %v12641_v30, %v11826_v16  ;;  %v11770_v18 = vld [vmem:[#allocation15 + $0xcc0] sm:$0xf] }
 0x6bc   :  { %12769 = vtanh.f32 %v7892_v2  ;;  %v15459_v21 = vpop.f32.mrf.mxu0  ;;  %8192 = vmatmul.bf16.vlgmr.msrb.gmra.mxu3 %v14673_v37  ;;  %v11575_v11 = vor.u32 %v12578_v49, %v11574_v29  ;;  %v12627_v4 = vld [vmem:[#allocation15 + $0xcd8] sm:$0xf0]  ;;  %v12501_v32 = vld [vmem:[#allocation15 + $0x8e8] sm:$0xf0]  ;;  %v11070_v16 = vld [vmem:[#allocation15 + $0x748] sm:$0xf] }
 0x6bd   :  { %v15462_v53 = vpop.f32.mrf.mxu2  ;;  %v15464_v58 = vpop.f32.mrf.mxu1  ;;  %8276 = vmatpush.bf16.msra.mxu2 %v11323_v44  ;;  %8246 = vmatpush.bf16.msrb.mxu1 %v11127_v23  ;;  %v11771_v44 = vor.u32 %v12627_v4, %v11770_v18  ;;  %v11267_v29 = vor.u32 %v12501_v32, %v11266_v52  ;;  %v11518_v49 = vld [vmem:[#allocation15 + $0xac8] sm:$0xf]  ;;  %v12620_v23 = vld [vmem:[#allocation15 + $0xca0] sm:$0xf0]  ;;  %v12445_v46 = vld [vmem:[#allocation15 + $0x728] sm:$0xf0] }
 0x6be   :  { %8304 = vmatpush.bf16.msra.mxu3 %v11575_v11  ;;  %v12564_v11 = vld [vmem:[#allocation15 + $0xae0] sm:$0xf0]  ;;  %v11043_v18 = vor.u32 %v12445_v46, %v11042_v51  ;;  %v12557_v4 = vld [vmem:[#allocation15 + $0xaa8] sm:$0xf0]  ;;  %v16397_v46 = vld [vmem:[#allocation37_spill] sm:$0xff] }
 0x6bf   :  { %8221 = vmatmul.bf16.vlgmr.msra.gmra.mxu0 %v16386_v34  ;;  %v15467_v9 = vpop.f32.mrf.mxu3  ;;  %v11519_v42 = vor.u32 %v12564_v11, %v11518_v49  ;;  %v10568_v49 = vld [vmem:[#allocation15 + $0x374] sm:$0xf0]  ;;  %v16396_v51 = vld [vmem:[#allocation35_spill] sm:$0xff] }
 0x6c0   :  { %8332 = vmatpush.bf16.msrb.mxu0 %v11827_v41  ;;  %v12452_v41 = vld [vmem:[#allocation15 + $0x760] sm:$0xf0] }
 0x6c1   :  { %8247 = vmatpush.bf16.msrb.mxu1 %v11099_v17  ;;  %v11071_v14 = vor.u32 %v12452_v41, %v11070_v16  ;;  %v11490_v17 = vld [vmem:[#allocation15 + $0xa90] sm:$0xf]  ;;  %v12323_v41 = vld [vmem:[#allocation15 + $0x35c] sm:$0xf] }
 0x6c2   :  { %v12770_v48 = vpop.eup %12769  ;;  %8305 = vmatpush.bf16.msra.mxu3 %v11547_v1  ;;  %v11714_v1 = vld [vmem:[#allocation15 + $0xc50] sm:$0xf]  ;;  %v11491_v52 = vor.u32 %v12557_v4, %v11490_v17  ;;  %v10571_v11 = vor.u32 %v12323_v41, %v10568_v49  ;;  %v15523_v17 = vperm.slane %v16397_v46, 3  ;;  %v10540_v4 = vld [vmem:[#allocation15 + $0x33c] sm:$0xf0] }
 0x6c3   :  { %8929 = vst [vmem:[%s16041_s11 + $0x198] sm:$0xff] %v12770_v48  ;;  %v11295_v48 = vor.u32 %v12508_v10, %v11294_v50  ;;  %v11742_v50 = vld [vmem:[#allocation15 + $0xc88] sm:$0xf]  ;;  %v16392_v10 = vld [vmem:[#allocation41_spill] sm:$0xff] }
 0x6c4   :  { %v15472_v61 = vpop.f32.mrf.mxu0  ;;  %8333 = vmatpush.bf16.msrb.mxu0 %v11799_v7  ;;  %v11743_v27 = vor.u32 %v12620_v23, %v11742_v50  ;;  %v16393_v7 = vld [vmem:[#allocation32_spill] sm:$0xff]  ;;  %v16394_v16 = vld [vmem:[#allocation25_spill] sm:$0xff]  ;;  %v7904_v49 = vadd.f32 %v15452_v19, %v15523_v17 }
 0x6c5   :  { %v15474_v38 = vpop.f32.mrf.mxu2  ;;  %v15476_v6 = vpop.f32.mrf.mxu1  ;;  %8277 = vmatpush.bf16.msra.mxu2 %v11295_v48  ;;  %8248 = vmatpush.bf16.msrb.mxu1 %v11071_v14 }
 0x6c6   :  { %8306 = vmatpush.bf16.msra.mxu3 %v11519_v42  ;;  %v7933_v46 = vadd.f32 %v15462_v53, %v7904_v49  ;;  %v7906_v53 = vadd.f32 %v15464_v58, %v15523_v17 }
 0x6c7   :  { %v15478_v26 = vpop.f32.mrf.mxu3 }
 0x6c8   :  { %8139 = vmatmul.bf16.gmra.mxu1 %v16387_v12  ;;  %8334 = vmatpush.bf16.msrb.mxu0 %v11771_v44  ;;  %v12613_v44 = vld [vmem:[#allocation15 + $0xc68] sm:$0xf0]  ;;  %v10316_v12 = vld [vmem:[#allocation15 + $0x17c] sm:$0xf0] }
 0x6c9   :  { %8278 = vmatpush.bf16.msra.mxu2 %v11267_v29  ;;  %v11715_v32 = vor.u32 %v12613_v44, %v11714_v1  ;;  %8249 = vmatpush.bf16.msrb.mxu1 %v11043_v18  ;;  %v12316_v18 = vld [vmem:[#allocation15 + $0x324] sm:$0xf]  ;;  %v16398_v44 = vld [vmem:[#allocation42_spill] sm:$0xff] }
 0x6ca   :  { %8168 = vmatmul.bf16.gmra.mxu2 %v16388_v8  ;;  %8307 = vmatpush.bf16.msra.mxu3 %v11491_v52  ;;  %v16400_v8 = vld [vmem:[#allocation29_spill] sm:$0xff] }
 0x6cc   :  { %v15482_v63 = vpop.f32.mrf.mxu0  ;;  %8197 = vmatmul.bf16.gmra.mxu3 %v16389_v0  ;;  %8335 = vmatpush.bf16.msrb.mxu0 %v11743_v27  ;;  %v16395_v27 = vld [vmem:[#allocation34_spill] sm:$0xff] }
 0x6cd   :  { %v15485_v3 = vpop.f32.mrf.mxu2  ;;  %v15487_v2 = vpop.f32.mrf.mxu1  ;;  %8387 = vmatpush.bf16.msrb.mxu2 %v10571_v11  ;;  %v16399_v11 = vld [vmem:[#allocation43_spill] sm:$0xff] }
 0x6cf   :  { %8226 = vmatmul.bf16.gmra.mxu0 %v16390_v47  ;;  %v15490_v36 = vpop.f32.mrf.mxu3  ;;  %v7962_v47 = vadd.f32 %v15467_v9, %v7933_v46  ;;  %v12372_v46 = vld [vmem:[#allocation15 + $0x4e4] sm:$0xf] }
 0x6d0   :  { %8336 = vmatpush.bf16.msrb.mxu0 %v11715_v32  ;;  %v10543_v32 = vor.u32 %v12316_v18, %v10540_v4  ;;  %v10344_v4 = vld [vmem:[#allocation15 + $0x1b4] sm:$0xf0] }
 0x6d2   :  { %8388 = vmatpush.bf16.msrb.mxu2 %v10543_v32  ;;  %v10512_v32 = vld [vmem:[#allocation15 + $0x304] sm:$0xf0] }
 0x6d4   :  { %v15492_v45 = vpop.f32.mrf.mxu0 }
 0x6d5   :  { %v15494_v15 = vpop.f32.mrf.mxu2  ;;  %v15496_v24 = vpop.f32.mrf.mxu1 }
 0x6d7   :  { %v15498_v30 = vpop.f32.mrf.mxu3 }
 0x6d8   :  { %8144 = vmatmul.bf16.gmra.mxu1 %v16391_v57  ;;  %v12309_v57 = vld [vmem:[#allocation15 + $0x2ec] sm:$0xf] }
 0x6da   :  { %8173 = vmatmul.bf16.gmra.mxu2 %v16392_v10 }
 0x6dc   :  { %v15502_v48 = vpop.f32.mrf.mxu0  ;;  %8202 = vmatmul.bf16.gmra.mxu3 %v16393_v7  ;;  %v12267_v7 = vld [vmem:[#allocation15 + $0x19c] sm:$0xf] }
 0x6dd   :  { %v15505_v54 = vpop.f32.mrf.mxu2  ;;  %v15507_v5 = vpop.f32.mrf.mxu1  ;;  %v10347_v0 = vor.u32 %v12267_v7, %v10344_v4  ;;  %v10764_v7 = vld [vmem:[#allocation15 + $0x4fc] sm:$0xf0] }
 0x6de   :  { %v16401_v4 = vld [vmem:[#allocation27_spill] sm:$0xff] }
 0x6df   :  { %8231 = vmatmul.bf16.gmra.mxu0 %v16394_v16  ;;  %v15510_v29 = vpop.f32.mrf.mxu3  ;;  %v10792_v16 = vld [vmem:[#allocation15 + $0x534] sm:$0xf0]  ;;  %8358 = vmatpush.bf16.msra.mxu1 %v10347_v0  ;;  %v12302_v0 = vld [vmem:[#allocation15 + $0x2b4] sm:$0xf] }
 0x6e4   :  { %v15512_v14 = vpop.f32.mrf.mxu0 }
 0x6e5   :  { %v15514_v50 = vpop.f32.mrf.mxu2  ;;  %v15516_v23 = vpop.f32.mrf.mxu1 }
 0x6e7   :  { %v15518_v42 = vpop.f32.mrf.mxu3 }
 0x6e8   :  { %8149 = vmatmul.bf16.gmra.mxu1 %v16395_v27  ;;  %v12379_v27 = vld [vmem:[#allocation15 + $0x51c] sm:$0xf] }
 0x6e9   :  { %v10795_v18 = vor.u32 %v12379_v27, %v10792_v16  ;;  %v7935_v16 = vadd.f32 %v15474_v38, %v7906_v53  ;;  %v7991_v27 = vadd.f32 %v15459_v21, %v7962_v47  ;;  %v7909_v47 = vadd.f32 %v15476_v6, %v15523_v17  ;;  %v10288_v6 = vld [vmem:[#allocation15 + $0x144] sm:$0xf0] }
 0x6ea   :  { %8178 = vmatmul.bf16.gmra.mxu2 %v16396_v51 }
 0x6eb   :  { %8416 = vmatpush.bf16.msrb.mxu3 %v10795_v18 }
 0x6ec   :  { %v15525_v1 = vpop.f32.mrf.mxu0  ;;  %8207 = vmatmul.bf16.gmra.mxu3 %v16398_v44 }
 0x6ed   :  { %v15528_v52 = vpop.f32.mrf.mxu2  ;;  %v15530_v41 = vpop.f32.mrf.mxu1 }
 0x6ef   :  { %8236 = vmatmul.bf16.gmra.mxu0 %v16399_v11  ;;  %v15535_v51 = vpop.f32.mrf.mxu3  ;;  %v10515_v11 = vor.u32 %v12309_v57, %v10512_v32  ;;  %v12260_v57 = vld [vmem:[#allocation15 + $0x164] sm:$0xf]  ;;  %v10767_v32 = vor.u32 %v12372_v46, %v10764_v7  ;;  %v7938_v46 = vadd.f32 %v15485_v3, %v7909_v47  ;;  %v12435_v47 = vld [vmem:[#allocation15 + $0x6dc] sm:$0xf] }
 0x6f0   :  { %v10319_v53 = vor.u32 %v12260_v57, %v10316_v12  ;;  %v12253_v12 = vld [vmem:[#allocation15 + $0x12c] sm:$0xf] }
 0x6f1   :  { %8389 = vmatpush.bf16.msrb.mxu2 %v10515_v11  ;;  %v10484_v11 = vld [vmem:[#allocation15 + $0x2cc] sm:$0xf0]  ;;  %8417 = vmatpush.bf16.msrb.mxu3 %v10767_v32 }
 0x6f2   :  { %v10487_v21 = vor.u32 %v12302_v0, %v10484_v11  ;;  %8359 = vmatpush.bf16.msra.mxu1 %v10319_v53  ;;  %v12295_v0 = vld [vmem:[#allocation15 + $0x27c] sm:$0xf]  ;;  %v10456_v11 = vld [vmem:[#allocation15 + $0x294] sm:$0xf0]  ;;  %v7967_v53 = vadd.f32 %v15490_v36, %v7938_v46 }
 0x6f3   :  { %v10459_v3 = vor.u32 %v12295_v0, %v10456_v11 }
 0x6f4   :  { %v15538_v10 = vpop.f32.mrf.mxu0 }
 0x6f5   :  { %v15540_v44 = vpop.f32.mrf.mxu2  ;;  %v8019_v19 = vpop.f32.mrf.mxu1  ;;  %8390 = vmatpush.bf16.msrb.mxu2 %v10487_v21 }
 0x6f6   :  { %v8020_v9 = vadd.f32 %v8019_v19, %v7991_v27 }
 0x6f7   :  { %v15545_v49 = vpop.f32.mrf.mxu3 }
 0x6f8   :  { %8250 = vmatmul.bf16.vlgmr.msrb.gmra.mxu1 %v16400_v8  ;;  %v7964_v8 = vadd.f32 %v15478_v26, %v7935_v16  ;;  %v12365_v16 = vld [vmem:[#allocation15 + $0x4ac] sm:$0xf] }
 0x6f9   :  { %8391 = vmatpush.bf16.msrb.mxu2 %v10459_v3 }
 0x6fa   :  { %8279 = vmatmul.bf16.vlgmr.msra.gmra.mxu2 %v14849_v20  ;;  %v7993_v7 = vadd.f32 %v15472_v61, %v7964_v8  ;;  %v11016_v61 = vld [vmem:[#allocation15 + $0x6f4] sm:$0xf0] }
 0x6fb   :  { %v11019_v8 = vor.u32 %v12435_v47, %v11016_v61  ;;  %v12421_v47 = vld [vmem:[#allocation15 + $0x66c] sm:$0xf]  ;;  %v10960_v61 = vld [vmem:[#allocation15 + $0x684] sm:$0xf0] }
 0x6fc   :  { %v8106_v18 = vpop.f32.mrf.mxu0  ;;  %8308 = vmatmul.bf16.vlgmr.msra.gmra.mxu3 %v16401_v4 }
 0x6fd   :  { %v8048_v58 = vpop.f32.mrf.mxu2  ;;  %v8021_v38 = vpop.f32.mrf.mxu1  ;;  %8445 = vmatpush.bf16.msra.mxu0 %v11019_v8  ;;  %v7914_v8 = vadd.f32 %v15496_v24, %v15523_v17 }
 0x6fe   :  { %v8049_v34 = vadd.f32 %v8048_v58, %v8020_v9  ;;  %v8022_v26 = vadd.f32 %v8021_v38, %v7993_v7  ;;  %v10736_v9 = vld [vmem:[#allocation15 + $0x4c4] sm:$0xf0] }
 0x6ff   :  { %8337 = vmatmul.bf16.vlgmr.msrb.gmra.mxu0 %v14857_v55  ;;  %v8077_v19 = vpop.f32.mrf.mxu3  ;;  %v10739_v32 = vor.u32 %v12365_v16, %v10736_v9  ;;  %v10988_v16 = vld [vmem:[#allocation15 + $0x6bc] sm:$0xf0] }
 0x700   :  { %v8078_v27 = vadd.f32 %v8077_v19, %v8049_v34  ;;  %v10291_v19 = vor.u32 %v12253_v12, %v10288_v6 }
 0x701   :  { %8418 = vmatpush.bf16.msrb.mxu3 %v10739_v32  ;;  %v10708_v32 = vld [vmem:[#allocation15 + $0x48c] sm:$0xf0] }
 0x702   :  { %v8107_v4 = vadd.f32 %v8106_v18, %v8078_v27  ;;  %v7911_v18 = vadd.f32 %v15487_v2, %v15523_v17  ;;  %8360 = vmatpush.bf16.msra.mxu1 %v10291_v19  ;;  %v7996_v27 = vadd.f32 %v15482_v63, %v7967_v53  ;;  %v12246_v63 = vld [vmem:[#allocation15 + $0xf4] sm:$0xf]  ;;  %v10260_v53 = vld [vmem:[#allocation15 + $0x10c] sm:$0xf0]  ;;  %v10428_v19 = vld [vmem:[#allocation15 + $0x25c] sm:$0xf0] }
 0x704   :  { %12771 = vtanh.f32 %v8107_v4  ;;  %v8108_v57 = vpop.f32.mrf.mxu0  ;;  %v7940_v36 = vadd.f32 %v15494_v15, %v7911_v18  ;;  %v12358_v15 = vld [vmem:[#allocation15 + $0x474] sm:$0xf] }
 0x705   :  { %v8050_v58 = vpop.f32.mrf.mxu2  ;;  %v8024_v21 = vpop.f32.mrf.mxu1  ;;  %v10711_v11 = vor.u32 %v12358_v15, %v10708_v32  ;;  %v10680_v15 = vld [vmem:[#allocation15 + $0x454] sm:$0xf0]  ;;  %v12239_v32 = vld [vmem:[#allocation15 + $0xbc] sm:$0xf] }
 0x706   :  { %v8051_v34 = vadd.f32 %v8050_v58, %v8022_v26  ;;  %v8025_v2 = vadd.f32 %v8024_v21, %v7996_v27  ;;  %v12428_v26 = vld [vmem:[#allocation15 + $0x6a4] sm:$0xf]  ;;  %v7969_v6 = vadd.f32 %v15498_v30, %v7940_v36  ;;  %v10263_v21 = vor.u32 %v12246_v63, %v10260_v53 }
 0x707   :  { %v8079_v4 = vpop.f32.mrf.mxu3  ;;  %v10991_v58 = vor.u32 %v12428_v26, %v10988_v16  ;;  %8419 = vmatpush.bf16.msrb.mxu3 %v10711_v11  ;;  %v10400_v11 = vld [vmem:[#allocation15 + $0x224] sm:$0xf0] }
 0x708   :  { %v8080_v38 = vadd.f32 %v8079_v4, %v8051_v34  ;;  %8255 = vmatmul.bf16.gmra.mxu1 %v14879_v35  ;;  %v12288_v34 = vld [vmem:[#allocation15 + $0x244] sm:$0xf]  ;;  %v10963_v4 = vor.u32 %v12421_v47, %v10960_v61  ;;  %v7998_v36 = vadd.f32 %v15492_v45, %v7969_v6  ;;  %v10232_v6 = vld [vmem:[#allocation15 + $0xd4] sm:$0xf0] }
 0x709   :  { %8446 = vmatpush.bf16.msra.mxu0 %v10991_v58  ;;  %v10431_v3 = vor.u32 %v12288_v34, %v10428_v19  ;;  %8361 = vmatpush.bf16.msra.mxu1 %v10263_v21  ;;  %v12351_v58 = vld [vmem:[#allocation15 + $0x43c] sm:$0xf]  ;;  %v10235_v53 = vor.u32 %v12239_v32, %v10232_v6  ;;  %v10904_v19 = vld [vmem:[#allocation15 + $0x614] sm:$0xf0]  ;;  %v7916_v21 = vadd.f32 %v15507_v5, %v15523_v17 }
 0x70a   :  { %8284 = vmatmul.bf16.gmra.mxu2 %v14881_v62  ;;  %v12772_v46 = vpop.eup %12771  ;;  %v8109_v7 = vadd.f32 %v8108_v57, %v8080_v38  ;;  %v7943_v38 = vadd.f32 %v15505_v54, %v7914_v8  ;;  %v12407_v34 = vld [vmem:[#allocation15 + $0x5fc] sm:$0xf]  ;;  %v7919_v6 = vadd.f32 %v15516_v23, %v15523_v17 }
 0x70b   :  { %8881 = vst [vmem:[%s16041_s11 + $0x18] sm:$0xff] %v12772_v46  ;;  %8392 = vmatpush.bf16.msrb.mxu2 %v10431_v3  ;;  %v10907_v47 = vor.u32 %v12407_v34, %v10904_v19 }
 0x70c   :  { %12773 = vtanh.f32 %v8109_v7  ;;  %v8111_v9 = vpop.f32.mrf.mxu0  ;;  %8313 = vmatmul.bf16.gmra.mxu3 %v14883_v22  ;;  %v12414_v7 = vld [vmem:[#allocation15 + $0x634] sm:$0xf]  ;;  %v7972_v54 = vadd.f32 %v15510_v29, %v7943_v38  ;;  %v7945_v29 = vadd.f32 %v15514_v50, %v7916_v21  ;;  %v10204_v38 = vld [vmem:[#allocation15 + $0x9c] sm:$0xf0] }
 0x70d   :  { %v8053_v12 = vpop.f32.mrf.mxu2  ;;  %v8026_v57 = vpop.f32.mrf.mxu1  ;;  %8447 = vmatpush.bf16.msra.mxu0 %v10963_v4  ;;  %8362 = vmatpush.bf16.msra.mxu1 %v10235_v53  ;;  %v12393_v53 = vld [vmem:[#allocation15 + $0x58c] sm:$0xf] }
 0x70e   :  { %v8054_v0 = vadd.f32 %v8053_v12, %v8025_v2  ;;  %v8027_v24 = vadd.f32 %v8026_v57, %v7998_v36  ;;  %v10932_v2 = vld [vmem:[#allocation15 + $0x64c] sm:$0xf0]  ;;  %v8001_v8 = vadd.f32 %v15502_v48, %v7972_v54  ;;  %v12344_v48 = vld [vmem:[#allocation15 + $0x404] sm:$0xf] }
 0x70f   :  { %8342 = vmatmul.bf16.gmra.mxu0 %v14906_v25  ;;  %v8082_v18 = vpop.f32.mrf.mxu3  ;;  %v10935_v12 = vor.u32 %v12414_v7, %v10932_v2  ;;  %v7974_v7 = vadd.f32 %v15518_v42, %v7945_v29 }
 0x710   :  { %v8083_v30 = vadd.f32 %v8082_v18, %v8054_v0  ;;  %v12281_v0 = vld [vmem:[#allocation15 + $0x20c] sm:$0xf] }
 0x711   :  { %8448 = vmatpush.bf16.msra.mxu0 %v10935_v12  ;;  %v10403_v57 = vor.u32 %v12281_v0, %v10400_v11  ;;  %v10876_v12 = vld [vmem:[#allocation15 + $0x5dc] sm:$0xf0]  ;;  %v10624_v11 = vld [vmem:[#allocation15 + $0x3e4] sm:$0xf0] }
 0x712   :  { %v12774_v27 = vpop.eup %12773  ;;  %v8112_v46 = vadd.f32 %v8111_v9, %v8083_v30  ;;  %v10683_v9 = vor.u32 %v12351_v58, %v10680_v15  ;;  %v12232_v30 = vld [vmem:[#allocation15 + $0x84] sm:$0xf]  ;;  %v12274_v58 = vld [vmem:[#allocation15 + $0x1d4] sm:$0xf]  ;;  %v10372_v15 = vld [vmem:[#allocation15 + $0x1ec] sm:$0xf0] }
 0x713   :  { %8888 = vst [vmem:[%s16041_s11 + $0x50] sm:$0xff] %v12774_v27  ;;  %8393 = vmatpush.bf16.msrb.mxu2 %v10403_v57  ;;  %v10207_v27 = vor.u32 %v12232_v30, %v10204_v38  ;;  %v10375_v54 = vor.u32 %v12274_v58, %v10372_v15  ;;  %v10848_v57 = vld [vmem:[#allocation15 + $0x5a4] sm:$0xf0]  ;;  %v12330_v38 = vld [vmem:[#allocation15 + $0x394] sm:$0xf] }
 0x714   :  { %12775 = vtanh.f32 %v8112_v46  ;;  %v8113_v26 = vpop.f32.mrf.mxu0  ;;  %8420 = vmatpush.bf16.msrb.mxu3 %v10683_v9  ;;  %v10652_v46 = vld [vmem:[#allocation15 + $0x41c] sm:$0xf0]  ;;  %v12337_v9 = vld [vmem:[#allocation15 + $0x3cc] sm:$0xf]  ;;  %v10851_v21 = vor.u32 %v12393_v53, %v10848_v57  ;;  %v12540_v58 = vld [vmem:[#allocation15 + $0xa24] sm:$0xf] }
 0x715   :  { %v8055_v16 = vpop.f32.mrf.mxu2  ;;  %v8029_v63 = vpop.f32.mrf.mxu1  ;;  %8449 = vmatpush.bf16.msra.mxu0 %v10907_v47  ;;  %8363 = vmatpush.bf16.msra.mxu1 %v10207_v27  ;;  %v10627_v19 = vor.u32 %v12337_v9, %v10624_v11  ;;  %v8003_v47 = vadd.f32 %v15512_v14, %v7974_v7  ;;  %v11464_v7 = vld [vmem:[#allocation15 + $0xa74] sm:$0xf0]  ;;  %v11436_v15 = vld [vmem:[#allocation15 + $0xa3c] sm:$0xf0] }
 0x716   :  { %v8056_v45 = vadd.f32 %v8055_v16, %v8027_v24  ;;  %v8030_v5 = vadd.f32 %v8029_v63, %v8001_v8  ;;  %v12400_v24 = vld [vmem:[#allocation15 + $0x5c4] sm:$0xf]  ;;  %v10655_v16 = vor.u32 %v12344_v48, %v10652_v46  ;;  %v10176_v63 = vld [vmem:[#allocation15 + $0x64] sm:$0xf0]  ;;  %v12218_v8 = vld [vmem:[#allocation15 + $0x14] sm:$0xf]  ;;  %v11439_v9 = vor.u32 %v12540_v58, %v11436_v15 }
 0x717   :  { %v8084_v3 = vpop.f32.mrf.mxu3  ;;  %v10879_v32 = vor.u32 %v12400_v24, %v10876_v12  ;;  %8394 = vmatpush.bf16.msrb.mxu2 %v10375_v54  ;;  %v10820_v46 = vld [vmem:[#allocation15 + $0x56c] sm:$0xf0]  ;;  %v12547_v24 = vld [vmem:[#allocation15 + $0xa5c] sm:$0xf]  ;;  %v12589_v15 = vld [vmem:[#allocation15 + $0xbac] sm:$0xf] }
 0x718   :  { %v8085_v61 = vadd.f32 %v8084_v3, %v8056_v45  ;;  %8260 = vmatmul.bf16.gmra.mxu1 %v14922_v33  ;;  %v12225_v45 = vld [vmem:[#allocation15 + $0x4c] sm:$0xf]  ;;  %8421 = vmatpush.bf16.msrb.mxu3 %v10655_v16  ;;  %v7948_v3 = vadd.f32 %v15528_v52, %v7919_v6  ;;  %v10596_v52 = vld [vmem:[#allocation15 + $0x3ac] sm:$0xf0]  ;;  %v7921_v16 = vadd.f32 %v15530_v41, %v15523_v17 }
 0x719   :  { %v10179_v42 = vor.u32 %v12225_v45, %v10176_v63  ;;  %8450 = vmatpush.bf16.msra.mxu0 %v10879_v32  ;;  %v10599_v48 = vor.u32 %v12330_v38, %v10596_v52  ;;  %v11660_v38 = vld [vmem:[#allocation15 + $0xbfc] sm:$0xf0]  ;;  %v12484_v52 = vld [vmem:[#allocation15 + $0x864] sm:$0xf] }
 0x71a   :  { %8289 = vmatmul.bf16.gmra.mxu2 %v14924_v60  ;;  %v12776_v18 = vpop.eup %12775  ;;  %v8114_v4 = vadd.f32 %v8113_v26, %v8085_v61  ;;  %v7977_v14 = vadd.f32 %v15535_v51, %v7948_v3  ;;  %v7950_v51 = vadd.f32 %v15540_v44, %v7921_v16  ;;  %v11688_v44 = vld [vmem:[#allocation15 + $0xc34] sm:$0xf0] }
 0x71b   :  { %8895 = vst [vmem:[%s16041_s11 + $0x88] sm:$0xff] %v12776_v18  ;;  %8364 = vmatpush.bf16.msra.mxu1 %v10179_v42  ;;  %v10148_v18 = vld [vmem:[#allocation15 + $0x2c] sm:$0xf0] }
 0x71c   :  { %12777 = vtanh.f32 %v8114_v4  ;;  %v8116_v36 = vpop.f32.mrf.mxu0  ;;  %8318 = vmatmul.bf16.gmra.mxu3 %v14926_v59  ;;  %v10151_v30 = vor.u32 %v12218_v8, %v10148_v18  ;;  %v8006_v54 = vadd.f32 %v15525_v1, %v7977_v14  ;;  %v7979_v1 = vadd.f32 %v15545_v49, %v7950_v51 }
 0x71d   :  { %v8058_v50 = vpop.f32.mrf.mxu2  ;;  %v8031_v26 = vpop.f32.mrf.mxu1  ;;  %8422 = vmatpush.bf16.msrb.mxu3 %v10627_v19  ;;  %8451 = vmatpush.bf16.msra.mxu0 %v10851_v21  ;;  %v11240_v19 = vld [vmem:[#allocation15 + $0x8b4] sm:$0xf0]  ;;  %v12533_v21 = vld [vmem:[#allocation15 + $0x9ec] sm:$0xf] }
 0x71e   :  { %v8059_v2 = vadd.f32 %v8058_v50, %v8030_v5  ;;  %v8032_v23 = vadd.f32 %v8031_v26, %v8003_v47  ;;  %v12386_v50 = vld [vmem:[#allocation15 + $0x554] sm:$0xf]  ;;  %v11467_v26 = vor.u32 %v12547_v24, %v11464_v7 }
 0x71f   :  { %8347 = vmatmul.bf16.gmra.mxu0 %v14943_v43  ;;  %v8087_v0 = vpop.f32.mrf.mxu3  ;;  %8365 = vmatpush.bf16.msra.mxu1 %v10151_v30  ;;  %v12596_v30 = vld [vmem:[#allocation15 + $0xbe4] sm:$0xf] }
 0x720   :  { %v8088_v34 = vadd.f32 %v8087_v0, %v8059_v2  ;;  %v10823_v2 = vor.u32 %v12386_v50, %v10820_v46  ;;  %8503 = vmatpush.bf16.msra.mxu2 %v11467_v26  ;;  %v12603_v0 = vld [vmem:[#allocation15 + $0xc1c] sm:$0xf] }
 0x721   :  { %8423 = vmatpush.bf16.msrb.mxu3 %v10599_v48  ;;  %v11691_v53 = vor.u32 %v12603_v0, %v11688_v44  ;;  %v11380_v48 = vld [vmem:[#allocation15 + $0x9cc] sm:$0xf0]  ;;  %v11352_v0 = vld [vmem:[#allocation15 + $0x994] sm:$0xf0]  ;;  %v12659_v44 = vld [vmem:[#allocation15 + $0xddc] sm:$0xf] }
 0x722   :  { %v12778_v61 = vpop.eup %12777  ;;  %v8117_v29 = vadd.f32 %v8116_v36, %v8088_v34  ;;  %8452 = vmatpush.bf16.msra.mxu0 %v10823_v2  ;;  %v12491_v34 = vld [vmem:[#allocation15 + $0x89c] sm:$0xf] }
 0x723   :  { %8902 = vst [vmem:[%s16041_s11 + $0xc0] sm:$0xff] %v12778_v61  ;;  %v11243_v47 = vor.u32 %v12491_v34, %v11240_v19  ;;  %v11408_v61 = vld [vmem:[#allocation15 + $0xa04] sm:$0xf0]  ;;  %v12652_v19 = vld [vmem:[#allocation15 + $0xda4] sm:$0xf] }
 0x724   :  { %12779 = vtanh.f32 %v8117_v29  ;;  %v8118_v4 = vpop.f32.mrf.mxu0  ;;  %8504 = vmatpush.bf16.msra.mxu2 %v11439_v9  ;;  %v8008_v29 = vadd.f32 %v15538_v10, %v7979_v1  ;;  %v11663_v10 = vor.u32 %v12596_v30, %v11660_v38  ;;  %v12477_v9 = vld [vmem:[#allocation15 + $0x82c] sm:$0xf]  ;;  %v11912_v1 = vld [vmem:[#allocation15 + $0xdf4] sm:$0xf0] }
 0x725   :  { %v8060_v5 = vpop.f32.mrf.mxu2  ;;  %v8034_v27 = vpop.f32.mrf.mxu1  ;;  %8532 = vmatpush.bf16.msra.mxu3 %v11691_v53  ;;  %8474 = vmatpush.bf16.msrb.mxu1 %v11243_v47  ;;  %v12645_v30 = vld [vmem:[#allocation15 + $0xd6c] sm:$0xf] }
 0x726   :  { %v8061_v36 = vadd.f32 %v8060_v5, %v8032_v23  ;;  %v8035_v17 = vadd.f32 %v8034_v27, %v8006_v54  ;;  %v11411_v23 = vor.u32 %v12533_v21, %v11408_v61  ;;  %v12526_v27 = vld [vmem:[#allocation15 + $0x9b4] sm:$0xf]  ;;  %v11884_v21 = vld [vmem:[#allocation15 + $0xdbc] sm:$0xf0] }
 0x727   :  { %v8089_v12 = vpop.f32.mrf.mxu3  ;;  %v11383_v24 = vor.u32 %v12526_v27, %v11380_v48  ;;  %v11887_v61 = vor.u32 %v12652_v19, %v11884_v21  ;;  %v16404_v27 = vld [vmem:[#allocation28_spill] sm:$0xff] }
 0x728   :  { %v8090_v32 = vadd.f32 %v8089_v12, %v8061_v36  ;;  %8265 = vmatmul.bf16.gmra.mxu1 %v14955_v40  ;;  %8505 = vmatpush.bf16.msra.mxu2 %v11411_v23  ;;  %v11212_v36 = vld [vmem:[#allocation15 + $0x87c] sm:$0xf0]  ;;  %v12470_v23 = vld [vmem:[#allocation15 + $0x7f4] sm:$0xf] }
 0x729   :  { %v11215_v46 = vor.u32 %v12484_v52, %v11212_v36  ;;  %8533 = vmatpush.bf16.msra.mxu3 %v11663_v10  ;;  %v16403_v10 = vld [vmem:[#allocation24_spill] sm:$0xff] }
 0x72a   :  { %8294 = vmatmul.bf16.gmra.mxu2 %v14957_v31  ;;  %v12780_v45 = vpop.eup %12779  ;;  %v8119_v63 = vadd.f32 %v8118_v4, %v8090_v32  ;;  %v11632_v32 = vld [vmem:[#allocation15 + $0xbc4] sm:$0xf0] }
 0x72b   :  { %8909 = vst [vmem:[%s16041_s11 + $0xf8] sm:$0xff] %v12780_v45  ;;  %8475 = vmatpush.bf16.msrb.mxu1 %v11215_v46  ;;  %v11635_v54 = vor.u32 %v12589_v15, %v11632_v32  ;;  %v16402_v45 = vld [vmem:[#allocation49_spill] sm:$0xff]  ;;  %v16405_v46 = vld [vmem:[#allocation30_spill] sm:$0xff] }
 0x72c   :  { %12781 = vtanh.f32 %v8119_v63  ;;  %v8121_v41 = vpop.f32.mrf.mxu0  ;;  %8323 = vmatmul.bf16.gmra.mxu3 %v14961_v39  ;;  %8506 = vmatpush.bf16.msra.mxu2 %v11383_v24  ;;  %v11576_v32 = vld [vmem:[#allocation15 + $0xb54] sm:$0xf0] }
 0x72d   :  { %v8063_v6 = vpop.f32.mrf.mxu2  ;;  %v8036_v11 = vpop.f32.mrf.mxu1  ;;  %8534 = vmatpush.bf16.msra.mxu3 %v11635_v54 }
 0x72e   :  { %v8064_v42 = vadd.f32 %v8063_v6, %v8035_v17  ;;  %v8037_v49 = vadd.f32 %v8036_v11, %v8008_v29  ;;  %v11184_v17 = vld [vmem:[#allocation15 + $0x844] sm:$0xf0]  ;;  %v11915_v11 = vor.u32 %v12659_v44, %v11912_v1  ;;  %v11604_v29 = vld [vmem:[#allocation15 + $0xb8c] sm:$0xf0] }
 0x72f   :  { %8352 = vmatmul.bf16.gmra.mxu0 %v14655_v56  ;;  %v8092_v57 = vpop.f32.mrf.mxu3  ;;  %v11187_v6 = vor.u32 %v12477_v9, %v11184_v17  ;;  %v16406_v9 = vld [vmem:[#allocation33_spill] sm:$0xff]  ;;  %v11296_v1 = vld [vmem:[#allocation15 + $0x924] sm:$0xf0] }
 0x730   :  { %v8093_v3 = vadd.f32 %v8092_v57, %v8064_v42  ;;  %8561 = vmatpush.bf16.msrb.mxu0 %v11915_v11  ;;  %v11800_v11 = vld [vmem:[#allocation15 + $0xd14] sm:$0xf0] }
 0x731   :  { %8476 = vmatpush.bf16.msrb.mxu1 %v11187_v6  ;;  %v11128_v6 = vld [vmem:[#allocation15 + $0x7d4] sm:$0xf0] }
 0x732   :  { %v12782_v8 = vpop.eup %12781  ;;  %v8122_v18 = vadd.f32 %v8121_v41, %v8093_v3  ;;  %v12519_v41 = vld [vmem:[#allocation15 + $0x97c] sm:$0xf]  ;;  %v12582_v3 = vld [vmem:[#allocation15 + $0xb74] sm:$0xf] }
 0x733   :  { %8916 = vst [vmem:[%s16041_s11 + $0x130] sm:$0xff] %v12782_v8  ;;  %v11355_v42 = vor.u32 %v12519_v41, %v11352_v0  ;;  %v11156_v8 = vld [vmem:[#allocation15 + $0x80c] sm:$0xf0]  ;;  %v12463_v41 = vld [vmem:[#allocation15 + $0x7bc] sm:$0xf] }
 0x734   :  { %12783 = vtanh.f32 %v8122_v18  ;;  %v8123_v4 = vpop.f32.mrf.mxu0  ;;  %v11607_v18 = vor.u32 %v12582_v3, %v11604_v29  ;;  %8562 = vmatpush.bf16.msrb.mxu0 %v11887_v61  ;;  %v12505_v0 = vld [vmem:[#allocation15 + $0x90c] sm:$0xf]  ;;  %v11131_v44 = vor.u32 %v12463_v41, %v11128_v6  ;;  %v12456_v61 = vld [vmem:[#allocation15 + $0x784] sm:$0xf]  ;;  %v11100_v29 = vld [vmem:[#allocation15 + $0x79c] sm:$0xf0] }
 0x735   :  { %v8065_v5 = vpop.f32.mrf.mxu2  ;;  %v15615_v14 = vpop.f32.mrf.mxu1  ;;  %8507 = vmatpush.bf16.msra.mxu2 %v11355_v42  ;;  %v12631_v42 = vld [vmem:[#allocation15 + $0xcfc] sm:$0xf]  ;;  %v16407_v41 = vld [vmem:[#allocation40_spill] sm:$0xff] }
 0x736   :  { %v8066_v50 = vadd.f32 %v8065_v5, %v8037_v49  ;;  %v11159_v49 = vor.u32 %v12470_v23, %v11156_v8  ;;  %v11324_v5 = vld [vmem:[#allocation15 + $0x95c] sm:$0xf0]  ;;  %8535 = vmatpush.bf16.msra.mxu3 %v11607_v18  ;;  %v11803_v19 = vor.u32 %v12631_v42, %v11800_v11  ;;  %v12568_v23 = vld [vmem:[#allocation15 + $0xb04] sm:$0xf]  ;;  %v11103_v18 = vor.u32 %v12456_v61, %v11100_v29  ;;  %v12442_v29 = vld [vmem:[#allocation15 + $0x714] sm:$0xf] }
 0x737   :  { %v8094_v7 = vpop.f32.mrf.mxu3 }
 0x738   :  { %v8095_v2 = vadd.f32 %v8094_v7, %v8066_v50  ;;  %8366 = vmatmul.bf16.vlgmr.msra.gmra.mxu1 %v14657_v28  ;;  %v11856_v50 = vld [vmem:[#allocation15 + $0xd84] sm:$0xf0]  ;;  %v12638_v7 = vld [vmem:[#allocation15 + $0xd34] sm:$0xf] }
 0x739   :  { %v11859_v36 = vor.u32 %v12645_v30, %v11856_v50  ;;  %8477 = vmatpush.bf16.msrb.mxu1 %v11159_v49  ;;  %v11548_v49 = vld [vmem:[#allocation15 + $0xb1c] sm:$0xf0]  ;;  %v12498_v50 = vld [vmem:[#allocation15 + $0x8d4] sm:$0xf] }
 0x73a   :  { %8395 = vmatmul.bf16.vlgmr.msrb.gmra.mxu2 %v14667_v13  ;;  %v12784_v26 = vpop.eup %12783  ;;  %v8124_v16 = vadd.f32 %v8123_v4, %v8095_v2  ;;  %v12512_v4 = vld [vmem:[#allocation15 + $0x944] sm:$0xf]  ;;  %v11828_v2 = vld [vmem:[#allocation15 + $0xd4c] sm:$0xf0]  ;;  %v11551_v30 = vor.u32 %v12568_v23, %v11548_v49 }
 0x73b   :  { %8923 = vst [vmem:[%s16041_s11 + $0x168] sm:$0xff] %v12784_v26  ;;  %v11327_v52 = vor.u32 %v12512_v4, %v11324_v5  ;;  %8563 = vmatpush.bf16.msrb.mxu0 %v11859_v36  ;;  %v12575_v26 = vld [vmem:[#allocation15 + $0xb3c] sm:$0xf]  ;;  %v11831_v15 = vor.u32 %v12638_v7, %v11828_v2  ;;  %v12624_v4 = vld [vmem:[#allocation15 + $0xcc4] sm:$0xf] }
 0x73c   :  { %12785 = vtanh.f32 %v8124_v16  ;;  %v15622_v12 = vpop.f32.mrf.mxu0  ;;  %8424 = vmatmul.bf16.vlgmr.msrb.gmra.mxu3 %v14673_v37  ;;  %v11579_v54 = vor.u32 %v12575_v26, %v11576_v32  ;;  %v11772_v5 = vld [vmem:[#allocation15 + $0xcdc] sm:$0xf0]  ;;  %v11268_v36 = vld [vmem:[#allocation15 + $0x8ec] sm:$0xf0]  ;;  %v12449_v7 = vld [vmem:[#allocation15 + $0x74c] sm:$0xf] }
 0x73d   :  { %v15625_v58 = vpop.f32.mrf.mxu2  ;;  %v15627_v51 = vpop.f32.mrf.mxu1  ;;  %8508 = vmatpush.bf16.msra.mxu2 %v11327_v52  ;;  %8478 = vmatpush.bf16.msrb.mxu1 %v11131_v44  ;;  %v11775_v52 = vor.u32 %v12624_v4, %v11772_v5  ;;  %v11271_v26 = vor.u32 %v12498_v50, %v11268_v36  ;;  %v12561_v32 = vld [vmem:[#allocation15 + $0xacc] sm:$0xf]  ;;  %v11744_v44 = vld [vmem:[#allocation15 + $0xca4] sm:$0xf0]  ;;  %v11044_v23 = vld [vmem:[#allocation15 + $0x72c] sm:$0xf0] }
 0x73e   :  { %8536 = vmatpush.bf16.msra.mxu3 %v11579_v54  ;;  %v11520_v54 = vld [vmem:[#allocation15 + $0xae4] sm:$0xf0]  ;;  %v11047_v4 = vor.u32 %v12442_v29, %v11044_v23  ;;  %v11492_v5 = vld [vmem:[#allocation15 + $0xaac] sm:$0xf0]  ;;  %v16412_v29 = vld [vmem:[#allocation35_spill] sm:$0xff] }
 0x73f   :  { %8453 = vmatmul.bf16.vlgmr.msra.gmra.mxu0 %v16402_v45  ;;  %v15630_v63 = vpop.f32.mrf.mxu3  ;;  %v11523_v42 = vor.u32 %v12561_v32, %v11520_v54  ;;  %v12327_v32 = vld [vmem:[#allocation15 + $0x378] sm:$0xf0]  ;;  %v15685_v23 = vld [vmem:[#allocation16] sm:$0xff] }
 0x740   :  { %8564 = vmatpush.bf16.msrb.mxu0 %v11831_v15  ;;  %v11072_v15 = vld [vmem:[#allocation15 + $0x764] sm:$0xf0]  ;;  %16413 = vst [vmem:[#allocation44_spill] sm:$0xff] %v15685_v23 }
 0x741   :  { %8479 = vmatpush.bf16.msrb.mxu1 %v11103_v18  ;;  %v11075_v6 = vor.u32 %v12449_v7, %v11072_v15  ;;  %v12554_v18 = vld [vmem:[#allocation15 + $0xa94] sm:$0xf]  ;;  %v10574_v15 = vld [vmem:[#allocation15 + $0x360] sm:$0xf] }
 0x742   :  { %v12786_v53 = vpop.eup %12785  ;;  %8537 = vmatpush.bf16.msra.mxu3 %v11551_v30  ;;  %v12610_v30 = vld [vmem:[#allocation15 + $0xc54] sm:$0xf]  ;;  %v11495_v50 = vor.u32 %v12554_v18, %v11492_v5  ;;  %v10575_v54 = vor.u32 %v12327_v32, %v10574_v15  ;;  %v15688_v18 = vperm.slane %v15685_v23, 4  ;;  %v12320_v5 = vld [vmem:[#allocation15 + $0x340] sm:$0xf0] }
 0x743   :  { %8930 = vst [vmem:[%s16041_s11 + $0x1a0] sm:$0xff] %v12786_v53  ;;  %v11299_v53 = vor.u32 %v12505_v0, %v11296_v1  ;;  %v12617_v0 = vld [vmem:[#allocation15 + $0xc8c] sm:$0xf]  ;;  %v16408_v1 = vld [vmem:[#allocation41_spill] sm:$0xff] }
 0x744   :  { %v15635_v57 = vpop.f32.mrf.mxu0  ;;  %8565 = vmatpush.bf16.msrb.mxu0 %v11803_v19  ;;  %v11747_v11 = vor.u32 %v12617_v0, %v11744_v44  ;;  %v16409_v19 = vld [vmem:[#allocation32_spill] sm:$0xff]  ;;  %v16410_v7 = vld [vmem:[#allocation25_spill] sm:$0xff]  ;;  %v8136_v32 = vadd.f32 %v15615_v14, %v15688_v18 }
 0x745   :  { %v15637_v34 = vpop.f32.mrf.mxu2  ;;  %v15639_v47 = vpop.f32.mrf.mxu1  ;;  %8509 = vmatpush.bf16.msra.mxu2 %v11299_v53  ;;  %8480 = vmatpush.bf16.msrb.mxu1 %v11075_v6 }
 0x746   :  { %8538 = vmatpush.bf16.msra.mxu3 %v11523_v42  ;;  %v8165_v23 = vadd.f32 %v15625_v58, %v8136_v32  ;;  %v8138_v58 = vadd.f32 %v15627_v51, %v15688_v18 }
 0x747   :  { %v15641_v38 = vpop.f32.mrf.mxu3 }
 0x748   :  { %8371 = vmatmul.bf16.gmra.mxu1 %v16403_v10  ;;  %8566 = vmatpush.bf16.msrb.mxu0 %v11775_v52  ;;  %v11716_v52 = vld [vmem:[#allocation15 + $0xc6c] sm:$0xf0]  ;;  %v12264_v10 = vld [vmem:[#allocation15 + $0x180] sm:$0xf0] }
 0x749   :  { %8510 = vmatpush.bf16.msra.mxu2 %v11271_v26  ;;  %v11719_v36 = vor.u32 %v12610_v30, %v11716_v52  ;;  %8481 = vmatpush.bf16.msrb.mxu1 %v11047_v4  ;;  %v10546_v4 = vld [vmem:[#allocation15 + $0x328] sm:$0xf]  ;;  %v16414_v52 = vld [vmem:[#allocation42_spill] sm:$0xff] }
 0x74a   :  { %8400 = vmatmul.bf16.gmra.mxu2 %v16404_v27  ;;  %8539 = vmatpush.bf16.msra.mxu3 %v11495_v50  ;;  %v16416_v27 = vld [vmem:[#allocation29_spill] sm:$0xff] }
 0x74c   :  { %v15645_v48 = vpop.f32.mrf.mxu0  ;;  %8429 = vmatmul.bf16.gmra.mxu3 %v16405_v46  ;;  %8567 = vmatpush.bf16.msrb.mxu0 %v11747_v11  ;;  %v16411_v11 = vld [vmem:[#allocation34_spill] sm:$0xff] }
 0x74d   :  { %v15648_v24 = vpop.f32.mrf.mxu2  ;;  %v15650_v16 = vpop.f32.mrf.mxu1  ;;  %8619 = vmatpush.bf16.msrb.mxu2 %v10575_v54  ;;  %v16415_v54 = vld [vmem:[#allocation43_spill] sm:$0xff] }
 0x74f   :  { %8458 = vmatmul.bf16.gmra.mxu0 %v16406_v9  ;;  %v15653_v17 = vpop.f32.mrf.mxu3  ;;  %v8194_v9 = vadd.f32 %v15630_v63, %v8165_v23  ;;  %v10770_v23 = vld [vmem:[#allocation15 + $0x4e8] sm:$0xf] }
 0x750   :  { %8568 = vmatpush.bf16.msrb.mxu0 %v11719_v36  ;;  %v10547_v36 = vor.u32 %v12320_v5, %v10546_v4  ;;  %v12271_v5 = vld [vmem:[#allocation15 + $0x1b8] sm:$0xf0] }
 0x752   :  { %8620 = vmatpush.bf16.msrb.mxu2 %v10547_v36  ;;  %v12313_v36 = vld [vmem:[#allocation15 + $0x308] sm:$0xf0] }
 0x754   :  { %v15655_v21 = vpop.f32.mrf.mxu0 }
 0x755   :  { %v15657_v3 = vpop.f32.mrf.mxu2  ;;  %v15659_v8 = vpop.f32.mrf.mxu1 }
 0x757   :  { %v15661_v2 = vpop.f32.mrf.mxu3 }
 0x758   :  { %8376 = vmatmul.bf16.gmra.mxu1 %v16407_v41  ;;  %v10518_v41 = vld [vmem:[#allocation15 + $0x2f0] sm:$0xf] }
 0x75a   :  { %8405 = vmatmul.bf16.gmra.mxu2 %v16408_v1 }
 0x75c   :  { %v15665_v53 = vpop.f32.mrf.mxu0  ;;  %8434 = vmatmul.bf16.gmra.mxu3 %v16409_v19  ;;  %v10350_v19 = vld [vmem:[#allocation15 + $0x1a0] sm:$0xf] }
 0x75d   :  { %v15668_v61 = vpop.f32.mrf.mxu2  ;;  %v15670_v49 = vpop.f32.mrf.mxu1  ;;  %v10351_v46 = vor.u32 %v12271_v5, %v10350_v19  ;;  %v12376_v19 = vld [vmem:[#allocation15 + $0x500] sm:$0xf0] }
 0x75e   :  { %v16417_v5 = vld [vmem:[#allocation27_spill] sm:$0xff] }
 0x75f   :  { %8463 = vmatmul.bf16.gmra.mxu0 %v16410_v7  ;;  %v15673_v26 = vpop.f32.mrf.mxu3  ;;  %v12383_v7 = vld [vmem:[#allocation15 + $0x538] sm:$0xf0]  ;;  %8590 = vmatpush.bf16.msra.mxu1 %v10351_v46  ;;  %v10490_v46 = vld [vmem:[#allocation15 + $0x2b8] sm:$0xf] }
 0x764   :  { %v15675_v6 = vpop.f32.mrf.mxu0 }
 0x765   :  { %v15677_v0 = vpop.f32.mrf.mxu2  ;;  %v15679_v44 = vpop.f32.mrf.mxu1 }
 0x767   :  { %v15681_v42 = vpop.f32.mrf.mxu3 }
 0x768   :  { %8381 = vmatmul.bf16.gmra.mxu1 %v16411_v11  ;;  %v10798_v11 = vld [vmem:[#allocation15 + $0x520] sm:$0xf] }
 0x769   :  { %v10799_v4 = vor.u32 %v12383_v7, %v10798_v11  ;;  %v8167_v7 = vadd.f32 %v15637_v34, %v8138_v58  ;;  %v8223_v11 = vadd.f32 %v15622_v12, %v8194_v9  ;;  %v8141_v9 = vadd.f32 %v15639_v47, %v15688_v18  ;;  %v12257_v47 = vld [vmem:[#allocation15 + $0x148] sm:$0xf0] }
 0x76a   :  { %8410 = vmatmul.bf16.gmra.mxu2 %v16412_v29 }
 0x76b   :  { %8648 = vmatpush.bf16.msrb.mxu3 %v10799_v4 }
 0x76c   :  { %v15690_v30 = vpop.f32.mrf.mxu0  ;;  %8439 = vmatmul.bf16.gmra.mxu3 %v16414_v52 }
 0x76d   :  { %v15693_v50 = vpop.f32.mrf.mxu2  ;;  %v15695_v15 = vpop.f32.mrf.mxu1 }
 0x76f   :  { %8468 = vmatmul.bf16.gmra.mxu0 %v16415_v54  ;;  %v15700_v29 = vpop.f32.mrf.mxu3  ;;  %v10519_v54 = vor.u32 %v12313_v36, %v10518_v41  ;;  %v10322_v41 = vld [vmem:[#allocation15 + $0x168] sm:$0xf]  ;;  %v10771_v36 = vor.u32 %v12376_v19, %v10770_v23  ;;  %v8170_v23 = vadd.f32 %v15648_v24, %v8141_v9  ;;  %v11022_v9 = vld [vmem:[#allocation15 + $0x6e0] sm:$0xf] }
 0x770   :  { %v10323_v58 = vor.u32 %v12264_v10, %v10322_v41  ;;  %v10294_v10 = vld [vmem:[#allocation15 + $0x130] sm:$0xf] }
 0x771   :  { %8621 = vmatpush.bf16.msrb.mxu2 %v10519_v54  ;;  %v12306_v54 = vld [vmem:[#allocation15 + $0x2d0] sm:$0xf0]  ;;  %8649 = vmatpush.bf16.msrb.mxu3 %v10771_v36 }
 0x772   :  { %v10491_v12 = vor.u32 %v12306_v54, %v10490_v46  ;;  %8591 = vmatpush.bf16.msra.mxu1 %v10323_v58  ;;  %v10462_v46 = vld [vmem:[#allocation15 + $0x280] sm:$0xf]  ;;  %v12299_v54 = vld [vmem:[#allocation15 + $0x298] sm:$0xf0]  ;;  %v8199_v58 = vadd.f32 %v15653_v17, %v8170_v23 }
 0x773   :  { %v10463_v24 = vor.u32 %v12299_v54, %v10462_v46 }
 0x774   :  { %v15703_v1 = vpop.f32.mrf.mxu0 }
 0x775   :  { %v15705_v52 = vpop.f32.mrf.mxu2  ;;  %v8251_v14 = vpop.f32.mrf.mxu1  ;;  %8622 = vmatpush.bf16.msrb.mxu2 %v10491_v12 }
 0x776   :  { %v8252_v63 = vadd.f32 %v8251_v14, %v8223_v11 }
 0x777   :  { %v15710_v32 = vpop.f32.mrf.mxu3 }
 0x778   :  { %8482 = vmatmul.bf16.vlgmr.msrb.gmra.mxu1 %v16416_v27  ;;  %v8196_v27 = vadd.f32 %v15641_v38, %v8167_v7  ;;  %v10742_v7 = vld [vmem:[#allocation15 + $0x4b0] sm:$0xf] }
 0x779   :  { %8623 = vmatpush.bf16.msrb.mxu2 %v10463_v24 }
 0x77a   :  { %8511 = vmatmul.bf16.vlgmr.msra.gmra.mxu2 %v14849_v20  ;;  %v8225_v19 = vadd.f32 %v15635_v57, %v8196_v27  ;;  %v12439_v57 = vld [vmem:[#allocation15 + $0x6f8] sm:$0xf0] }
 0x77b   :  { %v11023_v27 = vor.u32 %v12439_v57, %v11022_v9  ;;  %v10966_v9 = vld [vmem:[#allocation15 + $0x670] sm:$0xf]  ;;  %v12425_v57 = vld [vmem:[#allocation15 + $0x688] sm:$0xf0] }
 0x77c   :  { %v8338_v4 = vpop.f32.mrf.mxu0  ;;  %8540 = vmatmul.bf16.vlgmr.msra.gmra.mxu3 %v16417_v5 }
 0x77d   :  { %v8280_v51 = vpop.f32.mrf.mxu2  ;;  %v8253_v34 = vpop.f32.mrf.mxu1  ;;  %8677 = vmatpush.bf16.msra.mxu0 %v11023_v27  ;;  %v8146_v27 = vadd.f32 %v15659_v8, %v15688_v18 }
 0x77e   :  { %v8281_v45 = vadd.f32 %v8280_v51, %v8252_v63  ;;  %v8254_v38 = vadd.f32 %v8253_v34, %v8225_v19  ;;  %v12369_v63 = vld [vmem:[#allocation15 + $0x4c8] sm:$0xf0] }
 0x77f   :  { %8569 = vmatmul.bf16.vlgmr.msrb.gmra.mxu0 %v14857_v55  ;;  %v8309_v14 = vpop.f32.mrf.mxu3  ;;  %v10743_v36 = vor.u32 %v12369_v63, %v10742_v7  ;;  %v12432_v7 = vld [vmem:[#allocation15 + $0x6c0] sm:$0xf0] }
 0x780   :  { %v8310_v11 = vadd.f32 %v8309_v14, %v8281_v45  ;;  %v10295_v14 = vor.u32 %v12257_v47, %v10294_v10 }
 0x781   :  { %8650 = vmatpush.bf16.msrb.mxu3 %v10743_v36  ;;  %v12362_v36 = vld [vmem:[#allocation15 + $0x490] sm:$0xf0] }
 0x782   :  { %v8339_v5 = vadd.f32 %v8338_v4, %v8310_v11  ;;  %v8143_v4 = vadd.f32 %v15650_v16, %v15688_v18  ;;  %8592 = vmatpush.bf16.msra.mxu1 %v10295_v14  ;;  %v8228_v11 = vadd.f32 %v15645_v48, %v8199_v58  ;;  %v10266_v48 = vld [vmem:[#allocation15 + $0xf8] sm:$0xf]  ;;  %v12250_v58 = vld [vmem:[#allocation15 + $0x110] sm:$0xf0]  ;;  %v12292_v14 = vld [vmem:[#allocation15 + $0x260] sm:$0xf0] }
 0x784   :  { %12787 = vtanh.f32 %v8339_v5  ;;  %v8340_v41 = vpop.f32.mrf.mxu0  ;;  %v8172_v17 = vadd.f32 %v15657_v3, %v8143_v4  ;;  %v10714_v3 = vld [vmem:[#allocation15 + $0x478] sm:$0xf] }
 0x785   :  { %v8282_v51 = vpop.f32.mrf.mxu2  ;;  %v8256_v12 = vpop.f32.mrf.mxu1  ;;  %v10715_v54 = vor.u32 %v12362_v36, %v10714_v3  ;;  %v12355_v3 = vld [vmem:[#allocation15 + $0x458] sm:$0xf0]  ;;  %v10238_v36 = vld [vmem:[#allocation15 + $0xc0] sm:$0xf] }
 0x786   :  { %v8283_v45 = vadd.f32 %v8282_v51, %v8254_v38  ;;  %v8257_v16 = vadd.f32 %v8256_v12, %v8228_v11  ;;  %v10994_v38 = vld [vmem:[#allocation15 + $0x6a8] sm:$0xf]  ;;  %v8201_v47 = vadd.f32 %v15661_v2, %v8172_v17  ;;  %v10267_v12 = vor.u32 %v12250_v58, %v10266_v48 }
 0x787   :  { %v8311_v5 = vpop.f32.mrf.mxu3  ;;  %v10995_v51 = vor.u32 %v12432_v7, %v10994_v38  ;;  %8651 = vmatpush.bf16.msrb.mxu3 %v10715_v54  ;;  %v12285_v54 = vld [vmem:[#allocation15 + $0x228] sm:$0xf0] }
 0x788   :  { %v8312_v34 = vadd.f32 %v8311_v5, %v8283_v45  ;;  %8487 = vmatmul.bf16.gmra.mxu1 %v14879_v35  ;;  %v10434_v45 = vld [vmem:[#allocation15 + $0x248] sm:$0xf]  ;;  %v10967_v5 = vor.u32 %v12425_v57, %v10966_v9  ;;  %v8230_v17 = vadd.f32 %v15655_v21, %v8201_v47  ;;  %v12243_v47 = vld [vmem:[#allocation15 + $0xd8] sm:$0xf0] }
 0x789   :  { %8678 = vmatpush.bf16.msra.mxu0 %v10995_v51  ;;  %v10435_v24 = vor.u32 %v12292_v14, %v10434_v45  ;;  %8593 = vmatpush.bf16.msra.mxu1 %v10267_v12  ;;  %v10686_v51 = vld [vmem:[#allocation15 + $0x440] sm:$0xf]  ;;  %v10239_v58 = vor.u32 %v12243_v47, %v10238_v36  ;;  %v12411_v14 = vld [vmem:[#allocation15 + $0x618] sm:$0xf0]  ;;  %v8148_v12 = vadd.f32 %v15670_v49, %v15688_v18 }
 0x78a   :  { %8516 = vmatmul.bf16.gmra.mxu2 %v14881_v62  ;;  %v12788_v23 = vpop.eup %12787  ;;  %v8341_v19 = vadd.f32 %v8340_v41, %v8312_v34  ;;  %v8175_v34 = vadd.f32 %v15668_v61, %v8146_v27  ;;  %v10910_v45 = vld [vmem:[#allocation15 + $0x600] sm:$0xf]  ;;  %v8151_v47 = vadd.f32 %v15679_v44, %v15688_v18 }
 0x78b   :  { %8882 = vst [vmem:[%s16041_s11 + $0x20] sm:$0xff] %v12788_v23  ;;  %8624 = vmatpush.bf16.msrb.mxu2 %v10435_v24  ;;  %v10911_v9 = vor.u32 %v12411_v14, %v10910_v45 }
 0x78c   :  { %12789 = vtanh.f32 %v8341_v19  ;;  %v8343_v63 = vpop.f32.mrf.mxu0  ;;  %8545 = vmatmul.bf16.gmra.mxu3 %v14883_v22  ;;  %v10938_v19 = vld [vmem:[#allocation15 + $0x638] sm:$0xf]  ;;  %v8204_v61 = vadd.f32 %v15673_v26, %v8175_v34  ;;  %v8177_v26 = vadd.f32 %v15677_v0, %v8148_v12  ;;  %v12236_v34 = vld [vmem:[#allocation15 + $0xa0] sm:$0xf0] }
 0x78d   :  { %v8285_v10 = vpop.f32.mrf.mxu2  ;;  %v8258_v41 = vpop.f32.mrf.mxu1  ;;  %8679 = vmatpush.bf16.msra.mxu0 %v10967_v5  ;;  %8594 = vmatpush.bf16.msra.mxu1 %v10239_v58  ;;  %v10854_v58 = vld [vmem:[#allocation15 + $0x590] sm:$0xf] }
 0x78e   :  { %v8286_v46 = vadd.f32 %v8285_v10, %v8257_v16  ;;  %v8259_v8 = vadd.f32 %v8258_v41, %v8230_v17  ;;  %v12418_v16 = vld [vmem:[#allocation15 + $0x650] sm:$0xf0]  ;;  %v8233_v27 = vadd.f32 %v15665_v53, %v8204_v61  ;;  %v10658_v53 = vld [vmem:[#allocation15 + $0x408] sm:$0xf] }
 0x78f   :  { %8574 = vmatmul.bf16.gmra.mxu0 %v14906_v25  ;;  %v8314_v4 = vpop.f32.mrf.mxu3  ;;  %v10939_v10 = vor.u32 %v12418_v16, %v10938_v19  ;;  %v8206_v19 = vadd.f32 %v15681_v42, %v8177_v26 }
 0x790   :  { %v8315_v2 = vadd.f32 %v8314_v4, %v8286_v46  ;;  %v10406_v46 = vld [vmem:[#allocation15 + $0x210] sm:$0xf] }
 0x791   :  { %8680 = vmatpush.bf16.msra.mxu0 %v10939_v10  ;;  %v10407_v41 = vor.u32 %v12285_v54, %v10406_v46  ;;  %v12404_v10 = vld [vmem:[#allocation15 + $0x5e0] sm:$0xf0]  ;;  %v12341_v54 = vld [vmem:[#allocation15 + $0x3e8] sm:$0xf0] }
 0x792   :  { %v12790_v11 = vpop.eup %12789  ;;  %v8344_v23 = vadd.f32 %v8343_v63, %v8315_v2  ;;  %v10687_v63 = vor.u32 %v12355_v3, %v10686_v51  ;;  %v10210_v2 = vld [vmem:[#allocation15 + $0x88] sm:$0xf]  ;;  %v10378_v51 = vld [vmem:[#allocation15 + $0x1d8] sm:$0xf]  ;;  %v12278_v3 = vld [vmem:[#allocation15 + $0x1f0] sm:$0xf0] }
 0x793   :  { %8889 = vst [vmem:[%s16041_s11 + $0x58] sm:$0xff] %v12790_v11  ;;  %8625 = vmatpush.bf16.msrb.mxu2 %v10407_v41  ;;  %v10211_v11 = vor.u32 %v12236_v34, %v10210_v2  ;;  %v10379_v61 = vor.u32 %v12278_v3, %v10378_v51  ;;  %v12397_v41 = vld [vmem:[#allocation15 + $0x5a8] sm:$0xf0]  ;;  %v10602_v34 = vld [vmem:[#allocation15 + $0x398] sm:$0xf] }
 0x794   :  { %12791 = vtanh.f32 %v8344_v23  ;;  %v8345_v38 = vpop.f32.mrf.mxu0  ;;  %8652 = vmatpush.bf16.msrb.mxu3 %v10687_v63  ;;  %v12348_v23 = vld [vmem:[#allocation15 + $0x420] sm:$0xf0]  ;;  %v10630_v63 = vld [vmem:[#allocation15 + $0x3d0] sm:$0xf]  ;;  %v10855_v12 = vor.u32 %v12397_v41, %v10854_v58  ;;  %v11442_v51 = vld [vmem:[#allocation15 + $0xa28] sm:$0xf] }
 0x795   :  { %v8287_v7 = vpop.f32.mrf.mxu2  ;;  %v8261_v48 = vpop.f32.mrf.mxu1  ;;  %8681 = vmatpush.bf16.msra.mxu0 %v10911_v9  ;;  %8595 = vmatpush.bf16.msra.mxu1 %v10211_v11  ;;  %v10631_v14 = vor.u32 %v12341_v54, %v10630_v63  ;;  %v8235_v9 = vadd.f32 %v15675_v6, %v8206_v19  ;;  %v12551_v19 = vld [vmem:[#allocation15 + $0xa78] sm:$0xf0]  ;;  %v12544_v3 = vld [vmem:[#allocation15 + $0xa40] sm:$0xf0] }
 0x796   :  { %v8288_v21 = vadd.f32 %v8287_v7, %v8259_v8  ;;  %v8262_v49 = vadd.f32 %v8261_v48, %v8233_v27  ;;  %v10882_v8 = vld [vmem:[#allocation15 + $0x5c8] sm:$0xf]  ;;  %v10659_v7 = vor.u32 %v12348_v23, %v10658_v53  ;;  %v12229_v48 = vld [vmem:[#allocation15 + $0x68] sm:$0xf0]  ;;  %v10154_v27 = vld [vmem:[#allocation15 + $0x18] sm:$0xf]  ;;  %v11443_v63 = vor.u32 %v12544_v3, %v11442_v51 }
 0x797   :  { %v8316_v24 = vpop.f32.mrf.mxu3  ;;  %v10883_v36 = vor.u32 %v12404_v10, %v10882_v8  ;;  %8626 = vmatpush.bf16.msrb.mxu2 %v10379_v61  ;;  %v12390_v23 = vld [vmem:[#allocation15 + $0x570] sm:$0xf0]  ;;  %v11470_v8 = vld [vmem:[#allocation15 + $0xa60] sm:$0xf]  ;;  %v11638_v3 = vld [vmem:[#allocation15 + $0xbb0] sm:$0xf] }
 0x798   :  { %v8317_v57 = vadd.f32 %v8316_v24, %v8288_v21  ;;  %8492 = vmatmul.bf16.gmra.mxu1 %v14922_v33  ;;  %v10182_v21 = vld [vmem:[#allocation15 + $0x50] sm:$0xf]  ;;  %8653 = vmatpush.bf16.msrb.mxu3 %v10659_v7  ;;  %v8180_v24 = vadd.f32 %v15693_v50, %v8151_v47  ;;  %v12334_v50 = vld [vmem:[#allocation15 + $0x3b0] sm:$0xf0]  ;;  %v8153_v7 = vadd.f32 %v15695_v15, %v15688_v18 }
 0x799   :  { %v10183_v42 = vor.u32 %v12229_v48, %v10182_v21  ;;  %8682 = vmatpush.bf16.msra.mxu0 %v10883_v36  ;;  %v10603_v53 = vor.u32 %v12334_v50, %v10602_v34  ;;  %v12600_v34 = vld [vmem:[#allocation15 + $0xc00] sm:$0xf0]  ;;  %v11218_v50 = vld [vmem:[#allocation15 + $0x868] sm:$0xf] }
 0x79a   :  { %8521 = vmatmul.bf16.gmra.mxu2 %v14924_v60  ;;  %v12792_v4 = vpop.eup %12791  ;;  %v8346_v5 = vadd.f32 %v8345_v38, %v8317_v57  ;;  %v8209_v6 = vadd.f32 %v15700_v29, %v8180_v24  ;;  %v8182_v29 = vadd.f32 %v15705_v52, %v8153_v7  ;;  %v12607_v52 = vld [vmem:[#allocation15 + $0xc38] sm:$0xf0] }
 0x79b   :  { %8896 = vst [vmem:[%s16041_s11 + $0x90] sm:$0xff] %v12792_v4  ;;  %8596 = vmatpush.bf16.msra.mxu1 %v10183_v42  ;;  %v12222_v4 = vld [vmem:[#allocation15 + $0x30] sm:$0xf0] }
 0x79c   :  { %12793 = vtanh.f32 %v8346_v5  ;;  %v8348_v17 = vpop.f32.mrf.mxu0  ;;  %8550 = vmatmul.bf16.gmra.mxu3 %v14926_v59  ;;  %v10155_v2 = vor.u32 %v12222_v4, %v10154_v27  ;;  %v8238_v61 = vadd.f32 %v15690_v30, %v8209_v6  ;;  %v8211_v30 = vadd.f32 %v15710_v32, %v8182_v29 }
 0x79d   :  { %v8290_v0 = vpop.f32.mrf.mxu2  ;;  %v8263_v38 = vpop.f32.mrf.mxu1  ;;  %8654 = vmatpush.bf16.msrb.mxu3 %v10631_v14  ;;  %8683 = vmatpush.bf16.msra.mxu0 %v10855_v12  ;;  %v12495_v14 = vld [vmem:[#allocation15 + $0x8b8] sm:$0xf0]  ;;  %v11414_v12 = vld [vmem:[#allocation15 + $0x9f0] sm:$0xf] }
 0x79e   :  { %v8291_v16 = vadd.f32 %v8290_v0, %v8262_v49  ;;  %v8264_v44 = vadd.f32 %v8263_v38, %v8235_v9  ;;  %v10826_v0 = vld [vmem:[#allocation15 + $0x558] sm:$0xf]  ;;  %v11471_v38 = vor.u32 %v12551_v19, %v11470_v8 }
 0x79f   :  { %8579 = vmatmul.bf16.gmra.mxu0 %v14943_v43  ;;  %v8319_v46 = vpop.f32.mrf.mxu3  ;;  %8597 = vmatpush.bf16.msra.mxu1 %v10155_v2  ;;  %v11666_v2 = vld [vmem:[#allocation15 + $0xbe8] sm:$0xf] }
 0x7a0   :  { %v8320_v45 = vadd.f32 %v8319_v46, %v8291_v16  ;;  %v10827_v16 = vor.u32 %v12390_v23, %v10826_v0  ;;  %8735 = vmatpush.bf16.msra.mxu2 %v11471_v38  ;;  %v11694_v46 = vld [vmem:[#allocation15 + $0xc20] sm:$0xf] }
 0x7a1   :  { %8655 = vmatpush.bf16.msrb.mxu3 %v10603_v53  ;;  %v11695_v58 = vor.u32 %v12607_v52, %v11694_v46  ;;  %v12530_v53 = vld [vmem:[#allocation15 + $0x9d0] sm:$0xf0]  ;;  %v12663_v46 = vld [vmem:[#allocation15 + $0xdf8] sm:$0xf0] }
 0x7a2   :  { %v12794_v57 = vpop.eup %12793  ;;  %v8349_v26 = vadd.f32 %v8348_v17, %v8320_v45  ;;  %8684 = vmatpush.bf16.msra.mxu0 %v10827_v16  ;;  %v11246_v45 = vld [vmem:[#allocation15 + $0x8a0] sm:$0xf] }
 0x7a3   :  { %8903 = vst [vmem:[%s16041_s11 + $0xc8] sm:$0xff] %v12794_v57  ;;  %v11247_v9 = vor.u32 %v12495_v14, %v11246_v45  ;;  %v12537_v57 = vld [vmem:[#allocation15 + $0xa08] sm:$0xf0]  ;;  %v11610_v45 = vld [vmem:[#allocation15 + $0xb78] sm:$0xf] }
 0x7a4   :  { %12795 = vtanh.f32 %v8349_v26  ;;  %v8350_v5 = vpop.f32.mrf.mxu0  ;;  %8736 = vmatpush.bf16.msra.mxu2 %v11443_v63  ;;  %v8240_v26 = vadd.f32 %v15703_v1, %v8211_v30  ;;  %v11667_v1 = vor.u32 %v12600_v34, %v11666_v2  ;;  %v11358_v63 = vld [vmem:[#allocation15 + $0x980] sm:$0xf]  ;;  %v12649_v2 = vld [vmem:[#allocation15 + $0xd88] sm:$0xf0] }
 0x7a5   :  { %v8292_v49 = vpop.f32.mrf.mxu2  ;;  %v8266_v11 = vpop.f32.mrf.mxu1  ;;  %8764 = vmatpush.bf16.msra.mxu3 %v11695_v58  ;;  %8706 = vmatpush.bf16.msrb.mxu1 %v11247_v9  ;;  %v11890_v58 = vld [vmem:[#allocation15 + $0xda8] sm:$0xf]  ;;  %v11162_v9 = vld [vmem:[#allocation15 + $0x7f8] sm:$0xf] }
 0x7a6   :  { %v8293_v17 = vadd.f32 %v8292_v49, %v8264_v44  ;;  %v8267_v18 = vadd.f32 %v8266_v11, %v8238_v61  ;;  %v11415_v44 = vor.u32 %v12537_v57, %v11414_v12  ;;  %v11386_v11 = vld [vmem:[#allocation15 + $0x9b8] sm:$0xf]  ;;  %v12474_v57 = vld [vmem:[#allocation15 + $0x810] sm:$0xf0]  ;;  %v16419_v34 = vld [vmem:[#allocation24_spill] sm:$0xff] }
 0x7a7   :  { %v8321_v10 = vpop.f32.mrf.mxu3  ;;  %v11387_v8 = vor.u32 %v12530_v53, %v11386_v11  ;;  %v11834_v53 = vld [vmem:[#allocation15 + $0xd38] sm:$0xf] }
 0x7a8   :  { %v8322_v36 = vadd.f32 %v8321_v10, %v8293_v17  ;;  %8497 = vmatmul.bf16.gmra.mxu1 %v14955_v40  ;;  %8737 = vmatpush.bf16.msra.mxu2 %v11415_v44  ;;  %v12488_v17 = vld [vmem:[#allocation15 + $0x880] sm:$0xf0]  ;;  %v11163_v44 = vor.u32 %v12474_v57, %v11162_v9 }
 0x7a9   :  { %v11219_v23 = vor.u32 %v12488_v17, %v11218_v50  ;;  %8765 = vmatpush.bf16.msra.mxu3 %v11667_v1  ;;  %v16421_v17 = vld [vmem:[#allocation30_spill] sm:$0xff]  ;;  %v12572_v57 = vld [vmem:[#allocation15 + $0xb20] sm:$0xf0] }
 0x7aa   :  { %8526 = vmatmul.bf16.gmra.mxu2 %v14957_v31  ;;  %v12796_v21 = vpop.eup %12795  ;;  %v8351_v48 = vadd.f32 %v8350_v5, %v8322_v36  ;;  %v12593_v36 = vld [vmem:[#allocation15 + $0xbc8] sm:$0xf0] }
 0x7ab   :  { %8910 = vst [vmem:[%s16041_s11 + $0x100] sm:$0xff] %v12796_v21  ;;  %8707 = vmatpush.bf16.msrb.mxu1 %v11219_v23  ;;  %v11639_v29 = vor.u32 %v12593_v36, %v11638_v3  ;;  %v11190_v21 = vld [vmem:[#allocation15 + $0x830] sm:$0xf]  ;;  %v12642_v23 = vld [vmem:[#allocation15 + $0xd50] sm:$0xf0] }
 0x7ac   :  { %12797 = vtanh.f32 %v8351_v48  ;;  %v8353_v15 = vpop.f32.mrf.mxu0  ;;  %8555 = vmatmul.bf16.gmra.mxu3 %v14961_v39  ;;  %8738 = vmatpush.bf16.msra.mxu2 %v11387_v8  ;;  %v12481_v48 = vld [vmem:[#allocation15 + $0x848] sm:$0xf0]  ;;  %v11582_v8 = vld [vmem:[#allocation15 + $0xb40] sm:$0xf]  ;;  %v16422_v3 = vld [vmem:[#allocation33_spill] sm:$0xff] }
 0x7ad   :  { %v8295_v47 = vpop.f32.mrf.mxu2  ;;  %v8268_v54 = vpop.f32.mrf.mxu1  ;;  %8766 = vmatpush.bf16.msra.mxu3 %v11639_v29  ;;  %v11134_v29 = vld [vmem:[#allocation15 + $0x7c0] sm:$0xf] }
 0x7ae   :  { %v8296_v42 = vadd.f32 %v8295_v47, %v8267_v18  ;;  %v8269_v32 = vadd.f32 %v8268_v54, %v8240_v26  ;;  %v11191_v18 = vor.u32 %v12481_v48, %v11190_v21  ;;  %v11918_v47 = vld [vmem:[#allocation15 + $0xde0] sm:$0xf]  ;;  %v11302_v21 = vld [vmem:[#allocation15 + $0x910] sm:$0xf] }
 0x7af   :  { %8584 = vmatmul.bf16.gmra.mxu0 %v14655_v56  ;;  %v8324_v41 = vpop.f32.mrf.mxu3  ;;  %v15797_v52 = vor.u32 %v12663_v46, %v11918_v47 }
 0x7b0   :  { %v8325_v24 = vadd.f32 %v8324_v41, %v8296_v42  ;;  %8708 = vmatpush.bf16.msrb.mxu1 %v11191_v18  ;;  %v12656_v41 = vld [vmem:[#allocation15 + $0xdc0] sm:$0xf0]  ;;  %v11806_v18 = vld [vmem:[#allocation15 + $0xd00] sm:$0xf] }
 0x7b1   :  { %8793 = vmatpush.bf16.msrb.mxu0 %v15797_v52  ;;  %v15809_v12 = vor.u32 %v12656_v41, %v11890_v58  ;;  %v11106_v58 = vld [vmem:[#allocation15 + $0x788] sm:$0xf]  ;;  %v12460_v41 = vld [vmem:[#allocation15 + $0x7a0] sm:$0xf0] }
 0x7b2   :  { %v12798_v27 = vpop.eup %12797  ;;  %v8354_v4 = vadd.f32 %v8353_v15, %v8325_v24  ;;  %v12523_v15 = vld [vmem:[#allocation15 + $0x998] sm:$0xf0]  ;;  %v12586_v24 = vld [vmem:[#allocation15 + $0xb90] sm:$0xf0]  ;;  %v11107_v9 = vor.u32 %v12460_v41, %v11106_v58  ;;  %v11498_v58 = vld [vmem:[#allocation15 + $0xa98] sm:$0xf] }
 0x7b3   :  { %8917 = vst [vmem:[%s16041_s11 + $0x138] sm:$0xff] %v12798_v27  ;;  %v11611_v26 = vor.u32 %v12586_v24, %v11610_v45  ;;  %v11330_v27 = vld [vmem:[#allocation15 + $0x948] sm:$0xf] }
 0x7b4   :  { %12799 = vtanh.f32 %v8354_v4  ;;  %v8355_v5 = vpop.f32.mrf.mxu0  ;;  %v12516_v4 = vld [vmem:[#allocation15 + $0x960] sm:$0xf0]  ;;  %8709 = vmatpush.bf16.msrb.mxu1 %v11163_v44  ;;  %v11554_v45 = vld [vmem:[#allocation15 + $0xb08] sm:$0xf] }
 0x7b5   :  { %v8297_v49 = vpop.f32.mrf.mxu2  ;;  %v15780_v6 = vpop.f32.mrf.mxu1  ;;  %8794 = vmatpush.bf16.msrb.mxu0 %v15809_v12  ;;  %8767 = vmatpush.bf16.msra.mxu3 %v11611_v26  ;;  %v11778_v26 = vld [vmem:[#allocation15 + $0xcc8] sm:$0xf]  ;;  %v12628_v44 = vld [vmem:[#allocation15 + $0xce0] sm:$0xf0] }
 0x7b6   :  { %v8298_v0 = vadd.f32 %v8297_v49, %v8269_v32  ;;  %v11862_v32 = vld [vmem:[#allocation15 + $0xd70] sm:$0xf]  ;;  %v11331_v49 = vor.u32 %v12516_v4, %v11330_v27  ;;  %v11555_v27 = vor.u32 %v12572_v57, %v11554_v45  ;;  %v11779_v4 = vor.u32 %v12628_v44, %v11778_v26  ;;  %v11722_v57 = vld [vmem:[#allocation15 + $0xc58] sm:$0xf]  ;;  %v12614_v26 = vld [vmem:[#allocation15 + $0xc70] sm:$0xf0] }
 0x7b7   :  { %v8326_v19 = vpop.f32.mrf.mxu3  ;;  %v15815_v50 = vor.u32 %v12649_v2, %v11862_v32  ;;  %v11274_v32 = vld [vmem:[#allocation15 + $0x8d8] sm:$0xf]  ;;  %v11078_v2 = vld [vmem:[#allocation15 + $0x750] sm:$0xf] }
 0x7b8   :  { %v8327_v16 = vadd.f32 %v8326_v19, %v8298_v0  ;;  %8598 = vmatmul.bf16.vlgmr.msra.gmra.mxu1 %v14657_v28  ;;  %v16420_v0 = vld [vmem:[#allocation28_spill] sm:$0xff] }
 0x7b9   :  { %8795 = vmatpush.bf16.msrb.mxu0 %v15815_v50 }
 0x7ba   :  { %8627 = vmatmul.bf16.vlgmr.msrb.gmra.mxu2 %v14667_v13  ;;  %v12800_v38 = vpop.eup %12799  ;;  %v8356_v7 = vadd.f32 %v8355_v5, %v8327_v16  ;;  %v16418_v13 = vld [vmem:[#allocation49_spill] sm:$0xff]  ;;  %v15826_v16 = vor.u32 %v12642_v23, %v11834_v53  ;;  %v12565_v23 = vld [vmem:[#allocation15 + $0xae8] sm:$0xf0] }
 0x7bb   :  { %8924 = vst [vmem:[%s16041_s11 + $0x170] sm:$0xff] %v12800_v38  ;;  %v12579_v38 = vld [vmem:[#allocation15 + $0xb58] sm:$0xf0]  ;;  %v11526_v53 = vld [vmem:[#allocation15 + $0xad0] sm:$0xf] }
 0x7bc   :  { %12801 = vtanh.f32 %v8356_v7  ;;  %v15787_v10 = vpop.f32.mrf.mxu0  ;;  %8656 = vmatmul.bf16.vlgmr.msrb.gmra.mxu3 %v14673_v37  ;;  %v11359_v37 = vor.u32 %v12523_v15, %v11358_v63  ;;  %v11583_v7 = vor.u32 %v12579_v38, %v11582_v8  ;;  %v12509_v63 = vld [vmem:[#allocation15 + $0x928] sm:$0xf0]  ;;  %v12635_v15 = vld [vmem:[#allocation15 + $0xd18] sm:$0xf0] }
 0x7bd   :  { %v15790_v51 = vpop.f32.mrf.mxu2  ;;  %v15792_v28 = vpop.f32.mrf.mxu1  ;;  %8796 = vmatpush.bf16.msrb.mxu0 %v15826_v16  ;;  %v11303_v47 = vor.u32 %v12509_v63, %v11302_v21  ;;  %v15832_v46 = vor.u32 %v12635_v15, %v11806_v18  ;;  %v16423_v8 = vld [vmem:[#allocation40_spill] sm:$0xff]  ;;  %v11050_v15 = vld [vmem:[#allocation15 + $0x718] sm:$0xf] }
 0x7be   :  { %8739 = vmatpush.bf16.msra.mxu2 %v11359_v37  ;;  %8768 = vmatpush.bf16.msra.mxu3 %v11583_v7  ;;  %v11750_v7 = vld [vmem:[#allocation15 + $0xc90] sm:$0xf]  ;;  %v16425_v63 = vld [vmem:[#allocation32_spill] sm:$0xff] }
 0x7bf   :  { %8685 = vmatmul.bf16.vlgmr.msra.gmra.mxu0 %v16418_v13  ;;  %v15795_v61 = vpop.f32.mrf.mxu3  ;;  %v12467_v13 = vld [vmem:[#allocation15 + $0x7d8] sm:$0xf0] }
 0x7c0   :  { %v11135_v48 = vor.u32 %v12467_v13, %v11134_v29  ;;  %v16424_v29 = vld [vmem:[#allocation41_spill] sm:$0xff]  ;;  %v11527_v13 = vor.u32 %v12565_v23, %v11526_v53  ;;  %v16427_v53 = vld [vmem:[#allocation34_spill] sm:$0xff]  ;;  %v16428_v23 = vld [vmem:[#allocation35_spill] sm:$0xff] }
 0x7c1   :  { %8797 = vmatpush.bf16.msrb.mxu0 %v15832_v46 }
 0x7c2   :  { %v12802_v30 = vpop.eup %12801  ;;  %8740 = vmatpush.bf16.msra.mxu2 %v11331_v49  ;;  %8710 = vmatpush.bf16.msrb.mxu1 %v11135_v48  ;;  %v12502_v49 = vld [vmem:[#allocation15 + $0x8f0] sm:$0xf0] }
 0x7c3   :  { %8931 = vst [vmem:[%s16041_s11 + $0x1a8] sm:$0xff] %v12802_v30  ;;  %8769 = vmatpush.bf16.msra.mxu3 %v11555_v27  ;;  %v11723_v27 = vor.u32 %v12614_v26, %v11722_v57 }
 0x7c4   :  { %v15803_v42 = vpop.f32.mrf.mxu0 }
 0x7c5   :  { %v15805_v54 = vpop.f32.mrf.mxu2  ;;  %v15807_v14 = vpop.f32.mrf.mxu1  ;;  %8798 = vmatpush.bf16.msrb.mxu0 %v11779_v4 }
 0x7c6   :  { %8741 = vmatpush.bf16.msra.mxu2 %v11303_v47  ;;  %8711 = vmatpush.bf16.msrb.mxu1 %v11107_v9  ;;  %v12446_v47 = vld [vmem:[#allocation15 + $0x730] sm:$0xf0] }
 0x7c7   :  { %v15811_v5 = vpop.f32.mrf.mxu3  ;;  %8770 = vmatpush.bf16.msra.mxu3 %v11527_v13  ;;  %v11051_v45 = vor.u32 %v12446_v47, %v11050_v15  ;;  %v12558_v9 = vld [vmem:[#allocation15 + $0xab0] sm:$0xf0]  ;;  %v16431_v13 = vld [vmem:[#allocation43_spill] sm:$0xff] }
 0x7c8   :  { %8603 = vmatmul.bf16.gmra.mxu1 %v16419_v34  ;;  %v11499_v44 = vor.u32 %v12558_v9, %v11498_v58 }
 0x7ca   :  { %8632 = vmatmul.bf16.gmra.mxu2 %v16420_v0  ;;  %v11275_v0 = vor.u32 %v12502_v49, %v11274_v32 }
 0x7cb   :  { %8771 = vmatpush.bf16.msra.mxu3 %v11499_v44 }
 0x7cc   :  { %v15819_v1 = vpop.f32.mrf.mxu0  ;;  %8661 = vmatmul.bf16.gmra.mxu3 %v16421_v17  ;;  %v12453_v17 = vld [vmem:[#allocation15 + $0x768] sm:$0xf0]  ;;  %8742 = vmatpush.bf16.msra.mxu2 %v11275_v0 }
 0x7cd   :  { %v15822_v11 = vpop.f32.mrf.mxu2  ;;  %v15824_v19 = vpop.f32.mrf.mxu1  ;;  %v11079_v38 = vor.u32 %v12453_v17, %v11078_v2 }
 0x7cf   :  { %8690 = vmatmul.bf16.gmra.mxu0 %v16422_v3  ;;  %v15829_v36 = vpop.f32.mrf.mxu3  ;;  %v12621_v3 = vld [vmem:[#allocation15 + $0xca8] sm:$0xf0]  ;;  %8712 = vmatpush.bf16.msrb.mxu1 %v11079_v38 }
 0x7d0   :  { %v11751_v21 = vor.u32 %v12621_v3, %v11750_v7  ;;  %12672 = vmatpush.bf16.msrb.mxu2 %v15797_v52  ;;  %v16426_v52 = vld [vmem:[#allocation25_spill] sm:$0xff]  ;;  %v16430_v7 = vld [vmem:[#allocation42_spill] sm:$0xff] }
 0x7d2   :  { %8799 = vmatpush.bf16.msrb.mxu0 %v11751_v21 }
 0x7d3   :  { %8713 = vmatpush.bf16.msrb.mxu1 %v11051_v45 }
 0x7d4   :  { %v15834_v37 = vpop.f32.mrf.mxu0  ;;  %12673 = vmatpush.bf16.msrb.mxu2 %v15809_v12 }
 0x7d5   :  { %v15836_v30 = vpop.f32.mrf.mxu2  ;;  %v15839_v24 = vpop.f32.mrf.mxu1 }
 0x7d6   :  { %8800 = vmatpush.bf16.msrb.mxu0 %v11723_v27 }
 0x7d7   :  { %v15841_v34 = vpop.f32.mrf.mxu3 }
 0x7d8   :  { %8608 = vmatmul.bf16.gmra.mxu1 %v16423_v8  ;;  %12674 = vmatpush.bf16.msrb.mxu2 %v15815_v50  ;;  %v16429_v8 = vld [vmem:[#allocation44_spill] sm:$0xff] }
 0x7d9   :  { %v15870_v12 = vperm.slane %v16429_v8, 5 }
 0x7da   :  { %8637 = vmatmul.bf16.gmra.mxu2 %v16424_v29 }
 0x7db   :  { %v8368_v29 = vadd.f32 %v15780_v6, %v15870_v12  ;;  %v8370_v45 = vadd.f32 %v15792_v28, %v15870_v12  ;;  %v16432_v6 = vld [vmem:[#allocation29_spill] sm:$0xff] }
 0x7dc   :  { %v15846_v48 = vpop.f32.mrf.mxu0  ;;  %8666 = vmatmul.bf16.gmra.mxu3 %v16425_v63  ;;  %12675 = vmatpush.bf16.msrb.mxu2 %v15826_v16 }
 0x7dd   :  { %v15849_v18 = vpop.f32.mrf.mxu2  ;;  %v15851_v41 = vpop.f32.mrf.mxu1  ;;  %v8397_v63 = vadd.f32 %v15790_v51, %v8368_v29 }
 0x7df   :  { %8695 = vmatmul.bf16.gmra.mxu0 %v16426_v52  ;;  %v15854_v32 = vpop.f32.mrf.mxu3  ;;  %v8426_v58 = vadd.f32 %v15795_v61, %v8397_v63 }
 0x7e0   :  { %12676 = vmatpush.bf16.msrb.mxu2 %v15832_v46 }
 0x7e1   :  { %v8455_v51 = vadd.f32 %v15787_v10, %v8426_v58 }
 0x7e4   :  { %v15857_v49 = vpop.f32.mrf.mxu0  ;;  %12677 = vmatpush.bf16.msrb.mxu2 %v11779_v4  ;;  %v8399_v4 = vadd.f32 %v15805_v54, %v8370_v45 }
 0x7e5   :  { %v15859_v2 = vpop.f32.mrf.mxu2  ;;  %v15862_v0 = vpop.f32.mrf.mxu1 }
 0x7e6   :  { %v8428_v44 = vadd.f32 %v15811_v5, %v8399_v4 }
 0x7e7   :  { %v15864_v17 = vpop.f32.mrf.mxu3 }
 0x7e8   :  { %8613 = vmatmul.bf16.gmra.mxu1 %v16427_v53  ;;  %12678 = vmatpush.bf16.msrb.mxu2 %v11751_v21  ;;  %v16433_v21 = vld [vmem:[#allocation27_spill] sm:$0xff]  ;;  %v8373_v53 = vadd.f32 %v15807_v14, %v15870_v12  ;;  %v8375_v14 = vadd.f32 %v15824_v19, %v15870_v12 }
 0x7ea   :  { %8642 = vmatmul.bf16.gmra.mxu2 %v16428_v23  ;;  %v8402_v10 = vadd.f32 %v15822_v11, %v8373_v53  ;;  %v8404_v11 = vadd.f32 %v15836_v30, %v8375_v14 }
 0x7ec   :  { %v15872_v38 = vpop.f32.mrf.mxu0  ;;  %8671 = vmatmul.bf16.gmra.mxu3 %v16430_v7  ;;  %12679 = vmatpush.bf16.msrb.mxu2 %v11723_v27  ;;  %v8431_v5 = vadd.f32 %v15829_v36, %v8402_v10 }
 0x7ed   :  { %v15875_v3 = vpop.f32.mrf.mxu2  ;;  %v15878_v50 = vpop.f32.mrf.mxu1 }
 0x7ef   :  { %8700 = vmatmul.bf16.gmra.mxu0 %v16431_v13  ;;  %v15883_v16 = vpop.f32.mrf.mxu3 }
 0x7f4   :  { %v15886_v15 = vpop.f32.mrf.mxu0 }
 0x7f5   :  { %v15888_v47 = vpop.f32.mrf.mxu2  ;;  %v8483_v46 = vpop.f32.mrf.mxu1 }
 0x7f6   :  { %v8484_v57 = vadd.f32 %v8483_v46, %v8455_v51 }
 0x7f7   :  { %v15893_v9 = vpop.f32.mrf.mxu3 }
 0x7f8   :  { %8714 = vmatmul.bf16.vlgmr.msrb.gmra.mxu1 %v16432_v6 }
 0x7fa   :  { %8743 = vmatmul.bf16.vlgmr.msra.gmra.mxu2 %v14849_v20  ;;  %v8457_v20 = vadd.f32 %v15803_v42, %v8428_v44  ;;  %v8460_v42 = vadd.f32 %v15819_v1, %v8431_v5  ;;  %v8378_v1 = vadd.f32 %v15839_v24, %v15870_v12 }
 0x7fc   :  { %v8570_v26 = vpop.f32.mrf.mxu0  ;;  %8772 = vmatmul.bf16.vlgmr.msra.gmra.mxu3 %v16433_v21 }
 0x7fd   :  { %v8512_v61 = vpop.f32.mrf.mxu2  ;;  %v8485_v28 = vpop.f32.mrf.mxu1 }
 0x7fe   :  { %v8513_v52 = vadd.f32 %v8512_v61, %v8484_v57  ;;  %v8486_v8 = vadd.f32 %v8485_v28, %v8457_v20  ;;  %v8407_v57 = vadd.f32 %v15849_v18, %v8378_v1  ;;  %v8380_v28 = vadd.f32 %v15851_v41, %v15870_v12 }
 0x7ff   :  { %8801 = vmatmul.bf16.vlgmr.msrb.gmra.mxu0 %v14857_v55  ;;  %v8541_v27 = vpop.f32.mrf.mxu3 }
 0x800   :  { %v8542_v54 = vadd.f32 %v8541_v27, %v8513_v52  ;;  %v8436_v24 = vadd.f32 %v15854_v32, %v8407_v57 }
 0x802   :  { %v8571_v23 = vadd.f32 %v8570_v26, %v8542_v54  ;;  %v8465_v27 = vadd.f32 %v15846_v48, %v8436_v24  ;;  %v8383_v48 = vadd.f32 %v15862_v0, %v15870_v12 }
 0x804   :  { %12803 = vtanh.f32 %v8571_v23  ;;  %v8572_v7 = vpop.f32.mrf.mxu0 }
 0x805   :  { %v8514_v29 = vpop.f32.mrf.mxu2  ;;  %v8488_v63 = vpop.f32.mrf.mxu1 }
 0x806   :  { %v8515_v13 = vadd.f32 %v8514_v29, %v8486_v8  ;;  %v8489_v36 = vadd.f32 %v8488_v63, %v8460_v42 }
 0x807   :  { %v8543_v58 = vpop.f32.mrf.mxu3 }
 0x808   :  { %v8544_v55 = vadd.f32 %v8543_v58, %v8515_v13  ;;  %8719 = vmatmul.bf16.gmra.mxu1 %v14879_v35  ;;  %v8433_v35 = vadd.f32 %v15841_v34, %v8404_v11  ;;  %v8385_v58 = vadd.f32 %v15878_v50, %v15870_v12 }
 0x80a   :  { %8748 = vmatmul.bf16.gmra.mxu2 %v14881_v62  ;;  %v12804_v46 = vpop.eup %12803  ;;  %v8573_v45 = vadd.f32 %v8572_v7, %v8544_v55  ;;  %v8462_v26 = vadd.f32 %v15834_v37, %v8433_v35  ;;  %v8409_v37 = vadd.f32 %v15859_v2, %v8380_v28  ;;  %v8412_v7 = vadd.f32 %v15875_v3, %v8383_v48 }
 0x80b   :  { %8883 = vst [vmem:[%s16041_s11 + $0x28] sm:$0xff] %v12804_v46 }
 0x80c   :  { %12805 = vtanh.f32 %v8573_v45  ;;  %v8575_v6 = vpop.f32.mrf.mxu0  ;;  %8777 = vmatmul.bf16.gmra.mxu3 %v14883_v22  ;;  %v8441_v0 = vadd.f32 %v15883_v16, %v8412_v7 }
 0x80d   :  { %v8517_v19 = vpop.f32.mrf.mxu2  ;;  %v8490_v30 = vpop.f32.mrf.mxu1 }
 0x80e   :  { %v8518_v4 = vadd.f32 %v8517_v19, %v8489_v36  ;;  %v8491_v22 = vadd.f32 %v8490_v30, %v8462_v26  ;;  %v8470_v11 = vadd.f32 %v15872_v38, %v8441_v0 }
 0x80f   :  { %8806 = vmatmul.bf16.gmra.mxu0 %v14906_v25  ;;  %v8546_v62 = vpop.f32.mrf.mxu3 }
 0x810   :  { %v8547_v51 = vadd.f32 %v8546_v62, %v8518_v4 }
 0x812   :  { %v12806_v21 = vpop.eup %12805  ;;  %v8576_v61 = vadd.f32 %v8575_v6, %v8547_v51 }
 0x813   :  { %8890 = vst [vmem:[%s16041_s11 + $0x60] sm:$0xff] %v12806_v21 }
 0x814   :  { %12807 = vtanh.f32 %v8576_v61  ;;  %v8577_v34 = vpop.f32.mrf.mxu0 }
 0x815   :  { %v8519_v44 = vpop.f32.mrf.mxu2  ;;  %v8493_v25 = vpop.f32.mrf.mxu1 }
 0x816   :  { %v8520_v52 = vadd.f32 %v8519_v44, %v8491_v22  ;;  %v8494_v32 = vadd.f32 %v8493_v25, %v8465_v27 }
 0x817   :  { %v8548_v18 = vpop.f32.mrf.mxu3 }
 0x818   :  { %v8549_v53 = vadd.f32 %v8548_v18, %v8520_v52  ;;  %8724 = vmatmul.bf16.gmra.mxu1 %v14922_v33  ;;  %v8438_v33 = vadd.f32 %v15864_v17, %v8409_v37 }
 0x81a   :  { %8753 = vmatmul.bf16.gmra.mxu2 %v14924_v60  ;;  %v12808_v54 = vpop.eup %12807  ;;  %v8578_v10 = vadd.f32 %v8577_v34, %v8549_v53  ;;  %v8467_v29 = vadd.f32 %v15857_v49, %v8438_v33  ;;  %v8414_v49 = vadd.f32 %v15888_v47, %v8385_v58 }
 0x81b   :  { %8897 = vst [vmem:[%s16041_s11 + $0x98] sm:$0xff] %v12808_v54 }
 0x81c   :  { %12809 = vtanh.f32 %v8578_v10  ;;  %v8580_v20 = vpop.f32.mrf.mxu0  ;;  %8782 = vmatmul.bf16.gmra.mxu3 %v14926_v59 }
 0x81d   :  { %v8522_v41 = vpop.f32.mrf.mxu2  ;;  %v8495_v2 = vpop.f32.mrf.mxu1 }
 0x81e   :  { %v8523_v23 = vadd.f32 %v8522_v41, %v8494_v32  ;;  %v8496_v59 = vadd.f32 %v8495_v2, %v8467_v29 }
 0x81f   :  { %8811 = vmatmul.bf16.gmra.mxu0 %v14943_v43  ;;  %v8551_v60 = vpop.f32.mrf.mxu3 }
 0x820   :  { %v8552_v8 = vadd.f32 %v8551_v60, %v8523_v23  ;;  %v12837_v60 = vld [vmem:[#allocation16] sm:$0xff] }
 0x822   :  { %v12810_v5 = vpop.eup %12809  ;;  %v8581_v13 = vadd.f32 %v8580_v20, %v8552_v8  ;;  %v15987_v8 = vperm.slane %v12837_v60, 6 }
 0x823   :  { %8904 = vst [vmem:[%s16041_s11 + $0xd0] sm:$0xff] %v12810_v5 }
 0x824   :  { %12811 = vtanh.f32 %v8581_v13  ;;  %v8582_v17 = vpop.f32.mrf.mxu0 }
 0x825   :  { %v8524_v63 = vpop.f32.mrf.mxu2  ;;  %v8498_v43 = vpop.f32.mrf.mxu1 }
 0x826   :  { %v8525_v14 = vadd.f32 %v8524_v63, %v8496_v59  ;;  %v8499_v16 = vadd.f32 %v8498_v43, %v8470_v11 }
 0x827   :  { %v8553_v3 = vpop.f32.mrf.mxu3 }
 0x828   :  { %v8554_v55 = vadd.f32 %v8553_v3, %v8525_v14  ;;  %8729 = vmatmul.bf16.gmra.mxu1 %v14955_v40  ;;  %v8443_v40 = vadd.f32 %v15893_v9, %v8414_v49 }
 0x82a   :  { %8758 = vmatmul.bf16.gmra.mxu2 %v14957_v31  ;;  %v12812_v42 = vpop.eup %12811  ;;  %v8583_v46 = vadd.f32 %v8582_v17, %v8554_v55  ;;  %v8472_v31 = vadd.f32 %v15886_v15, %v8443_v40 }
 0x82b   :  { %8911 = vst [vmem:[%s16041_s11 + $0x108] sm:$0xff] %v12812_v42 }
 0x82c   :  { %12813 = vtanh.f32 %v8583_v46  ;;  %v8585_v45 = vpop.f32.mrf.mxu0  ;;  %8787 = vmatmul.bf16.gmra.mxu3 %v14961_v39 }
 0x82d   :  { %v8527_v12 = vpop.f32.mrf.mxu2  ;;  %v8500_v47 = vpop.f32.mrf.mxu1 }
 0x82e   :  { %v8528_v50 = vadd.f32 %v8527_v12, %v8499_v16  ;;  %v8501_v35 = vadd.f32 %v8500_v47, %v8472_v31 }
 0x82f   :  { %v8556_v36 = vpop.f32.mrf.mxu3 }
 0x830   :  { %v8557_v38 = vadd.f32 %v8556_v36, %v8528_v50 }
 0x832   :  { %v12814_v6 = vpop.eup %12813  ;;  %v8586_v19 = vadd.f32 %v8585_v45, %v8557_v38 }
 0x833   :  { %8918 = vst [vmem:[%s16041_s11 + $0x140] sm:$0xff] %v12814_v6 }
 0x834   :  { %12815 = vtanh.f32 %v8586_v19  ;;  %v8587_v4 = vpop.f32.mrf.mxu0 }
 0x835   :  { %v8529_v30 = vpop.f32.mrf.mxu2  ;;  %v8599_v1 = vpop.f32.mrf.mxu1 }
 0x836   :  { %v8530_v39 = vadd.f32 %v8529_v30, %v8501_v35  ;;  %v8600_v63 = vadd.f32 %v8599_v1, %v15987_v8 }
 0x837   :  { %v8558_v62 = vpop.f32.mrf.mxu3 }
 0x838   :  { %v8559_v9 = vadd.f32 %v8558_v62, %v8530_v39 }
 0x83a   :  { %8816 = vmatmul.bf16.vlgmr.msrb.gmra.mxu2 %v14655_v56  ;;  %v12816_v51 = vpop.eup %12815  ;;  %v8588_v57 = vadd.f32 %v8587_v4, %v8559_v9 }
 0x83b   :  { %8925 = vst [vmem:[%s16041_s11 + $0x178] sm:$0xff] %v12816_v51 }
 0x83c   :  { %12817 = vtanh.f32 %v8588_v57  ;;  %v8686_v15 = vpop.f32.mrf.mxu0 }
 0x83d   :  { %v8628_v26 = vpop.f32.mrf.mxu2  ;;  %v8601_v21 = vpop.f32.mrf.mxu1 }
 0x83e   :  { %v8629_v43 = vadd.f32 %v8628_v26, %v8600_v63  ;;  %v8602_v42 = vadd.f32 %v8601_v21, %v15987_v8 }
 0x83f   :  { %v8657_v61 = vpop.f32.mrf.mxu3 }
 0x840   :  { %v8658_v55 = vadd.f32 %v8657_v61, %v8629_v43 }
 0x842   :  { %v12818_v22 = vpop.eup %12817  ;;  %v8687_v12 = vadd.f32 %v8686_v15, %v8658_v55 }
 0x843   :  { %8932 = vst [vmem:[%s16041_s11 + $0x1b0] sm:$0xff] %v12818_v22 }
 0x844   :  { %v8688_v34 = vpop.f32.mrf.mxu0 }
 0x845   :  { %v8630_v44 = vpop.f32.mrf.mxu2  ;;  %v8604_v24 = vpop.f32.mrf.mxu1 }
 0x846   :  { %v8631_v45 = vadd.f32 %v8630_v44, %v8602_v42  ;;  %v8605_v6 = vadd.f32 %v8604_v24, %v15987_v8 }
 0x847   :  { %v8659_v56 = vpop.f32.mrf.mxu3 }
 0x848   :  { %v8660_v36 = vadd.f32 %v8659_v56, %v8631_v45 }
 0x84a   :  { %v8689_v30 = vadd.f32 %v8688_v34, %v8660_v36 }
 0x84c   :  { %v8691_v52 = vpop.f32.mrf.mxu0 }
 0x84d   :  { %v8633_v25 = vpop.f32.mrf.mxu2  ;;  %v8606_v28 = vpop.f32.mrf.mxu1 }
 0x84e   :  { %v8634_v4 = vadd.f32 %v8633_v25, %v8605_v6  ;;  %v8607_v26 = vadd.f32 %v8606_v28, %v15987_v8 }
 0x84f   :  { %v8662_v18 = vpop.f32.mrf.mxu3 }
 0x850   :  { %v8663_v51 = vadd.f32 %v8662_v18, %v8634_v4 }
 0x852   :  { %v8692_v44 = vadd.f32 %v8691_v52, %v8663_v51 }
 0x854   :  { %v15969_v53 = vpop.f32.mrf.mxu0 }
 0x855   :  { %v8635_v37 = vpop.f32.mrf.mxu2  ;;  %v15971_v27 = vpop.f32.mrf.mxu1 }
 0x856   :  { %v8636_v22 = vadd.f32 %v8635_v37, %v8607_v26  ;;  %v8610_v28 = vadd.f32 %v15971_v27, %v15987_v8 }
 0x857   :  { %v8664_v54 = vpop.f32.mrf.mxu3 }
 0x858   :  { %v8665_v60 = vadd.f32 %v8664_v54, %v8636_v22 }
 0x85a   :  { %v8694_v37 = vadd.f32 %v15969_v53, %v8665_v60 }
 0x85c   :  { %v15973_v10 = vpop.f32.mrf.mxu0 }
 0x85d   :  { %v15975_v32 = vpop.f32.mrf.mxu2  ;;  %v15977_v20 = vpop.f32.mrf.mxu1 }
 0x85e   :  { %v8639_v52 = vadd.f32 %v15975_v32, %v8610_v28  ;;  %v8612_v32 = vadd.f32 %v15977_v20, %v15987_v8 }
 0x85f   :  { %v15979_v41 = vpop.f32.mrf.mxu3 }
 0x864   :  { %v15981_v33 = vpop.f32.mrf.mxu0 }
 0x865   :  { %v15983_v23 = vpop.f32.mrf.mxu2  ;;  %v8614_v2 = vpop.f32.mrf.mxu1 }
 0x866   :  { %v8615_v7 = vadd.f32 %v8614_v2, %v15987_v8  ;;  %v8641_v42 = vadd.f32 %v15983_v23, %v8612_v32 }
 0x867   :  { %v15985_v48 = vpop.f32.mrf.mxu3 }
 0x86c   :  { %v8701_v29 = vpop.f32.mrf.mxu0 }
 0x86d   :  { %v8643_v5 = vpop.f32.mrf.mxu2  ;;  %v8616_v59 = vpop.f32.mrf.mxu1 }
 0x86e   :  { %v8644_v13 = vadd.f32 %v8643_v5, %v8615_v7  ;;  %v8617_v17 = vadd.f32 %v8616_v59, %v15987_v8 }
 0x86f   :  { %v8672_v0 = vpop.f32.mrf.mxu3 }
 0x870   :  { %v8673_v14 = vadd.f32 %v8672_v0, %v8644_v13 }
 0x872   :  { %v8702_v0 = vadd.f32 %v8701_v29, %v8673_v14  ;;  %v8670_v14 = vadd.f32 %v15985_v48, %v8641_v42 }
 0x874   :  { %v8703_v58 = vpop.f32.mrf.mxu0  ;;  %v8699_v23 = vadd.f32 %v15981_v33, %v8670_v14 }
 0x875   :  { %v8645_v3 = vpop.f32.mrf.mxu2  ;;  %v8715_v11 = vpop.f32.mrf.mxu1 }
 0x876   :  { %v8646_v49 = vadd.f32 %v8645_v3, %v8617_v17  ;;  %v8716_v40 = vadd.f32 %v8715_v11, %v8687_v12  ;;  %v8668_v3 = vadd.f32 %v15979_v41, %v8639_v52 }
 0x877   :  { %v8674_v46 = vpop.f32.mrf.mxu3 }
 0x878   :  { %v8675_v16 = vadd.f32 %v8674_v46, %v8646_v49  ;;  %v8697_v46 = vadd.f32 %v15973_v10, %v8668_v3 }
 0x87a   :  { %v8704_v54 = vadd.f32 %v8703_v58, %v8675_v16 }
 0x87c   :  { %v8802_v50 = vpop.f32.mrf.mxu0 }
 0x87d   :  { %v8744_v47 = vpop.f32.mrf.mxu2  ;;  %v8717_v31 = vpop.f32.mrf.mxu1 }
 0x87e   :  { %v8745_v38 = vadd.f32 %v8744_v47, %v8716_v40  ;;  %v8718_v1 = vadd.f32 %v8717_v31, %v8689_v30 }
 0x87f   :  { %v8773_v19 = vpop.f32.mrf.mxu3 }
 0x880   :  { %v8774_v35 = vadd.f32 %v8773_v19, %v8745_v38 }
 0x882   :  { %v8803_v39 = vadd.f32 %v8802_v50, %v8774_v35 }
 0x884   :  { %12819 = vtanh.f32 %v8803_v39  ;;  %v8804_v62 = vpop.f32.mrf.mxu0 }
 0x885   :  { %v8746_v9 = vpop.f32.mrf.mxu2  ;;  %v8720_v15 = vpop.f32.mrf.mxu1 }
 0x886   :  { %v8747_v57 = vadd.f32 %v8746_v9, %v8718_v1  ;;  %v8721_v34 = vadd.f32 %v8720_v15, %v8692_v44 }
 0x887   :  { %v8775_v21 = vpop.f32.mrf.mxu3 }
 0x888   :  { %v8776_v61 = vadd.f32 %v8775_v21, %v8747_v57 }
 0x88a   :  { %v12820_v56 = vpop.eup %12819  ;;  %v8805_v24 = vadd.f32 %v8804_v62, %v8776_v61 }
 0x88b   :  { %8884 = vst [vmem:[%s16041_s11 + $0x30] sm:$0xff] %v12820_v56 }
 0x88c   :  { %12821 = vtanh.f32 %v8805_v24  ;;  %v8807_v25 = vpop.f32.mrf.mxu0 }
 0x88d   :  { %v8749_v2 = vpop.f32.mrf.mxu2  ;;  %v8722_v7 = vpop.f32.mrf.mxu1 }
 0x88e   :  { %v8750_v18 = vadd.f32 %v8749_v2, %v8721_v34  ;;  %v8723_v63 = vadd.f32 %v8722_v7, %v8694_v37 }
 0x88f   :  { %v8778_v5 = vpop.f32.mrf.mxu3 }
 0x890   :  { %v8779_v13 = vadd.f32 %v8778_v5, %v8750_v18 }
 0x892   :  { %v12822_v59 = vpop.eup %12821  ;;  %v8808_v17 = vadd.f32 %v8807_v25, %v8779_v13 }
 0x893   :  { %8891 = vst [vmem:[%s16041_s11 + $0x68] sm:$0xff] %v12822_v59 }
 0x894   :  { %12823 = vtanh.f32 %v8808_v17  ;;  %v8809_v27 = vpop.f32.mrf.mxu0 }
 0x895   :  { %v8751_v43 = vpop.f32.mrf.mxu2  ;;  %v8725_v49 = vpop.f32.mrf.mxu1 }
 0x896   :  { %v8752_v55 = vadd.f32 %v8751_v43, %v8723_v63  ;;  %v8726_v29 = vadd.f32 %v8725_v49, %v8697_v46 }
 0x897   :  { %v8780_v53 = vpop.f32.mrf.mxu3 }
 0x898   :  { %v8781_v11 = vadd.f32 %v8780_v53, %v8752_v55 }
 0x89a   :  { %v12824_v45 = vpop.eup %12823  ;;  %v8810_v12 = vadd.f32 %v8809_v27, %v8781_v11 }
 0x89b   :  { %8898 = vst [vmem:[%s16041_s11 + $0xa0] sm:$0xff] %v12824_v45 }
 0x89c   :  { %12825 = vtanh.f32 %v8810_v12  ;;  %v8812_v16 = vpop.f32.mrf.mxu0 }
 0x89d   :  { %v8754_v41 = vpop.f32.mrf.mxu2  ;;  %v8727_v40 = vpop.f32.mrf.mxu1 }
 0x89e   :  { %v8755_v58 = vadd.f32 %v8754_v41, %v8726_v29  ;;  %v8728_v47 = vadd.f32 %v8727_v40, %v8699_v23 }
 0x89f   :  { %v8783_v20 = vpop.f32.mrf.mxu3 }
 0x8a0   :  { %v8784_v8 = vadd.f32 %v8783_v20, %v8755_v58 }
 0x8a2   :  { %v12826_v50 = vpop.eup %12825  ;;  %v8813_v10 = vadd.f32 %v8812_v16, %v8784_v8 }
 0x8a3   :  { %8905 = vst [vmem:[%s16041_s11 + $0xd8] sm:$0xff] %v12826_v50 }
 0x8a4   :  { %12827 = vtanh.f32 %v8813_v10  ;;  %v8814_v48 = vpop.f32.mrf.mxu0 }
 0x8a5   :  { %v8756_v36 = vpop.f32.mrf.mxu2  ;;  %v8730_v4 = vpop.f32.mrf.mxu1 }
 0x8a6   :  { %v8757_v38 = vadd.f32 %v8756_v36, %v8728_v47  ;;  %v8731_v1 = vadd.f32 %v8730_v4, %v8702_v0 }
 0x8a7   :  { %v8785_v31 = vpop.f32.mrf.mxu3 }
 0x8a8   :  { %v8786_v6 = vadd.f32 %v8785_v31, %v8757_v38 }
 0x8aa   :  { %v12828_v19 = vpop.eup %12827  ;;  %v8815_v35 = vadd.f32 %v8814_v48, %v8786_v6 }
 0x8ab   :  { %8912 = vst [vmem:[%s16041_s11 + $0x110] sm:$0xff] %v12828_v19 }
 0x8ac   :  { %12829 = vtanh.f32 %v8815_v35 }
 0x8ad   :  { %v8759_v33 = vpop.f32.mrf.mxu2  ;;  %v8732_v51 = vpop.f32.mrf.mxu1 }
 0x8ae   :  { %v8760_v62 = vadd.f32 %v8759_v33, %v8731_v1  ;;  %v8733_v26 = vadd.f32 %v8732_v51, %v8704_v54 }
 0x8af   :  { %v8788_v9 = vpop.f32.mrf.mxu3 }
 0x8b0   :  { %v8789_v57 = vadd.f32 %v8788_v9, %v8760_v62 }
 0x8b2   :  { %v12830_v30 = vpop.eup %12829 }
 0x8b3   :  { %8919 = vst [vmem:[%s16041_s11 + $0x148] sm:$0xff] %v12830_v30 }
 0x8b5   :  { %v8761_v39 = vpop.f32.mrf.mxu2 }
 0x8b6   :  { %v8762_v61 = vadd.f32 %v8761_v39, %v8733_v26 }
 0x8b7   :  { %v8790_v22 = vpop.f32.mrf.mxu3 }
 0x8b8   :  { %v8791_v44 = vadd.f32 %v8790_v22, %v8762_v61 }
 0x8bd   :  { %v8817_v15 = vpop.f32.mrf.mxu2 }
 0x8be   :  { %v8818_v21 = vadd.f32 %v8817_v15, %v8789_v57 }
 0x8c0   :  { %12831 = vtanh.f32 %v8818_v21 }
 0x8c5   :  { %v8819_v56 = vpop.f32.mrf.mxu2 }
 0x8c6   :  { %v12832_v24 = vpop.eup %12831  ;;  %v8820_v34 = vadd.f32 %v8819_v56, %v8791_v44 }
 0x8c7   :  { %8926 = vst [vmem:[%s16041_s11 + $0x180] sm:$0xff] %v12832_v24 }
 0x8c8   :  { %12833 = vtanh.f32 %v8820_v34 }
 0x8ce   :  { %v12834_v25 = vpop.eup %12833 }
 0x8cf   :  { %8933 = vst [vmem:[%s16041_s11 + $0x1b8] sm:$0xff] %v12834_v25 }
 0x8d0   :  { %8938 = vsyncpa [#allocation3], 1 }
 0x8d1   :  { %8939 = vsyncpa [#allocation5], 1 }
 0x8d2   :  { %8940 = vsyncpa [#allocation8], 1 }
 0x8d3   :  { %8941 = vsyncpa [#allocation11], 1 }
 0x8d4   :  { %8942 = vsyncpa [#allocation14], 1 }
 0x8d5   :  { %8943 = vsyncpa [#allocation17], 1 }

</bundles_post_ra>
